<compile_context>
chip_gen: v5e
topology: v5e:2x2
jax: 0.10.0
libtpu: 0.0.40
codegen_flags: <defaults>
</compile_context>

<pallas_src>
import functools

import jax
import jax.numpy as jnp
from jax.experimental import pallas as pl
from jax.experimental.pallas import tpu as pltpu


# ---------------------------------------------------------------------------
# Pallas kernel: TB windows (all heads) per grid step.
# ---------------------------------------------------------------------------
def _window_attention_kernel(x_ref, wqkv_ref, bqkv_ref, wproj_ref, bproj_ref,
                             bias_ref, *rest, num_heads, tokens, channels,
                             has_mask, mask_static, approx_recip):
    if has_mask:
        mask_ref, o_ref = rest
    else:
        (o_ref,) = rest

    H, N, C = num_heads, tokens, channels
    hd = C // H
    cdt = x_ref.dtype                               # MXU operand dtype (bf16/f32)

    if len(x_ref.shape) == 3:                       # (TB, N, C) fallback layout
        TB = x_ref.shape[0]
        x2d = x_ref[...].reshape(TB * N, C)
    else:                                           # (TB*N, C) flat layout
        x2d = x_ref[...]
        TB = x_ref.shape[0] // N

    # ---- Fused QKV projection: ONE (TB*N, C) @ (C, 3C) MXU matmul ----------
    qkv = jnp.dot(x2d, wqkv_ref[...], preferred_element_type=jnp.float32)
    qkv = qkv + bqkv_ref[...]                       # (TB*N, 3C) f32, (3,H,hd) cols

    # ---- head-major batched operands: z = h*TB + b --------------------------
    def split_heads(col0):
        parts = [qkv[:, col0 + h * hd: col0 + (h + 1) * hd] for h in range(H)]
        return jnp.concatenate(parts, axis=0).reshape(H * TB, N, hd).astype(cdt)

    q = split_heads(0)            # qk scale already folded into W_qkv / b_qkv
    k = split_heads(C)
    v = split_heads(2 * C)

    # ---- scores for every (head, window): one batched dot_general ----------
    s = jnp.einsum("znd,zmd->znm", q, k,
                   preferred_element_type=jnp.float32)          # (H*TB, N, N)
    s4 = s.reshape(H, TB, N, N) + bias_ref[...][:, None]        # rel-pos bias
    if has_mask:
        if mask_static:                                         # tb % nW == 0
            mask_blk = mask_ref[...]                            # (TB, N, N)
        else:                                                   # nW % tb == 0
            off = pl.multiple_of(
                (pl.program_id(0) * TB) % mask_ref.shape[0], TB)
            mask_blk = mask_ref[pl.ds(off, TB)]                 # (TB, N, N)
        s4 = s4 + mask_blk[None]                                # broadcast on heads
    s = s4.reshape(H * TB, N, N)

    # ---- numerically stable softmax; 1/l folded into PV result -------------
    s = s - jnp.max(s, axis=-1, keepdims=True)
    p = jnp.exp(s)
    l = jnp.sum(p, axis=-1, keepdims=True)                      # (H*TB, N, 1)
    o = jnp.einsum("znm,zmd->znd", p.astype(cdt), v,
                   preferred_element_type=jnp.float32)          # (H*TB, N, hd)
    o = o * pl.reciprocal(l, approx=approx_recip)

    # ---- concat heads along lanes, then ONE (TB*N, C) @ (C, C) projection --
    o2d = jnp.concatenate(
        [o[h * TB:(h + 1) * TB].reshape(TB * N, hd) for h in range(H)],
        axis=-1).astype(cdt)                                    # (TB*N, C)
    y = jnp.dot(o2d, wproj_ref[...], preferred_element_type=jnp.float32)
    y = y + bproj_ref[...]

    o_ref[...] = y.reshape(o_ref.shape).astype(o_ref.dtype)


# ---------------------------------------------------------------------------
# Generation-aware VMEM limit and tile-size selection.
# ---------------------------------------------------------------------------
def _vmem_limit_bytes():
    cap = 128 * 1024 * 1024
    try:
        cap = int(getattr(pltpu.get_tpu_info(), "vmem_capacity_bytes", cap))
    except Exception:
        pass
    if cap <= 64 * 1024 * 1024:           # v7x-class: 64 MiB physical per TC
        target = 48 * 1024 * 1024
    else:                                 # v5e / v6e: 128 MiB physical
        target = 96 * 1024 * 1024
    return max(min(target, cap - 8 * 1024 * 1024), 8 * 1024 * 1024)


def _choose_tb(B_, N, C, H, *, in_itemsize, out_itemsize, fixed_bytes,
               vmem_limit, nW=None, target_rows=512):
    """Largest window-tile (divisor of B_) that fits the VMEM budget, preferring
    the smallest one with >= target_rows matmul rows; capped at B_//2 so the
    parallel grid has >=2 steps (both v7x TensorCores busy)."""
    budget = max(int(vmem_limit * 0.75) - fixed_bytes, 0)
    max_tb = B_ if B_ < 2 else max(1, B_ // 2)
    best = 1
    for tb in range(1, max_tb + 1):
        if B_ % tb:
            continue
        if nW is not None and (tb % nW != 0 and nW % tb != 0):
            continue                                   # keep mask offsets simple
        io = 2 * tb * N * C * (in_itemsize + out_itemsize)       # dbl-buffered x/out
        work = tb * N * 3 * C * (4 + in_itemsize)                # qkv f32 + q/k/v
        work += 3 * tb * H * N * N * 4                           # scores / probs
        work += tb * N * C * (8 + in_itemsize)                   # o, concat, y
        if nW is not None:
            work += tb * N * N * 4                               # mask broadcast
        if tb > 1 and io + work > budget:
            break
        best = tb
        if tb * N >= target_rows:
            break
    return best


# ---------------------------------------------------------------------------
# Wrapper: parameter re-layout + pallas_call
# ---------------------------------------------------------------------------
def window_attention_pallas(x, params, rel_bias, mask=None, *, num_heads, scale,
                            compute_dtype=jnp.bfloat16, block_windows=None):
    """Swin WindowAttention forward.

    x:        (B_, N, C) = (num_windows * batch, tokens_per_window, channels)
    params:   (w_qkv (C, 3C), b_qkv (3C,), w_proj (C, C), b_proj (C,)); the 3C
              output dim is ordered (3, num_heads, head_dim) as in PyTorch.
    rel_bias: (num_heads, N, N) relative-position bias (already gathered).
    mask:     (nW, N, N) additive shifted-window mask, or None.
    """
    B_, N, C = x.shape
    H = num_heads
    assert C % H == 0, "dim must be divisible by num_heads"
    out_dtype = x.dtype
    cdt = jnp.dtype(compute_dtype)

    w_qkv, b_qkv, w_proj, b_proj = params

    # Fold qk scale into the Q columns of the fused (C, 3C) weight / bias.
    col_scale = jnp.concatenate([jnp.full((C,), scale, jnp.float32),
                                 jnp.ones((2 * C,), jnp.float32)])
    w_qkv_f = (w_qkv.astype(jnp.float32) * col_scale).astype(cdt)      # (C, 3C)
    b_qkv_f = (b_qkv.astype(jnp.float32) * col_scale).reshape(1, 3 * C)
    w_proj_f = w_proj.astype(cdt)                                       # (C, C)
    b_proj_f = b_proj.astype(jnp.float32).reshape(1, C)
    bias_f = rel_bias.astype(jnp.float32)                               # (H, N, N)
    x_c = x.astype(cdt)

    has_mask = mask is not None
    nW = mask.shape[0] if has_mask else None
    if has_mask:
        assert B_ % nW == 0, "B_ must be a multiple of num_windows when masking"

    vmem_limit = _vmem_limit_bytes()
    fixed_bytes = 2 * (C * 3 * C * cdt.itemsize + 3 * C * 4
                       + C * C * cdt.itemsize + C * 4 + H * N * N * 4)
    if has_mask:
        fixed_bytes += 2 * nW * N * N * 4

    tb = block_windows or _choose_tb(
        B_, N, C, H, in_itemsize=cdt.itemsize,
        out_itemsize=jnp.dtype(out_dtype).itemsize,
        fixed_bytes=fixed_bytes, vmem_limit=vmem_limit, nW=nW)
    assert B_ % tb == 0, "block_windows must divide B_"

    mask_static = False
    if has_mask:
        assert tb % nW == 0 or nW % tb == 0, (
            "block_windows must divide or be a multiple of num_windows")
        mask_static = (tb % nW == 0)
        if mask_static:
            mask_tab = jnp.tile(mask.astype(jnp.float32), (tb // nW, 1, 1))
        else:
            mask_tab = mask.astype(jnp.float32)                 # (nW, N, N)

    grid = (B_ // tb,)

    # 2-D (rows, C) I/O blocks: last dim == C (full vreg width for C>=128),
    # and the kernel's fused matmul needs no load-side reshape.
    flat_io = ((tb * N) % 8 == 0) or (tb == B_)
    if flat_io:
        x_in = x_c.reshape(B_ * N, C)
        io_spec = pl.BlockSpec((tb * N, C), lambda b: (b, 0))
        out_shape = jax.ShapeDtypeStruct((B_ * N, C), out_dtype)
    else:
        x_in = x_c
        io_spec = pl.BlockSpec((tb, N, C), lambda b: (b, 0, 0))
        out_shape = jax.ShapeDtypeStruct((B_, N, C), out_dtype)

    in_specs = [
        io_spec,                                              # x
        pl.BlockSpec((C, 3 * C), lambda b: (0, 0)),           # fused QKV weight
        pl.BlockSpec((1, 3 * C), lambda b: (0, 0)),           # fused QKV bias
        pl.BlockSpec((C, C), lambda b: (0, 0)),               # proj weight
        pl.BlockSpec((1, C), lambda b: (0, 0)),               # proj bias
        pl.BlockSpec((H, N, N), lambda b: (0, 0, 0)),         # rel-pos bias
    ]
    inputs = [x_in, w_qkv_f, b_qkv_f, w_proj_f, b_proj_f, bias_f]
    if has_mask:
        in_specs.append(pl.BlockSpec(mask_tab.shape, lambda b: (0, 0, 0)))
        inputs.append(mask_tab)                               # VMEM-resident table

    kernel = functools.partial(
        _window_attention_kernel,
        num_heads=H, tokens=N, channels=C,
        has_mask=has_mask, mask_static=mask_static,
        approx_recip=(cdt != jnp.dtype(jnp.float32)))

    out = pl.pallas_call(
        kernel,
        out_shape=out_shape,
        grid_spec=pltpu.PrefetchScalarGridSpec(
            num_scalar_prefetch=0,
            grid=grid,
            in_specs=in_specs,
            out_specs=io_spec),
        compiler_params=pltpu.CompilerParams(
            dimension_semantics=("parallel",),     # no cross-step state
            vmem_limit_bytes=vmem_limit),
    )(*inputs)

    return out.reshape(B_, N, C)


# ---------------------------------------------------------------------------
# Module setup (deterministic synthetic parameters) + pure-JAX reference
# ---------------------------------------------------------------------------
def make_relative_position_index(window_size):
    Wh, Ww = window_size
    coords = jnp.stack(jnp.meshgrid(jnp.arange(Wh), jnp.arange(Ww), indexing="ij"))
    coords_flat = coords.reshape(2, -1)                                  # (2, N)
    rel = coords_flat[:, :, None] - coords_flat[:, None, :]              # (2, N, N)
    rel = rel.transpose(1, 2, 0)                                         # (N, N, 2)
    rel = rel.at[:, :, 0].add(Wh - 1)
    rel = rel.at[:, :, 1].add(Ww - 1)
    rel = rel.at[:, :, 0].multiply(2 * Ww - 1)
    return rel.sum(-1)                                                   # (N, N)


def init_params(key, dim, window_size, num_heads):
    Wh, Ww = window_size
    k1, k2, k3, k4, k5, k6 = jax.random.split(key, 6)
    wqkv = jax.random.normal(k1, (dim, 3 * dim), jnp.float32) * 0.05
    bqkv = jax.random.normal(k2, (3 * dim,), jnp.float32) * 0.02
    wproj = jax.random.normal(k3, (dim, dim), jnp.float32) * 0.05
    bproj = jax.random.normal(k4, (dim,), jnp.float32) * 0.02
    table = jax.random.truncated_normal(
        k5, -2.0, 2.0, ((2 * Wh - 1) * (2 * Ww - 1), num_heads), jnp.float32) * 0.02
    return (wqkv, bqkv, wproj, bproj), table, k6


def gather_rel_bias(table, rel_index, window_size, num_heads):
    N = window_size[0] * window_size[1]
    bias = table[rel_index.reshape(-1)].reshape(N, N, num_heads)
    return bias.transpose(2, 0, 1)                                       # (H, N, N)


def reference_forward(x, params, rel_bias, mask, num_heads, scale):
    B_, N, C = x.shape
    hd = C // num_heads
    wqkv, bqkv, wproj, bproj = params
    qkv = x @ wqkv + bqkv
    qkv = qkv.reshape(B_, N, 3, num_heads, hd).transpose(2, 0, 3, 1, 4)
    q, k, v = qkv[0] * scale, qkv[1], qkv[2]
    attn = jnp.einsum("bhnd,bhmd->bhnm", q, k) + rel_bias[None]
    if mask is not None:
        nW = mask.shape[0]
        attn = attn.reshape(B_ // nW, nW, num_heads, N, N) + mask[None, :, None]
        attn = attn.reshape(B_, num_heads, N, N)
    attn = jax.nn.softmax(attn, axis=-1)
    out = jnp.einsum("bhnm,bhmd->bhnd", attn, v)
    out = out.transpose(0, 2, 1, 3).reshape(B_, N, C)
    return out @ wproj + bproj


if __name__ == "__main__":
    # Small, module-consistent shapes: dim=32, window 4x4 (N=16), 4 heads,
    # a 16x16 feature map -> nW=16 windows, batch=2 -> B_=32.
    dim = 32
    window_size = (4, 4)
    num_heads = 4
    head_dim = dim // num_heads
    scale = head_dim ** (-0.5)
    N = window_size[0] * window_size[1]
    batch, nW = 2, 16
    B_ = batch * nW

    key = jax.random.PRNGKey(0)
    params, table, key = init_params(key, dim, window_size, num_heads)
    rel_index = make_relative_position_index(window_size)
    rel_bias = gather_rel_bias(table, rel_index, window_size, num_heads)

    kx, km = jax.random.split(key)
    x = jax.random.normal(kx, (B_, N, dim), jnp.float32)
    # synthetic shifted-window style mask: 0 / -100 pattern, shape (nW, N, N)
    mask_bits = jax.random.bernoulli(km, 0.15, (nW, N, N))
    mask = jnp.where(mask_bits, -100.0, 0.0).astype(jnp.float32)

    ref = reference_forward(x, params, rel_bias, mask, num_heads, scale)
    ref_nm = reference_forward(x, params, rel_bias, None, num_heads, scale)
    jax.block_until_ready((ref, ref_nm))

    # 1) masked, f32 compute, auto tile (tb=16 -> grid=(2,), static mask offset,
    #    exact reciprocal on the strict-f32 path).
    out = jax.block_until_ready(
        window_attention_pallas(x, params, rel_bias, mask, num_heads=num_heads,
                                scale=scale, compute_dtype=jnp.float32))
    assert out.shape == (B_, N, dim)
    err = float(jnp.max(jnp.abs(out - ref)))
    assert err < 2e-3, f"masked f32 path max error {err}"

    # 2) masked, f32, tb=8 < nW=16 -> dynamic mask-offset path (grid=(4,)).
    out_tb8 = jax.block_until_ready(
        window_attention_pallas(x, params, rel_bias, mask, num_heads=num_heads,
                                scale=scale, compute_dtype=jnp.float32,
                                block_windows=8))
    err_tb8 = float(jnp.max(jnp.abs(out_tb8 - ref)))
    assert err_tb8 < 2e-3, f"masked f32 (tb=8) path max error {err_tb8}"

    # 3) mask=None branch (PyTorch mask=None): no mask DMA / adds at all.
    out_nm = jax.block_until_ready(
        window_attention_pallas(x, params, rel_bias, None, num_heads=num_heads,
                                scale=scale, compute_dtype=jnp.float32))
    err_nm = float(jnp.max(jnp.abs(out_nm - ref_nm)))
    assert err_nm < 2e-3, f"no-mask f32 path max error {err_nm}"

    # 4) default bf16 MXU-operand path (recommended on v6e/v7x); f32 accumulation
    #    and f32 softmax inside the kernel.
    out_bf16 = jax.block_until_ready(
        window_attention_pallas(x, params, rel_bias, mask, num_heads=num_heads,
                                scale=scale))
    err_bf16 = float(jnp.max(jnp.abs(out_bf16 - ref)))
    assert err_bf16 < 5e-2, f"bf16 path max error {err_bf16}"

    # TODO(synk): attn_drop / proj_drop (nn.Dropout) are inference no-ops and omitted.
    print("KERNEL_OK")
</pallas_src>

<mosaic_0001>
module attributes {stable_mosaic.version = 11 : i64} {
  func.func @_window_attention_kernel(%arg0: i32, %arg1: memref<256x32xf32, #tpu.memory_space<vmem>>, %arg2: memref<32x96xf32, #tpu.memory_space<vmem>>, %arg3: memref<1x96xf32, #tpu.memory_space<vmem>>, %arg4: memref<32x32xf32, #tpu.memory_space<vmem>>, %arg5: memref<1x32xf32, #tpu.memory_space<vmem>>, %arg6: memref<4x16x16xf32, #tpu.memory_space<vmem>>, %arg7: memref<16x16x16xf32, #tpu.memory_space<vmem>>, %arg8: memref<256x32xf32, #tpu.memory_space<vmem>>) attributes {dimension_semantics = [#tpu.dimension_semantics<parallel>], iteration_bounds = array<i64: 2>, scalar_prefetch = 0 : i64, scratch_operands = 0 : i64, tpu.core_type = #tpu.core_type<tc>, window_params = [{transform_indices = @transform_0, window_bounds = array<i64: 256, 32>}, {pipeline_mode = #tpu.pipeline_mode<synchronous>, transform_indices = @transform_1, window_bounds = array<i64: 32, 96>}, {pipeline_mode = #tpu.pipeline_mode<synchronous>, transform_indices = @transform_2, window_bounds = array<i64: 1, 96>}, {pipeline_mode = #tpu.pipeline_mode<synchronous>, transform_indices = @transform_3, window_bounds = array<i64: 32, 32>}, {pipeline_mode = #tpu.pipeline_mode<synchronous>, transform_indices = @transform_4, window_bounds = array<i64: 1, 32>}, {pipeline_mode = #tpu.pipeline_mode<synchronous>, transform_indices = @transform_5, window_bounds = array<i64: 4, 16, 16>}, {pipeline_mode = #tpu.pipeline_mode<synchronous>, transform_indices = @transform_6, window_bounds = array<i64: 16, 16, 16>}, {transform_indices = @transform_7, window_bounds = array<i64: 256, 32>}]} {
    %c0 = arith.constant 0 : index
    %c0_0 = arith.constant 0 : index
    %0 = vector.load %arg1[%c0, %c0_0] : memref<256x32xf32, #tpu.memory_space<vmem>>, vector<256x32xf32>
    %c0_1 = arith.constant 0 : index
    %c0_2 = arith.constant 0 : index
    %1 = vector.load %arg2[%c0_1, %c0_2] : memref<32x96xf32, #tpu.memory_space<vmem>>, vector<32x96xf32>
    %cst = arith.constant dense<0.000000e+00> : vector<256x96xf32>
    %2 = tpu.matmul %0, %1, %cst {dimension_numbers = #tpu.dot_dimension_numbers<[1], [0], [0], [1], [0, 0, 1, 1], [], []>} : vector<256x32xf32>, vector<32x96xf32>, vector<256x96xf32> -> vector<256x96xf32>
    %c0_3 = arith.constant 0 : index
    %c0_4 = arith.constant 0 : index
    %3 = vector.load %arg3[%c0_3, %c0_4] : memref<1x96xf32, #tpu.memory_space<vmem>>, vector<1x96xf32>
    %4 = vector.broadcast %3 : vector<1x96xf32> to vector<256x96xf32>
    %5 = arith.addf %2, %4 : vector<256x96xf32>
    %6 = vector.extract_strided_slice %5 {offsets = [0, 0], sizes = [256, 8], strides = [1, 1]} : vector<256x96xf32> to vector<256x8xf32>
    %7 = vector.extract_strided_slice %5 {offsets = [0, 8], sizes = [256, 8], strides = [1, 1]} : vector<256x96xf32> to vector<256x8xf32>
    %8 = vector.extract_strided_slice %5 {offsets = [0, 16], sizes = [256, 8], strides = [1, 1]} : vector<256x96xf32> to vector<256x8xf32>
    %9 = vector.extract_strided_slice %5 {offsets = [0, 24], sizes = [256, 8], strides = [1, 1]} : vector<256x96xf32> to vector<256x8xf32>
    %10 = tpu.concatenate %6, %7, %8, %9 in 0 : vector<256x8xf32>, vector<256x8xf32>, vector<256x8xf32>, vector<256x8xf32> -> vector<1024x8xf32>
    %11 = vector.shape_cast %10 : vector<1024x8xf32> to vector<64x16x8xf32>
    %12 = vector.extract_strided_slice %5 {offsets = [0, 32], sizes = [256, 8], strides = [1, 1]} : vector<256x96xf32> to vector<256x8xf32>
    %13 = vector.extract_strided_slice %5 {offsets = [0, 40], sizes = [256, 8], strides = [1, 1]} : vector<256x96xf32> to vector<256x8xf32>
    %14 = vector.extract_strided_slice %5 {offsets = [0, 48], sizes = [256, 8], strides = [1, 1]} : vector<256x96xf32> to vector<256x8xf32>
    %15 = vector.extract_strided_slice %5 {offsets = [0, 56], sizes = [256, 8], strides = [1, 1]} : vector<256x96xf32> to vector<256x8xf32>
    %16 = tpu.concatenate %12, %13, %14, %15 in 0 : vector<256x8xf32>, vector<256x8xf32>, vector<256x8xf32>, vector<256x8xf32> -> vector<1024x8xf32>
    %17 = vector.shape_cast %16 : vector<1024x8xf32> to vector<64x16x8xf32>
    %18 = vector.extract_strided_slice %5 {offsets = [0, 64], sizes = [256, 8], strides = [1, 1]} : vector<256x96xf32> to vector<256x8xf32>
    %19 = vector.extract_strided_slice %5 {offsets = [0, 72], sizes = [256, 8], strides = [1, 1]} : vector<256x96xf32> to vector<256x8xf32>
    %20 = vector.extract_strided_slice %5 {offsets = [0, 80], sizes = [256, 8], strides = [1, 1]} : vector<256x96xf32> to vector<256x8xf32>
    %21 = vector.extract_strided_slice %5 {offsets = [0, 88], sizes = [256, 8], strides = [1, 1]} : vector<256x96xf32> to vector<256x8xf32>
    %22 = tpu.concatenate %18, %19, %20, %21 in 0 : vector<256x8xf32>, vector<256x8xf32>, vector<256x8xf32>, vector<256x8xf32> -> vector<1024x8xf32>
    %23 = vector.shape_cast %22 : vector<1024x8xf32> to vector<64x16x8xf32>
    "tpu.trace_start"() <{level = 10 : i32, message = "znd,zmd->znm"}> : () -> ()
    %cst_5 = arith.constant dense<0.000000e+00> : vector<64x16x16xf32>
    %24 = tpu.matmul %11, %17, %cst_5 {dimension_numbers = #tpu.dot_dimension_numbers<[2], [2], [1], [1], [0, 0, 0, 1, 1, 1], [0], [0]>} : vector<64x16x8xf32>, vector<64x16x8xf32>, vector<64x16x16xf32> -> vector<64x16x16xf32>
    "tpu.trace_stop"() : () -> ()
    %25 = vector.shape_cast %24 : vector<64x16x16xf32> to vector<4x16x16x16xf32>
    %c0_6 = arith.constant 0 : index
    %c0_7 = arith.constant 0 : index
    %c0_8 = arith.constant 0 : index
    %26 = vector.load %arg6[%c0_6, %c0_7, %c0_8] : memref<4x16x16xf32, #tpu.memory_space<vmem>>, vector<4x16x16xf32>
    %27 = vector.shape_cast %26 : vector<4x16x16xf32> to vector<4x1x16x16xf32>
    %28 = vector.broadcast %27 : vector<4x1x16x16xf32> to vector<4x16x16x16xf32>
    %29 = arith.addf %25, %28 : vector<4x16x16x16xf32>
    %c0_9 = arith.constant 0 : index
    %c0_10 = arith.constant 0 : index
    %c0_11 = arith.constant 0 : index
    %30 = vector.load %arg7[%c0_9, %c0_10, %c0_11] : memref<16x16x16xf32, #tpu.memory_space<vmem>>, vector<16x16x16xf32>
    %31 = vector.shape_cast %30 : vector<16x16x16xf32> to vector<1x16x16x16xf32>
    %32 = vector.broadcast %31 : vector<1x16x16x16xf32> to vector<4x16x16x16xf32>
    %33 = arith.addf %29, %32 : vector<4x16x16x16xf32>
    %34 = vector.shape_cast %33 : vector<4x16x16x16xf32> to vector<64x16x16xf32>
    %cst_12 = arith.constant dense<0xFF800000> : vector<64x16xf32>
    %35 = vector.multi_reduction <maximumf>, %34, %cst_12 [2] : vector<64x16x16xf32> to vector<64x16xf32>
    %36 = vector.shape_cast %35 : vector<64x16xf32> to vector<64x16x1xf32>
    %37 = vector.broadcast %36 : vector<64x16x1xf32> to vector<64x16x16xf32>
    %38 = arith.subf %34, %37 : vector<64x16x16xf32>
    %39 = math.exp %38 : vector<64x16x16xf32>
    %cst_13 = arith.constant dense<0.000000e+00> : vector<64x16xf32>
    %40 = vector.multi_reduction <add>, %39, %cst_13 [2] : vector<64x16x16xf32> to vector<64x16xf32>
    %41 = vector.shape_cast %40 : vector<64x16xf32> to vector<64x16x1xf32>
    "tpu.trace_start"() <{level = 10 : i32, message = "znm,zmd->znd"}> : () -> ()
    %cst_14 = arith.constant dense<0.000000e+00> : vector<64x16x8xf32>
    %42 = tpu.matmul %39, %23, %cst_14 {dimension_numbers = #tpu.dot_dimension_numbers<[2], [1], [1], [2], [0, 0, 0, 1, 1, 2], [0], [0]>} : vector<64x16x16xf32>, vector<64x16x8xf32>, vector<64x16x8xf32> -> vector<64x16x8xf32>
    "tpu.trace_stop"() : () -> ()
    %43 = tpu.reciprocal %41 : vector<64x16x1xf32> -> vector<64x16x1xf32>
    %44 = vector.broadcast %43 : vector<64x16x1xf32> to vector<64x16x8xf32>
    %45 = arith.mulf %42, %44 : vector<64x16x8xf32>
    %46 = vector.extract_strided_slice %45 {offsets = [0, 0, 0], sizes = [16, 16, 8], strides = [1, 1, 1]} : vector<64x16x8xf32> to vector<16x16x8xf32>
    %47 = vector.shape_cast %46 : vector<16x16x8xf32> to vector<256x8xf32>
    %48 = vector.extract_strided_slice %45 {offsets = [16, 0, 0], sizes = [16, 16, 8], strides = [1, 1, 1]} : vector<64x16x8xf32> to vector<16x16x8xf32>
    %49 = vector.shape_cast %48 : vector<16x16x8xf32> to vector<256x8xf32>
    %50 = vector.extract_strided_slice %45 {offsets = [32, 0, 0], sizes = [16, 16, 8], strides = [1, 1, 1]} : vector<64x16x8xf32> to vector<16x16x8xf32>
    %51 = vector.shape_cast %50 : vector<16x16x8xf32> to vector<256x8xf32>
    %52 = vector.extract_strided_slice %45 {offsets = [48, 0, 0], sizes = [16, 16, 8], strides = [1, 1, 1]} : vector<64x16x8xf32> to vector<16x16x8xf32>
    %53 = vector.shape_cast %52 : vector<16x16x8xf32> to vector<256x8xf32>
    %54 = tpu.concatenate %47, %49, %51, %53 in 1 : vector<256x8xf32>, vector<256x8xf32>, vector<256x8xf32>, vector<256x8xf32> -> vector<256x32xf32>
    %c0_15 = arith.constant 0 : index
    %c0_16 = arith.constant 0 : index
    %55 = vector.load %arg4[%c0_15, %c0_16] : memref<32x32xf32, #tpu.memory_space<vmem>>, vector<32x32xf32>
    %cst_17 = arith.constant dense<0.000000e+00> : vector<256x32xf32>
    %56 = tpu.matmul %54, %55, %cst_17 {dimension_numbers = #tpu.dot_dimension_numbers<[1], [0], [0], [1], [0, 0, 1, 1], [], []>} : vector<256x32xf32>, vector<32x32xf32>, vector<256x32xf32> -> vector<256x32xf32>
    %c0_18 = arith.constant 0 : index
    %c0_19 = arith.constant 0 : index
    %57 = vector.load %arg5[%c0_18, %c0_19] : memref<1x32xf32, #tpu.memory_space<vmem>>, vector<1x32xf32>
    %58 = vector.broadcast %57 : vector<1x32xf32> to vector<256x32xf32>
    %59 = arith.addf %56, %58 : vector<256x32xf32>
    %c0_20 = arith.constant 0 : index
    %c0_21 = arith.constant 0 : index
    %60 = vector.load %arg8[%c0_20, %c0_21] : memref<256x32xf32, #tpu.memory_space<vmem>>, vector<256x32xf32>
    tpu.vector_store %arg8[%c0_20, %c0_21], %59 {strides = array<i32>} : memref<256x32xf32, #tpu.memory_space<vmem>>, vector<256x32xf32>,
    return
  }
  func.func @transform_0(%arg0: i32) -> (i32, i32) {
    %c0_i32 = arith.constant 0 : i32
    %c0_i32_0 = arith.constant 0 : i32
    return %arg0, %c0_i32 : i32, i32
  }
  func.func @transform_1(%arg0: i32) -> (i32, i32) {
    %c0_i32 = arith.constant 0 : i32
    %c0_i32_0 = arith.constant 0 : i32
    %c0_i32_1 = arith.constant 0 : i32
    return %c0_i32, %c0_i32_0 : i32, i32
  }
  func.func @transform_2(%arg0: i32) -> (i32, i32) {
    %c0_i32 = arith.constant 0 : i32
    %c0_i32_0 = arith.constant 0 : i32
    %c0_i32_1 = arith.constant 0 : i32
    return %c0_i32, %c0_i32_0 : i32, i32
  }
  func.func @transform_3(%arg0: i32) -> (i32, i32) {
    %c0_i32 = arith.constant 0 : i32
    %c0_i32_0 = arith.constant 0 : i32
    %c0_i32_1 = arith.constant 0 : i32
    return %c0_i32, %c0_i32_0 : i32, i32
  }
  func.func @transform_4(%arg0: i32) -> (i32, i32) {
    %c0_i32 = arith.constant 0 : i32
    %c0_i32_0 = arith.constant 0 : i32
    %c0_i32_1 = arith.constant 0 : i32
    return %c0_i32, %c0_i32_0 : i32, i32
  }
  func.func @transform_5(%arg0: i32) -> (i32, i32, i32) {
    %c0_i32 = arith.constant 0 : i32
    %c0_i32_0 = arith.constant 0 : i32
    %c0_i32_1 = arith.constant 0 : i32
    %c0_i32_2 = arith.constant 0 : i32
    return %c0_i32, %c0_i32_0, %c0_i32_1 : i32, i32, i32
  }
  func.func @transform_6(%arg0: i32) -> (i32, i32, i32) {
    %c0_i32 = arith.constant 0 : i32
    %c0_i32_0 = arith.constant 0 : i32
    %c0_i32_1 = arith.constant 0 : i32
    %c0_i32_2 = arith.constant 0 : i32
    return %c0_i32, %c0_i32_0, %c0_i32_1 : i32, i32, i32
  }
  func.func @transform_7(%arg0: i32) -> (i32, i32) {
    %c0_i32 = arith.constant 0 : i32
    %c0_i32_0 = arith.constant 0 : i32
    return %arg0, %c0_i32 : i32, i32
  }
}

</mosaic_0001>

<bundles_post_ra>
// kernel: tpu_custom_call.1
= control target key start
LH: loop header
LB: loop body
LE: loop exit
PB: predicated region body
PF: predicated region fallthrough
CT: control target
= control target key end

     0   :  { %s10804_s24 = smov 0   ;;  %s17645_s0 = inlined_call_operand.vmem [shape: f32[512,32], index: 0, kind: input, shape index: {}]   ;;  %s17646_s1 = inlined_call_operand.vmem [shape: f32[32,96], index: 1, kind: input, shape index: {}]   ;;  %s17647_s2 = inlined_call_operand.vmem [shape: f32[1,96], index: 2, kind: input, shape index: {}]   ;;  %s17648_s3 = inlined_call_operand.vmem [shape: f32[32,32], index: 3, kind: input, shape index: {}]   ;;  %s17649_s4 = inlined_call_operand.vmem [shape: f32[1,32], index: 4, kind: input, shape index: {}]   ;;  %s17650_s5 = inlined_call_operand.vmem [shape: f32[4,16,16], index: 5, kind: input, shape index: {}]   ;;  %s17651_s6 = inlined_call_operand.vmem [shape: f32[16,16,16], index: 6, kind: input, shape index: {}]   ;;  %s17652_s7 = inlined_call_operand.vmem [shape: f32[512,32], index: 7, kind: output, shape index: {}]  }
   0x1 LB: > { %s9392_s25 = sadd.s32 4294967295, %s10754_s24   ;;  %p9396_p0 = scmp.ge.s32.totalorder %s10754_s24, 1  ;;  %s10754_s24 = sphi %s10804_s24, %s17_s24  }
   0x2   : > { %p238_p1 = scmp.lt.s32.totalorder %s10754_s24, 3 }
   0x4   : > { %p239_p2 = pnand %p9396_p0, %p238_p1 }
   0x6   : > { %242 = sbr.rel (%p239_p2) target bundleno = 2820 (0xb04), region = 48 }
   0xb   : > { %v317_v0 = vld [vmem:[%s17646_s1 + $0x18] sm:$0xff]  ;;  %v316_v1 = vld [vmem:[%s17646_s1 + $0x10] sm:$0xff]  ;;  %s9397_s30 = sshll.u32 %s9392_s25, 5  ;;  %v315_v2 = vld [vmem:[%s17646_s1 + $0x8] sm:$0xff]  ;;  %vm322_vm0 = vcmask 261120   ;;  %s10756_s18 = smov 112  }
   0xc   : > { %431 = vmatpush.msra.mxu0 %v317_v0  ;;  %9851 = vmatpush.msra.mxu1 %v317_v0  ;;  %p271_p3 = scmp.lt.s32.totalorder %s9397_s30, 63  ;;  %v314_v3 = vld [vmem:[%s17646_s1] sm:$0xff]  ;;  %s10757_s19 = smov 120   ;;  %vm760_vm1 = vcmask 64512   ;;  %vm3293_vm2 = vcmask 130048  }
   0xd   : > { %9852 = vmatpush.msra.mxu2 %v317_v0  ;;  %9853 = vmatpush.msra.mxu3 %v317_v0  ;;  %v10897_v35 = vld [vmem:[%s17647_s2] ss:$0 sm:$0xff]  ;;  %s10758_s20 = smov 104   ;;  %s10759_s21 = smov 96  }
   0xe   : > { %432 = vmatpush.msra.mxu0 %v316_v1  ;;  %9854 = vmatpush.msra.mxu1 %v316_v1  ;;  %s19476_s30 = smov (!%p271_p3, %s9397_s30), 63  ;;  %s10760_s27 = smov 64  }
   0xf   : > { %9855 = vmatpush.msra.mxu2 %v316_v1  ;;  %9856 = vmatpush.msra.mxu3 %v316_v1  ;;  %s9398_s12 = sshll.u32 %s19476_s30, 3  ;;  %s10761_s28 = smov 8  }
  0x10   : > { %433 = vmatpush.msra.mxu0 %v315_v2  ;;  %9857 = vmatpush.msra.mxu1 %v315_v2  ;;  %s10832_s15 = scalar_lea.vmem %s17645_s0, %s9398_s12  ;;  %s10762_s29 = smov 16  }
  0x11   : > { %9858 = vmatpush.msra.mxu2 %v315_v2  ;;  %9859 = vmatpush.msra.mxu3 %v315_v2  ;;  %v282_v4 = vld [vmem:[%s10832_s15] sm:$0xff]  ;;  %v283_v8 = vld [vmem:[%s10832_s15 + $0x8] sm:$0xff]  ;;  %v284_v12 = vld [vmem:[%s10832_s15 + $0x10] sm:$0xff]  ;;  %s10763_s8 = smov 24   ;;  %s15782_s22 = scalar_lea.vmem %s17652_s7, %s9398_s12 }
  0x12   : > { %434 = vmatpush.msra.mxu0 %v314_v3  ;;  %9860 = vmatpush.msra.mxu1 %v314_v3  ;;  %v290_v5 = vld [vmem:[%s10832_s15 + $0x40] sm:$0xff]  ;;  %v291_v9 = vld [vmem:[%s10832_s15 + $0x48] sm:$0xff]  ;;  %v292_v13 = vld [vmem:[%s10832_s15 + $0x50] sm:$0xff] }
  0x13   : > { %v298_v6 = vld [vmem:[%s10832_s15 + $0x80] sm:$0xff]  ;;  %9401 = vmatmul.msk.f32.vlgmr.msra.gmra.mxu0 %vm322_vm0, %v282_v4  ;;  %9409 = vmatmul.msk.f32.vlgmr.msra.gmra.mxu1 %vm322_vm0, %v290_v5  ;;  %v299_v10 = vld [vmem:[%s10832_s15 + $0x88] sm:$0xff]  ;;  %v300_v14 = vld [vmem:[%s10832_s15 + $0x90] sm:$0xff] }
  0x14   : > { %9861 = vmatpush.msra.mxu2 %v314_v3  ;;  %9862 = vmatpush.msra.mxu3 %v314_v3  ;;  %v306_v7 = vld [vmem:[%s10832_s15 + $0xc0] sm:$0xff]  ;;  %v307_v11 = vld [vmem:[%s10832_s15 + $0xc8] sm:$0xff]  ;;  %v308_v15 = vld [vmem:[%s10832_s15 + $0xd0] sm:$0xff] }
  0x15   : > { %9417 = vmatmul.msk.f32.vlgmr.msra.gmra.mxu2 %vm322_vm0, %v298_v6  ;;  %9425 = vmatmul.msk.f32.vlgmr.msra.gmra.mxu3 %vm322_vm0, %v306_v7  ;;  %v285_v16 = vld [vmem:[%s10832_s15 + $0x18] sm:$0xff]  ;;  %v286_v20 = vld [vmem:[%s10832_s15 + $0x20] sm:$0xff]  ;;  %v287_v24 = vld [vmem:[%s10832_s15 + $0x28] sm:$0xff] }
  0x16   : > { %v293_v17 = vld [vmem:[%s10832_s15 + $0x58] sm:$0xff]  ;;  %v294_v21 = vld [vmem:[%s10832_s15 + $0x60] sm:$0xff]  ;;  %v295_v25 = vld [vmem:[%s10832_s15 + $0x68] sm:$0xff] }
  0x17   : > { %v301_v18 = vld [vmem:[%s10832_s15 + $0x98] sm:$0xff]  ;;  %v302_v22 = vld [vmem:[%s10832_s15 + $0xa0] sm:$0xff]  ;;  %v303_v26 = vld [vmem:[%s10832_s15 + $0xa8] sm:$0xff] }
  0x18   : > { %v309_v19 = vld [vmem:[%s10832_s15 + $0xd8] sm:$0xff]  ;;  %v310_v23 = vld [vmem:[%s10832_s15 + $0xe0] sm:$0xff]  ;;  %v288_v27 = vld [vmem:[%s10832_s15 + $0x30] sm:$0xff] }
  0x19   : > { %v296_v28 = vld [vmem:[%s10832_s15 + $0x70] sm:$0xff]  ;;  %v289_v30 = vld [vmem:[%s10832_s15 + $0x38] sm:$0xff]  ;;  %v311_v31 = vld [vmem:[%s10832_s15 + $0xe8] sm:$0xff] }
  0x1a   : > { %v304_v29 = vld [vmem:[%s10832_s15 + $0xb0] sm:$0xff]  ;;  %v305_v32 = vld [vmem:[%s10832_s15 + $0xb8] sm:$0xff] }
  0x1b   : > { %9402 = vmatmul.msk.f32.gmra.mxu0 %vm322_vm0, %v283_v8  ;;  %9410 = vmatmul.msk.f32.gmra.mxu1 %vm322_vm0, %v291_v9  ;;  %v312_v33 = vld [vmem:[%s10832_s15 + $0xf0] sm:$0xff]  ;;  %v297_v34 = vld [vmem:[%s10832_s15 + $0x78] sm:$0xff] }
  0x1c   : > { %v313_v44 = vld [vmem:[%s10832_s15 + $0xf8] sm:$0xff] }
  0x1d   : > { %9418 = vmatmul.msk.f32.gmra.mxu2 %vm322_vm0, %v299_v10  ;;  %9426 = vmatmul.msk.f32.gmra.mxu3 %vm322_vm0, %v307_v11 }
  0x23   : > { %9403 = vmatmul.msk.f32.gmra.mxu0 %vm322_vm0, %v284_v12  ;;  %9411 = vmatmul.msk.f32.gmra.mxu1 %vm322_vm0, %v292_v13 }
  0x25   : > { %9419 = vmatmul.msk.f32.gmra.mxu2 %vm322_vm0, %v300_v14  ;;  %9427 = vmatmul.msk.f32.gmra.mxu3 %vm322_vm0, %v308_v15 }
  0x2b   : > { %9404 = vmatmul.msk.f32.gmra.mxu0 %vm322_vm0, %v285_v16  ;;  %9412 = vmatmul.msk.f32.gmra.mxu1 %vm322_vm0, %v293_v17 }
  0x2d   : > { %9420 = vmatmul.msk.f32.gmra.mxu2 %vm322_vm0, %v301_v18  ;;  %9428 = vmatmul.msk.f32.gmra.mxu3 %vm322_vm0, %v309_v19 }
  0x33   : > { %9405 = vmatmul.msk.f32.gmra.mxu0 %vm322_vm0, %v286_v20  ;;  %9413 = vmatmul.msk.f32.gmra.mxu1 %vm322_vm0, %v294_v21 }
  0x35   : > { %9421 = vmatmul.msk.f32.gmra.mxu2 %vm322_vm0, %v302_v22  ;;  %9429 = vmatmul.msk.f32.gmra.mxu3 %vm322_vm0, %v310_v23 }
  0x3b   : > { %9406 = vmatmul.msk.f32.gmra.mxu0 %vm322_vm0, %v287_v24  ;;  %9414 = vmatmul.msk.f32.gmra.mxu1 %vm322_vm0, %v295_v25 }
  0x3d   : > { %9422 = vmatmul.msk.f32.gmra.mxu2 %vm322_vm0, %v303_v26  ;;  %9430 = vmatmul.msk.f32.gmra.mxu3 %vm322_vm0, %v311_v31 }
  0x43   : > { %9407 = vmatmul.msk.f32.gmra.mxu0 %vm322_vm0, %v288_v27  ;;  %9415 = vmatmul.msk.f32.gmra.mxu1 %vm322_vm0, %v296_v28 }
  0x45   : > { %9423 = vmatmul.msk.f32.gmra.mxu2 %vm322_vm0, %v304_v29  ;;  %9431 = vmatmul.msk.f32.gmra.mxu3 %vm322_vm0, %v312_v33 }
  0x4b   : > { %9408 = vmatmul.msk.f32.gmra.mxu0 %vm322_vm0, %v289_v30  ;;  %9416 = vmatmul.msk.f32.gmra.mxu1 %vm322_vm0, %v297_v34 }
  0x4d   : > { %9424 = vmatmul.msk.f32.gmra.mxu2 %vm322_vm0, %v305_v32  ;;  %9432 = vmatmul.msk.f32.gmra.mxu3 %vm322_vm0, %v313_v44 }
  0x90   : > { %v436_v36 = vpop.f32.mrf.mxu0  ;;  %v460_v37 = vpop.f32.mrf.mxu1 }
  0x91   : > { %v10902_v38 = vadd.f32 %v10897_v35, %v436_v36  ;;  %v10905_v39 = vadd.f32 %v10897_v35, %v460_v37 }
  0x93   : > { %18133 = vst [vmem:[#allocation2_spill] sm:$0xff] %v10902_v38  ;;  %644 = vrot.lane.b32.xlu1 %v10905_v39, %s10756_s18  ;;  %580 = vrot.lane.b32.xlu2 %v10905_v39, %s10757_s19 }
  0x94   : > { %18134 = vst [vmem:[#allocation3_spill] sm:$0xff] %v10905_v39  ;;  %564 = vrot.lane.b32.xlu0 %v10902_v38, %s10757_s19 }
  0x98   : > { %v508_v40 = vpop.f32.mrf.mxu3  ;;  %v484_v41 = vpop.f32.mrf.mxu2 }
  0x99   : > { %v10920_v42 = vadd.f32 %v10897_v35, %v484_v41  ;;  %v10923_v43 = vadd.f32 %v10897_v35, %v508_v40  ;;  %v463_v45 = vpop.f32.mrf.mxu1  ;;  %v439_v48 = vpop.f32.mrf.mxu0 }
  0x9a   : > { %v10934_v46 = vadd.f32 %v10897_v35, %v463_v45  ;;  %v10946_v50 = vadd.f32 %v10897_v35, %v439_v48 }
  0x9b   : > { %692 = vrot.lane.b32.xlu1 %v10902_v38, %s10758_s20  ;;  %628 = vrot.lane.b32.xlu2 %v10902_v38, %s10756_s18  ;;  %18135 = vst [vmem:[#allocation4_spill] sm:$0xff] %v10920_v42 }
  0x9c   : > { %708 = vrot.lane.b32.xlu0 %v10905_v39, %s10758_s20  ;;  %18136 = vst [vmem:[#allocation5_spill] sm:$0xff] %v10923_v43 }
  0x9d   : > { %18137 = vst [vmem:[#allocation6_spill] sm:$0xff] %v10934_v46 }
  0x9e   : > { %18139 = vst [vmem:[#allocation8_spill] sm:$0xff] %v10946_v50 }
  0xa0   : > { %v511_v47 = vpop.f32.mrf.mxu3  ;;  %v487_v51 = vpop.f32.mrf.mxu2 }
  0xa1   : > { %v10943_v49 = vadd.f32 %v10897_v35, %v511_v47  ;;  %v10955_v52 = vadd.f32 %v10897_v35, %v487_v51  ;;  %v442_v53 = vpop.f32.mrf.mxu0  ;;  %v466_v54 = vpop.f32.mrf.mxu1 }
  0xa2   : > { %v10964_v55 = vadd.f32 %v10897_v35, %v442_v53  ;;  %v10967_v56 = vadd.f32 %v10897_v35, %v466_v54 }
  0xa3   : > { %596 = vrot.lane.b32.xlu1 %v10920_v42, %s10757_s19  ;;  %676 = vrot.lane.b32.xlu2 %v10923_v43, %s10756_s18  ;;  %18138 = vst [vmem:[#allocation7_spill] sm:$0xff] %v10943_v49 }
  0xa4   : > { %612 = vrot.lane.b32.xlu0 %v10923_v43, %s10757_s19  ;;  %18140 = vst [vmem:[#allocation9_spill] sm:$0xff] %v10955_v52 }
  0xa5   : > { %18141 = vst [vmem:[#allocation10_spill] sm:$0xff] %v10964_v55 }
  0xa6   : > { %18142 = vst [vmem:[#allocation11_spill] sm:$0xff] %v10967_v56 }
  0xa8   : > { %v514_v57 = vpop.f32.mrf.mxu3  ;;  %v490_v59 = vpop.f32.mrf.mxu2 }
  0xa9   : > { %v10976_v58 = vadd.f32 %v10897_v35, %v514_v57  ;;  %v10985_v60 = vadd.f32 %v10897_v35, %v490_v59  ;;  %v469_v61 = vpop.f32.mrf.mxu1  ;;  %v445_v63 = vpop.f32.mrf.mxu0 }
  0xaa   : > { %v10994_v62 = vadd.f32 %v10897_v35, %v469_v61  ;;  %v11003_v0 = vadd.f32 %v10897_v35, %v445_v63 }
  0xab   : > { %710 = vrot.lane.b32.xlu1 %v10934_v46, %s10758_s20  ;;  %646 = vrot.lane.b32.xlu2 %v10934_v46, %s10756_s18  ;;  %18143 = vst [vmem:[#allocation12_spill] sm:$0xff] %v10976_v58 }
  0xac   : > { %660 = vrot.lane.b32.xlu0 %v10920_v42, %s10756_s18  ;;  %18144 = vst [vmem:[#allocation13_spill] sm:$0xff] %v10985_v60 }
  0xad   : > { %18145 = vst [vmem:[#allocation14_spill] sm:$0xff] %v10994_v62 }
  0xae   : > { %18146 = vst [vmem:[#allocation15_spill] sm:$0xff] %v11003_v0 }
  0xb0   : > { %v517_v1 = vpop.f32.mrf.mxu3  ;;  %v493_v5 = vpop.f32.mrf.mxu2 }
  0xb1   : > { %v11012_v2 = vadd.f32 %v10897_v35, %v517_v1  ;;  %v448_v3 = vpop.f32.mrf.mxu0  ;;  %v11026_v7 = vadd.f32 %v10897_v35, %v493_v5  ;;  %v472_v8 = vpop.f32.mrf.mxu1 }
  0xb2   : > { %v11023_v6 = vadd.f32 %v10897_v35, %v448_v3  ;;  %v11037_v10 = vadd.f32 %v10897_v35, %v472_v8 }
  0xb3   : > { %614 = vrot.lane.b32.xlu1 %v10943_v49, %s10757_s19  ;;  %694 = vrot.lane.b32.xlu2 %v10946_v50, %s10758_s20  ;;  %18147 = vst [vmem:[#allocation16_spill] sm:$0xff] %v11012_v2 }
  0xb4   : > { %566 = vrot.lane.b32.xlu0 %v10946_v50, %s10757_s19  ;;  %18149 = vst [vmem:[#allocation18_spill] sm:$0xff] %v11023_v6 }
  0xb5   : > { %18150 = vst [vmem:[#allocation19_spill] sm:$0xff] %v11026_v7 }
  0xb6   : > { %18152 = vst [vmem:[#allocation21_spill] sm:$0xff] %v11037_v10 }
  0xb8   : > { %v520_v11 = vpop.f32.mrf.mxu3  ;;  %v496_v16 = vpop.f32.mrf.mxu2 }
  0xb9   : > { %v11048_v13 = vadd.f32 %v10897_v35, %v520_v11  ;;  %v11063_v18 = vadd.f32 %v10897_v35, %v496_v16  ;;  %v475_v21 = vpop.f32.mrf.mxu1  ;;  %v451_v24 = vpop.f32.mrf.mxu0 }
  0xba   : > { %v11078_v23 = vadd.f32 %v10897_v35, %v475_v21  ;;  %v11081_v25 = vadd.f32 %v10897_v35, %v451_v24 }
  0xbb   : > { %662 = vrot.lane.b32.xlu1 %v10955_v52, %s10756_s18  ;;  %598 = vrot.lane.b32.xlu2 %v10955_v52, %s10757_s19  ;;  %18154 = vst [vmem:[#allocation23_spill] sm:$0xff] %v11048_v13 }
  0xbc   : > { %582 = vrot.lane.b32.xlu0 %v10934_v46, %s10757_s19  ;;  %18158 = vst [vmem:[#allocation27_spill] sm:$0xff] %v11063_v18 }
  0xbd   : > { %18162 = vst [vmem:[#allocation31_spill] sm:$0xff] %v11078_v23 }
  0xbe   : > { %18163 = vst [vmem:[#allocation32_spill] sm:$0xff] %v11081_v25 }
  0xc0   : > { %v523_v26 = vpop.f32.mrf.mxu3  ;;  %v499_v33 = vpop.f32.mrf.mxu2 }
  0xc1   : > { %v11096_v30 = vadd.f32 %v10897_v35, %v523_v26  ;;  %v11111_v36 = vadd.f32 %v10897_v35, %v499_v33  ;;  %v478_v41 = vpop.f32.mrf.mxu1  ;;  %v454_v45 = vpop.f32.mrf.mxu0 }
  0xc2   : > { %v11126_v47 = vadd.f32 %v10897_v35, %v478_v41  ;;  %v11129_v48 = vadd.f32 %v10897_v35, %v454_v45 }
  0xc3   : > { %568 = vrot.lane.b32.xlu1 %v10964_v55, %s10757_s19  ;;  %712 = vrot.lane.b32.xlu2 %v10967_v56, %s10758_s20  ;;  %18167 = vst [vmem:[#allocation36_spill] sm:$0xff] %v11096_v30 }
  0xc4   : > { %630 = vrot.lane.b32.xlu0 %v10946_v50, %s10756_s18  ;;  %18171 = vst [vmem:[#allocation40_spill] sm:$0xff] %v11111_v36 }
  0xc5   : > { %18175 = vst [vmem:[#allocation44_spill] sm:$0xff] %v11126_v47 }
  0xc6   : > { %18176 = vst [vmem:[#allocation45_spill] sm:$0xff] %v11129_v48 }
  0xc8   : > { %v526_v51 = vpop.f32.mrf.mxu3  ;;  %v502_v1 = vpop.f32.mrf.mxu2 }
  0xc9   : > { %v11144_v59 = vadd.f32 %v10897_v35, %v526_v51  ;;  %v11159_v5 = vadd.f32 %v10897_v35, %v502_v1  ;;  %v457_v8 = vpop.f32.mrf.mxu0  ;;  %v481_v21 = vpop.f32.mrf.mxu1 }
  0xca   : > { %v11174_v26 = vadd.f32 %v10897_v35, %v457_v8  ;;  %v11177_v33 = vadd.f32 %v10897_v35, %v481_v21 }
  0xcb   : > { %584 = vrot.lane.b32.xlu1 %v10967_v56, %s10757_s19  ;;  %616 = vrot.lane.b32.xlu2 %v10976_v58, %s10757_s19  ;;  %18180 = vst [vmem:[#allocation49_spill] sm:$0xff] %v11144_v59 }
  0xcc   : > { %678 = vrot.lane.b32.xlu0 %v10943_v49, %s10756_s18  ;;  %18184 = vst [vmem:[#allocation53_spill] sm:$0xff] %v11159_v5 }
  0xcd   : > { %18188 = vst [vmem:[#allocation57_spill] sm:$0xff] %v11174_v26 }
  0xce   : > { %18189 = vst [vmem:[#allocation58_spill] sm:$0xff] %v11177_v33 }
  0xd0   : > { %v529_v41 = vpop.f32.mrf.mxu3 }
  0xd1   : > { %v11192_v8 = vadd.f32 %v10897_v35, %v529_v41 }
  0xd3   : > { %632 = vrot.lane.b32.xlu1 %v10964_v55, %s10756_s18  ;;  %664 = vrot.lane.b32.xlu2 %v10985_v60, %s10756_s18  ;;  %18193 = vst [vmem:[#allocation62_spill] sm:$0xff] %v11192_v8 }
  0xd4   : > { %648 = vrot.lane.b32.xlu0 %v10967_v56, %s10756_s18 }
  0xdb   : > { %680 = vrot.lane.b32.xlu1 %v10976_v58, %s10756_s18  ;;  %586 = vrot.lane.b32.xlu2 %v10994_v62, %s10757_s19 }
  0xdc   : > { %696 = vrot.lane.b32.xlu0 %v10964_v55, %s10758_s20 }
  0xe3   : > { %570 = vrot.lane.b32.xlu1 %v11003_v0, %s10757_s19  ;;  %634 = vrot.lane.b32.xlu2 %v11003_v0, %s10756_s18 }
  0xe4   : > { %600 = vrot.lane.b32.xlu0 %v10985_v60, %s10757_s19 }
  0xeb   : > { %650 = vrot.lane.b32.xlu1 %v10994_v62, %s10756_s18  ;;  %682 = vrot.lane.b32.xlu2 %v11012_v2, %s10756_s18 }
  0xec   : > { %618 = vrot.lane.b32.xlu0 %v11012_v2, %s10757_s19 }
  0xed   : > { %v11020_v4 = vpop.permute.xlu2 %580 }
  0xee   : > { %18148 = vst [vmem:[#allocation17_spill] sm:$0xff] %v11020_v4 }
  0xf3   : > { %698 = vrot.lane.b32.xlu1 %v11003_v0, %s10758_s20  ;;  %572 = vrot.lane.b32.xlu2 %v11023_v6, %s10757_s19 }
  0xf4   : > { %666 = vrot.lane.b32.xlu0 %v11026_v7, %s10756_s18 }
  0xf5   : > { %v11034_v9 = vpop.permute.xlu2 %628 }
  0xf6   : > { %18151 = vst [vmem:[#allocation20_spill] sm:$0xff] %v11034_v9 }
  0xfb   : > { %602 = vrot.lane.b32.xlu1 %v11026_v7, %s10757_s19  ;;  %652 = vrot.lane.b32.xlu2 %v11037_v10, %s10756_s18 }
  0xfc   : > { %588 = vrot.lane.b32.xlu0 %v11037_v10, %s10757_s19 }
  0xfd   : > { %v11045_v12 = vpop.permute.xlu2 %676 }
  0xfe   : > { %18153 = vst [vmem:[#allocation22_spill] sm:$0xff] %v11045_v12 }
 0x103   : > { %620 = vrot.lane.b32.xlu1 %v11048_v13, %s10757_s19  ;;  %700 = vrot.lane.b32.xlu2 %v11023_v6, %s10758_s20 }
 0x104   : > { %636 = vrot.lane.b32.xlu0 %v11023_v6, %s10756_s18 }
 0x105   : > { %v11056_v14 = vpop.permute.xlu1 %644  ;;  %v11058_v15 = vpop.permute.xlu2 %646 }
 0x106   : > { %18155 = vst [vmem:[#allocation24_spill] sm:$0xff] %v11056_v14  ;;  %v11060_v17 = vpop.permute.xlu0 %564 }
 0x107   : > { %18156 = vst [vmem:[#allocation25_spill] sm:$0xff] %v11058_v15 }
 0x108   : > { %18157 = vst [vmem:[#allocation26_spill] sm:$0xff] %v11060_v17 }
 0x10b   : > { %668 = vrot.lane.b32.xlu1 %v11063_v18, %s10756_s18  ;;  %604 = vrot.lane.b32.xlu2 %v11063_v18, %s10757_s19 }
 0x10c   : > { %684 = vrot.lane.b32.xlu0 %v11048_v13, %s10756_s18 }
 0x10d   : > { %v11071_v19 = vpop.permute.xlu1 %692  ;;  %v11073_v20 = vpop.permute.xlu2 %694 }
 0x10e   : > { %18159 = vst [vmem:[#allocation28_spill] sm:$0xff] %v11071_v19  ;;  %v11075_v22 = vpop.permute.xlu0 %708 }
 0x10f   : > { %18160 = vst [vmem:[#allocation29_spill] sm:$0xff] %v11073_v20 }
 0x110   : > { %18161 = vst [vmem:[#allocation30_spill] sm:$0xff] %v11075_v22 }
 0x113   : > { %590 = vrot.lane.b32.xlu1 %v11078_v23, %s10757_s19  ;;  %574 = vrot.lane.b32.xlu2 %v11081_v25, %s10757_s19 }
 0x114   : > { %654 = vrot.lane.b32.xlu0 %v11078_v23, %s10756_s18 }
 0x115   : > { %v11089_v27 = vpop.permute.xlu1 %596  ;;  %v11091_v28 = vpop.permute.xlu2 %598 }
 0x116   : > { %18164 = vst [vmem:[#allocation33_spill] sm:$0xff] %v11089_v27  ;;  %v11093_v29 = vpop.permute.xlu0 %612 }
 0x117   : > { %18165 = vst [vmem:[#allocation34_spill] sm:$0xff] %v11091_v28 }
 0x118   : > { %18166 = vst [vmem:[#allocation35_spill] sm:$0xff] %v11093_v29 }
 0x11b   : > { %638 = vrot.lane.b32.xlu1 %v11081_v25, %s10756_s18  ;;  %622 = vrot.lane.b32.xlu2 %v11096_v30, %s10757_s19 }
 0x11c   : > { %702 = vrot.lane.b32.xlu0 %v11081_v25, %s10758_s20 }
 0x11d   : > { %v11104_v31 = vpop.permute.xlu1 %710  ;;  %v11106_v32 = vpop.permute.xlu2 %712 }
 0x11e   : > { %18168 = vst [vmem:[#allocation37_spill] sm:$0xff] %v11104_v31  ;;  %v11108_v34 = vpop.permute.xlu0 %660 }
 0x11f   : > { %18169 = vst [vmem:[#allocation38_spill] sm:$0xff] %v11106_v32  ;;  %v505_v32 = vpop.f32.mrf.mxu2 }
 0x120   : > { %18170 = vst [vmem:[#allocation39_spill] sm:$0xff] %v11108_v34  ;;  %v11207_v19 = vadd.f32 %v10897_v35, %v505_v32 }
 0x122   : > { %18197 = vst [vmem:[#allocation66_spill] sm:$0xff] %v11207_v19 }
 0x123   : > { %686 = vrot.lane.b32.xlu1 %v11096_v30, %s10756_s18  ;;  %670 = vrot.lane.b32.xlu2 %v11111_v36, %s10756_s18 }
 0x124   : > { %606 = vrot.lane.b32.xlu0 %v11111_v36, %s10757_s19 }
 0x125   : > { %v11119_v37 = vpop.permute.xlu1 %614  ;;  %v11121_v40 = vpop.permute.xlu2 %616 }
 0x126   : > { %18172 = vst [vmem:[#allocation41_spill] sm:$0xff] %v11119_v37  ;;  %v11123_v44 = vpop.permute.xlu0 %566 }
 0x127   : > { %18173 = vst [vmem:[#allocation42_spill] sm:$0xff] %v11121_v40 }
 0x128   : > { %18174 = vst [vmem:[#allocation43_spill] sm:$0xff] %v11123_v44 }
 0x12b   : > { %656 = vrot.lane.b32.xlu1 %v11126_v47, %s10756_s18  ;;  %592 = vrot.lane.b32.xlu2 %v11126_v47, %s10757_s19 }
 0x12c   : > { %576 = vrot.lane.b32.xlu0 %v11129_v48, %s10757_s19 }
 0x12d   : > { %v11137_v53 = vpop.permute.xlu1 %662  ;;  %v11139_v54 = vpop.permute.xlu2 %664 }
 0x12e   : > { %18177 = vst [vmem:[#allocation46_spill] sm:$0xff] %v11137_v53  ;;  %v11141_v57 = vpop.permute.xlu0 %582 }
 0x12f   : > { %18178 = vst [vmem:[#allocation47_spill] sm:$0xff] %v11139_v54 }
 0x130   : > { %18179 = vst [vmem:[#allocation48_spill] sm:$0xff] %v11141_v57 }
 0x133   : > { %704 = vrot.lane.b32.xlu1 %v11129_v48, %s10758_s20  ;;  %640 = vrot.lane.b32.xlu2 %v11129_v48, %s10756_s18 }
 0x134   : > { %624 = vrot.lane.b32.xlu0 %v11144_v59, %s10757_s19 }
 0x135   : > { %v11152_v61 = vpop.permute.xlu1 %568  ;;  %v11154_v63 = vpop.permute.xlu2 %586 }
 0x136   : > { %18181 = vst [vmem:[#allocation50_spill] sm:$0xff] %v11152_v61  ;;  %v11156_v3 = vpop.permute.xlu0 %630 }
 0x137   : > { %18182 = vst [vmem:[#allocation51_spill] sm:$0xff] %v11154_v63 }
 0x138   : > { %18183 = vst [vmem:[#allocation52_spill] sm:$0xff] %v11156_v3 }
 0x13b   : > { %608 = vrot.lane.b32.xlu1 %v11159_v5, %s10757_s19  ;;  %688 = vrot.lane.b32.xlu2 %v11144_v59, %s10756_s18 }
 0x13c   : > { %672 = vrot.lane.b32.xlu0 %v11159_v5, %s10756_s18 }
 0x13d   : > { %v11167_v11 = vpop.permute.xlu1 %584  ;;  %v11169_v16 = vpop.permute.xlu2 %634 }
 0x13e   : > { %18185 = vst [vmem:[#allocation54_spill] sm:$0xff] %v11167_v11  ;;  %v11171_v24 = vpop.permute.xlu0 %678 }
 0x13f   : > { %18186 = vst [vmem:[#allocation55_spill] sm:$0xff] %v11169_v16 }
 0x140   : > { %18187 = vst [vmem:[#allocation56_spill] sm:$0xff] %v11171_v24 }
 0x143   : > { %578 = vrot.lane.b32.xlu1 %v11174_v26, %s10757_s19  ;;  %658 = vrot.lane.b32.xlu2 %v11177_v33, %s10756_s18 }
 0x144   : > { %594 = vrot.lane.b32.xlu0 %v11177_v33, %s10757_s19 }
 0x145   : > { %v11185_v45 = vpop.permute.xlu1 %632  ;;  %v11187_v51 = vpop.permute.xlu2 %682 }
 0x146   : > { %18190 = vst [vmem:[#allocation59_spill] sm:$0xff] %v11185_v45  ;;  %v11189_v1 = vpop.permute.xlu0 %648 }
 0x147   : > { %18191 = vst [vmem:[#allocation60_spill] sm:$0xff] %v11187_v51 }
 0x148   : > { %18192 = vst [vmem:[#allocation61_spill] sm:$0xff] %v11189_v1 }
 0x14b   : > { %626 = vrot.lane.b32.xlu1 %v11192_v8, %s10757_s19  ;;  %706 = vrot.lane.b32.xlu2 %v11174_v26, %s10758_s20 }
 0x14c   : > { %642 = vrot.lane.b32.xlu0 %v11174_v26, %s10756_s18 }
 0x14d   : > { %v11200_v21 = vpop.permute.xlu1 %680  ;;  %v11202_v31 = vpop.permute.xlu2 %572 }
 0x14e   : > { %18194 = vst [vmem:[#allocation63_spill] sm:$0xff] %v11200_v21  ;;  %v11204_v22 = vpop.permute.xlu0 %696 }
 0x14f   : > { %18195 = vst [vmem:[#allocation64_spill] sm:$0xff] %v11202_v31 }
 0x150   : > { %18196 = vst [vmem:[#allocation65_spill] sm:$0xff] %v11204_v22 }
 0x153   : > { %674 = vrot.lane.b32.xlu1 %v11207_v19, %s10756_s18  ;;  %610 = vrot.lane.b32.xlu2 %v11207_v19, %s10757_s19 }
 0x154   : > { %690 = vrot.lane.b32.xlu0 %v11192_v8, %s10756_s18 }
 0x155   : > { %v11215_v41 = vpop.permute.xlu1 %570  ;;  %v11217_v20 = vpop.permute.xlu2 %652 }
 0x156   : > { %18198 = vst [vmem:[#allocation67_spill] sm:$0xff] %v11215_v41  ;;  %v11219_v21 = vpop.permute.xlu0 %600 }
 0x157   : > { %18199 = vst [vmem:[#allocation68_spill] sm:$0xff] %v11217_v20 }
 0x158   : > { %18200 = vst [vmem:[#allocation69_spill] sm:$0xff] %v11219_v21 }
 0x15b   : > { %716 = vrot.lane.b32.xlu1 %v11037_v10, %s10758_s20  ;;  %718 = vrot.lane.b32.xlu2 %v11078_v23, %s10758_s20 }
 0x15c   : > { %714 = vrot.lane.b32.xlu0 %v10994_v62, %s10758_s20 }
 0x15d   : > { %v11227_v35 = vpop.permute.xlu1 %650  ;;  %v11229_v32 = vpop.permute.xlu2 %700 }
 0x15e   : > { %18201 = vst [vmem:[#allocation70_spill] sm:$0xff] %v11227_v35  ;;  %v11231_v22 = vpop.permute.xlu0 %618 }
 0x15f   : > { %18202 = vst [vmem:[#allocation71_spill] sm:$0xff] %v11229_v32 }
 0x160   : > { %18203 = vst [vmem:[#allocation72_spill] sm:$0xff] %v11231_v22 }
 0x163   : > { %722 = vrot.lane.b32.xlu1 %v11177_v33, %s10758_s20  ;;  %724 = vrot.lane.b32.xlu2 %v10920_v42, %s10758_s20 }
 0x164   : > { %720 = vrot.lane.b32.xlu0 %v11126_v47, %s10758_s20 }
 0x165   : > { %v11239_v51 = vpop.permute.xlu1 %698  ;;  %v11241_v24 = vpop.permute.xlu2 %604 }
 0x166   : > { %18204 = vst [vmem:[#allocation73_spill] sm:$0xff] %v11239_v51  ;;  %v11243_v12 = vpop.permute.xlu0 %666 }
 0x167   : > { %18205 = vst [vmem:[#allocation74_spill] sm:$0xff] %v11241_v24 }
 0x168   : > { %18206 = vst [vmem:[#allocation75_spill] sm:$0xff] %v11243_v12 }
 0x16b   : > { %728 = vrot.lane.b32.xlu1 %v10985_v60, %s10758_s20  ;;  %730 = vrot.lane.b32.xlu2 %v11026_v7, %s10758_s20 }
 0x16c   : > { %726 = vrot.lane.b32.xlu0 %v10955_v52, %s10758_s20 }
 0x16d   : > { %v11251_v32 = vpop.permute.xlu1 %602  ;;  %v11253_v53 = vpop.permute.xlu2 %574 }
 0x16e   : > { %18207 = vst [vmem:[#allocation76_spill] sm:$0xff] %v11251_v32  ;;  %v11255_v54 = vpop.permute.xlu0 %588 }
 0x16f   : > { %18208 = vst [vmem:[#allocation77_spill] sm:$0xff] %v11253_v53 }
 0x170   : > { %18209 = vst [vmem:[#allocation78_spill] sm:$0xff] %v11255_v54 }
 0x173   : > { %734 = vrot.lane.b32.xlu1 %v11111_v36, %s10758_s20  ;;  %736 = vrot.lane.b32.xlu2 %v11159_v5, %s10758_s20 }
 0x174   : > { %732 = vrot.lane.b32.xlu0 %v11063_v18, %s10758_s20 }
 0x175   : > { %v11263_v51 = vpop.permute.xlu1 %620  ;;  %v11265_v12 = vpop.permute.xlu2 %622 }
 0x176   : > { %18210 = vst [vmem:[#allocation79_spill] sm:$0xff] %v11263_v51  ;;  %v11267_v34 = vpop.permute.xlu0 %636 }
 0x177   : > { %18211 = vst [vmem:[#allocation80_spill] sm:$0xff] %v11265_v12 }
 0x178   : > { %18212 = vst [vmem:[#allocation81_spill] sm:$0xff] %v11267_v34 }
 0x17b   : > { %740 = vrot.lane.b32.xlu1 %v10923_v43, %s10758_s20  ;;  %742 = vrot.lane.b32.xlu2 %v10943_v49, %s10758_s20 }
 0x17c   : > { %738 = vrot.lane.b32.xlu0 %v11207_v19, %s10758_s20 }
 0x17d   : > { %v11275_v35 = vpop.permute.xlu1 %668  ;;  %v11277_v20 = vpop.permute.xlu2 %670 }
 0x17e   : > { %18213 = vst [vmem:[#allocation82_spill] sm:$0xff] %v11275_v35  ;;  %v11279_v1 = vpop.permute.xlu0 %684 }
 0x17f   : > { %18214 = vst [vmem:[#allocation83_spill] sm:$0xff] %v11277_v20 }
 0x180   : > { %18215 = vst [vmem:[#allocation84_spill] sm:$0xff] %v11279_v1 }
 0x183   : > { %746 = vrot.lane.b32.xlu1 %v11012_v2, %s10758_s20  ;;  %748 = vrot.lane.b32.xlu2 %v11048_v13, %s10758_s20 }
 0x184   : > { %744 = vrot.lane.b32.xlu0 %v10976_v58, %s10758_s20 }
 0x185   : > { %v11287_v14 = vpop.permute.xlu1 %590  ;;  %v11289_v15 = vpop.permute.xlu2 %592 }
 0x186   : > { %18216 = vst [vmem:[#allocation85_spill] sm:$0xff] %v11287_v14  ;;  %v11291_v34 = vpop.permute.xlu0 %654 }
 0x187   : > { %18217 = vst [vmem:[#allocation86_spill] sm:$0xff] %v11289_v15 }
 0x188   : > { %18218 = vst [vmem:[#allocation87_spill] sm:$0xff] %v11291_v34 }
 0x18b   : > { %752 = vrot.lane.b32.xlu1 %v11144_v59, %s10758_s20  ;;  %754 = vrot.lane.b32.xlu2 %v11192_v8, %s10758_s20 }
 0x18c   : > { %750 = vrot.lane.b32.xlu0 %v11096_v30, %s10758_s20 }
 0x18d   : > { %v11299_v1 = vpop.permute.xlu1 %638  ;;  %v11301_v35 = vpop.permute.xlu2 %640 }
 0x18e   : > { %18219 = vst [vmem:[#allocation88_spill] sm:$0xff] %v11299_v1  ;;  %v11303_v20 = vpop.permute.xlu0 %702 }
 0x18f   : > { %18220 = vst [vmem:[#allocation89_spill] sm:$0xff] %v11301_v35 }
 0x190   : > { %18221 = vst [vmem:[#allocation90_spill] sm:$0xff] %v11303_v20 }
 0x193   : > { %758 = vrot.lane.b32.xlu1 %v10946_v50, %s10759_s21  ;;  %792 = vrot.lane.b32.xlu2 %v10964_v55, %s10759_s21 }
 0x194   : > { %756 = vrot.lane.b32.xlu0 %v10902_v38, %s10759_s21 }
 0x195   : > { %v11311_v34 = vpop.permute.xlu1 %686  ;;  %v11313_v45 = vpop.permute.xlu2 %688 }
 0x196   : > { %18222 = vst [vmem:[#allocation91_spill] sm:$0xff] %v11311_v34  ;;  %v11315_v16 = vpop.permute.xlu0 %606 }
 0x197   : > { %18223 = vst [vmem:[#allocation92_spill] sm:$0xff] %v11313_v45 }
 0x198   : > { %18224 = vst [vmem:[#allocation93_spill] sm:$0xff] %v11315_v16 }
 0x19b   : > { %827 = vrot.lane.b32.xlu1 %v11023_v6, %s10759_s21  ;;  %829 = vrot.lane.b32.xlu2 %v11081_v25, %s10759_s21 }
 0x19c   : > { %794 = vrot.lane.b32.xlu0 %v11003_v0, %s10759_s21 }
 0x19d   : > { %v11323_v20 = vpop.permute.xlu1 %656  ;;  %v11325_v1 = vpop.permute.xlu2 %658 }
 0x19e   : > { %18225 = vst [vmem:[#allocation94_spill] sm:$0xff] %v11323_v20  ;;  %v11327_v35 = vpop.permute.xlu0 %576 }
 0x19f   : > { %18226 = vst [vmem:[#allocation95_spill] sm:$0xff] %v11325_v1 }
 0x1a0   : > { %18227 = vst [vmem:[#allocation96_spill] sm:$0xff] %v11327_v35 }
 0x1a3   : > { %864 = vrot.lane.b32.xlu1 %v11174_v26, %s10759_s21  ;;  %897 = vrot.lane.b32.xlu2 %v10905_v39, %s10759_s21 }
 0x1a4   : > { %862 = vrot.lane.b32.xlu0 %v11129_v48, %s10759_s21 }
 0x1a5   : > { %v11335_v34 = vpop.permute.xlu1 %704  ;;  %v11337_v45 = vpop.permute.xlu2 %706 }
 0x1a6   : > { %18228 = vst [vmem:[#allocation97_spill] sm:$0xff] %v11335_v34  ;;  %v11339_v3 = vpop.permute.xlu0 %624 }
 0x1a7   : > { %18229 = vst [vmem:[#allocation98_spill] sm:$0xff] %v11337_v45 }
 0x1a8   : > { %18230 = vst [vmem:[#allocation99_spill] sm:$0xff] %v11339_v3 }
 0x1ab   : > { %932 = vrot.lane.b32.xlu1 %v10967_v56, %s10759_s21  ;;  %934 = vrot.lane.b32.xlu2 %v10994_v62, %s10759_s21 }
 0x1ac   : > { %899 = vrot.lane.b32.xlu0 %v10934_v46, %s10759_s21 }
 0x1ad   : > { %v11347_v20 = vpop.permute.xlu1 %608  ;;  %v11349_v1 = vpop.permute.xlu2 %610 }
 0x1ae   : > { %18231 = vst [vmem:[#allocation100_spill] sm:$0xff] %v11347_v20  ;;  %v11351_v9 = vpop.permute.xlu0 %672 }
 0x1af   : > { %18232 = vst [vmem:[#allocation101_spill] sm:$0xff] %v11349_v1 }
 0x1b0   : > { %18233 = vst [vmem:[#allocation102_spill] sm:$0xff] %v11351_v9 }
 0x1b3   : > { %969 = vrot.lane.b32.xlu1 %v11078_v23, %s10759_s21  ;;  %1002 = vrot.lane.b32.xlu2 %v11126_v47, %s10759_s21 }
 0x1b4   : > { %967 = vrot.lane.b32.xlu0 %v11037_v10, %s10759_s21 }
 0x1b5   : > { %v11359_v34 = vpop.permute.xlu1 %578  ;;  %v11361_v45 = vpop.permute.xlu2 %718 }
 0x1b6   : > { %18234 = vst [vmem:[#allocation103_spill] sm:$0xff] %v11359_v34  ;;  %v11363_v3 = vpop.permute.xlu0 %594 }
 0x1b7   : > { %18235 = vst [vmem:[#allocation104_spill] sm:$0xff] %v11361_v45 }
 0x1b8   : > { %18236 = vst [vmem:[#allocation105_spill] sm:$0xff] %v11363_v3 }
 0x1bb   : > { %1037 = vrot.lane.b32.xlu1 %v10920_v42, %s10759_s21  ;;  %1039 = vrot.lane.b32.xlu2 %v10955_v52, %s10759_s21 }
 0x1bc   : > { %1004 = vrot.lane.b32.xlu0 %v11177_v33, %s10759_s21 }
 0x1bd   : > { %v11371_v9 = vpop.permute.xlu1 %626  ;;  %v11373_v47 = vpop.permute.xlu2 %724 }
 0x1be   : > { %18237 = vst [vmem:[#allocation106_spill] sm:$0xff] %v11371_v9  ;;  %v11375_v23 = vpop.permute.xlu0 %642 }
 0x1bf   : > { %18238 = vst [vmem:[#allocation107_spill] sm:$0xff] %v11373_v47 }
 0x1c0   : > { %18239 = vst [vmem:[#allocation108_spill] sm:$0xff] %v11375_v23 }
 0x1c3   : > { %1074 = vrot.lane.b32.xlu1 %v11026_v7, %s10759_s21  ;;  %1107 = vrot.lane.b32.xlu2 %v11063_v18, %s10759_s21 }
 0x1c4   : > { %1072 = vrot.lane.b32.xlu0 %v10985_v60, %s10759_s21 }
 0x1c5   : > { %v11383_v45 = vpop.permute.xlu1 %674  ;;  %v11385_v52 = vpop.permute.xlu2 %730 }
 0x1c6   : > { %18240 = vst [vmem:[#allocation109_spill] sm:$0xff] %v11383_v45  ;;  %v11387_v33 = vpop.permute.xlu0 %690 }
 0x1c7   : > { %18241 = vst [vmem:[#allocation110_spill] sm:$0xff] %v11385_v52 }
 0x1c8   : > { %18242 = vst [vmem:[#allocation111_spill] sm:$0xff] %v11387_v33 }
 0x1cb   : > { %1142 = vrot.lane.b32.xlu1 %v11159_v5, %s10759_s21  ;;  %1144 = vrot.lane.b32.xlu2 %v11207_v19, %s10759_s21 }
 0x1cc   : > { %1109 = vrot.lane.b32.xlu0 %v11111_v36, %s10759_s21 }
 0x1cd   : > { %v11395_v47 = vpop.permute.xlu1 %716  ;;  %v11397_v23 = vpop.permute.xlu2 %736 }
 0x1ce   : > { %18243 = vst [vmem:[#allocation112_spill] sm:$0xff] %v11395_v47  ;;  %v11399_v18 = vpop.permute.xlu0 %714 }
 0x1cf   : > { %18244 = vst [vmem:[#allocation113_spill] sm:$0xff] %v11397_v23 }
 0x1d0   : > { %18245 = vst [vmem:[#allocation114_spill] sm:$0xff] %v11399_v18 }
 0x1d3   : > { %1179 = vrot.lane.b32.xlu1 %v10943_v49, %s10759_s21  ;;  %1212 = vrot.lane.b32.xlu2 %v10976_v58, %s10759_s21 }
 0x1d4   : > { %1177 = vrot.lane.b32.xlu0 %v10923_v43, %s10759_s21 }
 0x1d5   : > { %v11407_v52 = vpop.permute.xlu1 %722  ;;  %v11409_v33 = vpop.permute.xlu2 %742 }
 0x1d6   : > { %18246 = vst [vmem:[#allocation115_spill] sm:$0xff] %v11407_v52  ;;  %v11411_v45 = vpop.permute.xlu0 %720 }
 0x1d7   : > { %18247 = vst [vmem:[#allocation116_spill] sm:$0xff] %v11409_v33 }
 0x1d8   : > { %18248 = vst [vmem:[#allocation117_spill] sm:$0xff] %v11411_v45 }
 0x1db   : > { %1247 = vrot.lane.b32.xlu1 %v11048_v13, %s10759_s21  ;;  %1249 = vrot.lane.b32.xlu2 %v11096_v30, %s10759_s21 }
 0x1dc   : > { %1214 = vrot.lane.b32.xlu0 %v11012_v2, %s10759_s21 }
 0x1dd   : > { %v11419_v23 = vpop.permute.xlu1 %728  ;;  %v11421_v47 = vpop.permute.xlu2 %748 }
 0x1de   : > { %18249 = vst [vmem:[#allocation118_spill] sm:$0xff] %v11419_v23  ;;  %v11423_v18 = vpop.permute.xlu0 %726 }
 0x1df   : > { %18250 = vst [vmem:[#allocation119_spill] sm:$0xff] %v11421_v47 }
 0x1e0   : > { %18251 = vst [vmem:[#allocation120_spill] sm:$0xff] %v11423_v18 }
 0x1e3   : > { %1284 = vrot.lane.b32.xlu1 %v11192_v8, %s10759_s21  ;;  %1317 = vrot.lane.b32.xlu2 %v11060_v17, %s10759_s21 }
 0x1e4   : > { %1282 = vrot.lane.b32.xlu0 %v11144_v59, %s10759_s21 }
 0x1e5   : > { %v11431_v33 = vpop.permute.xlu1 %734  ;;  %v11433_v52 = vpop.permute.xlu2 %754 }
 0x1e6   : > { %18252 = vst [vmem:[#allocation121_spill] sm:$0xff] %v11431_v33  ;;  %v11435_v45 = vpop.permute.xlu0 %732 }
 0x1e7   : > { %18253 = vst [vmem:[#allocation122_spill] sm:$0xff] %v11433_v52 }
 0x1e8   : > { %18254 = vst [vmem:[#allocation123_spill] sm:$0xff] %v11435_v45 }
 0x1eb   : > { %1352 = vrot.lane.b32.xlu1 %v11152_v61, %s10759_s21  ;;  %1354 = vrot.lane.b32.xlu2 %v11215_v41, %s10759_s21 }
 0x1ec   : > { %1319 = vrot.lane.b32.xlu0 %v11123_v44, %s10759_s21 }
 0x1ed   : > { %v11443_v47 = vpop.permute.xlu1 %740  ;;  %v793_v23 = vpop.permute.xlu2 %792 }
 0x1ee   : > { %18255 = vst [vmem:[#allocation124_spill] sm:$0xff] %v11443_v47  ;;  %v11445_v18 = vpop.permute.xlu0 %738 }
 0x1ef   : > { %18256 = vst [vmem:[#allocation125_spill] sm:$0xff] %v11445_v18 }
 0x1f3   : > { %1389 = vrot.lane.b32.xlu1 %v11253_v53, %s10759_s21  ;;  %1422 = vrot.lane.b32.xlu2 %v11327_v35, %s10759_s21 }
 0x1f4   : > { %1387 = vrot.lane.b32.xlu0 %v11202_v31, %s10759_s21 }
 0x1f5   : > { %v11453_v52 = vpop.permute.xlu1 %746  ;;  %v830_v33 = vpop.permute.xlu2 %829 }
 0x1f6   : > { %18257 = vst [vmem:[#allocation126_spill] sm:$0xff] %v11453_v52  ;;  %v11455_v45 = vpop.permute.xlu0 %744  ;;  %9441 = vmatpush.xpose.msk.msrb.mxu3 %vm760_vm1, %v830_v33 }
 0x1f7   : > { %18258 = vst [vmem:[#allocation127_spill] sm:$0xff] %v11455_v45 }
 0x1fb   : > { %1457 = vrot.lane.b32.xlu1 %v11020_v4, %s10759_s21  ;;  %1459 = vrot.lane.b32.xlu2 %v11141_v57, %s10759_s21 }
 0x1fc   : > { %1424 = vrot.lane.b32.xlu0 %v11359_v34, %s10759_s21 }
 0x1fd   : > { %v11464_v47 = vpop.permute.xlu1 %752  ;;  %v898_v18 = vpop.permute.xlu2 %897 }
 0x1fe   : > { %18259 = vst [vmem:[#allocation128_spill] sm:$0xff] %v11464_v47  ;;  %v11466_v35 = vpop.permute.xlu0 %750 }
 0x1ff   : > { %18260 = vst [vmem:[#allocation129_spill] sm:$0xff] %v11466_v35 }
 0x203   : > { %1494 = vrot.lane.b32.xlu1 %v11154_v63, %s10759_s21  ;;  %1527 = vrot.lane.b32.xlu2 %v11255_v54, %s10759_s21 }
 0x204   : > { %1492 = vrot.lane.b32.xlu0 %v11167_v11, %s10759_s21 }
 0x205   : > { %v759_v33 = vpop.permute.xlu1 %758  ;;  %v935_v52 = vpop.permute.xlu2 %934 }
 0x206   : > { %v757_v45 = vpop.permute.xlu0 %756  ;;  %9433 = vmatpush.xpose.msk.msrb.mxu1 %vm760_vm1, %v759_v33 }
 0x20a   : > { %9434 = vmatpush.xpose.msk.msrb.mxu1 %vm760_vm1, %v757_v45 }
 0x20b   : > { %1562 = vrot.lane.b32.xlu1 %v11289_v15, %s10759_s21  ;;  %1564 = vrot.lane.b32.xlu2 %v11363_v3, %s10759_s21 }
 0x20c   : > { %1529 = vrot.lane.b32.xlu0 %v11287_v14, %s10759_s21 }
 0x20d   : > { %v828_v47 = vpop.permute.xlu1 %827  ;;  %v1003_v35 = vpop.permute.xlu2 %1002  ;;  %9435 = vmatmul.msk.f32.vlgmr.msrb.gmra.mxu1 %vm760_vm1, %v10902_v38 }
 0x20e   : > { %v795_v54 = vpop.permute.xlu0 %794  ;;  %9442 = vmatpush.xpose.msk.msrb.mxu3 %vm760_vm1, %v828_v47 }
 0x20f   : > { %9437 = vmatpush.xpose.msk.msrb.mxu2 %vm760_vm1, %v795_v54 }
 0x211   : > { %9443 = vmatmul.msk.f32.vlgmr.msrb.gmra.mxu3 %vm760_vm1, %v11023_v6 }
 0x212   : > { %9453 = vmatpush.xpose.msk.msra.mxu3 %vm760_vm1, %v935_v52 }
 0x213   : > { %9438 = vmatpush.xpose.msk.msrb.mxu2 %vm760_vm1, %v793_v23  ;;  %1599 = vrot.lane.b32.xlu1 %v11091_v28, %s10759_s21 }
 0x214   : > { %1597 = vrot.lane.b32.xlu0 %v11089_v27, %s10759_s21  ;;  %1632 = vrot.lane.b32.xlu2 %v11219_v21, %s10759_s21 }
 0x215   : > { %v865_v45 = vpop.permute.xlu1 %864  ;;  %v1040_v47 = vpop.permute.xlu2 %1039  ;;  %9436 = vmatmul.msk.f32.gmra.mxu1 %vm760_vm1, %v10946_v50 }
 0x216   : > { %9439 = vmatmul.msk.f32.vlgmr.msrb.gmra.mxu2 %vm760_vm1, %v10964_v55  ;;  %v863_v52 = vpop.permute.xlu0 %862  ;;  %9445 = vmatpush.xpose.msk.msra.mxu1 %vm760_vm1, %v865_v45 }
 0x219   : > { %9444 = vmatmul.msk.f32.gmra.mxu3 %vm760_vm1, %v11081_v25 }
 0x21a   : > { %9446 = vmatpush.xpose.msk.msra.mxu1 %vm760_vm1, %v863_v52 }
 0x21b   : > { %1667 = vrot.lane.b32.xlu1 %v11241_v24, %s10759_s21 }
 0x21c   : > { %1634 = vrot.lane.b32.xlu0 %v11251_v32, %s10759_s21  ;;  %1669 = vrot.lane.b32.xlu2 %v11315_v16, %s10759_s21 }
 0x21d   : > { %v933_v23 = vpop.permute.xlu1 %932  ;;  %v1108_v54 = vpop.permute.xlu2 %1107  ;;  %9447 = vmatmul.msk.f32.vlgmr.msra.gmra.mxu1 %vm760_vm1, %v11129_v48  ;;  %v18265_v48 = vld [vmem:[#allocation20_spill] sm:$0xff] }
 0x21e   : > { %9440 = vmatmul.msk.f32.gmra.mxu2 %vm760_vm1, %v11003_v0  ;;  %v900_v33 = vpop.permute.xlu0 %899  ;;  %9454 = vmatpush.xpose.msk.msra.mxu3 %vm760_vm1, %v933_v23  ;;  %v18323_v0 = vld [vmem:[#allocation121_spill] sm:$0xff] }
 0x21f   : > { %9449 = vmatpush.xpose.msk.msra.mxu2 %vm760_vm1, %v900_v33 }
 0x221   : > { %9455 = vmatmul.msk.f32.vlgmr.msra.gmra.mxu3 %vm760_vm1, %v10967_v56 }
 0x222   : > { %9465 = vmatpush.xpose.msk.msrb.mxu3 %vm760_vm1, %v1040_v47 }
 0x223   : > { %9450 = vmatpush.xpose.msk.msra.mxu2 %vm760_vm1, %v898_v18  ;;  %1704 = vrot.lane.b32.xlu1 %v11349_v1, %s10759_s21 }
 0x224   : > { %1702 = vrot.lane.b32.xlu0 %v11347_v20, %s10759_s21  ;;  %1737 = vrot.lane.b32.xlu2 %v11093_v29, %s10759_s21 }
 0x225   : > { %v970_v45 = vpop.permute.xlu1 %969  ;;  %v1145_v52 = vpop.permute.xlu2 %1144  ;;  %9448 = vmatmul.msk.f32.gmra.mxu1 %vm760_vm1, %v11174_v26  ;;  %v18266_v26 = vld [vmem:[#allocation52_spill] sm:$0xff] }
 0x226   : > { %9451 = vmatmul.msk.f32.vlgmr.msra.gmra.mxu2 %vm760_vm1, %v10905_v39  ;;  %v968_v47 = vpop.permute.xlu0 %967  ;;  %9457 = vmatpush.xpose.msk.msrb.mxu1 %vm760_vm1, %v970_v45  ;;  %v18261_v45 = vld [vmem:[#allocation99_spill] sm:$0xff]  ;;  %v18274_v39 = vld [vmem:[#allocation108_spill] sm:$0xff] }
 0x229   : > { %9456 = vmatmul.msk.f32.gmra.mxu3 %vm760_vm1, %v10994_v62 }
 0x22a   : > { %9458 = vmatpush.xpose.msk.msrb.mxu1 %vm760_vm1, %v968_v47 }
 0x22b   : > { %1772 = vrot.lane.b32.xlu1 %v11121_v40, %s10759_s21 }
 0x22c   : > { %1739 = vrot.lane.b32.xlu0 %v11119_v37, %s10759_s21  ;;  %1774 = vrot.lane.b32.xlu2 %v11231_v22, %s10759_s21 }
 0x22d   : > { %v1038_v18 = vpop.permute.xlu1 %1037  ;;  %v1213_v23 = vpop.permute.xlu2 %1212  ;;  %9459 = vmatmul.msk.f32.vlgmr.msrb.gmra.mxu1 %vm760_vm1, %v11037_v10  ;;  %v18262_v10 = vld [vmem:[#allocation31_spill] sm:$0xff] }
 0x22e   : > { %9452 = vmatmul.msk.f32.gmra.mxu2 %vm760_vm1, %v10934_v46  ;;  %v1005_v33 = vpop.permute.xlu0 %1004  ;;  %9466 = vmatpush.xpose.msk.msrb.mxu3 %vm760_vm1, %v1038_v18  ;;  %v18322_v46 = vld [vmem:[#allocation113_spill] sm:$0xff] }
 0x22f   : > { %9461 = vmatpush.xpose.msk.msrb.mxu2 %vm760_vm1, %v1005_v33 }
 0x231   : > { %9467 = vmatmul.msk.f32.vlgmr.msrb.gmra.mxu3 %vm760_vm1, %v10920_v42 }
 0x232   : > { %9477 = vmatpush.xpose.msk.msra.mxu3 %vm760_vm1, %v1145_v52  ;;  %v18263_v52 = vld [vmem:[#allocation44_spill] sm:$0xff] }
 0x233   : > { %9462 = vmatpush.xpose.msk.msrb.mxu2 %vm760_vm1, %v1003_v35  ;;  %1809 = vrot.lane.b32.xlu1 %v11265_v12, %s10759_s21  ;;  %v18264_v35 = vld [vmem:[#allocation9_spill] sm:$0xff] }
 0x234   : > { %1807 = vrot.lane.b32.xlu0 %v11263_v51, %s10759_s21  ;;  %1842 = vrot.lane.b32.xlu2 %v18261_v45, %s10759_s21 }
 0x235   : > { %v1075_v47 = vpop.permute.xlu1 %1074  ;;  %v1250_v18 = vpop.permute.xlu2 %1249  ;;  %9460 = vmatmul.msk.f32.gmra.mxu1 %vm760_vm1, %v18262_v10 }
 0x236   : > { %9463 = vmatmul.msk.f32.vlgmr.msrb.gmra.mxu2 %vm760_vm1, %v18263_v52  ;;  %v1073_v33 = vpop.permute.xlu0 %1072  ;;  %9469 = vmatpush.xpose.msk.msra.mxu1 %vm760_vm1, %v1075_v47  ;;  %v18267_v47 = vld [vmem:[#allocation58_spill] sm:$0xff] }
 0x239   : > { %9468 = vmatmul.msk.f32.gmra.mxu3 %vm760_vm1, %v18264_v35 }
 0x23a   : > { %9470 = vmatpush.xpose.msk.msra.mxu1 %vm760_vm1, %v1073_v33  ;;  %v18268_v33 = vld [vmem:[#allocation55_spill] sm:$0xff] }
 0x23b   : > { %1877 = vrot.lane.b32.xlu1 %v18265_v48, %s10759_s21 }
 0x23c   : > { %1844 = vrot.lane.b32.xlu0 %v11371_v9, %s10759_s21  ;;  %1879 = vrot.lane.b32.xlu2 %v18266_v26, %s10759_s21 }
 0x23d   : > { %v1143_v10 = vpop.permute.xlu1 %1142  ;;  %v1318_v42 = vpop.permute.xlu2 %1317  ;;  %9471 = vmatmul.msk.f32.vlgmr.msra.gmra.mxu1 %vm760_vm1, %v10985_v60  ;;  %v18269_v60 = vld [vmem:[#allocation59_spill] sm:$0xff] }
 0x23e   : > { %9464 = vmatmul.msk.f32.gmra.mxu2 %vm760_vm1, %v18267_v47  ;;  %v1110_v52 = vpop.permute.xlu0 %1109  ;;  %9478 = vmatpush.xpose.msk.msra.mxu3 %vm760_vm1, %v1143_v10  ;;  %v18270_v47 = vld [vmem:[#allocation81_spill] sm:$0xff] }
 0x23f   : > { %9473 = vmatpush.xpose.msk.msra.mxu2 %vm760_vm1, %v1110_v52 }
 0x241   : > { %9479 = vmatmul.msk.f32.vlgmr.msra.gmra.mxu3 %vm760_vm1, %v11159_v5  ;;  %v18273_v5 = vld [vmem:[#allocation88_spill] sm:$0xff] }
 0x242   : > { %9489 = vmatpush.xpose.msk.msrb.mxu3 %vm760_vm1, %v1250_v18  ;;  %v18271_v18 = vld [vmem:[#allocation27_spill] sm:$0xff] }
 0x243   : > { %9474 = vmatpush.xpose.msk.msra.mxu2 %vm760_vm1, %v1108_v54  ;;  %1914 = vrot.lane.b32.xlu1 %v18268_v33, %s10759_s21  ;;  %v18272_v54 = vld [vmem:[#allocation89_spill] sm:$0xff] }
 0x244   : > { %1912 = vrot.lane.b32.xlu0 %v18269_v60, %s10759_s21  ;;  %1947 = vrot.lane.b32.xlu2 %v18270_v47, %s10759_s21 }
 0x245   : > { %v1180_v56 = vpop.permute.xlu1 %1179  ;;  %v1355_v10 = vpop.permute.xlu2 %1354  ;;  %9472 = vmatmul.msk.f32.gmra.mxu1 %vm760_vm1, %v11026_v7 }
 0x246   : > { %9475 = vmatmul.msk.f32.vlgmr.msra.gmra.mxu2 %vm760_vm1, %v18271_v18  ;;  %v1178_v52 = vpop.permute.xlu0 %1177  ;;  %9481 = vmatpush.xpose.msk.msrb.mxu1 %vm760_vm1, %v1180_v56  ;;  %v18277_v18 = vld [vmem:[#allocation61_spill] sm:$0xff] }
 0x249   : > { %9480 = vmatmul.msk.f32.gmra.mxu3 %vm760_vm1, %v11207_v19  ;;  %v18276_v19 = vld [vmem:[#allocation24_spill] sm:$0xff] }
 0x24a   : > { %9482 = vmatpush.xpose.msk.msrb.mxu1 %vm760_vm1, %v1178_v52  ;;  %v18275_v52 = vld [vmem:[#allocation25_spill] sm:$0xff] }
 0x24b   : > { %1982 = vrot.lane.b32.xlu1 %v18272_v54, %s10759_s21 }
 0x24c   : > { %1949 = vrot.lane.b32.xlu0 %v18273_v5, %s10759_s21  ;;  %1984 = vrot.lane.b32.xlu2 %v18274_v39, %s10759_s21 }
 0x24d   : > { %v1248_v7 = vpop.permute.xlu1 %1247  ;;  %v1423_v55 = vpop.permute.xlu2 %1422  ;;  %9483 = vmatmul.msk.f32.vlgmr.msrb.gmra.mxu1 %vm760_vm1, %v10923_v43 }
 0x24e   : > { %9476 = vmatmul.msk.f32.gmra.mxu2 %vm760_vm1, %v11111_v36  ;;  %v1215_v56 = vpop.permute.xlu0 %1214  ;;  %9490 = vmatpush.xpose.msk.msrb.mxu3 %vm760_vm1, %v1248_v7 }
 0x24f   : > { %9485 = vmatpush.xpose.msk.msrb.mxu2 %vm760_vm1, %v1215_v56  ;;  %v18279_v56 = vld [vmem:[#allocation70_spill] sm:$0xff] }
 0x251   : > { %9491 = vmatmul.msk.f32.vlgmr.msrb.gmra.mxu3 %vm760_vm1, %v11048_v13  ;;  %v18280_v13 = vld [vmem:[#allocation87_spill] sm:$0xff] }
 0x252   : > { %9501 = vmatpush.xpose.msk.msra.mxu3 %vm760_vm1, %v1355_v10 }
 0x253   : > { %9486 = vmatpush.xpose.msk.msrb.mxu2 %vm760_vm1, %v1213_v23  ;;  %2019 = vrot.lane.b32.xlu1 %v18275_v52, %s10759_s21  ;;  %v18278_v23 = vld [vmem:[#allocation68_spill] sm:$0xff] }
 0x254   : > { %2017 = vrot.lane.b32.xlu0 %v18276_v19, %s10759_s21  ;;  %2052 = vrot.lane.b32.xlu2 %v18277_v18, %s10759_s21 }
 0x255   : > { %v1285_v36 = vpop.permute.xlu1 %1284  ;;  %v1460_v7 = vpop.permute.xlu2 %1459  ;;  %9484 = vmatmul.msk.f32.gmra.mxu1 %vm760_vm1, %v10943_v49 }
 0x256   : > { %9487 = vmatmul.msk.f32.vlgmr.msrb.gmra.mxu2 %vm760_vm1, %v10976_v58  ;;  %v1283_v10 = vpop.permute.xlu0 %1282  ;;  %9493 = vmatpush.xpose.msk.msra.mxu1 %vm760_vm1, %v1285_v36 }
 0x259   : > { %9492 = vmatmul.msk.f32.gmra.mxu3 %vm760_vm1, %v11096_v30  ;;  %v18283_v30 = vld [vmem:[#allocation39_spill] sm:$0xff] }
 0x25a   : > { %9494 = vmatpush.xpose.msk.msra.mxu1 %vm760_vm1, %v1283_v10  ;;  %v18281_v10 = vld [vmem:[#allocation95_spill] sm:$0xff] }
 0x25b   : > { %2087 = vrot.lane.b32.xlu1 %v18278_v23, %s10759_s21 }
 0x25c   : > { %2054 = vrot.lane.b32.xlu0 %v18279_v56, %s10759_s21  ;;  %2089 = vrot.lane.b32.xlu2 %v18280_v13, %s10759_s21 }
 0x25d   : > { %v1353_v43 = vpop.permute.xlu1 %1352  ;;  %v1528_v49 = vpop.permute.xlu2 %1527  ;;  %9495 = vmatmul.msk.f32.vlgmr.msra.gmra.mxu1 %vm760_vm1, %v11144_v59  ;;  %v18282_v59 = vld [vmem:[#allocation94_spill] sm:$0xff] }
 0x25e   : > { %9488 = vmatmul.msk.f32.gmra.mxu2 %vm760_vm1, %v11012_v2  ;;  %v1320_v36 = vpop.permute.xlu0 %1319  ;;  %9502 = vmatpush.xpose.msk.msra.mxu3 %vm760_vm1, %v1353_v43 }
 0x25f   : > { %9497 = vmatpush.xpose.msk.msra.mxu2 %vm760_vm1, %v1320_v36  ;;  %v18285_v36 = vld [vmem:[#allocation46_spill] sm:$0xff] }
 0x261   : > { %9503 = vmatmul.msk.f32.vlgmr.msra.gmra.mxu3 %vm760_vm1, %v11152_v61  ;;  %v18286_v61 = vld [vmem:[#allocation75_spill] sm:$0xff] }
 0x262   : > { %9513 = vmatpush.xpose.msk.msrb.mxu3 %vm760_vm1, %v1460_v7 }
 0x263   : > { %9498 = vmatpush.xpose.msk.msra.mxu2 %vm760_vm1, %v1318_v42  ;;  %2124 = vrot.lane.b32.xlu1 %v18281_v10, %s10759_s21  ;;  %v18284_v42 = vld [vmem:[#allocation47_spill] sm:$0xff] }
 0x264   : > { %2122 = vrot.lane.b32.xlu0 %v18282_v59, %s10759_s21  ;;  %2157 = vrot.lane.b32.xlu2 %v18283_v30, %s10759_s21 }
 0x265   : > { %v1390_v58 = vpop.permute.xlu1 %1389  ;;  %v1565_v43 = vpop.permute.xlu2 %1564  ;;  %9496 = vmatmul.msk.f32.gmra.mxu1 %vm760_vm1, %v11192_v8 }
 0x266   : > { %9499 = vmatmul.msk.f32.vlgmr.msra.gmra.mxu2 %vm760_vm1, %v11060_v17  ;;  %v1388_v7 = vpop.permute.xlu0 %1387  ;;  %9505 = vmatpush.xpose.msk.msrb.mxu1 %vm760_vm1, %v1390_v58 }
 0x269   : > { %9504 = vmatmul.msk.f32.gmra.mxu3 %vm760_vm1, %v11215_v41  ;;  %v18289_v41 = vld [vmem:[#allocation102_spill] sm:$0xff] }
 0x26a   : > { %9506 = vmatpush.xpose.msk.msrb.mxu1 %vm760_vm1, %v1388_v7  ;;  %v18287_v7 = vld [vmem:[#allocation83_spill] sm:$0xff] }
 0x26b   : > { %2192 = vrot.lane.b32.xlu1 %v18284_v42, %s10759_s21 }
 0x26c   : > { %2159 = vrot.lane.b32.xlu0 %v18285_v36, %s10759_s21  ;;  %2194 = vrot.lane.b32.xlu2 %v18286_v61, %s10759_s21 }
 0x26d   : > { %v1458_v8 = vpop.permute.xlu1 %1457  ;;  %9507 = vmatmul.msk.f32.vlgmr.msrb.gmra.mxu1 %vm760_vm1, %v11202_v31  ;;  %v18288_v31 = vld [vmem:[#allocation82_spill] sm:$0xff] }
 0x26e   : > { %v1633_v17 = vpop.permute.xlu2 %1632  ;;  %9500 = vmatmul.msk.f32.gmra.mxu2 %vm760_vm1, %v11123_v44  ;;  %v1425_v58 = vpop.permute.xlu0 %1424  ;;  %9514 = vmatpush.xpose.msk.msrb.mxu3 %vm760_vm1, %v1458_v8 }
 0x26f   : > { %9509 = vmatpush.xpose.msk.msrb.mxu2 %vm760_vm1, %v1425_v58 }
 0x271   : > { %9515 = vmatmul.msk.f32.vlgmr.msrb.gmra.mxu3 %vm760_vm1, %v11020_v4  ;;  %v18292_v4 = vld [vmem:[#allocation109_spill] sm:$0xff] }
 0x272   : > { %9525 = vmatpush.xpose.msk.msra.mxu3 %vm760_vm1, %v1565_v43  ;;  %v18290_v43 = vld [vmem:[#allocation96_spill] sm:$0xff] }
 0x273   : > { %9510 = vmatpush.xpose.msk.msrb.mxu2 %vm760_vm1, %v1423_v55  ;;  %2229 = vrot.lane.b32.xlu1 %v18287_v7, %s10759_s21  ;;  %v18291_v55 = vld [vmem:[#allocation22_spill] sm:$0xff] }
 0x274   : > { %2227 = vrot.lane.b32.xlu0 %v18288_v31, %s10759_s21  ;;  %2262 = vrot.lane.b32.xlu2 %v18289_v41, %s10759_s21 }
 0x275   : > { %v1495_v44 = vpop.permute.xlu1 %1494  ;;  %9508 = vmatmul.msk.f32.gmra.mxu1 %vm760_vm1, %v11253_v53  ;;  %v18293_v53 = vld [vmem:[#allocation56_spill] sm:$0xff] }
 0x276   : > { %v1670_v8 = vpop.permute.xlu2 %1669  ;;  %9511 = vmatmul.msk.f32.vlgmr.msrb.gmra.mxu2 %vm760_vm1, %v18290_v43  ;;  %v1493_v58 = vpop.permute.xlu0 %1492  ;;  %9517 = vmatpush.xpose.msk.msra.mxu1 %vm760_vm1, %v1495_v44 }
 0x279   : > { %9516 = vmatmul.msk.f32.gmra.mxu3 %vm760_vm1, %v11141_v57 }
 0x27a   : > { %9518 = vmatpush.xpose.msk.msra.mxu1 %vm760_vm1, %v1493_v58  ;;  %v18294_v58 = vld [vmem:[#allocation60_spill] sm:$0xff] }
 0x27b   : > { %2297 = vrot.lane.b32.xlu1 %v18291_v55, %s10759_s21 }
 0x27c   : > { %2264 = vrot.lane.b32.xlu0 %v18292_v4, %s10759_s21  ;;  %2299 = vrot.lane.b32.xlu2 %v18293_v53, %s10759_s21 }
 0x27d   : > { %v1563_v2 = vpop.permute.xlu1 %1562  ;;  %9519 = vmatmul.msk.f32.vlgmr.msra.gmra.mxu1 %vm760_vm1, %v11167_v11  ;;  %v18295_v11 = vld [vmem:[#allocation63_spill] sm:$0xff] }
 0x27e   : > { %v1738_v43 = vpop.permute.xlu2 %1737  ;;  %9512 = vmatmul.msk.f32.gmra.mxu2 %vm760_vm1, %v11359_v34  ;;  %v1530_v44 = vpop.permute.xlu0 %1529  ;;  %9526 = vmatpush.xpose.msk.msra.mxu3 %vm760_vm1, %v1563_v2  ;;  %v18296_v34 = vld [vmem:[#allocation84_spill] sm:$0xff] }
 0x27f   : > { %9521 = vmatpush.xpose.msk.msra.mxu2 %vm760_vm1, %v1530_v44 }
 0x281   : > { %9527 = vmatmul.msk.f32.vlgmr.msra.gmra.mxu3 %vm760_vm1, %v11289_v15  ;;  %v18299_v15 = vld [vmem:[#allocation91_spill] sm:$0xff] }
 0x282   : > { %9537 = vmatpush.xpose.msk.msrb.mxu3 %vm760_vm1, %v1670_v8  ;;  %v18297_v8 = vld [vmem:[#allocation78_spill] sm:$0xff] }
 0x283   : > { %9522 = vmatpush.xpose.msk.msra.mxu2 %vm760_vm1, %v1528_v49  ;;  %2334 = vrot.lane.b32.xlu1 %v18294_v58, %s10759_s21  ;;  %v18298_v49 = vld [vmem:[#allocation92_spill] sm:$0xff] }
 0x284   : > { %2332 = vrot.lane.b32.xlu0 %v18295_v11, %s10759_s21  ;;  %2367 = vrot.lane.b32.xlu2 %v18296_v34, %s10759_s21 }
 0x285   : > { %v1600_v57 = vpop.permute.xlu1 %1599  ;;  %9520 = vmatmul.msk.f32.gmra.mxu1 %vm760_vm1, %v11154_v63  ;;  %v18300_v63 = vld [vmem:[#allocation111_spill] sm:$0xff] }
 0x286   : > { %v1775_v2 = vpop.permute.xlu2 %1774  ;;  %9523 = vmatmul.msk.f32.vlgmr.msra.gmra.mxu2 %vm760_vm1, %v18297_v8  ;;  %v1598_v44 = vpop.permute.xlu0 %1597  ;;  %9529 = vmatpush.xpose.msk.msrb.mxu1 %vm760_vm1, %v1600_v57 }
 0x289   : > { %9528 = vmatmul.msk.f32.gmra.mxu3 %vm760_vm1, %v11363_v3  ;;  %v18302_v3 = vld [vmem:[#allocation28_spill] sm:$0xff] }
 0x28a   : > { %9530 = vmatpush.xpose.msk.msrb.mxu1 %vm760_vm1, %v1598_v44  ;;  %v18301_v44 = vld [vmem:[#allocation29_spill] sm:$0xff] }
 0x28b   : > { %2402 = vrot.lane.b32.xlu1 %v18298_v49, %s10759_s21 }
 0x28c   : > { %2369 = vrot.lane.b32.xlu0 %v18299_v15, %s10759_s21  ;;  %2404 = vrot.lane.b32.xlu2 %v18300_v63, %s10759_s21 }
 0x28d   : > { %v1668_v35 = vpop.permute.xlu1 %1667  ;;  %9531 = vmatmul.msk.f32.vlgmr.msrb.gmra.mxu1 %vm760_vm1, %v11089_v27 }
 0x28e   : > { %v1843_v8 = vpop.permute.xlu2 %1842  ;;  %9524 = vmatmul.msk.f32.gmra.mxu2 %vm760_vm1, %v11287_v14  ;;  %v1635_v57 = vpop.permute.xlu0 %1634  ;;  %9538 = vmatpush.xpose.msk.msrb.mxu3 %vm760_vm1, %v1668_v35  ;;  %v18303_v14 = vld [vmem:[#allocation65_spill] sm:$0xff] }
 0x28f   : > { %9533 = vmatpush.xpose.msk.msrb.mxu2 %vm760_vm1, %v1635_v57  ;;  %v18305_v57 = vld [vmem:[#allocation73_spill] sm:$0xff] }
 0x291   : > { %9539 = vmatmul.msk.f32.vlgmr.msrb.gmra.mxu3 %vm760_vm1, %v11241_v24  ;;  %v18306_v24 = vld [vmem:[#allocation90_spill] sm:$0xff] }
 0x292   : > { %9549 = vmatpush.xpose.msk.msra.mxu3 %vm760_vm1, %v1775_v2 }
 0x293   : > { %9534 = vmatpush.xpose.msk.msrb.mxu2 %vm760_vm1, %v1633_v17  ;;  %2439 = vrot.lane.b32.xlu1 %v18301_v44, %s10759_s21  ;;  %v18304_v17 = vld [vmem:[#allocation71_spill] sm:$0xff] }
 0x294   : > { %2437 = vrot.lane.b32.xlu0 %v18302_v3, %s10759_s21  ;;  %2472 = vrot.lane.b32.xlu2 %v18303_v14, %s10759_s21  ;;  %v11829_v6 = vpop.f32.mrf.mxu3 }
 0x295   : > { %v1705_v27 = vpop.permute.xlu1 %1704  ;;  %9532 = vmatmul.msk.f32.gmra.mxu1 %vm760_vm1, %v11091_v28 }
 0x296   : > { %v1880_v35 = vpop.permute.xlu2 %1879  ;;  %9535 = vmatmul.msk.f32.vlgmr.msrb.gmra.mxu2 %vm760_vm1, %v11219_v21  ;;  %v1703_v2 = vpop.permute.xlu0 %1702  ;;  %9541 = vmatpush.xpose.msk.msra.mxu1 %vm760_vm1, %v1705_v27 }
 0x299   : > { %9540 = vmatmul.msk.f32.gmra.mxu3 %vm760_vm1, %v11315_v16  ;;  %v18309_v16 = vld [vmem:[#allocation30_spill] sm:$0xff] }
 0x29a   : > { %9542 = vmatpush.xpose.msk.msra.mxu1 %vm760_vm1, %v1703_v2  ;;  %v18307_v2 = vld [vmem:[#allocation98_spill] sm:$0xff] }
 0x29b   : > { %2507 = vrot.lane.b32.xlu1 %v18304_v17, %s10759_s21 }
 0x29c   : > { %2474 = vrot.lane.b32.xlu0 %v18305_v57, %s10759_s21  ;;  %2509 = vrot.lane.b32.xlu2 %v18306_v24, %s10759_s21 }
 0x29d   : > { %v1773_v28 = vpop.permute.xlu1 %1772  ;;  %9543 = vmatmul.msk.f32.vlgmr.msra.gmra.mxu1 %vm760_vm1, %v11347_v20  ;;  %v18308_v20 = vld [vmem:[#allocation97_spill] sm:$0xff] }
 0x29e   : > { %v1948_v21 = vpop.permute.xlu2 %1947  ;;  %9536 = vmatmul.msk.f32.gmra.mxu2 %vm760_vm1, %v11251_v32  ;;  %v1740_v27 = vpop.permute.xlu0 %1739  ;;  %9550 = vmatpush.xpose.msk.msra.mxu3 %vm760_vm1, %v1773_v28 }
 0x29f   : > { %9545 = vmatpush.xpose.msk.msra.mxu2 %vm760_vm1, %v1740_v27  ;;  %v18311_v27 = vld [vmem:[#allocation37_spill] sm:$0xff] }
 0x2a1   : > { %9551 = vmatmul.msk.f32.vlgmr.msra.gmra.mxu3 %vm760_vm1, %v11121_v40 }
 0x2a2   : > { %9561 = vmatpush.xpose.msk.msrb.mxu3 %vm760_vm1, %v1880_v35 }
 0x2a3   : > { %9546 = vmatpush.xpose.msk.msra.mxu2 %vm760_vm1, %v1738_v43  ;;  %2544 = vrot.lane.b32.xlu1 %v18307_v2, %s10759_s21  ;;  %v18310_v43 = vld [vmem:[#allocation38_spill] sm:$0xff] }
 0x2a4   : > { %2542 = vrot.lane.b32.xlu0 %v18308_v20, %s10759_s21  ;;  %2577 = vrot.lane.b32.xlu2 %v18309_v16, %s10759_s21 }
 0x2a5   : > { %v1810_v32 = vpop.permute.xlu1 %1809  ;;  %9544 = vmatmul.msk.f32.gmra.mxu1 %vm760_vm1, %v11349_v1  ;;  %v18312_v1 = vld [vmem:[#allocation114_spill] sm:$0xff] }
 0x2a6   : > { %v1985_v28 = vpop.permute.xlu2 %1984  ;;  %9547 = vmatmul.msk.f32.vlgmr.msra.gmra.mxu2 %vm760_vm1, %v11093_v29  ;;  %v1808_v35 = vpop.permute.xlu0 %1807  ;;  %9553 = vmatpush.xpose.msk.msrb.mxu1 %vm760_vm1, %v1810_v32 }
 0x2a9   : > { %9552 = vmatmul.msk.f32.gmra.mxu3 %vm760_vm1, %v11231_v22  ;;  %v18315_v22 = vld [vmem:[#allocation117_spill] sm:$0xff] }
 0x2aa   : > { %9554 = vmatpush.xpose.msk.msrb.mxu1 %vm760_vm1, %v1808_v35  ;;  %v18313_v35 = vld [vmem:[#allocation104_spill] sm:$0xff] }
 0x2ab   : > { %2612 = vrot.lane.b32.xlu1 %v18310_v43, %s10759_s21 }
 0x2ac   : > { %2579 = vrot.lane.b32.xlu0 %v18311_v27, %s10759_s21  ;;  %2614 = vrot.lane.b32.xlu2 %v18312_v1, %s10759_s21 }
 0x2ad   : > { %v1878_v40 = vpop.permute.xlu1 %1877  ;;  %9555 = vmatmul.msk.f32.vlgmr.msrb.gmra.mxu1 %vm760_vm1, %v11263_v51  ;;  %v18314_v51 = vld [vmem:[#allocation112_spill] sm:$0xff] }
 0x2ae   : > { %v11782_v29 = vpop.permute.xlu2 %2052  ;;  %9548 = vmatmul.msk.f32.gmra.mxu2 %vm760_vm1, %v11119_v37  ;;  %v1845_v32 = vpop.permute.xlu0 %1844  ;;  %9562 = vmatpush.xpose.msk.msrb.mxu3 %vm760_vm1, %v1878_v40 }
 0x2af   : > { %9557 = vmatpush.xpose.msk.msrb.mxu2 %vm760_vm1, %v1845_v32  ;;  %v11808_v32 = vpop.f32.mrf.mxu2 }
 0x2b1   : > { %9563 = vmatmul.msk.f32.vlgmr.msrb.gmra.mxu3 %vm760_vm1, %v18265_v48  ;;  %v18316_v48 = vld [vmem:[#allocation107_spill] sm:$0xff] }
 0x2b2   : > { %9573 = vmatpush.xpose.msk.msra.mxu3 %vm760_vm1, %v1985_v28 }
 0x2b3   : > { %9558 = vmatpush.xpose.msk.msrb.mxu2 %vm760_vm1, %v1843_v8  ;;  %2649 = vrot.lane.b32.xlu1 %v18313_v35, %s10759_s21  ;;  %v11803_v8 = vpop.f32.mrf.mxu1 }
 0x2b4   : > { %2647 = vrot.lane.b32.xlu0 %v18314_v51, %s10759_s21  ;;  %2682 = vrot.lane.b32.xlu2 %v18315_v22, %s10759_s21 }
 0x2b5   : > { %v1915_v37 = vpop.permute.xlu1 %1914  ;;  %9556 = vmatmul.msk.f32.gmra.mxu1 %vm760_vm1, %v11265_v12  ;;  %v18317_v12 = vld [vmem:[#allocation115_spill] sm:$0xff] }
 0x2b6   : > { %v2090_v40 = vpop.permute.xlu2 %2089  ;;  %9559 = vmatmul.msk.f32.vlgmr.msrb.gmra.mxu2 %vm760_vm1, %v18261_v45  ;;  %v1913_v28 = vpop.permute.xlu0 %1912  ;;  %9565 = vmatpush.xpose.msk.msra.mxu1 %vm760_vm1, %v1915_v37  ;;  %v18318_v45 = vld [vmem:[#allocation120_spill] sm:$0xff] }
 0x2b9   : > { %9564 = vmatmul.msk.f32.gmra.mxu3 %vm760_vm1, %v18266_v26 }
 0x2ba   : > { %9566 = vmatpush.xpose.msk.msra.mxu1 %vm760_vm1, %v1913_v28 }
 0x2bb   : > { %2717 = vrot.lane.b32.xlu1 %v18316_v48, %s10759_s21  ;;  %v11825_v26 = vpop.f32.mrf.mxu1 }
 0x2bc   : > { %2684 = vrot.lane.b32.xlu0 %v18317_v12, %s10759_s21  ;;  %2719 = vrot.lane.b32.xlu2 %v18318_v45, %s10759_s21 }
 0x2bd   : > { %v1983_v62 = vpop.permute.xlu1 %1982  ;;  %9567 = vmatmul.msk.f32.vlgmr.msra.gmra.mxu1 %vm760_vm1, %v18269_v60  ;;  %v18319_v60 = vld [vmem:[#allocation110_spill] sm:$0xff] }
 0x2be   : > { %v11818_v37 = vpop.permute.xlu2 %2157  ;;  %9560 = vmatmul.msk.f32.gmra.mxu2 %vm760_vm1, %v11371_v9  ;;  %v1950_v28 = vpop.permute.xlu0 %1949  ;;  %9574 = vmatpush.xpose.msk.msra.mxu3 %vm760_vm1, %v1983_v62  ;;  %v18320_v9 = vld [vmem:[#allocation118_spill] sm:$0xff]  ;;  %v18321_v62 = vld [vmem:[#allocation123_spill] sm:$0xff] }
 0x2bf   : > { %9569 = vmatpush.xpose.msk.msra.mxu2 %vm760_vm1, %v1950_v28  ;;  %v11838_v28 = vpop.f32.mrf.mxu2 }
 0x2c1   : > { %9575 = vmatmul.msk.f32.vlgmr.msra.gmra.mxu3 %vm760_vm1, %v18272_v54 }
 0x2c2   : > { %9585 = vmatpush.xpose.msk.msrb.mxu3 %vm760_vm1, %v2090_v40 }
 0x2c3   : > { %9570 = vmatpush.xpose.msk.msra.mxu2 %vm760_vm1, %v1948_v21  ;;  %2754 = vrot.lane.b32.xlu1 %v18319_v60, %s10759_s21  ;;  %v11848_v25 = vpop.f32.mrf.mxu1 }
 0x2c4   : > { %2752 = vrot.lane.b32.xlu0 %v18320_v9, %s10759_s21  ;;  %2787 = vrot.lane.b32.xlu2 %v18321_v62, %s10759_s21 }
 0x2c5   : > { %v2020_v40 = vpop.permute.xlu1 %2019  ;;  %9568 = vmatmul.msk.f32.gmra.mxu1 %vm760_vm1, %v18268_v33  ;;  %v18324_v33 = vld [vmem:[#allocation125_spill] sm:$0xff] }
 0x2c6   : > { %v2195_v54 = vpop.permute.xlu2 %2194  ;;  %9571 = vmatmul.msk.f32.vlgmr.msra.gmra.mxu2 %vm760_vm1, %v18270_v47  ;;  %v2018_v21 = vpop.permute.xlu0 %2017  ;;  %9577 = vmatpush.xpose.msk.msrb.mxu1 %vm760_vm1, %v2020_v40 }
 0x2c7   : > { %v11856_v47 = vpop.f32.mrf.mxu3 }
 0x2c9   : > { %9576 = vmatmul.msk.f32.gmra.mxu3 %vm760_vm1, %v18274_v39  ;;  %v11863_v39 = vpop.f32.mrf.mxu2 }
 0x2ca   : > { %9578 = vmatpush.xpose.msk.msrb.mxu1 %vm760_vm1, %v2018_v21 }
 0x2cb   : > { %2822 = vrot.lane.b32.xlu1 %v18322_v46, %s10759_s21  ;;  %v11877_v50 = vpop.f32.mrf.mxu1 }
 0x2cc   : > { %2789 = vrot.lane.b32.xlu0 %v18323_v0, %s10759_s21  ;;  %2824 = vrot.lane.b32.xlu2 %v18324_v33, %s10759_s21 }
 0x2cd   : > { %v2088_v38 = vpop.permute.xlu1 %2087  ;;  %9579 = vmatmul.msk.f32.vlgmr.msrb.gmra.mxu1 %vm760_vm1, %v18276_v19  ;;  %v18325_v19 = vld [vmem:[#allocation116_spill] sm:$0xff] }
 0x2ce   : > { %v2263_v40 = vpop.permute.xlu2 %2262  ;;  %9572 = vmatmul.msk.f32.gmra.mxu2 %vm760_vm1, %v18273_v5  ;;  %v2055_v21 = vpop.permute.xlu0 %2054  ;;  %9586 = vmatpush.xpose.msk.msrb.mxu3 %vm760_vm1, %v2088_v38  ;;  %v18326_v5 = vld [vmem:[#allocation124_spill] sm:$0xff]  ;;  %v18327_v38 = vld [vmem:[#allocation127_spill] sm:$0xff] }
 0x2cf   : > { %9581 = vmatpush.xpose.msk.msrb.mxu2 %vm760_vm1, %v2055_v21 }
 0x2d1   : > { %9587 = vmatmul.msk.f32.vlgmr.msrb.gmra.mxu3 %vm760_vm1, %v18278_v23  ;;  %v11884_v23 = vpop.f32.mrf.mxu3 }
 0x2d2   : > { %9597 = vmatpush.xpose.msk.msra.mxu3 %vm760_vm1, %v2195_v54 }
 0x2d3   : > { %9582 = vmatpush.xpose.msk.msrb.mxu2 %vm760_vm1, %v11782_v29  ;;  %2859 = vrot.lane.b32.xlu1 %v18325_v19, %s10759_s21  ;;  %v11886_v19 = vpop.f32.mrf.mxu2 }
 0x2d4   : > { %2857 = vrot.lane.b32.xlu0 %v18326_v5, %s10759_s21  ;;  %2892 = vrot.lane.b32.xlu2 %v18327_v38, %s10759_s21  ;;  %v18328_v38 = vld [vmem:[#allocation119_spill] sm:$0xff] }
 0x2d5   : > { %v2125_v21 = vpop.permute.xlu1 %2124  ;;  %9580 = vmatmul.msk.f32.gmra.mxu1 %vm760_vm1, %v18275_v52  ;;  %v18329_v52 = vld [vmem:[#allocation126_spill] sm:$0xff] }
 0x2d6   : > { %v2300_v54 = vpop.permute.xlu2 %2299  ;;  %9583 = vmatmul.msk.f32.vlgmr.msrb.gmra.mxu2 %vm760_vm1, %v18277_v18  ;;  %v2123_v29 = vpop.permute.xlu0 %2122  ;;  %9589 = vmatpush.xpose.msk.msra.mxu1 %vm760_vm1, %v2125_v21  ;;  %v18330_v18 = vld [vmem:[#allocation129_spill] sm:$0xff] }
 0x2d9   : > { %9588 = vmatmul.msk.f32.gmra.mxu3 %vm760_vm1, %v18280_v13 }
 0x2da   : > { %9590 = vmatpush.xpose.msk.msra.mxu1 %vm760_vm1, %v2123_v29  ;;  %v11902_v29 = vpop.f32.mrf.mxu1 }
 0x2db   : > { %2927 = vrot.lane.b32.xlu1 %v18328_v38, %s10759_s21 }
 0x2dc   : > { %2894 = vrot.lane.b32.xlu0 %v18329_v52, %s10759_s21  ;;  %2929 = vrot.lane.b32.xlu2 %v18330_v18, %s10759_s21  ;;  %v11906_v52 = vpop.f32.mrf.mxu3  ;;  %v11910_v18 = vpop.f32.mrf.mxu2 }
 0x2dd   : > { %v2193_v33 = vpop.permute.xlu1 %2192  ;;  %9591 = vmatmul.msk.f32.vlgmr.msra.gmra.mxu1 %vm760_vm1, %v18282_v59  ;;  %v18331_v59 = vld [vmem:[#allocation122_spill] sm:$0xff] }
 0x2de   : > { %v2368_v21 = vpop.permute.xlu2 %2367  ;;  %9584 = vmatmul.msk.f32.gmra.mxu2 %vm760_vm1, %v18279_v56  ;;  %v2160_v13 = vpop.permute.xlu0 %2159  ;;  %9598 = vmatpush.xpose.msk.msra.mxu3 %vm760_vm1, %v2193_v33  ;;  %v18332_v33 = vld [vmem:[#allocation128_spill] sm:$0xff] }
 0x2df   : > { %9593 = vmatpush.xpose.msk.msra.mxu2 %vm760_vm1, %v2160_v13 }
 0x2e1   : > { %9599 = vmatmul.msk.f32.vlgmr.msra.gmra.mxu3 %vm760_vm1, %v18284_v42 }
 0x2e2   : > { %9609 = vmatpush.xpose.msk.msrb.mxu3 %vm760_vm1, %v2300_v54  ;;  %v11923_v42 = vpop.f32.mrf.mxu1 }
 0x2e3   : > { %9594 = vmatpush.xpose.msk.msra.mxu2 %vm760_vm1, %v11818_v37  ;;  %2964 = vrot.lane.b32.xlu1 %v18331_v59, %s10759_s21 }
 0x2e4   : > { %2962 = vrot.lane.b32.xlu0 %v18332_v33, %s10759_s21  ;;  %v11928_v37 = vpop.f32.mrf.mxu3  ;;  %v11930_v59 = vpop.f32.mrf.mxu2 }
 0x2e5   : > { %v2230_v56 = vpop.permute.xlu1 %2229  ;;  %9592 = vmatmul.msk.f32.gmra.mxu1 %vm760_vm1, %v18281_v10 }
 0x2e6   : > { %v2405_v13 = vpop.permute.xlu2 %2404  ;;  %9595 = vmatmul.msk.f32.vlgmr.msra.gmra.mxu2 %vm760_vm1, %v18283_v30  ;;  %v2228_v54 = vpop.permute.xlu0 %2227  ;;  %9601 = vmatpush.xpose.msk.msrb.mxu1 %vm760_vm1, %v2230_v56 }
 0x2e9   : > { %9600 = vmatmul.msk.f32.gmra.mxu3 %vm760_vm1, %v18286_v61 }
 0x2ea   : > { %9602 = vmatpush.xpose.msk.msrb.mxu1 %vm760_vm1, %v2228_v54  ;;  %v11943_v54 = vpop.f32.mrf.mxu1 }
 0x2ed   : > { %v2298_v33 = vpop.permute.xlu1 %2297  ;;  %9603 = vmatmul.msk.f32.vlgmr.msrb.gmra.mxu1 %vm760_vm1, %v18288_v31  ;;  %v11946_v31 = vpop.f32.mrf.mxu3 }
 0x2ee   : > { %v11934_v10 = vpop.permute.xlu2 %2472  ;;  %9596 = vmatmul.msk.f32.gmra.mxu2 %vm760_vm1, %v18285_v36  ;;  %v2265_v56 = vpop.permute.xlu0 %2264  ;;  %9610 = vmatpush.xpose.msk.msrb.mxu3 %vm760_vm1, %v2298_v33 }
 0x2ef   : > { %9605 = vmatpush.xpose.msk.msrb.mxu2 %vm760_vm1, %v2265_v56  ;;  %v11958_v56 = vld [vmem:[%s17650_s5] sm:$0xff] }
 0x2f1   : > { %9611 = vmatmul.msk.f32.vlgmr.msrb.gmra.mxu3 %vm760_vm1, %v18291_v55 }
 0x2f2   : > { %9621 = vmatpush.xpose.msk.msra.mxu3 %vm760_vm1, %v2405_v13  ;;  %v11953_v13 = vpop.f32.mrf.mxu2 }
 0x2f3   : > { %9606 = vmatpush.xpose.msk.msrb.mxu2 %vm760_vm1, %v2263_v40  ;;  %v3005_v40 = vadd.f32 %v11958_v56, %v11803_v8 }
 0x2f5   : > { %v2335_v61 = vpop.permute.xlu1 %2334  ;;  %9604 = vmatmul.msk.f32.gmra.mxu1 %vm760_vm1, %v18287_v7  ;;  %v11965_v7 = vpop.f32.mrf.mxu1 }
 0x2f6   : > { %v2510_v30 = vpop.permute.xlu2 %2509  ;;  %9607 = vmatmul.msk.f32.vlgmr.msrb.gmra.mxu2 %vm760_vm1, %v18289_v41  ;;  %v2333_v33 = vpop.permute.xlu0 %2332  ;;  %9613 = vmatpush.xpose.msk.msra.mxu1 %vm760_vm1, %v2335_v61  ;;  %v11972_v61 = vld [vmem:[%s17651_s6] sm:$0xff] }
 0x2f7   : > { %18333 = vst [vmem:[#allocation130_spill] sm:$0xff] %v11972_v61  ;;  %v11979_v8 = vpop.f32.mrf.mxu3 }
 0x2f9   : > { %9612 = vmatmul.msk.f32.gmra.mxu3 %vm760_vm1, %v18293_v53  ;;  %v11983_v53 = vadd.f32 %v11972_v61, %v3005_v40 }
 0x2fa   : > { %9614 = vmatpush.xpose.msk.msra.mxu1 %vm760_vm1, %v2333_v33 }
 0x2fb   : > { %18334 = vst [vmem:[#allocation131_spill] sm:$0xff] %v11983_v53 }
 0x2fd   : > { %v2403_v41 = vpop.permute.xlu1 %2402  ;;  %9615 = vmatmul.msk.f32.vlgmr.msra.gmra.mxu1 %vm760_vm1, %v18295_v11  ;;  %v11990_v11 = vld [vmem:[%s17650_s5 + $0x8] sm:$0xff] }
 0x2fe   : > { %v11974_v55 = vpop.permute.xlu2 %2577  ;;  %9608 = vmatmul.msk.f32.gmra.mxu2 %vm760_vm1, %v18292_v4  ;;  %v2370_v33 = vpop.permute.xlu0 %2369  ;;  %9622 = vmatpush.xpose.msk.msra.mxu3 %vm760_vm1, %v2403_v41  ;;  %v3007_v41 = vadd.f32 %v11958_v56, %v11808_v32  ;;  %v3008_v40 = vadd.f32 %v11990_v11, %v11838_v28  ;;  %v12009_v32 = vld [vmem:[%s17651_s6 + $0x18] sm:$0xff] }
 0x2ff   : > { %9617 = vmatpush.xpose.msk.msra.mxu2 %vm760_vm1, %v2370_v33  ;;  %v11992_v4 = vpop.f32.mrf.mxu2  ;;  %v3294_v33 = vsel %vm3293_vm2, %v11983_v53, -inf  ;;  %18335 = vst [vmem:[#allocation132_spill] sm:$0xff] %v12009_v32  ;;  %v12032_v61 = vpop.f32.mrf.mxu3 }
 0x301   : > { %9623 = vmatmul.msk.f32.vlgmr.msra.gmra.mxu3 %vm760_vm1, %v18298_v49  ;;  %v3006_v49 = vadd.f32 %v11990_v11, %v11825_v26  ;;  %v12022_v26 = vld [vmem:[%s17651_s6 + $0x8] sm:$0xff] }
 0x303   : > { %9618 = vmatpush.xpose.msk.msra.mxu2 %vm760_vm1, %v2368_v21  ;;  %v12024_v21 = vpop.f32.mrf.mxu1 }
 0x305   : > { %3295 = vmax.xlane.f32.xlu2 %v3294_v33  ;;  %v2440_v36 = vpop.permute.xlu1 %2439  ;;  %9616 = vmatmul.msk.f32.gmra.mxu1 %vm760_vm1, %v18294_v58  ;;  %v12027_v58 = vadd.f32 %v12009_v32, %v3008_v40  ;;  %v3011_v40 = vadd.f32 %v11958_v56, %v11848_v25  ;;  %v12062_v25 = vld [vmem:[%s17651_s6 + $0x30] sm:$0xff] }
 0x306   : > { %9619 = vmatmul.msk.f32.vlgmr.msra.gmra.mxu2 %vm760_vm1, %v18296_v34  ;;  %v2438_v28 = vpop.permute.xlu0 %2437  ;;  %9625 = vmatpush.xpose.msk.msrb.mxu0 %vm760_vm1, %v2440_v36  ;;  %v2615_v33 = vpop.permute.xlu2 %2614  ;;  %v12037_v36 = vadd.f32 %v12022_v26, %v3006_v49  ;;  %v3009_v34 = vadd.f32 %v11958_v56, %v11829_v6  ;;  %v3010_v49 = vadd.f32 %v11990_v11, %v11856_v47  ;;  %v12057_v6 = vld [vmem:[%s17651_s6 + $0x20] sm:$0xff] }
 0x307   : > { %9633 = vmatpush.xpose.msk.msrb.mxu2 %vm760_vm1, %v2510_v30  ;;  %v12014_v30 = vld [vmem:[%s17651_s6 + $0x10] sm:$0xff]  ;;  %18337 = vst [vmem:[#allocation134_spill] sm:$0xff] %v12027_v58  ;;  %v12044_v32 = vpop.f32.mrf.mxu2 }
 0x308   : > { %18336 = vst [vmem:[#allocation133_spill] sm:$0xff] %v12014_v30  ;;  %v12030_v53 = vadd.f32 %v12014_v30, %v3007_v41  ;;  %v3303_v41 = vsel %vm3293_vm2, %v12027_v58, -inf }
 0x309   : > { %9624 = vmatmul.msk.f32.gmra.mxu3 %vm760_vm1, %v18300_v63 }
 0x30a   : > { %18338 = vst [vmem:[#allocation135_spill] sm:$0xff] %v12030_v53  ;;  %9626 = vmatpush.xpose.msk.msrb.mxu0 %vm760_vm1, %v2438_v28  ;;  %v3300_v30 = vsel %vm3293_vm2, %v12030_v53, -inf  ;;  %v3297_v28 = vsel %vm3293_vm2, %v12037_v36, -inf }
 0x30d   : > { %3304 = vmax.xlane.f32.xlu2 %v3303_v41  ;;  %v2508_v63 = vpop.permute.xlu1 %2507  ;;  %3301 = vmax.xlane.f32.xlu1 %v3300_v30  ;;  %v12069_v41 = vld [vmem:[%s17651_s6 + $0x28] sm:$0xff]  ;;  %v12076_v30 = vadd.f32 %v12057_v6, %v3009_v34  ;;  %v3014_v34 = vadd.f32 %v11990_v11, %v11886_v19  ;;  %v12108_v19 = vld [vmem:[%s17651_s6 + $0x38] sm:$0xff] }
 0x30e   : > { %3298 = vmax.xlane.f32.xlu0 %v3297_v28  ;;  %9620 = vmatmul.msk.f32.gmra.mxu2 %vm760_vm1, %v18299_v15  ;;  %v2475_v47 = vpop.permute.xlu0 %2474  ;;  %v12079_v28 = vadd.f32 %v12062_v25, %v3011_v40  ;;  %v12081_v15 = vpop.f32.mrf.mxu1  ;;  %v12084_v53 = vadd.f32 %v12069_v41, %v3010_v49 }
 0x30f   : > { %9627 = vmatmul.msk.f32.vlgmr.msrb.gmra.mxu0 %vm760_vm1, %v18302_v3  ;;  %9629 = vmatpush.xpose.msk.msrb.mxu1 %vm760_vm1, %v2475_v47  ;;  %18339 = vst [vmem:[#allocation136_spill] sm:$0xff] %v12076_v30  ;;  %v12086_v58 = vpop.permute.xlu2 %2682  ;;  %v3012_v47 = vadd.f32 %v11990_v11, %v11877_v50  ;;  %v3306_v40 = vsel %vm3293_vm2, %v12076_v30, -inf  ;;  %v3013_v3 = vadd.f32 %v11958_v56, %v11863_v39 }
 0x310   : > { %9634 = vmatpush.xpose.msk.msrb.mxu2 %vm760_vm1, %v2508_v63  ;;  %18340 = vst [vmem:[#allocation137_spill] sm:$0xff] %v12079_v28  ;;  %v12094_v63 = vpop.f32.mrf.mxu3  ;;  %v3312_v49 = vsel %vm3293_vm2, %v12079_v28, -inf  ;;  %v3309_v50 = vsel %vm3293_vm2, %v12084_v53, -inf  ;;  %v12115_v28 = vpop.f32.mrf.mxu2  ;;  %v3015_v30 = vadd.f32 %v11958_v56, %v11884_v23 }
 0x311   : > { %18341 = vst [vmem:[#allocation138_spill] sm:$0xff] %v12084_v53 }
 0x313   : > { %9630 = vmatpush.xpose.msk.msrb.mxu1 %vm760_vm1, %v11934_v10 }
 0x315   : > { %3307 = vmax.xlane.f32.xlu2 %v3306_v40  ;;  %v2545_v10 = vpop.permute.xlu1 %2544  ;;  %3313 = vmax.xlane.f32.xlu1 %v3312_v49  ;;  %v12122_v40 = vld [vmem:[%s17651_s6 + $0x40] sm:$0xff]  ;;  %v12130_v49 = vadd.f32 %v12108_v19, %v3012_v47 }
 0x316   : > { %3310 = vmax.xlane.f32.xlu0 %v3309_v50  ;;  %9631 = vmatmul.msk.f32.vlgmr.msrb.gmra.mxu1 %vm760_vm1, %v18303_v14  ;;  %v2543_v39 = vpop.permute.xlu0 %2542  ;;  %v12136_v14 = vadd.f32 %v12122_v40, %v3013_v3  ;;  %v12138_v53 = vpop.f32.mrf.mxu1  ;;  %v3016_v3 = vadd.f32 %v11990_v11, %v11906_v52  ;;  %v12165_v52 = vld [vmem:[%s17651_s6 + $0x58] sm:$0xff] }
 0x317   : > { %9645 = vmatpush.xpose.msk.msra.mxu1 %vm760_vm1, %v2615_v33  ;;  %v12113_v33 = vld [vmem:[%s17651_s6 + $0x48] sm:$0xff]  ;;  %9628 = vmatmul.msk.f32.gmra.mxu0 %vm760_vm1, %v18301_v44  ;;  %18342 = vst [vmem:[#allocation139_spill] sm:$0xff] %v12130_v49  ;;  %v2720_v44 = vpop.permute.xlu2 %2719 }
 0x318   : > { %9635 = vmatmul.msk.f32.vlgmr.msrb.gmra.mxu2 %vm760_vm1, %v18304_v17  ;;  %9637 = vmatpush.xpose.msk.msrb.mxu3 %vm760_vm1, %v2545_v10  ;;  %v12133_v50 = vadd.f32 %v12113_v33, %v3014_v34  ;;  %18344 = vst [vmem:[#allocation141_spill] sm:$0xff] %v12136_v14  ;;  %v3315_v10 = vsel %vm3293_vm2, %v12130_v49, -inf  ;;  %v3017_v34 = vadd.f32 %v11958_v56, %v11902_v29  ;;  %v3318_v23 = vsel %vm3293_vm2, %v12136_v14, -inf  ;;  %v12158_v49 = vpop.f32.mrf.mxu3 }
 0x31a   : > { %18343 = vst [vmem:[#allocation140_spill] sm:$0xff] %v12133_v50  ;;  %v3321_v47 = vsel %vm3293_vm2, %v12133_v50, -inf }
 0x31c   : > { %9638 = vmatpush.xpose.msk.msrb.mxu3 %vm760_vm1, %v2543_v39  ;;  %v12156_v39 = vld [vmem:[%s17651_s6 + $0x50] sm:$0xff] }
 0x31d   : > { %3316 = vmax.xlane.f32.xlu2 %v3315_v10  ;;  %v2613_v17 = vpop.permute.xlu1 %2612  ;;  %3322 = vmax.xlane.f32.xlu1 %v3321_v47  ;;  %v12170_v10 = vld [vmem:[%s17651_s6 + $0x60] sm:$0xff]  ;;  %v12176_v47 = vpop.f32.mrf.mxu2 }
 0x31e   : > { %3319 = vmax.xlane.f32.xlu0 %v3318_v23  ;;  %9632 = vmatmul.msk.f32.gmra.mxu1 %vm760_vm1, %v18305_v57  ;;  %v2580_v29 = vpop.permute.xlu0 %2579  ;;  %v12181_v23 = vadd.f32 %v12156_v39, %v3015_v30  ;;  %v12184_v57 = vadd.f32 %v12165_v52, %v3016_v3  ;;  %v12187_v14 = vadd.f32 %v12170_v10, %v3017_v34  ;;  %v12199_v3 = vpop.f32.mrf.mxu1 }
 0x31f   : > { %9639 = vmatmul.msk.f32.vlgmr.msrb.gmra.mxu3 %vm760_vm1, %v18308_v20  ;;  %9641 = vmatpush.xpose.msk.msra.mxu0 %vm760_vm1, %v2580_v29  ;;  %v3020_v30 = vadd.f32 %v11990_v11, %v11930_v59  ;;  %v12209_v20 = vld [vmem:[%s17651_s6 + $0x68] sm:$0xff] }
 0x320   : > { %9636 = vmatmul.msk.f32.gmra.mxu2 %vm760_vm1, %v18306_v24  ;;  %9646 = vmatpush.xpose.msk.msra.mxu1 %vm760_vm1, %v2613_v17  ;;  %18345 = vst [vmem:[#allocation142_spill] sm:$0xff] %v12181_v23  ;;  %v3018_v24 = vadd.f32 %v11990_v11, %v11923_v42  ;;  %v3324_v29 = vsel %vm3293_vm2, %v12181_v23, -inf  ;;  %v3019_v17 = vadd.f32 %v11958_v56, %v11910_v18  ;;  %v3327_v42 = vsel %vm3293_vm2, %v12184_v57, -inf  ;;  %v12211_v18 = vpop.permute.xlu2 %2787 }
 0x321   : > { %18346 = vst [vmem:[#allocation143_spill] sm:$0xff] %v12184_v57  ;;  %v12227_v57 = vpop.f32.mrf.mxu3 }
 0x322   : > { %18347 = vst [vmem:[#allocation144_spill] sm:$0xff] %v12187_v14 }
 0x323   : > { %9642 = vmatpush.xpose.msk.msra.mxu0 %vm760_vm1, %v11974_v55  ;;  %v3330_v55 = vsel %vm3293_vm2, %v12187_v14, -inf }
 0x325   : > { %3325 = vmax.xlane.f32.xlu2 %v3324_v29  ;;  %v2650_v34 = vpop.permute.xlu1 %2649  ;;  %3331 = vmax.xlane.f32.xlu1 %v3330_v55  ;;  %v12221_v29 = vld [vmem:[%s17651_s6 + $0x78] sm:$0xff] }
 0x326   : > { %3328 = vmax.xlane.f32.xlu0 %v3327_v42  ;;  %v2648_v59 = vpop.permute.xlu0 %2647  ;;  %9643 = vmatmul.msk.f32.vlgmr.msra.gmra.mxu0 %vm760_vm1, %v18309_v16  ;;  %v12233_v42 = vadd.f32 %v12209_v20, %v3018_v24  ;;  %v12239_v14 = vadd.f32 %v12221_v29, %v3020_v30  ;;  %v3021_v16 = vadd.f32 %v11958_v56, %v11928_v37  ;;  %v12259_v37 = vld [vmem:[%s17651_s6 + $0x80] sm:$0xff] }
 0x327   : > { %9657 = vmatpush.xpose.msk.msrb.mxu0 %vm760_vm1, %v2720_v44  ;;  %v12216_v44 = vld [vmem:[%s17651_s6 + $0x70] sm:$0xff]  ;;  %9640 = vmatmul.msk.f32.gmra.mxu3 %vm760_vm1, %v18307_v2  ;;  %v12241_v2 = vpop.f32.mrf.mxu2  ;;  %v3023_v24 = vadd.f32 %v11958_v56, %v11943_v54  ;;  %v12271_v54 = vpop.f32.mrf.mxu1 }
 0x328   : > { %9647 = vmatmul.msk.f32.vlgmr.msra.gmra.mxu1 %vm760_vm1, %v18310_v43  ;;  %9649 = vmatpush.xpose.msk.msra.mxu2 %vm760_vm1, %v2650_v34  ;;  %18348 = vst [vmem:[#allocation145_spill] sm:$0xff] %v12233_v42  ;;  %v12236_v55 = vadd.f32 %v12216_v44, %v3019_v17  ;;  %v3333_v43 = vsel %vm3293_vm2, %v12233_v42, -inf  ;;  %v3022_v17 = vadd.f32 %v11990_v11, %v11946_v31  ;;  %v3339_v23 = vsel %vm3293_vm2, %v12239_v14, -inf  ;;  %v12264_v31 = vld [vmem:[%s17651_s6 + $0x88] sm:$0xff] }
 0x329   : > { %18350 = vst [vmem:[#allocation147_spill] sm:$0xff] %v12239_v14 }
 0x32a   : > { %18349 = vst [vmem:[#allocation146_spill] sm:$0xff] %v12236_v55  ;;  %v3336_v30 = vsel %vm3293_vm2, %v12236_v55, -inf  ;;  %v12285_v55 = vadd.f32 %v12264_v31, %v3022_v17  ;;  %v3025_v17 = vadd.f32 %v11958_v56, %v11953_v13 }
 0x32c   : > { %9650 = vmatpush.xpose.msk.msra.mxu2 %vm760_vm1, %v2648_v59  ;;  %18352 = vst [vmem:[#allocation149_spill] sm:$0xff] %v12285_v55 }
 0x32d   : > { %3334 = vmax.xlane.f32.xlu2 %v3333_v43  ;;  %v2718_v34 = vpop.permute.xlu1 %2717  ;;  %3340 = vmax.xlane.f32.xlu1 %v3339_v23  ;;  %v12269_v43 = vld [vmem:[%s17651_s6 + $0x90] sm:$0xff]  ;;  %v2825_v23 = vpop.permute.xlu2 %2824 }
 0x32e   : > { %3337 = vmax.xlane.f32.xlu0 %v3336_v30  ;;  %v2685_v59 = vpop.permute.xlu0 %2684  ;;  %9644 = vmatmul.msk.f32.gmra.mxu0 %vm760_vm1, %v18311_v27  ;;  %v12281_v30 = vadd.f32 %v12259_v37, %v3021_v16  ;;  %v12288_v14 = vadd.f32 %v12269_v43, %v3023_v24  ;;  %v12290_v27 = vpop.f32.mrf.mxu3  ;;  %v3026_v24 = vadd.f32 %v11990_v11, %v11992_v4  ;;  %v12317_v4 = vld [vmem:[%s17651_s6 + $0xa0] sm:$0xff] }
 0x32f   : > { %9651 = vmatmul.msk.f32.vlgmr.msra.gmra.mxu2 %vm760_vm1, %v18314_v51  ;;  %9653 = vmatpush.xpose.msk.msra.mxu3 %vm760_vm1, %v2685_v59  ;;  %v3024_v51 = vadd.f32 %v11990_v11, %v11965_v7  ;;  %v12294_v42 = vpop.f32.mrf.mxu2  ;;  %v3345_v7 = vsel %vm3293_vm2, %v12285_v55, -inf }
 0x330   : > { %9648 = vmatmul.msk.f32.gmra.mxu1 %vm760_vm1, %v18312_v1  ;;  %18351 = vst [vmem:[#allocation148_spill] sm:$0xff] %v12281_v30  ;;  %9658 = vmatpush.xpose.msk.msrb.mxu0 %vm760_vm1, %v2718_v34  ;;  %v3342_v16 = vsel %vm3293_vm2, %v12281_v30, -inf  ;;  %v3348_v59 = vsel %vm3293_vm2, %v12288_v14, -inf }
 0x331   : > { %18353 = vst [vmem:[#allocation150_spill] sm:$0xff] %v12288_v14 }
 0x333   : > { %9654 = vmatpush.xpose.msk.msra.mxu3 %vm760_vm1, %v12086_v58  ;;  %v12312_v58 = vld [vmem:[%s17651_s6 + $0x98] sm:$0xff] }
 0x335   : > { %3343 = vmax.xlane.f32.xlu2 %v3342_v16  ;;  %v2755_v34 = vpop.permute.xlu1 %2754  ;;  %3349 = vmax.xlane.f32.xlu1 %v3348_v59  ;;  %v12332_v16 = vadd.f32 %v12312_v58, %v3024_v51  ;;  %v12337_v59 = vadd.f32 %v12317_v4, %v3025_v17  ;;  %v3028_v17 = vadd.f32 %v11990_v11, %v12032_v61  ;;  %v12369_v61 = vld [vmem:[%s17651_s6 + $0xb8] sm:$0xff] }
 0x336   : > { %3346 = vmax.xlane.f32.xlu0 %v3345_v7  ;;  %v2753_v13 = vpop.permute.xlu0 %2752  ;;  %9655 = vmatmul.msk.f32.vlgmr.msra.gmra.mxu3 %vm760_vm1, %v18315_v22  ;;  %v12334_v7 = vpop.f32.mrf.mxu1  ;;  %v3027_v22 = vadd.f32 %v11958_v56, %v11979_v8 }
 0x337   : > { %9669 = vmatpush.xpose.msk.msrb.mxu3 %vm760_vm1, %v2825_v23  ;;  %v12322_v23 = vld [vmem:[%s17651_s6 + $0xa8] sm:$0xff]  ;;  %9652 = vmatmul.msk.f32.gmra.mxu2 %vm760_vm1, %v18313_v35  ;;  %18354 = vst [vmem:[#allocation151_spill] sm:$0xff] %v12332_v16  ;;  %v12342_v35 = vpop.permute.xlu2 %2892  ;;  %v12346_v55 = vpop.f32.mrf.mxu3  ;;  %v3351_v51 = vsel %vm3293_vm2, %v12332_v16, -inf }
 0x338   : > { %9659 = vmatmul.msk.f32.vlgmr.msrb.gmra.mxu0 %vm760_vm1, %v18316_v48  ;;  %9661 = vmatpush.xpose.msk.msrb.mxu1 %vm760_vm1, %v2755_v34  ;;  %18355 = vst [vmem:[#allocation152_spill] sm:$0xff] %v12337_v59  ;;  %v12340_v1 = vadd.f32 %v12322_v23, %v3026_v24  ;;  %v3029_v34 = vadd.f32 %v11958_v56, %v12024_v21  ;;  %v3354_v48 = vsel %vm3293_vm2, %v12337_v59, -inf  ;;  %v12364_v16 = vpop.f32.mrf.mxu2 }
 0x33a   : > { %18356 = vst [vmem:[#allocation153_spill] sm:$0xff] %v12340_v1  ;;  %v3357_v8 = vsel %vm3293_vm2, %v12340_v1, -inf }
 0x33c   : > { %9662 = vmatpush.xpose.msk.msrb.mxu1 %vm760_vm1, %v2753_v13  ;;  %v12362_v13 = vld [vmem:[%s17651_s6 + $0xb0] sm:$0xff] }
 0x33d   : > { %3352 = vmax.xlane.f32.xlu2 %v3351_v51  ;;  %v2823_v24 = vpop.permute.xlu1 %2822  ;;  %3358 = vmax.xlane.f32.xlu1 %v3357_v8  ;;  %v12374_v51 = vld [vmem:[%s17651_s6 + $0xc0] sm:$0xff]  ;;  %v12388_v8 = vadd.f32 %v12369_v61, %v3028_v17  ;;  %v3032_v17 = vadd.f32 %v11990_v11, %v12115_v28  ;;  %v12425_v28 = vld [vmem:[%s17651_s6 + $0xd8] sm:$0xff] }
 0x33e   : > { %3355 = vmax.xlane.f32.xlu0 %v3354_v48  ;;  %v2790_v21 = vpop.permute.xlu0 %2789  ;;  %9656 = vmatmul.msk.f32.gmra.mxu3 %vm760_vm1, %v18317_v12  ;;  %v12384_v48 = vadd.f32 %v12362_v13, %v3027_v22  ;;  %v12391_v59 = vadd.f32 %v12374_v51, %v3029_v34  ;;  %v12393_v12 = vpop.f32.mrf.mxu1 }
 0x33f   : > { %9663 = vmatmul.msk.f32.vlgmr.msrb.gmra.mxu1 %vm760_vm1, %v18320_v9  ;;  %9665 = vmatpush.xpose.msk.msrb.mxu2 %vm760_vm1, %v2790_v21  ;;  %18358 = vst [vmem:[#allocation155_spill] sm:$0xff] %v12388_v8  ;;  %v3030_v9 = vadd.f32 %v11990_v11, %v12081_v15  ;;  %v2930_v1 = vpop.permute.xlu2 %2929  ;;  %v3363_v15 = vsel %vm3293_vm2, %v12388_v8, -inf  ;;  %v12443_v8 = vadd.f32 %v12425_v28, %v3032_v17 }
 0x340   : > { %9660 = vmatmul.msk.f32.gmra.mxu0 %vm760_vm1, %v18318_v45  ;;  %18357 = vst [vmem:[#allocation154_spill] sm:$0xff] %v12384_v48  ;;  %9670 = vmatpush.xpose.msk.msrb.mxu3 %vm760_vm1, %v2823_v24  ;;  %v3360_v22 = vsel %vm3293_vm2, %v12384_v48, -inf  ;;  %v3031_v24 = vadd.f32 %v11958_v56, %v12044_v32  ;;  %v3366_v21 = vsel %vm3293_vm2, %v12391_v59, -inf  ;;  %v12415_v45 = vpop.f32.mrf.mxu3 }
 0x341   : > { %18359 = vst [vmem:[#allocation156_spill] sm:$0xff] %v12391_v59 }
 0x342   : > { %18362 = vst [vmem:[#allocation159_spill] sm:$0xff] %v12443_v8 }
 0x343   : > { %9666 = vmatpush.xpose.msk.msrb.mxu2 %vm760_vm1, %v12211_v18  ;;  %v12413_v18 = vld [vmem:[%s17651_s6 + $0xc8] sm:$0xff] }
 0x345   : > { %3361 = vmax.xlane.f32.xlu2 %v3360_v22  ;;  %v2860_v34 = vpop.permute.xlu1 %2859  ;;  %3367 = vmax.xlane.f32.xlu1 %v3366_v21  ;;  %v12431_v22 = vpop.f32.mrf.mxu2 }
 0x346   : > { %3364 = vmax.xlane.f32.xlu0 %v3363_v15  ;;  %v2858_v32 = vpop.permute.xlu0 %2857  ;;  %9667 = vmatmul.msk.f32.vlgmr.msrb.gmra.mxu2 %vm760_vm1, %v18321_v62  ;;  %v12437_v15 = vadd.f32 %v12413_v18, %v3030_v9  ;;  %v3034_v9 = vadd.f32 %v11990_v11, %v12158_v49 }
 0x347   : > { %9681 = vmatpush.xpose.msk.msra.mxu2 %vm760_vm1, %v2930_v1  ;;  %v12420_v1 = vld [vmem:[%s17651_s6 + $0xd0] sm:$0xff]  ;;  %9664 = vmatmul.msk.f32.gmra.mxu1 %vm760_vm1, %v18319_v60  ;;  %v3033_v60 = vadd.f32 %v11958_v56, %v12094_v63  ;;  %v3375_v63 = vsel %vm3293_vm2, %v12443_v8, -inf }
 0x348   : > { %9671 = vmatmul.msk.f32.vlgmr.msrb.gmra.mxu3 %vm760_vm1, %v18322_v46  ;;  %9673 = vmatpush.xpose.msk.msra.mxu0 %vm760_vm1, %v2860_v34  ;;  %18360 = vst [vmem:[#allocation157_spill] sm:$0xff] %v12437_v15  ;;  %v12440_v21 = vadd.f32 %v12420_v1, %v3031_v24  ;;  %v3369_v62 = vsel %vm3293_vm2, %v12437_v15, -inf  ;;  %v3035_v34 = vadd.f32 %v11958_v56, %v12138_v53  ;;  %v12454_v46 = vpop.f32.mrf.mxu1  ;;  %v12468_v56 = vld [vmem:[%s17651_s6 + $0xe8] sm:$0xff]  ;;  %v12479_v49 = vpop.f32.mrf.mxu3 }
 0x34a   : > { %18361 = vst [vmem:[#allocation158_spill] sm:$0xff] %v12440_v21  ;;  %v3372_v17 = vsel %vm3293_vm2, %v12440_v21, -inf  ;;  %v12489_v21 = vadd.f32 %v12468_v56, %v3034_v9 }
 0x34c   : > { %9674 = vmatpush.xpose.msk.msra.mxu0 %vm760_vm1, %v2858_v32  ;;  %v12463_v32 = vld [vmem:[%s17651_s6 + $0xe0] sm:$0xff]  ;;  %18365 = vst [vmem:[#allocation161_spill] sm:$0xff] %v12489_v21 }
 0x34d   : > { %3370 = vmax.xlane.f32.xlu2 %v3369_v62  ;;  %v2928_v24 = vpop.permute.xlu1 %2927  ;;  %3376 = vmax.xlane.f32.xlu1 %v3375_v63  ;;  %v12473_v62 = vld [vmem:[%s17651_s6 + $0xf0] sm:$0xff]  ;;  %v12485_v63 = vadd.f32 %v12463_v32, %v3033_v60  ;;  %v12494_v8 = vpop.f32.mrf.mxu2  ;;  %v12506_v60 = vld [vmem:[%s17650_s5 + $0x18] sm:$0xff] }
 0x34e   : > { %3373 = vmax.xlane.f32.xlu0 %v3372_v17  ;;  %v2895_v53 = vpop.permute.xlu0 %2894  ;;  %9668 = vmatmul.msk.f32.gmra.mxu2 %vm760_vm1, %v18323_v0  ;;  %v18363_v17 = vld [vmem:[#allocation125_spill] sm:$0xff]  ;;  %v12492_v0 = vadd.f32 %v12473_v62, %v3035_v34 }
 0x34f   : > { %9675 = vmatmul.msk.f32.vlgmr.msra.gmra.mxu0 %vm760_vm1, %v18326_v5  ;;  %9677 = vmatpush.xpose.msk.msra.mxu1 %vm760_vm1, %v2895_v53  ;;  %18364 = vst [vmem:[#allocation160_spill] sm:$0xff] %v12485_v63  ;;  %v3036_v5 = vadd.f32 %v11990_v11, %v12199_v3  ;;  %v12501_v53 = vld [vmem:[%s17650_s5 + $0x10] sm:$0xff]  ;;  %v3378_v34 = vsel %vm3293_vm2, %v12485_v63, -inf  ;;  %v3038_v11 = vadd.f32 %v12506_v60, %v12241_v2  ;;  %v18368_v2 = vld [vmem:[#allocation127_spill] sm:$0xff] }
 0x350   : > { %9672 = vmatmul.msk.f32.gmra.mxu3 %vm760_vm1, %v18363_v17  ;;  %9682 = vmatpush.xpose.msk.msra.mxu2 %vm760_vm1, %v2928_v24  ;;  %18366 = vst [vmem:[#allocation162_spill] sm:$0xff] %v12492_v0  ;;  %v3037_v9 = vadd.f32 %v12501_v53, %v12176_v47  ;;  %v3381_v24 = vsel %vm3293_vm2, %v12489_v21, -inf  ;;  %v3384_v17 = vsel %vm3293_vm2, %v12492_v0, -inf  ;;  %v12525_v63 = vpop.f32.mrf.mxu1  ;;  %v18367_v47 = vld [vmem:[#allocation116_spill] sm:$0xff]  ;;  %v18370_v21 = vld [vmem:[#allocation130_spill] sm:$0xff] }
 0x352   : > { %v12538_v0 = vadd.f32 %v18370_v21, %v3037_v9  ;;  %v3041_v9 = vadd.f32 %v12501_v53, %v12271_v54  ;;  %v18376_v54 = vld [vmem:[#allocation133_spill] sm:$0xff] }
 0x353   : > { %9678 = vmatpush.xpose.msk.msra.mxu1 %vm760_vm1, %v12342_v35  ;;  %v12523_v35 = vld [vmem:[%s17651_s6 + $0xf8] sm:$0xff] }
 0x354   : > { %18371 = vst [vmem:[#allocation130_spill] sm:$0xff] %v12538_v0 }
 0x355   : > { %3379 = vmax.xlane.f32.xlu2 %v3378_v34  ;;  %v2965_v3 = vpop.permute.xlu1 %2964  ;;  %3385 = vmax.xlane.f32.xlu1 %v3384_v17  ;;  %v12535_v34 = vadd.f32 %v12523_v35, %v3036_v5  ;;  %v12541_v17 = vadd.f32 %v12022_v26, %v3038_v11  ;;  %v12547_v15 = vpop.f32.mrf.mxu2  ;;  %v3040_v11 = vadd.f32 %v12506_v60, %v12290_v27 }
 0x356   : > { %3382 = vmax.xlane.f32.xlu0 %v3381_v24  ;;  %9679 = vmatmul.msk.f32.vlgmr.msra.gmra.mxu1 %vm760_vm1, %v18368_v2  ;;  %v12543_v24 = vpop.f32.mrf.mxu3  ;;  %v3039_v2 = vadd.f32 %v12501_v53, %v12227_v57 }
 0x357   : > { %9676 = vmatmul.msk.f32.gmra.mxu0 %vm760_vm1, %v18367_v47  ;;  %9683 = vmatmul.msk.f32.vlgmr.msra.gmra.mxu2 %vm760_vm1, %v18328_v38  ;;  %18369 = vst [vmem:[#allocation163_spill] sm:$0xff] %v12535_v34  ;;  %v2963_v47 = vpop.permute.xlu0 %2962  ;;  %v3387_v5 = vsel %vm3293_vm2, %v12535_v34, -inf  ;;  %v3393_v57 = vsel %vm3293_vm2, %v12541_v17, -inf  ;;  %v18373_v38 = vld [vmem:[#allocation126_spill] sm:$0xff]  ;;  %v18375_v34 = vld [vmem:[#allocation129_spill] sm:$0xff] }
 0x358   : > { %9685 = vmatpush.xpose.msk.msra.mxu3 %vm760_vm1, %v2965_v3  ;;  %18372 = vst [vmem:[#allocation164_spill] sm:$0xff] %v12541_v17  ;;  %v3390_v3 = vsel %vm3293_vm2, %v12538_v0, -inf  ;;  %v12567_v27 = vadd.f32 %v18376_v54, %v3039_v2  ;;  %v18378_v0 = vld [vmem:[#allocation132_spill] sm:$0xff]  ;;  %v3043_v2 = vadd.f32 %v12501_v53, %v12294_v42 }
 0x359   : > { %v12572_v59 = vadd.f32 %v18378_v0, %v3040_v11 }
 0x35a   : > { %18377 = vst [vmem:[#allocation133_spill] sm:$0xff] %v12567_v27  ;;  %v12597_v42 = vadd.f32 %v12062_v25, %v3043_v2 }
 0x35b   : > { %18379 = vst [vmem:[#allocation132_spill] sm:$0xff] %v12572_v59  ;;  %v3399_v11 = vsel %vm3293_vm2, %v12572_v59, -inf  ;;  %v3045_v59 = vadd.f32 %v12501_v53, %v12346_v55 }
 0x35c   : > { %9686 = vmatpush.xpose.msk.msra.mxu3 %vm760_vm1, %v2963_v47  ;;  %v18374_v47 = vld [vmem:[#allocation128_spill] sm:$0xff]  ;;  %18383 = vst [vmem:[#allocation167_spill] sm:$0xff] %v12597_v42  ;;  %v3408_v2 = vsel %vm3293_vm2, %v12597_v42, -inf }
 0x35d   : > { %3388 = vmax.xlane.f32.xlu2 %v3387_v5  ;;  %3394 = vmax.xlane.f32.xlu1 %v3393_v57  ;;  %v12569_v5 = vpop.f32.mrf.mxu1  ;;  %v3042_v57 = vadd.f32 %v12506_v60, %v12334_v7  ;;  %v1664_v17 = vpop.f32.mrf.mxu2  ;;  %v18381_v7 = vld [vmem:[#allocation122_spill] sm:$0xff] }
 0x35e   : > { %3391 = vmax.xlane.f32.xlu0 %v3390_v3  ;;  %9680 = vmatmul.msk.f32.gmra.mxu1 %vm760_vm1, %v18373_v38  ;;  %v12575_v3 = vadd.f32 %v12057_v6, %v3041_v9  ;;  %v12579_v38 = vpop.f32.mrf.mxu3  ;;  %v3056_v48 = vadd.f32 %v12506_v60, %v1664_v17 }
 0x35f   : > { %9687 = vmatmul.msk.f32.vlgmr.msra.gmra.mxu3 %vm760_vm1, %v18374_v47  ;;  %9684 = vmatmul.msk.f32.gmra.mxu2 %vm760_vm1, %v18375_v34  ;;  %v3396_v47 = vsel %vm3293_vm2, %v12567_v27, -inf  ;;  %v3044_v34 = vadd.f32 %v12506_v60, %v12364_v16  ;;  %v12594_v27 = vadd.f32 %v12069_v41, %v3042_v57  ;;  %v3046_v57 = vadd.f32 %v12506_v60, %v12415_v45 }
 0x360   : > { %18380 = vst [vmem:[#allocation165_spill] sm:$0xff] %v12575_v3  ;;  %v3402_v9 = vsel %vm3293_vm2, %v12575_v3, -inf  ;;  %v12707_v17 = vadd.f32 %v12312_v58, %v3056_v48 }
 0x361   : > { %18382 = vst [vmem:[#allocation166_spill] sm:$0xff] %v12594_v27  ;;  %v12600_v16 = vadd.f32 %v12108_v19, %v3044_v34 }
 0x362   : > { %18397 = vst [vmem:[#allocation181_spill] sm:$0xff] %v12707_v17  ;;  %v3447_v48 = vsel %vm3293_vm2, %v12707_v17, -inf }
 0x363   : > { %18384 = vst [vmem:[#allocation168_spill] sm:$0xff] %v12600_v16  ;;  %v3411_v34 = vsel %vm3293_vm2, %v12600_v16, -inf }
 0x365   : > { %3397 = vmax.xlane.f32.xlu2 %v3396_v47  ;;  %3403 = vmax.xlane.f32.xlu1 %v3402_v9  ;;  %v12602_v47 = vpop.f32.mrf.mxu1  ;;  %v3047_v9 = vadd.f32 %v12501_v53, %v12393_v12  ;;  %v12616_v55 = vpop.f32.mrf.mxu2  ;;  %v12622_v12 = vadd.f32 %v12113_v33, %v3046_v57 }
 0x366   : > { %3400 = vmax.xlane.f32.xlu0 %v3399_v11  ;;  %v3405_v11 = vsel %vm3293_vm2, %v12594_v27, -inf  ;;  %v12619_v27 = vadd.f32 %v12122_v40, %v3045_v59  ;;  %v3061_v17 = vadd.f32 %v12501_v53, %v12616_v55 }
 0x367   : > { %9688 = vmatmul.msk.f32.gmra.mxu3 %vm760_vm1, %v18381_v7  ;;  %v1699_v7 = vpop.f32.mrf.mxu3  ;;  %18386 = vst [vmem:[#allocation170_spill] sm:$0xff] %v12622_v12  ;;  %v12625_v45 = vadd.f32 %v12156_v39, %v3047_v9  ;;  %v3417_v57 = vsel %vm3293_vm2, %v12622_v12, -inf  ;;  %v3051_v12 = vadd.f32 %v12501_v53, %v12479_v49 }
 0x368   : > { %18385 = vst [vmem:[#allocation169_spill] sm:$0xff] %v12619_v27  ;;  %v3414_v42 = vsel %vm3293_vm2, %v12619_v27, -inf }
 0x369   : > { %18387 = vst [vmem:[#allocation171_spill] sm:$0xff] %v12625_v45  ;;  %v3420_v9 = vsel %vm3293_vm2, %v12625_v45, -inf }
 0x36d   : > { %3406 = vmax.xlane.f32.xlu2 %v3405_v11  ;;  %3412 = vmax.xlane.f32.xlu1 %v3411_v34  ;;  %v3048_v11 = vadd.f32 %v12506_v60, %v12454_v46  ;;  %v3050_v34 = vadd.f32 %v12506_v60, %v12494_v8  ;;  %v12635_v59 = vpop.f32.mrf.mxu1  ;;  %v1769_v16 = vpop.f32.mrf.mxu2 }
 0x36e   : > { %3409 = vmax.xlane.f32.xlu0 %v3408_v2  ;;  %v3049_v2 = vadd.f32 %v12501_v53, %v12431_v22 }
 0x36f   : > { %v12641_v46 = vpop.f32.mrf.mxu3  ;;  %v12646_v22 = vadd.f32 %v12165_v52, %v3048_v11  ;;  %v3052_v11 = vadd.f32 %v12506_v60, %v12543_v24 }
 0x370   : > { %v12649_v8 = vadd.f32 %v12170_v10, %v3049_v2 }
 0x371   : > { %18388 = vst [vmem:[#allocation172_spill] sm:$0xff] %v12646_v22  ;;  %v12676_v24 = vadd.f32 %v12221_v29, %v3052_v11 }
 0x372   : > { %18389 = vst [vmem:[#allocation173_spill] sm:$0xff] %v12649_v8  ;;  %v3426_v2 = vsel %vm3293_vm2, %v12649_v8, -inf }
 0x373   : > { %18392 = vst [vmem:[#allocation176_spill] sm:$0xff] %v12676_v24  ;;  %v3435_v11 = vsel %vm3293_vm2, %v12676_v24, -inf }
 0x375   : > { %3415 = vmax.xlane.f32.xlu2 %v3414_v42  ;;  %3421 = vmax.xlane.f32.xlu1 %v3420_v9  ;;  %v12652_v42 = vadd.f32 %v12209_v20, %v3050_v34  ;;  %v3053_v9 = vadd.f32 %v12501_v53, %v12525_v63  ;;  %v1836_v45 = vpop.f32.mrf.mxu1 }
 0x376   : > { %3418 = vmax.xlane.f32.xlu0 %v3417_v57  ;;  %v3423_v57 = vsel %vm3293_vm2, %v12646_v22, -inf  ;;  %v12671_v22 = vadd.f32 %v12216_v44, %v3051_v12  ;;  %v3055_v12 = vadd.f32 %v12501_v53, %v12547_v15 }
 0x377   : > { %18390 = vst [vmem:[#allocation174_spill] sm:$0xff] %v12652_v42  ;;  %v3429_v34 = vsel %vm3293_vm2, %v12652_v42, -inf  ;;  %v1804_v8 = vpop.f32.mrf.mxu3 }
 0x378   : > { %v12643_v27 = vpop.xlane.xlu2 %3295  ;;  %18391 = vst [vmem:[#allocation175_spill] sm:$0xff] %v12671_v22  ;;  %v3432_v42 = vsel %vm3293_vm2, %v12671_v22, -inf  ;;  %v12704_v15 = vadd.f32 %v12269_v43, %v3055_v12 }
 0x37a   : > { %18396 = vst [vmem:[#allocation180_spill] sm:$0xff] %v12704_v15  ;;  %v3444_v12 = vsel %vm3293_vm2, %v12704_v15, -inf  ;;  %v3060_v15 = vadd.f32 %v12506_v60, %v12635_v59 }
 0x37d   : > { %3424 = vmax.xlane.f32.xlu2 %v3423_v57  ;;  %3430 = vmax.xlane.f32.xlu1 %v3429_v34  ;;  %v12679_v57 = vadd.f32 %v12259_v37, %v3053_v9  ;;  %v12683_v34 = vpop.f32.mrf.mxu2 }
 0x37e   : > { %3427 = vmax.xlane.f32.xlu0 %v3426_v2  ;;  %v3054_v2 = vadd.f32 %v12506_v60, %v12569_v5 }
 0x37f   : > { %18393 = vst [vmem:[#allocation177_spill] sm:$0xff] %v12679_v57  ;;  %v3438_v9 = vsel %vm3293_vm2, %v12679_v57, -inf  ;;  %v3058_v57 = vadd.f32 %v12506_v60, %v1699_v7 }
 0x380   : > { %v12666_v49 = vpop.xlane.xlu2 %3304  ;;  %v12668_v3 = vpop.xlane.xlu1 %3301  ;;  %v12699_v22 = vadd.f32 %v12264_v31, %v3054_v2  ;;  %v3059_v2 = vadd.f32 %v12501_v53, %v12602_v47 }
 0x381   : > { %v12673_v63 = vpop.xlane.xlu0 %3298  ;;  %v12732_v7 = vadd.f32 %v12322_v23, %v3058_v57 }
 0x382   : > { %18394 = vst [vmem:[#allocation178_spill] sm:$0xff] %v12699_v22  ;;  %v3441_v24 = vsel %vm3293_vm2, %v12699_v22, -inf }
 0x383   : > { %18401 = vst [vmem:[#allocation185_spill] sm:$0xff] %v12732_v7  ;;  %v3453_v57 = vsel %vm3293_vm2, %v12732_v7, -inf }
 0x385   : > { %3433 = vmax.xlane.f32.xlu2 %v3432_v42  ;;  %3439 = vmax.xlane.f32.xlu1 %v3438_v9  ;;  %v1839_v42 = vpop.f32.mrf.mxu1  ;;  %v12711_v9 = vpop.f32.mrf.mxu3 }
 0x386   : > { %3436 = vmax.xlane.f32.xlu0 %v3435_v11  ;;  %v3057_v11 = vadd.f32 %v12501_v53, %v12579_v38  ;;  %v1874_v50 = vpop.f32.mrf.mxu2 }
 0x388   : > { %v12694_v5 = vpop.xlane.xlu2 %3307  ;;  %v12696_v14 = vpop.xlane.xlu1 %3313  ;;  %v12727_v22 = vadd.f32 %v12317_v4, %v3057_v11  ;;  %v3062_v11 = vadd.f32 %v12506_v60, %v1769_v16 }
 0x389   : > { %v12701_v30 = vpop.xlane.xlu0 %3310 }
 0x38a   : > { %18395 = vst [vmem:[#allocation179_spill] sm:$0xff] %v12701_v30  ;;  %v12763_v7 = vadd.f32 %v12413_v18, %v3062_v11 }
 0x38b   : > { %18399 = vst [vmem:[#allocation183_spill] sm:$0xff] %v12727_v22 }
 0x38c   : > { %18408 = vst [vmem:[#allocation192_spill] sm:$0xff] %v12763_v7 }
 0x38d   : > { %3442 = vmax.xlane.f32.xlu2 %v3441_v24  ;;  %3448 = vmax.xlane.f32.xlu1 %v3447_v48  ;;  %v12735_v24 = vadd.f32 %v12362_v13, %v3059_v2  ;;  %v3450_v48 = vsel %vm3293_vm2, %v12727_v22, -inf  ;;  %v12753_v22 = vadd.f32 %v12369_v61, %v3060_v15  ;;  %v3064_v15 = vadd.f32 %v12506_v60, %v1804_v8 }
 0x38e   : > { %3445 = vmax.xlane.f32.xlu0 %v3444_v12  ;;  %v1941_v12 = vpop.f32.mrf.mxu1  ;;  %v12748_v59 = vpop.f32.mrf.mxu2 }
 0x38f   : > { %18402 = vst [vmem:[#allocation186_spill] sm:$0xff] %v12735_v24  ;;  %v3456_v2 = vsel %vm3293_vm2, %v12735_v24, -inf  ;;  %v3065_v24 = vadd.f32 %v12501_v53, %v1836_v45  ;;  %v12785_v8 = vadd.f32 %v12425_v28, %v3064_v15 }
 0x390   : > { %v12722_v38 = vpop.xlane.xlu2 %3316  ;;  %v12724_v30 = vpop.xlane.xlu1 %3322  ;;  %18404 = vst [vmem:[#allocation188_spill] sm:$0xff] %v12753_v22 }
 0x391   : > { %18398 = vst [vmem:[#allocation182_spill] sm:$0xff] %v12724_v30  ;;  %v12729_v47 = vpop.xlane.xlu0 %3319 }
 0x392   : > { %18400 = vst [vmem:[#allocation184_spill] sm:$0xff] %v12729_v47  ;;  %v1909_v47 = vpop.f32.mrf.mxu3 }
 0x393   : > { %18412 = vst [vmem:[#allocation196_spill] sm:$0xff] %v12785_v8 }
 0x395   : > { %3451 = vmax.xlane.f32.xlu2 %v3450_v48  ;;  %3457 = vmax.xlane.f32.xlu1 %v3456_v2  ;;  %v12760_v48 = vadd.f32 %v12374_v51, %v3061_v17  ;;  %v3459_v2 = vsel %vm3293_vm2, %v12753_v22, -inf  ;;  %v3465_v17 = vsel %vm3293_vm2, %v12763_v7, -inf  ;;  %v3068_v7 = vadd.f32 %v12506_v60, %v1874_v50 }
 0x396   : > { %3454 = vmax.xlane.f32.xlu0 %v3453_v57  ;;  %v3063_v57 = vadd.f32 %v12501_v53, %v12641_v46 }
 0x397   : > { %18407 = vst [vmem:[#allocation191_spill] sm:$0xff] %v12760_v48 }
 0x398   : > { %v12750_v30 = vpop.xlane.xlu2 %3325  ;;  %v12755_v55 = vpop.xlane.xlu1 %3331  ;;  %v12778_v46 = vadd.f32 %v12420_v1, %v3063_v57  ;;  %v3067_v57 = vadd.f32 %v12501_v53, %v12683_v34  ;;  %v12808_v53 = vld [vmem:[%s17650_s5 + $0x20] sm:$0xff] }
 0x399   : > { %18403 = vst [vmem:[#allocation187_spill] sm:$0xff] %v12750_v30  ;;  %v12757_v16 = vpop.xlane.xlu0 %3328 }
 0x39a   : > { %18405 = vst [vmem:[#allocation189_spill] sm:$0xff] %v12755_v55  ;;  %v1944_v55 = vpop.f32.mrf.mxu1  ;;  %v2011_v11 = vpop.f32.mrf.mxu3  ;;  %v12815_v34 = vadd.f32 %v12473_v62, %v3067_v57 }
 0x39b   : > { %18406 = vst [vmem:[#allocation190_spill] sm:$0xff] %v12757_v16  ;;  %v3462_v16 = vsel %vm3293_vm2, %v12760_v48, -inf  ;;  %v1979_v48 = vpop.f32.mrf.mxu2 }
 0x39c   : > { %18409 = vst [vmem:[#allocation193_spill] sm:$0xff] %v12778_v46 }
 0x39d   : > { %3460 = vmax.xlane.f32.xlu2 %v3459_v2  ;;  %3466 = vmax.xlane.f32.xlu1 %v3465_v17  ;;  %v12788_v2 = vadd.f32 %v12463_v32, %v3065_v24  ;;  %v3468_v17 = vsel %vm3293_vm2, %v12778_v46, -inf  ;;  %18418 = vst [vmem:[#allocation202_spill] sm:$0xff] %v12815_v34  ;;  %v3071_v46 = vadd.f32 %v12808_v53, %v1941_v12 }
 0x39e   : > { %3463 = vmax.xlane.f32.xlu0 %v3462_v16  ;;  %v3066_v16 = vadd.f32 %v12506_v60, %v1839_v42 }
 0x39f   : > { %18413 = vst [vmem:[#allocation197_spill] sm:$0xff] %v12788_v2  ;;  %v3474_v15 = vsel %vm3293_vm2, %v12788_v2, -inf  ;;  %v12848_v12 = vadd.f32 %v18376_v54, %v3071_v46 }
 0x3a0   : > { %v12775_v30 = vpop.xlane.xlu2 %3334  ;;  %v12780_v22 = vpop.xlane.xlu1 %3340  ;;  %v12803_v42 = vadd.f32 %v12468_v56, %v3066_v16  ;;  %v12823_v16 = vld [vmem:[%s17650_s5 + $0x28] sm:$0xff] }
 0x3a1   : > { %18410 = vst [vmem:[#allocation194_spill] sm:$0xff] %v12780_v22  ;;  %v12782_v45 = vpop.xlane.xlu0 %3337  ;;  %v3070_v57 = vadd.f32 %v12823_v16, %v1909_v47  ;;  %v3492_v54 = vsel %vm3293_vm2, %v12848_v12, -inf }
 0x3a2   : > { %18411 = vst [vmem:[#allocation195_spill] sm:$0xff] %v12782_v45  ;;  %v3471_v45 = vsel %vm3293_vm2, %v12785_v8, -inf  ;;  %v2046_v24 = vpop.f32.mrf.mxu1  ;;  %v3477_v2 = vsel %vm3293_vm2, %v12803_v42, -inf }
 0x3a3   : > { %18415 = vst [vmem:[#allocation199_spill] sm:$0xff] %v12803_v42  ;;  %v2081_v8 = vpop.f32.mrf.mxu2  ;;  %v12845_v47 = vadd.f32 %v12022_v26, %v3070_v57 }
 0x3a4   : > { %18422 = vst [vmem:[#allocation206_spill] sm:$0xff] %v12848_v12 }
 0x3a5   : > { %3469 = vmax.xlane.f32.xlu2 %v3468_v17  ;;  %3475 = vmax.xlane.f32.xlu1 %v3474_v15  ;;  %v2014_v17 = vpop.f32.mrf.mxu3  ;;  %v3069_v15 = vadd.f32 %v12808_v53, %v12711_v9  ;;  %18421 = vst [vmem:[#allocation205_spill] sm:$0xff] %v12845_v47  ;;  %v3489_v26 = vsel %vm3293_vm2, %v12845_v47, -inf  ;;  %v3075_v47 = vadd.f32 %v12808_v53, %v2011_v11 }
 0x3a6   : > { %3472 = vmax.xlane.f32.xlu0 %v3471_v45  ;;  %v12818_v45 = vadd.f32 %v12523_v35, %v3068_v7  ;;  %v3480_v7 = vsel %vm3293_vm2, %v12815_v34, -inf  ;;  %v3072_v34 = vadd.f32 %v12823_v16, %v1944_v55 }
 0x3a7   : > { %v12838_v9 = vadd.f32 %v18370_v21, %v3069_v15  ;;  %v3073_v21 = vadd.f32 %v12808_v53, %v12748_v59  ;;  %v3074_v15 = vadd.f32 %v12823_v16, %v1979_v48 }
 0x3a8   : > { %v12800_v22 = vpop.xlane.xlu2 %3343  ;;  %v12810_v50 = vpop.xlane.xlu1 %3349  ;;  %18419 = vst [vmem:[#allocation203_spill] sm:$0xff] %v12818_v45  ;;  %v12863_v57 = vadd.f32 %v18378_v0, %v3072_v34  ;;  %v3076_v0 = vadd.f32 %v12823_v16, %v2014_v17 }
 0x3a9   : > { %18414 = vst [vmem:[#allocation198_spill] sm:$0xff] %v12800_v22  ;;  %v12812_v60 = vpop.xlane.xlu0 %3346  ;;  %v12870_v48 = vadd.f32 %v12057_v6, %v3073_v21 }
 0x3aa   : > { %18416 = vst [vmem:[#allocation200_spill] sm:$0xff] %v12810_v50  ;;  %v12894_v17 = vadd.f32 %v12108_v19, %v3076_v0 }
 0x3ab   : > { %18417 = vst [vmem:[#allocation201_spill] sm:$0xff] %v12812_v60  ;;  %v3483_v60 = vsel %vm3293_vm2, %v12818_v45, -inf  ;;  %v2084_v46 = vpop.f32.mrf.mxu2  ;;  %v3498_v34 = vsel %vm3293_vm2, %v12870_v48, -inf }
 0x3ac   : > { %18420 = vst [vmem:[#allocation204_spill] sm:$0xff] %v12838_v9 }
 0x3ad   : > { %3478 = vmax.xlane.f32.xlu2 %v3477_v2  ;;  %3484 = vmax.xlane.f32.xlu1 %v3483_v60  ;;  %v2049_v2 = vpop.f32.mrf.mxu1  ;;  %v3486_v60 = vsel %vm3293_vm2, %v12838_v9, -inf  ;;  %18423 = vst [vmem:[#allocation207_spill] sm:$0xff] %v12863_v57 }
 0x3ae   : > { %3481 = vmax.xlane.f32.xlu0 %v3480_v7  ;;  %v2116_v7 = vpop.f32.mrf.mxu3  ;;  %18424 = vst [vmem:[#allocation208_spill] sm:$0xff] %v12870_v48  ;;  %v3078_v48 = vadd.f32 %v12823_v16, %v2049_v2 }
 0x3af   : > { %18427 = vst [vmem:[#allocation211_spill] sm:$0xff] %v12894_v17 }
 0x3b0   : > { %v12835_v50 = vpop.xlane.xlu2 %3352  ;;  %v12840_v22 = vpop.xlane.xlu1 %3358  ;;  %v12911_v2 = vadd.f32 %v12113_v33, %v3078_v48 }
 0x3b1   : > { %v12842_v42 = vpop.xlane.xlu0 %3355 }
 0x3b2   : > { %18429 = vst [vmem:[#allocation213_spill] sm:$0xff] %v12911_v2 }
 0x3b5   : > { %3487 = vmax.xlane.f32.xlu2 %v3486_v60  ;;  %3493 = vmax.xlane.f32.xlu1 %v3492_v54  ;;  %v12873_v60 = vadd.f32 %v12069_v41, %v3074_v15  ;;  %v2151_v12 = vpop.f32.mrf.mxu1  ;;  %v3077_v54 = vadd.f32 %v12808_v53, %v2046_v24  ;;  %v2186_v41 = vpop.f32.mrf.mxu2  ;;  %v12887_v15 = vadd.f32 %v12062_v25, %v3075_v47  ;;  %v3507_v47 = vsel %vm3293_vm2, %v12894_v17, -inf }
 0x3b6   : > { %3490 = vmax.xlane.f32.xlu0 %v3489_v26  ;;  %v3495_v26 = vsel %vm3293_vm2, %v12863_v57, -inf  ;;  %v2119_v21 = vpop.f32.mrf.mxu3  ;;  %v3080_v25 = vadd.f32 %v12823_v16, %v2084_v46 }
 0x3b7   : > { %18425 = vst [vmem:[#allocation209_spill] sm:$0xff] %v12873_v60  ;;  %v3501_v6 = vsel %vm3293_vm2, %v12873_v60, -inf  ;;  %v3082_v33 = vadd.f32 %v12823_v16, %v2119_v21 }
 0x3b8   : > { %v12860_v55 = vpop.xlane.xlu2 %3361  ;;  %v12865_v9 = vpop.xlane.xlu1 %3367  ;;  %18426 = vst [vmem:[#allocation210_spill] sm:$0xff] %v12887_v15 }
 0x3b9   : > { %v12867_v59 = vpop.xlane.xlu0 %3364  ;;  %v12942_v21 = vadd.f32 %v12209_v20, %v3082_v33 }
 0x3bb   : > { %18433 = vst [vmem:[#allocation217_spill] sm:$0xff] %v12942_v21 }
 0x3bd   : > { %3496 = vmax.xlane.f32.xlu2 %v3495_v26  ;;  %3502 = vmax.xlane.f32.xlu1 %v3501_v6  ;;  %v12897_v26 = vadd.f32 %v12122_v40, %v3077_v54  ;;  %v3079_v6 = vadd.f32 %v12808_v53, %v2081_v8  ;;  %v2154_v0 = vpop.f32.mrf.mxu1  ;;  %v2189_v17 = vpop.f32.mrf.mxu2 }
 0x3be   : > { %3499 = vmax.xlane.f32.xlu0 %v3498_v34  ;;  %v3504_v34 = vsel %vm3293_vm2, %v12887_v15, -inf  ;;  %v2221_v40 = vpop.f32.mrf.mxu3 }
 0x3bf   : > { %18428 = vst [vmem:[#allocation212_spill] sm:$0xff] %v12897_v26  ;;  %v3510_v19 = vsel %vm3293_vm2, %v12897_v26, -inf  ;;  %v12918_v46 = vadd.f32 %v12156_v39, %v3079_v6  ;;  %v3083_v26 = vadd.f32 %v12808_v53, %v2151_v12 }
 0x3c0   : > { %v12884_v11 = vpop.xlane.xlu2 %3370  ;;  %v12889_v57 = vpop.xlane.xlu1 %3376 }
 0x3c1   : > { %v12891_v24 = vpop.xlane.xlu0 %3373  ;;  %18430 = vst [vmem:[#allocation214_spill] sm:$0xff] %v12918_v46  ;;  %v3516_v48 = vsel %vm3293_vm2, %v12918_v46, -inf }
 0x3c5   : > { %3505 = vmax.xlane.f32.xlu2 %v3504_v34  ;;  %3511 = vmax.xlane.f32.xlu1 %v3510_v19  ;;  %v12921_v34 = vadd.f32 %v12165_v52, %v3080_v25  ;;  %v3513_v19 = vsel %vm3293_vm2, %v12911_v2, -inf  ;;  %v2256_v52 = vpop.f32.mrf.mxu1  ;;  %v3525_v2 = vsel %vm3293_vm2, %v12942_v21, -inf  ;;  %v3087_v21 = vadd.f32 %v12808_v53, %v2221_v40 }
 0x3c6   : > { %3508 = vmax.xlane.f32.xlu0 %v3507_v47  ;;  %v3081_v47 = vadd.f32 %v12808_v53, %v2116_v7  ;;  %v2224_v46 = vpop.f32.mrf.mxu3 }
 0x3c7   : > { %18431 = vst [vmem:[#allocation215_spill] sm:$0xff] %v12921_v34  ;;  %v3519_v39 = vsel %vm3293_vm2, %v12921_v34, -inf  ;;  %v12983_v40 = vadd.f32 %v12269_v43, %v3087_v21 }
 0x3c8   : > { %v12908_v54 = vpop.xlane.xlu2 %3379  ;;  %v12913_v15 = vpop.xlane.xlu1 %3385  ;;  %v12935_v7 = vadd.f32 %v12170_v10, %v3081_v47  ;;  %v3085_v10 = vadd.f32 %v12808_v53, %v2186_v41  ;;  %v3086_v47 = vadd.f32 %v12823_v16, %v2189_v17 }
 0x3c9   : > { %v12915_v8 = vpop.xlane.xlu0 %3382  ;;  %18438 = vst [vmem:[#allocation222_spill] sm:$0xff] %v12983_v40 }
 0x3ca   : > { %18432 = vst [vmem:[#allocation216_spill] sm:$0xff] %v12935_v7  ;;  %v3522_v34 = vsel %vm3293_vm2, %v12935_v7, -inf  ;;  %v12966_v41 = vadd.f32 %v12259_v37, %v3085_v10  ;;  %v12969_v17 = vadd.f32 %v12264_v31, %v3086_v47 }
 0x3cc   : > { %18436 = vst [vmem:[#allocation220_spill] sm:$0xff] %v12966_v41  ;;  %v3537_v37 = vsel %vm3293_vm2, %v12969_v17, -inf }
 0x3cd   : > { %3514 = vmax.xlane.f32.xlu2 %v3513_v19  ;;  %3520 = vmax.xlane.f32.xlu1 %v3519_v39  ;;  %v12945_v19 = vadd.f32 %v12216_v44, %v3083_v26  ;;  %v2291_v39 = vpop.f32.mrf.mxu2  ;;  %18437 = vst [vmem:[#allocation221_spill] sm:$0xff] %v12969_v17 }
 0x3ce   : > { %3517 = vmax.xlane.f32.xlu0 %v3516_v48  ;;  %v3084_v48 = vadd.f32 %v12823_v16, %v2154_v0 }
 0x3cf   : > { %18434 = vst [vmem:[#allocation218_spill] sm:$0xff] %v12945_v19  ;;  %v3528_v20 = vsel %vm3293_vm2, %v12945_v19, -inf  ;;  %v3534_v19 = vsel %vm3293_vm2, %v12966_v41, -inf }
 0x3d0   : > { %v12932_v6 = vpop.xlane.xlu2 %3388  ;;  %v12937_v25 = vpop.xlane.xlu1 %3394  ;;  %v12959_v26 = vadd.f32 %v12221_v29, %v3084_v48  ;;  %v3089_v29 = vadd.f32 %v12808_v53, %v2256_v52  ;;  %v3088_v48 = vadd.f32 %v12823_v16, %v2224_v46 }
 0x3d1   : > { %v12939_v12 = vpop.xlane.xlu0 %3391 }
 0x3d2   : > { %18435 = vst [vmem:[#allocation219_spill] sm:$0xff] %v12959_v26  ;;  %v12990_v46 = vadd.f32 %v12312_v58, %v3088_v48 }
 0x3d4   : > { %18439 = vst [vmem:[#allocation223_spill] sm:$0xff] %v12990_v46  ;;  %v3543_v21 = vsel %vm3293_vm2, %v12990_v46, -inf }
 0x3d5   : > { %3523 = vmax.xlane.f32.xlu2 %v3522_v34  ;;  %3529 = vmax.xlane.f32.xlu1 %v3528_v20  ;;  %v2259_v34 = vpop.f32.mrf.mxu1  ;;  %v3531_v20 = vsel %vm3293_vm2, %v12959_v26, -inf  ;;  %v2294_v31 = vpop.f32.mrf.mxu2 }
 0x3d6   : > { %3526 = vmax.xlane.f32.xlu0 %v3525_v2  ;;  %v2326_v2 = vpop.f32.mrf.mxu3  ;;  %v3090_v41 = vadd.f32 %v12823_v16, %v2259_v34  ;;  %v3092_v43 = vadd.f32 %v12823_v16, %v2294_v31 }
 0x3d7   : > { %v3093_v46 = vadd.f32 %v12808_v53, %v2326_v2 }
 0x3d8   : > { %v12956_v44 = vpop.xlane.xlu2 %3397  ;;  %v12961_v0 = vpop.xlane.xlu1 %3403 }
 0x3d9   : > { %v12963_v33 = vpop.xlane.xlu0 %3400  ;;  %v13031_v2 = vadd.f32 %v12374_v51, %v3093_v46  ;;  %v2466_v51 = vpop.f32.mrf.mxu0 }
 0x3db   : > { %18444 = vst [vmem:[#allocation228_spill] sm:$0xff] %v13031_v2 }
 0x3dd   : > { %3532 = vmax.xlane.f32.xlu2 %v3531_v20  ;;  %3538 = vmax.xlane.f32.xlu1 %v3537_v37  ;;  %v12993_v20 = vadd.f32 %v12317_v4, %v3089_v29  ;;  %v3091_v37 = vadd.f32 %v12808_v53, %v2291_v39  ;;  %v2361_v17 = vpop.f32.mrf.mxu1  ;;  %v2396_v4 = vpop.f32.mrf.mxu2  ;;  %v13007_v29 = vadd.f32 %v12322_v23, %v3090_v41 }
 0x3de   : > { %3535 = vmax.xlane.f32.xlu0 %v3534_v19  ;;  %v3540_v19 = vsel %vm3293_vm2, %v12983_v40, -inf  ;;  %v2329_v48 = vpop.f32.mrf.mxu3 }
 0x3df   : > { %18440 = vst [vmem:[#allocation224_spill] sm:$0xff] %v12993_v20  ;;  %v3546_v58 = vsel %vm3293_vm2, %v12993_v20, -inf  ;;  %v13014_v31 = vadd.f32 %v12362_v13, %v3091_v37  ;;  %v3094_v23 = vadd.f32 %v12823_v16, %v2329_v48 }
 0x3e0   : > { %v12980_v10 = vpop.xlane.xlu2 %3406  ;;  %v12985_v47 = vpop.xlane.xlu1 %3412  ;;  %18441 = vst [vmem:[#allocation225_spill] sm:$0xff] %v13007_v29 }
 0x3e1   : > { %v12987_v52 = vpop.xlane.xlu0 %3409  ;;  %18442 = vst [vmem:[#allocation226_spill] sm:$0xff] %v13014_v31  ;;  %v3552_v41 = vsel %vm3293_vm2, %v13014_v31, -inf  ;;  %v13038_v48 = vadd.f32 %v12413_v18, %v3094_v23 }
 0x3e3   : > { %18445 = vst [vmem:[#allocation229_spill] sm:$0xff] %v13038_v48  ;;  %v3561_v20 = vsel %vm3293_vm2, %v13038_v48, -inf }
 0x3e5   : > { %3541 = vmax.xlane.f32.xlu2 %v3540_v19  ;;  %3547 = vmax.xlane.f32.xlu1 %v3546_v58  ;;  %v13017_v19 = vadd.f32 %v12369_v61, %v3092_v43  ;;  %v3095_v58 = vadd.f32 %v12808_v53, %v2361_v17  ;;  %v2364_v61 = vpop.f32.mrf.mxu1  ;;  %v2399_v31 = vpop.f32.mrf.mxu2 }
 0x3e6   : > { %3544 = vmax.xlane.f32.xlu0 %v3543_v21  ;;  %v3549_v21 = vsel %vm3293_vm2, %v13007_v29, -inf  ;;  %v2431_v37 = vpop.f32.mrf.mxu3  ;;  %v3098_v46 = vadd.f32 %v12823_v16, %v2399_v31 }
 0x3e7   : > { %18443 = vst [vmem:[#allocation227_spill] sm:$0xff] %v13017_v19  ;;  %v3555_v13 = vsel %vm3293_vm2, %v13017_v19, -inf  ;;  %v3097_v19 = vadd.f32 %v12808_v53, %v2396_v4  ;;  %v3099_v48 = vadd.f32 %v12808_v53, %v2431_v37 }
 0x3e8   : > { %v13004_v34 = vpop.xlane.xlu2 %3415  ;;  %v13009_v39 = vpop.xlane.xlu1 %3421 }
 0x3e9   : > { %v13011_v40 = vpop.xlane.xlu0 %3418  ;;  %v13062_v31 = vadd.f32 %v12463_v32, %v3097_v19  ;;  %v2469_v19 = vpop.f32.mrf.mxu0  ;;  %v13084_v53 = vadd.f32 %v12473_v62, %v3099_v48 }
 0x3eb   : > { %18448 = vst [vmem:[#allocation232_spill] sm:$0xff] %v13062_v31  ;;  %v3570_v32 = vsel %vm3293_vm2, %v13062_v31, -inf }
 0x3ec   : > { %18450 = vst [vmem:[#allocation234_spill] sm:$0xff] %v13084_v53 }
 0x3ed   : > { %3550 = vmax.xlane.f32.xlu2 %v3549_v21  ;;  %3556 = vmax.xlane.f32.xlu1 %v3555_v13  ;;  %v13041_v21 = vadd.f32 %v12420_v1, %v3095_v58  ;;  %v3558_v13 = vsel %vm3293_vm2, %v13031_v2, -inf  ;;  %v2501_v1 = vpop.f32.mrf.mxu1 }
 0x3ee   : > { %3553 = vmax.xlane.f32.xlu0 %v3552_v41  ;;  %v3096_v41 = vadd.f32 %v12823_v16, %v2364_v61 }
 0x3ef   : > { %18446 = vst [vmem:[#allocation230_spill] sm:$0xff] %v13041_v21  ;;  %v3564_v18 = vsel %vm3293_vm2, %v13041_v21, -inf }
 0x3f0   : > { %v13028_v43 = vpop.xlane.xlu2 %3424  ;;  %v13033_v29 = vpop.xlane.xlu1 %3430  ;;  %v13055_v23 = vadd.f32 %v12425_v28, %v3096_v41 }
 0x3f1   : > { %v13035_v17 = vpop.xlane.xlu0 %3427 }
 0x3f2   : > { %18447 = vst [vmem:[#allocation231_spill] sm:$0xff] %v13055_v23  ;;  %v3567_v28 = vsel %vm3293_vm2, %v13055_v23, -inf }
 0x3f5   : > { %3559 = vmax.xlane.f32.xlu2 %v3558_v13  ;;  %3565 = vmax.xlane.f32.xlu1 %v3564_v18  ;;  %v13065_v13 = vadd.f32 %v12468_v56, %v3098_v46  ;;  %v2434_v18 = vpop.f32.mrf.mxu3  ;;  %v2536_v46 = vpop.f32.mrf.mxu2 }
 0x3f6   : > { %3562 = vmax.xlane.f32.xlu0 %v3561_v20  ;;  %v13070_v20 = vld [vmem:[%s17650_s5 + $0x30] sm:$0xff]  ;;  %v3100_v21 = vadd.f32 %v12823_v16, %v2434_v18  ;;  %v13089_v16 = vld [vmem:[%s17650_s5 + $0x38] sm:$0xff]  ;;  %v2504_v62 = vpop.f32.mrf.mxu1 }
 0x3f7   : > { %18449 = vst [vmem:[#allocation233_spill] sm:$0xff] %v13065_v13  ;;  %v3101_v41 = vadd.f32 %v13070_v20, %v2466_v51  ;;  %v3573_v56 = vsel %vm3293_vm2, %v13065_v13, -inf  ;;  %v3102_v48 = vadd.f32 %v13089_v16, %v2469_v19  ;;  %v3103_v13 = vadd.f32 %v13070_v20, %v2501_v1  ;;  %v10714_v19 = vld [vmem:[%s17651_s6 + $0x8] sm:$0xff] }
 0x3f8   : > { %v13052_v58 = vpop.xlane.xlu2 %3433  ;;  %v13057_v61 = vpop.xlane.xlu1 %3439  ;;  %v13096_v18 = vadd.f32 %v12523_v35, %v3100_v21  ;;  %v3104_v31 = vadd.f32 %v13089_v16, %v2504_v62 }
 0x3f9   : > { %v13059_v4 = vpop.xlane.xlu0 %3436  ;;  %v13117_v1 = vadd.f32 %v10714_v19, %v3102_v48  ;;  %v3105_v48 = vadd.f32 %v13070_v20, %v2536_v46  ;;  %v10717_v46 = vld [vmem:[%s17651_s6 + $0x20] sm:$0xff] }
 0x3fa   : > { %18451 = vst [vmem:[#allocation235_spill] sm:$0xff] %v13096_v18  ;;  %v3579_v35 = vsel %vm3293_vm2, %v13096_v18, -inf  ;;  %v10715_v18 = vld [vmem:[%s17651_s6 + $0x10] sm:$0xff] }
 0x3fb   : > { %18453 = vst [vmem:[#allocation237_spill] sm:$0xff] %v13117_v1  ;;  %v3585_v19 = vsel %vm3293_vm2, %v13117_v1, -inf }
 0x3fd   : > { %3568 = vmax.xlane.f32.xlu2 %v3567_v28  ;;  %3574 = vmax.xlane.f32.xlu1 %v3573_v56  ;;  %v10713_v28 = vld [vmem:[%s17651_s6] sm:$0xff]  ;;  %v3576_v56 = vsel %vm3293_vm2, %v13084_v53, -inf  ;;  %v2571_v23 = vpop.f32.mrf.mxu3  ;;  %v2539_v53 = vpop.f32.mrf.mxu2 }
 0x3fe   : > { %3571 = vmax.xlane.f32.xlu0 %v3570_v32  ;;  %v13101_v32 = vadd.f32 %v10713_v28, %v3101_v41  ;;  %v2606_v41 = vpop.f32.mrf.mxu0  ;;  %v3106_v26 = vadd.f32 %v13089_v16, %v2539_v53  ;;  %v3107_v7 = vadd.f32 %v13070_v20, %v2571_v23  ;;  %v13147_v53 = vadd.f32 %v10717_v46, %v3105_v48 }
 0x3ff   : > { %v3109_v45 = vadd.f32 %v13070_v20, %v2606_v41 }
 0x400   : > { %v13081_v2 = vpop.xlane.xlu2 %3442  ;;  %v13091_v37 = vpop.xlane.xlu1 %3448  ;;  %18452 = vst [vmem:[#allocation236_spill] sm:$0xff] %v13101_v32  ;;  %v3582_v21 = vsel %vm3293_vm2, %v13101_v32, -inf  ;;  %v13126_v32 = vadd.f32 %v10715_v18, %v3103_v13  ;;  %v3594_v46 = vsel %vm3293_vm2, %v13147_v53, -inf }
 0x401   : > { %v13093_v51 = vpop.xlane.xlu0 %3445  ;;  %18456 = vst [vmem:[#allocation240_spill] sm:$0xff] %v13147_v53 }
 0x402   : > { %18454 = vst [vmem:[#allocation238_spill] sm:$0xff] %v13126_v32  ;;  %v3588_v13 = vsel %vm3293_vm2, %v13126_v32, -inf }
 0x405   : > { %3577 = vmax.xlane.f32.xlu2 %v3576_v56  ;;  %3583 = vmax.xlane.f32.xlu1 %v3582_v21 }
 0x406   : > { %3580 = vmax.xlane.f32.xlu0 %v3579_v35  ;;  %v10716_v35 = vld [vmem:[%s17651_s6 + $0x18] sm:$0xff]  ;;  %v2609_v1 = vpop.f32.mrf.mxu0 }
 0x407   : > { %v13131_v21 = vadd.f32 %v10716_v35, %v3104_v31  ;;  %v2641_v31 = vpop.f32.mrf.mxu1  ;;  %v2574_v35 = vpop.f32.mrf.mxu3 }
 0x408   : > { %v13112_v28 = vpop.xlane.xlu2 %3451  ;;  %v13119_v62 = vpop.xlane.xlu1 %3457  ;;  %v3108_v48 = vadd.f32 %v13089_v16, %v2574_v35  ;;  %v10720_v35 = vld [vmem:[%s17651_s6 + $0x38] sm:$0xff] }
 0x409   : > { %v13121_v56 = vpop.xlane.xlu0 %3454  ;;  %18455 = vst [vmem:[#allocation239_spill] sm:$0xff] %v13131_v21  ;;  %v3591_v18 = vsel %vm3293_vm2, %v13131_v21, -inf  ;;  %v10718_v21 = vld [vmem:[%s17651_s6 + $0x28] sm:$0xff] }
 0x40a   : > { %v13177_v41 = vadd.f32 %v10720_v35, %v3108_v48  ;;  %v3111_v48 = vadd.f32 %v13070_v20, %v2641_v31  ;;  %v10723_v31 = vld [vmem:[%s17651_s6 + $0x50] sm:$0xff] }
 0x40c   : > { %18462 = vst [vmem:[#allocation246_spill] sm:$0xff] %v13177_v41  ;;  %v3603_v35 = vsel %vm3293_vm2, %v13177_v41, -inf }
 0x40d   : > { %3586 = vmax.xlane.f32.xlu2 %v3585_v19  ;;  %3592 = vmax.xlane.f32.xlu1 %v3591_v18  ;;  %v10719_v18 = vld [vmem:[%s17651_s6 + $0x30] sm:$0xff] }
 0x40e   : > { %3589 = vmax.xlane.f32.xlu0 %v3588_v13  ;;  %v13156_v13 = vadd.f32 %v10718_v21, %v3106_v26  ;;  %v13161_v32 = vadd.f32 %v10719_v18, %v3107_v7 }
 0x40f   : > { %v2711_v7 = vpop.f32.mrf.mxu3  ;;  %v2644_v53 = vpop.f32.mrf.mxu1 }
 0x410   : > { %v13142_v60 = vpop.xlane.xlu2 %3460  ;;  %v13149_v23 = vpop.xlane.xlu1 %3466  ;;  %18459 = vst [vmem:[#allocation243_spill] sm:$0xff] %v13156_v13  ;;  %v3597_v26 = vsel %vm3293_vm2, %v13156_v13, -inf  ;;  %v3600_v21 = vsel %vm3293_vm2, %v13161_v32, -inf }
 0x411   : > { %18457 = vst [vmem:[#allocation241_spill] sm:$0xff] %v13149_v23  ;;  %v13151_v19 = vpop.xlane.xlu0 %3463  ;;  %v2676_v23 = vpop.f32.mrf.mxu2 }
 0x412   : > { %18458 = vst [vmem:[#allocation242_spill] sm:$0xff] %v13151_v19  ;;  %v3110_v19 = vadd.f32 %v13089_v16, %v2609_v1 }
 0x413   : > { %18460 = vst [vmem:[#allocation244_spill] sm:$0xff] %v13161_v32  ;;  %v10721_v32 = vld [vmem:[%s17651_s6 + $0x40] sm:$0xff] }
 0x414   : > { %v13186_v13 = vadd.f32 %v10721_v32, %v3109_v45 }
 0x415   : > { %3595 = vmax.xlane.f32.xlu2 %v3594_v46  ;;  %3601 = vmax.xlane.f32.xlu1 %v3600_v21 }
 0x416   : > { %3598 = vmax.xlane.f32.xlu0 %v3597_v26  ;;  %18465 = vst [vmem:[#allocation249_spill] sm:$0xff] %v13186_v13  ;;  %v10722_v26 = vld [vmem:[%s17651_s6 + $0x48] sm:$0xff]  ;;  %v3606_v45 = vsel %vm3293_vm2, %v13186_v13, -inf }
 0x417   : > { %v13191_v21 = vadd.f32 %v10722_v26, %v3110_v19  ;;  %v2746_v19 = vpop.f32.mrf.mxu0  ;;  %v2714_v41 = vpop.f32.mrf.mxu3 }
 0x418   : > { %v13172_v18 = vpop.xlane.xlu2 %3469  ;;  %v13179_v1 = vpop.xlane.xlu1 %3475 }
 0x419   : > { %18461 = vst [vmem:[#allocation245_spill] sm:$0xff] %v13172_v18  ;;  %v13181_v46 = vpop.xlane.xlu0 %3472  ;;  %v3609_v32 = vsel %vm3293_vm2, %v13191_v21, -inf  ;;  %v2679_v26 = vpop.f32.mrf.mxu2 }
 0x41a   : > { %18463 = vst [vmem:[#allocation247_spill] sm:$0xff] %v13179_v1  ;;  %v3113_v1 = vadd.f32 %v13070_v20, %v2676_v23 }
 0x41b   : > { %18464 = vst [vmem:[#allocation248_spill] sm:$0xff] %v13181_v46  ;;  %v3112_v46 = vadd.f32 %v13089_v16, %v2644_v53  ;;  %v13207_v53 = vadd.f32 %v10723_v31, %v3111_v48  ;;  %v3114_v48 = vadd.f32 %v13089_v16, %v2679_v26  ;;  %v10726_v26 = vld [vmem:[%s17651_s6 + $0x68] sm:$0xff] }
 0x41c   : > { %18466 = vst [vmem:[#allocation250_spill] sm:$0xff] %v13191_v21  ;;  %v10724_v21 = vld [vmem:[%s17651_s6 + $0x58] sm:$0xff] }
 0x41d   : > { %3604 = vmax.xlane.f32.xlu2 %v3603_v35  ;;  %3610 = vmax.xlane.f32.xlu1 %v3609_v32  ;;  %18468 = vst [vmem:[#allocation252_spill] sm:$0xff] %v13207_v53  ;;  %v10725_v32 = vld [vmem:[%s17651_s6 + $0x60] sm:$0xff]  ;;  %v3612_v31 = vsel %vm3293_vm2, %v13207_v53, -inf }
 0x41e   : > { %3607 = vmax.xlane.f32.xlu0 %v3606_v45  ;;  %v13216_v45 = vadd.f32 %v10724_v21, %v3112_v46  ;;  %v13221_v13 = vadd.f32 %v10725_v32, %v3113_v1 }
 0x420   : > { %v13202_v18 = vpop.xlane.xlu2 %3478  ;;  %v13209_v23 = vpop.xlane.xlu1 %3484  ;;  %18471 = vst [vmem:[#allocation255_spill] sm:$0xff] %v13216_v45  ;;  %v3615_v46 = vsel %vm3293_vm2, %v13216_v45, -inf  ;;  %v3618_v21 = vsel %vm3293_vm2, %v13221_v13, -inf }
 0x421   : > { %18467 = vst [vmem:[#allocation251_spill] sm:$0xff] %v13202_v18  ;;  %v13211_v35 = vpop.xlane.xlu0 %3481  ;;  %v3116_v18 = vadd.f32 %v13089_v16, %v2714_v41  ;;  %v2816_v1 = vpop.f32.mrf.mxu2 }
 0x422   : > { %18469 = vst [vmem:[#allocation253_spill] sm:$0xff] %v13209_v23  ;;  %v2781_v23 = vpop.f32.mrf.mxu1 }
 0x423   : > { %18470 = vst [vmem:[#allocation254_spill] sm:$0xff] %v13211_v35  ;;  %v3115_v35 = vadd.f32 %v13070_v20, %v2711_v7  ;;  %v13237_v7 = vadd.f32 %v10726_v26, %v3114_v48  ;;  %v3117_v48 = vadd.f32 %v13070_v20, %v2746_v19  ;;  %v10729_v19 = vld [vmem:[%s17651_s6 + $0x80] sm:$0xff] }
 0x424   : > { %18472 = vst [vmem:[#allocation256_spill] sm:$0xff] %v13221_v13  ;;  %v2749_v13 = vpop.f32.mrf.mxu0 }
 0x425   : > { %3613 = vmax.xlane.f32.xlu2 %v3612_v31  ;;  %3619 = vmax.xlane.f32.xlu1 %v3618_v21  ;;  %18474 = vst [vmem:[#allocation258_spill] sm:$0xff] %v13237_v7  ;;  %v10727_v31 = vld [vmem:[%s17651_s6 + $0x70] sm:$0xff]  ;;  %v3621_v26 = vsel %vm3293_vm2, %v13237_v7, -inf }
 0x426   : > { %3616 = vmax.xlane.f32.xlu0 %v3615_v46  ;;  %v13246_v45 = vadd.f32 %v10727_v31, %v3115_v35  ;;  %v10728_v46 = vld [vmem:[%s17651_s6 + $0x78] sm:$0xff] }
 0x427   : > { %v13251_v21 = vadd.f32 %v10728_v46, %v3116_v18  ;;  %v2851_v46 = vpop.f32.mrf.mxu3 }
 0x428   : > { %v13232_v32 = vpop.xlane.xlu2 %3487  ;;  %v13239_v53 = vpop.xlane.xlu1 %3493  ;;  %18477 = vst [vmem:[#allocation261_spill] sm:$0xff] %v13246_v45  ;;  %v3624_v35 = vsel %vm3293_vm2, %v13246_v45, -inf }
 0x429   : > { %18473 = vst [vmem:[#allocation257_spill] sm:$0xff] %v13232_v32  ;;  %v13241_v41 = vpop.xlane.xlu0 %3490  ;;  %v3627_v31 = vsel %vm3293_vm2, %v13251_v21, -inf  ;;  %v2819_v7 = vpop.f32.mrf.mxu2 }
 0x42a   : > { %18475 = vst [vmem:[#allocation259_spill] sm:$0xff] %v13239_v53  ;;  %v3119_v53 = vadd.f32 %v13070_v20, %v2781_v23  ;;  %v2784_v18 = vpop.f32.mrf.mxu1 }
 0x42b   : > { %18476 = vst [vmem:[#allocation260_spill] sm:$0xff] %v13241_v41  ;;  %v3118_v41 = vadd.f32 %v13089_v16, %v2749_v13  ;;  %v13267_v13 = vadd.f32 %v10729_v19, %v3117_v48  ;;  %v3120_v48 = vadd.f32 %v13089_v16, %v2784_v18  ;;  %v10732_v18 = vld [vmem:[%s17651_s6 + $0x98] sm:$0xff] }
 0x42c   : > { %18478 = vst [vmem:[#allocation262_spill] sm:$0xff] %v13251_v21  ;;  %v10730_v21 = vld [vmem:[%s17651_s6 + $0x88] sm:$0xff] }
 0x42d   : > { %3622 = vmax.xlane.f32.xlu2 %v3621_v26  ;;  %3628 = vmax.xlane.f32.xlu1 %v3627_v31  ;;  %18480 = vst [vmem:[#allocation264_spill] sm:$0xff] %v13267_v13  ;;  %v10731_v31 = vld [vmem:[%s17651_s6 + $0x90] sm:$0xff]  ;;  %v3630_v19 = vsel %vm3293_vm2, %v13267_v13, -inf }
 0x42e   : > { %3625 = vmax.xlane.f32.xlu0 %v3624_v35  ;;  %v13276_v35 = vadd.f32 %v10730_v21, %v3118_v41  ;;  %v13281_v45 = vadd.f32 %v10731_v31, %v3119_v53 }
 0x430   : > { %v13262_v32 = vpop.xlane.xlu2 %3496  ;;  %v13269_v23 = vpop.xlane.xlu1 %3502  ;;  %18483 = vst [vmem:[#allocation267_spill] sm:$0xff] %v13276_v35  ;;  %v3633_v41 = vsel %vm3293_vm2, %v13276_v35, -inf  ;;  %v3636_v21 = vsel %vm3293_vm2, %v13281_v45, -inf }
 0x431   : > { %18479 = vst [vmem:[#allocation263_spill] sm:$0xff] %v13262_v32  ;;  %v13271_v26 = vpop.xlane.xlu0 %3499  ;;  %v3122_v32 = vadd.f32 %v13089_v16, %v2819_v7 }
 0x432   : > { %18481 = vst [vmem:[#allocation265_spill] sm:$0xff] %v13269_v23  ;;  %v2886_v23 = vpop.f32.mrf.mxu0  ;;  %v2921_v53 = vpop.f32.mrf.mxu1 }
 0x433   : > { %18482 = vst [vmem:[#allocation266_spill] sm:$0xff] %v13271_v26  ;;  %v3121_v26 = vadd.f32 %v13070_v20, %v2816_v1  ;;  %v13297_v1 = vadd.f32 %v10732_v18, %v3120_v48  ;;  %v3123_v48 = vadd.f32 %v13070_v20, %v2851_v46  ;;  %v10735_v46 = vld [vmem:[%s17651_s6 + $0xb0] sm:$0xff] }
 0x434   : > { %18484 = vst [vmem:[#allocation268_spill] sm:$0xff] %v13281_v45  ;;  %v2854_v45 = vpop.f32.mrf.mxu3 }
 0x435   : > { %3631 = vmax.xlane.f32.xlu2 %v3630_v19  ;;  %3637 = vmax.xlane.f32.xlu1 %v3636_v21  ;;  %18486 = vst [vmem:[#allocation270_spill] sm:$0xff] %v13297_v1  ;;  %v10733_v19 = vld [vmem:[%s17651_s6 + $0xa0] sm:$0xff]  ;;  %v3639_v18 = vsel %vm3293_vm2, %v13297_v1, -inf }
 0x436   : > { %3634 = vmax.xlane.f32.xlu0 %v3633_v41  ;;  %v13306_v35 = vadd.f32 %v10733_v19, %v3121_v26  ;;  %v10734_v41 = vld [vmem:[%s17651_s6 + $0xa8] sm:$0xff] }
 0x437   : > { %v13311_v21 = vadd.f32 %v10734_v41, %v3122_v32  ;;  %v2956_v41 = vpop.f32.mrf.mxu2 }
 0x438   : > { %v13292_v31 = vpop.xlane.xlu2 %3505  ;;  %v13299_v13 = vpop.xlane.xlu1 %3511  ;;  %18489 = vst [vmem:[#allocation273_spill] sm:$0xff] %v13306_v35  ;;  %v3642_v26 = vsel %vm3293_vm2, %v13306_v35, -inf }
 0x439   : > { %18485 = vst [vmem:[#allocation269_spill] sm:$0xff] %v13292_v31  ;;  %v13301_v7 = vpop.xlane.xlu0 %3508  ;;  %v3645_v19 = vsel %vm3293_vm2, %v13311_v21, -inf }
 0x43a   : > { %18487 = vst [vmem:[#allocation271_spill] sm:$0xff] %v13299_v13  ;;  %v3124_v13 = vadd.f32 %v13089_v16, %v2854_v45  ;;  %v2889_v32 = vpop.f32.mrf.mxu0  ;;  %v2924_v35 = vpop.f32.mrf.mxu1 }
 0x43b   : > { %18488 = vst [vmem:[#allocation272_spill] sm:$0xff] %v13301_v7  ;;  %v3125_v7 = vadd.f32 %v13070_v20, %v2886_v23  ;;  %v13327_v23 = vadd.f32 %v10735_v46, %v3123_v48  ;;  %v3126_v48 = vadd.f32 %v13089_v16, %v2889_v32  ;;  %v10738_v32 = vld [vmem:[%s17651_s6 + $0xc8] sm:$0xff] }
 0x43c   : > { %18490 = vst [vmem:[#allocation274_spill] sm:$0xff] %v13311_v21  ;;  %v10736_v21 = vld [vmem:[%s17651_s6 + $0xb8] sm:$0xff] }
 0x43d   : > { %3640 = vmax.xlane.f32.xlu2 %v3639_v18  ;;  %3646 = vmax.xlane.f32.xlu1 %v3645_v19  ;;  %18492 = vst [vmem:[#allocation276_spill] sm:$0xff] %v13327_v23  ;;  %v10737_v19 = vld [vmem:[%s17651_s6 + $0xc0] sm:$0xff]  ;;  %v3648_v46 = vsel %vm3293_vm2, %v13327_v23, -inf }
 0x43e   : > { %3643 = vmax.xlane.f32.xlu0 %v3642_v26  ;;  %v13336_v26 = vadd.f32 %v10736_v21, %v3124_v13  ;;  %v13341_v1 = vadd.f32 %v10737_v19, %v3125_v7  ;;  %v13357_v19 = vadd.f32 %v10738_v32, %v3126_v48  ;;  %v18502_v48 = vld [vmem:[#allocation131_spill] sm:$0xff] }
 0x43f   : > { %v2959_v23 = vpop.f32.mrf.mxu2  ;;  %v3678_v32 = vsub.f32 %v18502_v48, %v12643_v27 }
 0x440   : > { %v13322_v31 = vpop.xlane.xlu2 %3514  ;;  %v13329_v45 = vpop.xlane.xlu1 %3520  ;;  %18495 = vst [vmem:[#allocation279_spill] sm:$0xff] %v13336_v26  ;;  %v3651_v13 = vsel %vm3293_vm2, %v13336_v26, -inf  ;;  %v3654_v21 = vsel %vm3293_vm2, %v13341_v1, -inf }
 0x441   : > { %18491 = vst [vmem:[#allocation275_spill] sm:$0xff] %v13322_v31  ;;  %v13331_v18 = vpop.xlane.xlu0 %3517  ;;  %v2991_v31 = vpop.f32.mrf.mxu3  ;;  %v3806_v27 = vmul.f32 1.442695, %v3678_v32 }
 0x442   : > { %18493 = vst [vmem:[#allocation277_spill] sm:$0xff] %v13329_v45  ;;  %v3128_v45 = vadd.f32 %v13089_v16, %v2924_v35 }
 0x443   : > { %18494 = vst [vmem:[#allocation278_spill] sm:$0xff] %v13331_v18  ;;  %v3127_v18 = vadd.f32 %v13070_v20, %v2921_v53  ;;  %10201 = vpow2.f32 %v3806_v27 }
 0x444   : > { %18496 = vst [vmem:[#allocation280_spill] sm:$0xff] %v13341_v1  ;;  %v3679_v1 = vsub.f32 %v12037_v36, %v12673_v63 }
 0x445   : > { %3649 = vmax.xlane.f32.xlu2 %v3648_v46  ;;  %3655 = vmax.xlane.f32.xlu1 %v3654_v21  ;;  %18497 = vst [vmem:[#allocation281_spill] sm:$0xff] %v13357_v19  ;;  %v10739_v46 = vld [vmem:[%s17651_s6 + $0xd0] sm:$0xff] }
 0x446   : > { %3652 = vmax.xlane.f32.xlu0 %v3651_v13  ;;  %v13366_v26 = vadd.f32 %v10739_v46, %v3127_v18  ;;  %v10740_v13 = vld [vmem:[%s17651_s6 + $0xd8] sm:$0xff]  ;;  %v3130_v18 = vadd.f32 %v13089_v16, %v2959_v23  ;;  %v3131_v46 = vadd.f32 %v13070_v20, %v2991_v31  ;;  %v3808_v36 = vmul.f32 1.442695, %v3679_v1  ;;  %v10741_v23 = vld [vmem:[%s17651_s6 + $0xe0] sm:$0xff]  ;;  %v10743_v1 = vld [vmem:[%s17651_s6 + $0xf0] sm:$0xff] }
 0x447   : > { %v13371_v21 = vadd.f32 %v10740_v13, %v3128_v45 }
 0x448   : > { %v13352_v7 = vpop.xlane.xlu2 %3523  ;;  %v13359_v53 = vpop.xlane.xlu1 %3529  ;;  %18500 = vst [vmem:[#allocation284_spill] sm:$0xff] %v13366_v26  ;;  %v3660_v45 = vsel %vm3293_vm2, %v13366_v26, -inf  ;;  %v13405_v32 = vadd.f32 %v10743_v1, %v3131_v46  ;;  %10203 = vpow2.f32 %v3808_v36  ;;  %v18508_v26 = vld [vmem:[#allocation136_spill] sm:$0xff] }
 0x449   : > { %18498 = vst [vmem:[#allocation282_spill] sm:$0xff] %v13359_v53  ;;  %v13361_v35 = vpop.xlane.xlu0 %3526  ;;  %v3657_v53 = vsel %vm3293_vm2, %v13357_v19, -inf  ;;  %v3663_v13 = vsel %vm3293_vm2, %v13371_v21, -inf  ;;  %v2994_v63 = vpop.f32.mrf.mxu3  ;;  %v3682_v19 = vsub.f32 %v18508_v26, %v12694_v5  ;;  %v10744_v5 = vld [vmem:[%s17651_s6 + $0xf8] sm:$0xff] }
 0x44a   : > { %18499 = vst [vmem:[#allocation283_spill] sm:$0xff] %v13361_v35  ;;  %v3129_v35 = vadd.f32 %v13070_v20, %v2956_v41  ;;  %v13427_v26 = vpop.eup %10201 }
 0x44b   : > { %18501 = vst [vmem:[#allocation285_spill] sm:$0xff] %v13371_v21  ;;  %v3814_v36 = vmul.f32 1.442695, %v3682_v19 }
 0x44c   : > { %v13391_v48 = vadd.f32 %v10741_v23, %v3129_v35  ;;  %18505 = vst [vmem:[#allocation287_spill] sm:$0xff] %v13405_v32  ;;  %v18507_v23 = vld [vmem:[#allocation135_spill] sm:$0xff] }
 0x44d   : > { %3658 = vmax.xlane.f32.xlu2 %v3657_v53  ;;  %3664 = vmax.xlane.f32.xlu1 %v3663_v13  ;;  %v10742_v53 = vld [vmem:[%s17651_s6 + $0xe8] sm:$0xff]  ;;  %v18506_v13 = vld [vmem:[#allocation134_spill] sm:$0xff]  ;;  %v3680_v21 = vsub.f32 %v18507_v23, %v12668_v3  ;;  %18510 = vst [vmem:[#allocation135_spill] sm:$0xff] %v13427_v26 }
 0x44e   : > { %3661 = vmax.xlane.f32.xlu0 %v3660_v45  ;;  %18503 = vst [vmem:[#allocation131_spill] sm:$0xff] %v13391_v48  ;;  %v13400_v45 = vadd.f32 %v10742_v53, %v3130_v18  ;;  %v3681_v35 = vsub.f32 %v18506_v13, %v12666_v49  ;;  %v3132_v18 = vadd.f32 %v13089_v16, %v2994_v63  ;;  %v3666_v53 = vsel %vm3293_vm2, %v13391_v48, -inf  ;;  %v13433_v23 = vpop.eup %10203  ;;  %v18526_v48 = vld [vmem:[#allocation142_spill] sm:$0xff] }
 0x44f   : > { %v3672_v49 = vsel %vm3293_vm2, %v13405_v32, -inf  ;;  %v3810_v3 = vmul.f32 1.442695, %v3680_v21  ;;  %18511 = vst [vmem:[#allocation136_spill] sm:$0xff] %v13433_v23  ;;  %v18512_v21 = vld [vmem:[#allocation137_spill] sm:$0xff]  ;;  %v4062_v32 = vsel %vm3293_vm2, %v13427_v26, 0.0 }
 0x450   : > { %v13386_v41 = vpop.xlane.xlu2 %3532  ;;  %v13393_v20 = vpop.xlane.xlu1 %3538  ;;  %18504 = vst [vmem:[#allocation286_spill] sm:$0xff] %v13400_v45  ;;  %v3669_v46 = vsel %vm3293_vm2, %v13400_v45, -inf  ;;  %v3812_v27 = vmul.f32 1.442695, %v3681_v35  ;;  %v13425_v16 = vadd.f32 %v10744_v5, %v3132_v18  ;;  %v3684_v19 = vsub.f32 %v18512_v21, %v12696_v14  ;;  %v18513_v35 = vld [vmem:[#allocation179_spill] sm:$0xff] }
 0x451   : > { %v13395_v31 = vpop.xlane.xlu0 %3535  ;;  %v18515_v18 = vld [vmem:[#allocation139_spill] sm:$0xff] }
 0x452   : > { %18509 = vst [vmem:[#allocation134_spill] sm:$0xff] %v13425_v16  ;;  %10205 = vpow2.f32 %v3812_v27  ;;  %v3675_v5 = vsel %vm3293_vm2, %v13425_v16, -inf  ;;  %v4065_v27 = vsel %vm3293_vm2, %v13433_v23, 0.0  ;;  %v3818_v45 = vmul.f32 1.442695, %v3684_v19  ;;  %v18522_v16 = vld [vmem:[#allocation140_spill] sm:$0xff] }
 0x453   : > { %10207 = vpow2.f32 %v3810_v3 }
 0x454   : > { %10209 = vpow2.f32 %v3814_v36 }
 0x455   : > { %3667 = vmax.xlane.f32.xlu2 %v3666_v53  ;;  %3673 = vmax.xlane.f32.xlu1 %v3672_v49  ;;  %v18514_v53 = vld [vmem:[#allocation138_spill] sm:$0xff]  ;;  %v3685_v49 = vsub.f32 %v18515_v18, %v12722_v38  ;;  %10211 = vpow2.f32 %v3818_v45 }
 0x456   : > { %3670 = vmax.xlane.f32.xlu0 %v3669_v46  ;;  %v3683_v46 = vsub.f32 %v18514_v53, %v18513_v35 }
 0x457   : > { %v3820_v36 = vmul.f32 1.442695, %v3685_v49  ;;  %v18525_v49 = vld [vmem:[#allocation187_spill] sm:$0xff] }
 0x458   : > { %v13420_v1 = vpop.xlane.xlu2 %3541  ;;  %v13429_v63 = vpop.xlane.xlu1 %3547  ;;  %v3816_v14 = vmul.f32 1.442695, %v3683_v46  ;;  %v18524_v46 = vld [vmem:[#allocation141_spill] sm:$0xff]  ;;  %v3688_v23 = vsub.f32 %v18526_v48, %v18525_v49 }
 0x459   : > { %v13431_v13 = vpop.xlane.xlu0 %3544  ;;  %v13447_v3 = vpop.eup %10205  ;;  %v18532_v49 = vld [vmem:[#allocation189_spill] sm:$0xff] }
 0x45a   : > { %18516 = vst [vmem:[#allocation137_spill] sm:$0xff] %v13447_v3  ;;  %v13451_v38 = vpop.eup %10207  ;;  %10213 = vpow2.f32 %v3816_v14 }
 0x45b   : > { %18517 = vst [vmem:[#allocation179_spill] sm:$0xff] %v13451_v38  ;;  %v13457_v18 = vpop.eup %10209  ;;  %10215 = vpow2.f32 %v3820_v36  ;;  %v4068_v26 = vsel %vm3293_vm2, %v13451_v38, 0.0  ;;  %v3826_v36 = vmul.f32 1.442695, %v3688_v23  ;;  %v18536_v23 = vld [vmem:[#allocation145_spill] sm:$0xff] }
 0x45c   : > { %18520 = vst [vmem:[#allocation288_spill] sm:$0xff] %v13457_v18  ;;  %v4074_v45 = vsel %vm3293_vm2, %v13457_v18, 0.0  ;;  %v13471_v14 = vpop.eup %10211  ;;  %v3691_v18 = vsub.f32 %v18536_v23, %v12775_v30  ;;  %v18543_v23 = vld [vmem:[#allocation194_spill] sm:$0xff] }
 0x45d   : > { %3676 = vmax.xlane.f32.xlu2 %v3675_v5  ;;  %4066 = vadd.xlane.f32.xlu1 %v4065_v27  ;;  %v18521_v5 = vld [vmem:[#allocation182_spill] sm:$0xff] }
 0x45e   : > { %4063 = vadd.xlane.f32.xlu0 %v4062_v32  ;;  %v3687_v19 = vsub.f32 %v18522_v16, %v18521_v5  ;;  %v18523_v32 = vld [vmem:[#allocation184_spill] sm:$0xff]  ;;  %18527 = vst [vmem:[#allocation182_spill] sm:$0xff] %v13471_v14 }
 0x45f   : > { %v3686_v27 = vsub.f32 %v18524_v46, %v18523_v32 }
 0x460   : > { %v13449_v21 = vpop.xlane.xlu2 %3550  ;;  %v13453_v35 = vpop.xlane.xlu1 %3556 }
 0x461   : > { %18518 = vst [vmem:[#allocation138_spill] sm:$0xff] %v13453_v35  ;;  %v13455_v53 = vpop.xlane.xlu0 %3553  ;;  %v3824_v35 = vmul.f32 1.442695, %v3687_v19  ;;  %v3822_v16 = vmul.f32 1.442695, %v3686_v27  ;;  %v13475_v48 = vpop.eup %10213  ;;  %v18535_v27 = vld [vmem:[#allocation143_spill] sm:$0xff] }
 0x462   : > { %18519 = vst [vmem:[#allocation139_spill] sm:$0xff] %v13455_v53  ;;  %v4071_v53 = vsel %vm3293_vm2, %v13447_v3, 0.0  ;;  %v13481_v46 = vpop.eup %10215  ;;  %v18533_v3 = vld [vmem:[#allocation144_spill] sm:$0xff]  ;;  %v4077_v38 = vsel %vm3293_vm2, %v13475_v48, 0.0 }
 0x463   : > { %18528 = vst [vmem:[#allocation140_spill] sm:$0xff] %v13475_v48  ;;  %10217 = vpow2.f32 %v3824_v35  ;;  %v3690_v19 = vsub.f32 %v18533_v3, %v18532_v49  ;;  %v4083_v35 = vsel %vm3293_vm2, %v13481_v46, 0.0 }
 0x464   : > { %18531 = vst [vmem:[#allocation187_spill] sm:$0xff] %v13481_v46  ;;  %10219 = vpow2.f32 %v3822_v16  ;;  %v18544_v46 = vld [vmem:[#allocation147_spill] sm:$0xff] }
 0x465   : > { %4069 = vadd.xlane.f32.xlu2 %v4068_v26  ;;  %4075 = vadd.xlane.f32.xlu1 %v4074_v45  ;;  %10221 = vpow2.f32 %v3826_v36  ;;  %v3832_v36 = vmul.f32 1.442695, %v3691_v18  ;;  %v18547_v18 = vld [vmem:[#allocation198_spill] sm:$0xff] }
 0x466   : > { %4072 = vadd.xlane.f32.xlu0 %v4071_v53  ;;  %v18534_v53 = vld [vmem:[#allocation190_spill] sm:$0xff] }
 0x467   : > { %v3689_v45 = vsub.f32 %v18535_v27, %v18534_v53 }
 0x468   : > { %v13473_v5 = vpop.xlane.xlu2 %3559  ;;  %v13477_v32 = vpop.xlane.xlu1 %3565 }
 0x469   : > { %18529 = vst [vmem:[#allocation184_spill] sm:$0xff] %v13477_v32  ;;  %v13479_v26 = vpop.xlane.xlu0 %3562  ;;  %v3830_v32 = vmul.f32 1.442695, %v3690_v19  ;;  %v3828_v3 = vmul.f32 1.442695, %v3689_v45  ;;  %v13495_v16 = vpop.eup %10217  ;;  %v3693_v19 = vsub.f32 %v18544_v46, %v18543_v23  ;;  %v18546_v45 = vld [vmem:[#allocation146_spill] sm:$0xff] }
 0x46a   : > { %18530 = vst [vmem:[#allocation141_spill] sm:$0xff] %v13479_v26  ;;  %v4080_v26 = vsel %vm3293_vm2, %v13471_v14, 0.0  ;;  %v13499_v30 = vpop.eup %10219  ;;  %v18548_v14 = vld [vmem:[#allocation148_spill] sm:$0xff] }
 0x46b   : > { %18537 = vst [vmem:[#allocation142_spill] sm:$0xff] %v13495_v16  ;;  %v13505_v27 = vpop.eup %10221  ;;  %10223 = vpow2.f32 %v3830_v32  ;;  %v3694_v48 = vsub.f32 %v18548_v14, %v18547_v18  ;;  %v18551_v18 = vld [vmem:[#allocation200_spill] sm:$0xff] }
 0x46c   : > { %18539 = vst [vmem:[#allocation144_spill] sm:$0xff] %v13499_v30  ;;  %10225 = vpow2.f32 %v3828_v3  ;;  %v4092_v32 = vsel %vm3293_vm2, %v13505_v27, 0.0 }
 0x46d   : > { %4078 = vadd.xlane.f32.xlu2 %v4077_v38  ;;  %4084 = vadd.xlane.f32.xlu1 %v4083_v35  ;;  %18542 = vst [vmem:[#allocation145_spill] sm:$0xff] %v13505_v27  ;;  %10227 = vpow2.f32 %v3832_v36  ;;  %v3838_v36 = vmul.f32 1.442695, %v3694_v48  ;;  %v18555_v48 = vld [vmem:[#allocation151_spill] sm:$0xff] }
 0x46e   : > { %4081 = vadd.xlane.f32.xlu0 %v4080_v26  ;;  %v18545_v26 = vld [vmem:[#allocation195_spill] sm:$0xff]  ;;  %v3697_v27 = vsub.f32 %v18555_v48, %v12835_v50  ;;  %v18559_v48 = vld [vmem:[#allocation153_spill] sm:$0xff] }
 0x46f   : > { %v3692_v35 = vsub.f32 %v18546_v45, %v18545_v26 }
 0x470   : > { %v13497_v49 = vpop.xlane.xlu2 %3568  ;;  %v13501_v53 = vpop.xlane.xlu1 %3574 }
 0x471   : > { %18538 = vst [vmem:[#allocation189_spill] sm:$0xff] %v13497_v49  ;;  %v13503_v38 = vpop.xlane.xlu0 %3571  ;;  %v4086_v49 = vsel %vm3293_vm2, %v13499_v30, 0.0  ;;  %v3834_v46 = vmul.f32 1.442695, %v3692_v35  ;;  %v13519_v3 = vpop.eup %10223  ;;  %v18554_v35 = vld [vmem:[#allocation149_spill] sm:$0xff] }
 0x472   : > { %18540 = vst [vmem:[#allocation190_spill] sm:$0xff] %v13501_v53  ;;  %v4089_v53 = vsel %vm3293_vm2, %v13495_v16, 0.0  ;;  %v13523_v14 = vpop.eup %10225  ;;  %v18552_v16 = vld [vmem:[#allocation150_spill] sm:$0xff] }
 0x473   : > { %18541 = vst [vmem:[#allocation143_spill] sm:$0xff] %v13503_v38  ;;  %v3836_v38 = vmul.f32 1.442695, %v3693_v19  ;;  %v13529_v45 = vpop.eup %10227  ;;  %v3696_v19 = vsub.f32 %v18552_v16, %v18551_v18  ;;  %v4095_v30 = vsel %vm3293_vm2, %v13523_v14, 0.0 }
 0x475   : > { %4087 = vadd.xlane.f32.xlu2 %v4086_v49  ;;  %4093 = vadd.xlane.f32.xlu1 %v4092_v32  ;;  %10229 = vpow2.f32 %v3836_v38  ;;  %v4101_v38 = vsel %vm3293_vm2, %v13529_v45, 0.0 }
 0x476   : > { %4090 = vadd.xlane.f32.xlu0 %v4089_v53  ;;  %10231 = vpow2.f32 %v3834_v46  ;;  %v18553_v53 = vld [vmem:[#allocation201_spill] sm:$0xff] }
 0x477   : > { %v3695_v32 = vsub.f32 %v18554_v35, %v18553_v53  ;;  %10233 = vpow2.f32 %v3838_v36  ;;  %v3844_v36 = vmul.f32 1.442695, %v3697_v27  ;;  %v18561_v27 = vld [vmem:[#allocation154_spill] sm:$0xff] }
 0x478   : > { %v13521_v23 = vpop.xlane.xlu2 %3577  ;;  %v13525_v26 = vpop.xlane.xlu1 %3583 }
 0x479   : > { %18549 = vst [vmem:[#allocation194_spill] sm:$0xff] %v13525_v26  ;;  %v13527_v49 = vpop.xlane.xlu0 %3580  ;;  %v3842_v26 = vmul.f32 1.442695, %v3696_v19  ;;  %v3840_v16 = vmul.f32 1.442695, %v3695_v32  ;;  %v3699_v19 = vsub.f32 %v18559_v48, %v12840_v22 }
 0x47a   : > { %18550 = vst [vmem:[#allocation147_spill] sm:$0xff] %v13527_v49  ;;  %v4098_v49 = vsel %vm3293_vm2, %v13519_v3, 0.0 }
 0x47b   : > { %v13543_v46 = vpop.eup %10229  ;;  %10235 = vpow2.f32 %v3842_v26 }
 0x47c   : > { %v13547_v50 = vpop.eup %10231  ;;  %10237 = vpow2.f32 %v3840_v16 }
 0x47d   : > { %4096 = vadd.xlane.f32.xlu2 %v4095_v30  ;;  %4102 = vadd.xlane.f32.xlu1 %v4101_v38  ;;  %v13553_v35 = vpop.eup %10233  ;;  %10239 = vpow2.f32 %v3844_v36  ;;  %v3700_v38 = vsub.f32 %v18561_v27, %v12860_v55  ;;  %v18565_v27 = vld [vmem:[#allocation156_spill] sm:$0xff] }
 0x47e   : > { %4099 = vadd.xlane.f32.xlu0 %v4098_v49  ;;  %v18560_v49 = vld [vmem:[#allocation152_spill] sm:$0xff]  ;;  %v4110_v26 = vsel %vm3293_vm2, %v13553_v35, 0.0 }
 0x47f   : > { %v3698_v32 = vsub.f32 %v18560_v49, %v12842_v42  ;;  %v3850_v42 = vmul.f32 1.442695, %v3700_v38  ;;  %v18567_v38 = vld [vmem:[#allocation157_spill] sm:$0xff] }
 0x480   : > { %v13545_v18 = vpop.xlane.xlu2 %3586  ;;  %v13549_v53 = vpop.xlane.xlu1 %3592 }
 0x481   : > { %18556 = vst [vmem:[#allocation195_spill] sm:$0xff] %v13545_v18  ;;  %v13551_v30 = vpop.xlane.xlu0 %3589  ;;  %v4104_v18 = vsel %vm3293_vm2, %v13547_v50, 0.0  ;;  %v3846_v22 = vmul.f32 1.442695, %v3698_v32  ;;  %v13567_v16 = vpop.eup %10235 }
 0x482   : > { %18557 = vst [vmem:[#allocation146_spill] sm:$0xff] %v13549_v53  ;;  %v4107_v53 = vsel %vm3293_vm2, %v13543_v46, 0.0  ;;  %v13571_v55 = vpop.eup %10237 }
 0x483   : > { %18558 = vst [vmem:[#allocation198_spill] sm:$0xff] %v13551_v30  ;;  %v3848_v30 = vmul.f32 1.442695, %v3699_v19  ;;  %v13577_v49 = vpop.eup %10239  ;;  %v3702_v19 = vsub.f32 %v18565_v27, %v12865_v9 }
 0x485   : > { %4105 = vadd.xlane.f32.xlu2 %v4104_v18  ;;  %4111 = vadd.xlane.f32.xlu1 %v4110_v26  ;;  %10241 = vpow2.f32 %v3848_v30  ;;  %v3703_v26 = vsub.f32 %v18567_v38, %v12884_v11  ;;  %v4119_v30 = vsel %vm3293_vm2, %v13577_v49, 0.0  ;;  %v18571_v38 = vld [vmem:[#allocation159_spill] sm:$0xff] }
 0x486   : > { %4108 = vadd.xlane.f32.xlu0 %v4107_v53  ;;  %10243 = vpow2.f32 %v3846_v22  ;;  %v18566_v53 = vld [vmem:[#allocation155_spill] sm:$0xff] }
 0x487   : > { %v3701_v32 = vsub.f32 %v18566_v53, %v12867_v59  ;;  %10245 = vpow2.f32 %v3850_v42  ;;  %v3856_v59 = vmul.f32 1.442695, %v3703_v26  ;;  %v18573_v26 = vld [vmem:[#allocation160_spill] sm:$0xff] }
 0x488   : > { %v13569_v36 = vpop.xlane.xlu2 %3595  ;;  %v13573_v48 = vpop.xlane.xlu1 %3601 }
 0x489   : > { %18562 = vst [vmem:[#allocation148_spill] sm:$0xff] %v13569_v36  ;;  %v13575_v18 = vpop.xlane.xlu0 %3598  ;;  %v4113_v36 = vsel %vm3293_vm2, %v13571_v55, 0.0  ;;  %v3852_v9 = vmul.f32 1.442695, %v3701_v32 }
 0x48a   : > { %18563 = vst [vmem:[#allocation200_spill] sm:$0xff] %v13573_v48  ;;  %v4116_v48 = vsel %vm3293_vm2, %v13567_v16, 0.0 }
 0x48b   : > { %18564 = vst [vmem:[#allocation150_spill] sm:$0xff] %v13575_v18  ;;  %v3854_v18 = vmul.f32 1.442695, %v3702_v19  ;;  %v13591_v22 = vpop.eup %10241  ;;  %v3705_v19 = vsub.f32 %v18571_v38, %v12889_v57 }
 0x48c   : > { %v13595_v11 = vpop.eup %10243 }
 0x48d   : > { %4114 = vadd.xlane.f32.xlu2 %v4113_v36  ;;  %4120 = vadd.xlane.f32.xlu1 %v4119_v30  ;;  %v13601_v53 = vpop.eup %10245  ;;  %10247 = vpow2.f32 %v3854_v18  ;;  %v3706_v30 = vsub.f32 %v18573_v26, %v12908_v54  ;;  %v4125_v18 = vsel %vm3293_vm2, %v13591_v22, 0.0  ;;  %v18577_v26 = vld [vmem:[#allocation162_spill] sm:$0xff] }
 0x48e   : > { %4117 = vadd.xlane.f32.xlu0 %v4116_v48  ;;  %10249 = vpow2.f32 %v3852_v9  ;;  %v18572_v48 = vld [vmem:[#allocation158_spill] sm:$0xff] }
 0x48f   : > { %v3704_v32 = vsub.f32 %v18572_v48, %v12891_v24  ;;  %10251 = vpow2.f32 %v3856_v59  ;;  %v3862_v24 = vmul.f32 1.442695, %v3706_v30  ;;  %v18579_v30 = vld [vmem:[#allocation163_spill] sm:$0xff] }
 0x490   : > { %v13593_v42 = vpop.xlane.xlu2 %3604  ;;  %v13597_v27 = vpop.xlane.xlu1 %3610 }
 0x491   : > { %18568 = vst [vmem:[#allocation201_spill] sm:$0xff] %v13593_v42  ;;  %v13599_v36 = vpop.xlane.xlu0 %3607  ;;  %v4122_v42 = vsel %vm3293_vm2, %v13595_v11, 0.0  ;;  %v3858_v57 = vmul.f32 1.442695, %v3704_v32 }
 0x492   : > { %18569 = vst [vmem:[#allocation149_spill] sm:$0xff] %v13597_v27  ;;  %v4128_v27 = vsel %vm3293_vm2, %v13601_v53, 0.0 }
 0x493   : > { %18570 = vst [vmem:[#allocation151_spill] sm:$0xff] %v13599_v36  ;;  %v3860_v36 = vmul.f32 1.442695, %v3705_v19  ;;  %v13615_v9 = vpop.eup %10247  ;;  %v3708_v19 = vsub.f32 %v18577_v26, %v12913_v15 }
 0x494   : > { %v13619_v54 = vpop.eup %10249 }
 0x495   : > { %4123 = vadd.xlane.f32.xlu2 %v4122_v42  ;;  %4129 = vadd.xlane.f32.xlu1 %v4128_v27  ;;  %v13625_v48 = vpop.eup %10251  ;;  %10253 = vpow2.f32 %v3860_v36  ;;  %v18578_v27 = vld [vmem:[#allocation161_spill] sm:$0xff]  ;;  %v4134_v36 = vsel %vm3293_vm2, %v13615_v9, 0.0 }
 0x496   : > { %4126 = vadd.xlane.f32.xlu0 %v4125_v18  ;;  %10255 = vpow2.f32 %v3858_v57  ;;  %v3707_v32 = vsub.f32 %v18578_v27, %v12915_v8  ;;  %v3709_v18 = vsub.f32 %v18579_v30, %v12932_v6  ;;  %v18583_v30 = vld [vmem:[#allocation164_spill] sm:$0xff] }
 0x497   : > { %10257 = vpow2.f32 %v3862_v24 }
 0x498   : > { %v13617_v59 = vpop.xlane.xlu2 %3613  ;;  %v13621_v38 = vpop.xlane.xlu1 %3619  ;;  %v3864_v15 = vmul.f32 1.442695, %v3707_v32  ;;  %v3868_v8 = vmul.f32 1.442695, %v3709_v18  ;;  %v18585_v18 = vld [vmem:[#allocation133_spill] sm:$0xff] }
 0x499   : > { %18574 = vst [vmem:[#allocation153_spill] sm:$0xff] %v13617_v59  ;;  %v13623_v42 = vpop.xlane.xlu0 %3616  ;;  %v4131_v59 = vsel %vm3293_vm2, %v13619_v54, 0.0 }
 0x49a   : > { %18575 = vst [vmem:[#allocation152_spill] sm:$0xff] %v13621_v38  ;;  %v3866_v38 = vmul.f32 1.442695, %v3708_v19  ;;  %v3711_v19 = vsub.f32 %v18583_v30, %v12937_v25 }
 0x49b   : > { %18576 = vst [vmem:[#allocation154_spill] sm:$0xff] %v13623_v42  ;;  %v4137_v42 = vsel %vm3293_vm2, %v13625_v48, 0.0  ;;  %v13639_v57 = vpop.eup %10253 }
 0x49c   : > { %v13643_v6 = vpop.eup %10255  ;;  %10259 = vpow2.f32 %v3866_v38  ;;  %v4143_v38 = vsel %vm3293_vm2, %v13639_v57, 0.0 }
 0x49d   : > { %4132 = vadd.xlane.f32.xlu2 %v4131_v59  ;;  %4138 = vadd.xlane.f32.xlu1 %v4137_v42  ;;  %v13649_v27 = vpop.eup %10257  ;;  %10261 = vpow2.f32 %v3864_v15  ;;  %v18584_v42 = vld [vmem:[#allocation130_spill] sm:$0xff] }
 0x49e   : > { %4135 = vadd.xlane.f32.xlu0 %v4134_v36  ;;  %v3710_v32 = vsub.f32 %v18584_v42, %v12939_v12  ;;  %10263 = vpow2.f32 %v3868_v8  ;;  %v3712_v36 = vsub.f32 %v18585_v18, %v12956_v44  ;;  %v18589_v18 = vld [vmem:[#allocation165_spill] sm:$0xff] }
 0x4a0   : > { %v13641_v24 = vpop.xlane.xlu2 %3622  ;;  %v13645_v26 = vpop.xlane.xlu1 %3628  ;;  %v3870_v25 = vmul.f32 1.442695, %v3710_v32  ;;  %v3874_v12 = vmul.f32 1.442695, %v3712_v36  ;;  %v18591_v36 = vld [vmem:[#allocation166_spill] sm:$0xff] }
 0x4a1   : > { %18580 = vst [vmem:[#allocation156_spill] sm:$0xff] %v13641_v24  ;;  %v13647_v59 = vpop.xlane.xlu0 %3625  ;;  %v4140_v24 = vsel %vm3293_vm2, %v13643_v6, 0.0 }
 0x4a2   : > { %18581 = vst [vmem:[#allocation155_spill] sm:$0xff] %v13645_v26  ;;  %v4146_v26 = vsel %vm3293_vm2, %v13649_v27, 0.0  ;;  %v13663_v15 = vpop.eup %10259 }
 0x4a3   : > { %18582 = vst [vmem:[#allocation157_spill] sm:$0xff] %v13647_v59  ;;  %v3872_v59 = vmul.f32 1.442695, %v3711_v19  ;;  %v13667_v44 = vpop.eup %10261  ;;  %v3714_v19 = vsub.f32 %v18589_v18, %v12961_v0 }
 0x4a4   : > { %v13673_v42 = vpop.eup %10263 }
 0x4a5   : > { %4141 = vadd.xlane.f32.xlu2 %v4140_v24  ;;  %4147 = vadd.xlane.f32.xlu1 %v4146_v26  ;;  %10265 = vpow2.f32 %v3872_v59  ;;  %v18590_v26 = vld [vmem:[#allocation132_spill] sm:$0xff]  ;;  %v4152_v59 = vsel %vm3293_vm2, %v13663_v15, 0.0 }
 0x4a6   : > { %4144 = vadd.xlane.f32.xlu0 %v4143_v38  ;;  %10267 = vpow2.f32 %v3870_v25  ;;  %v3713_v32 = vsub.f32 %v18590_v26, %v12963_v33  ;;  %v3715_v38 = vsub.f32 %v18591_v36, %v12980_v10  ;;  %v18595_v36 = vld [vmem:[#allocation168_spill] sm:$0xff] }
 0x4a7   : > { %10269 = vpow2.f32 %v3874_v12 }
 0x4a8   : > { %v13665_v8 = vpop.xlane.xlu2 %3631  ;;  %v13669_v30 = vpop.xlane.xlu1 %3637  ;;  %v3876_v0 = vmul.f32 1.442695, %v3713_v32  ;;  %v3880_v33 = vmul.f32 1.442695, %v3715_v38  ;;  %v18597_v38 = vld [vmem:[#allocation169_spill] sm:$0xff] }
 0x4a9   : > { %18586 = vst [vmem:[#allocation159_spill] sm:$0xff] %v13665_v8  ;;  %v13671_v24 = vpop.xlane.xlu0 %3634  ;;  %v4149_v8 = vsel %vm3293_vm2, %v13667_v44, 0.0 }
 0x4aa   : > { %18587 = vst [vmem:[#allocation158_spill] sm:$0xff] %v13669_v30  ;;  %v3878_v30 = vmul.f32 1.442695, %v3714_v19  ;;  %v3717_v19 = vsub.f32 %v18595_v36, %v12985_v47 }
 0x4ab   : > { %18588 = vst [vmem:[#allocation160_spill] sm:$0xff] %v13671_v24  ;;  %v4155_v24 = vsel %vm3293_vm2, %v13673_v42, 0.0  ;;  %v13687_v25 = vpop.eup %10265 }
 0x4ac   : > { %v13691_v10 = vpop.eup %10267  ;;  %10271 = vpow2.f32 %v3878_v30  ;;  %v4161_v30 = vsel %vm3293_vm2, %v13687_v25, 0.0 }
 0x4ad   : > { %4150 = vadd.xlane.f32.xlu2 %v4149_v8  ;;  %4156 = vadd.xlane.f32.xlu1 %v4155_v24  ;;  %v13697_v26 = vpop.eup %10269  ;;  %10273 = vpow2.f32 %v3876_v0  ;;  %v18596_v24 = vld [vmem:[#allocation167_spill] sm:$0xff] }
 0x4ae   : > { %4153 = vadd.xlane.f32.xlu0 %v4152_v59  ;;  %v3716_v32 = vsub.f32 %v18596_v24, %v12987_v52  ;;  %10275 = vpow2.f32 %v3880_v33  ;;  %v3718_v59 = vsub.f32 %v18597_v38, %v13004_v34  ;;  %v18601_v38 = vld [vmem:[#allocation171_spill] sm:$0xff] }
 0x4b0   : > { %v13689_v12 = vpop.xlane.xlu2 %3640  ;;  %v13693_v18 = vpop.xlane.xlu1 %3646  ;;  %v3882_v47 = vmul.f32 1.442695, %v3716_v32  ;;  %v3886_v52 = vmul.f32 1.442695, %v3718_v59  ;;  %v18603_v59 = vld [vmem:[#allocation172_spill] sm:$0xff] }
 0x4b1   : > { %18592 = vst [vmem:[#allocation162_spill] sm:$0xff] %v13689_v12  ;;  %v13695_v8 = vpop.xlane.xlu0 %3643  ;;  %v4158_v12 = vsel %vm3293_vm2, %v13691_v10, 0.0 }
 0x4b2   : > { %18593 = vst [vmem:[#allocation161_spill] sm:$0xff] %v13693_v18  ;;  %v4164_v18 = vsel %vm3293_vm2, %v13697_v26, 0.0  ;;  %v13711_v0 = vpop.eup %10271 }
 0x4b3   : > { %18594 = vst [vmem:[#allocation163_spill] sm:$0xff] %v13695_v8  ;;  %v3884_v8 = vmul.f32 1.442695, %v3717_v19  ;;  %v13715_v34 = vpop.eup %10273  ;;  %v3720_v19 = vsub.f32 %v18601_v38, %v13009_v39 }
 0x4b4   : > { %v13721_v24 = vpop.eup %10275 }
 0x4b5   : > { %4159 = vadd.xlane.f32.xlu2 %v4158_v12  ;;  %4165 = vadd.xlane.f32.xlu1 %v4164_v18  ;;  %10277 = vpow2.f32 %v3884_v8  ;;  %v18602_v18 = vld [vmem:[#allocation170_spill] sm:$0xff]  ;;  %v4170_v8 = vsel %vm3293_vm2, %v13711_v0, 0.0 }
 0x4b6   : > { %4162 = vadd.xlane.f32.xlu0 %v4161_v30  ;;  %10279 = vpow2.f32 %v3882_v47  ;;  %v3719_v32 = vsub.f32 %v18602_v18, %v13011_v40  ;;  %v3721_v30 = vsub.f32 %v18603_v59, %v13028_v43  ;;  %v18607_v59 = vld [vmem:[#allocation174_spill] sm:$0xff] }
 0x4b7   : > { %10281 = vpow2.f32 %v3886_v52 }
 0x4b8   : > { %v13713_v33 = vpop.xlane.xlu2 %3649  ;;  %v13717_v36 = vpop.xlane.xlu1 %3655  ;;  %v3888_v39 = vmul.f32 1.442695, %v3719_v32  ;;  %v3892_v40 = vmul.f32 1.442695, %v3721_v30  ;;  %v18609_v30 = vld [vmem:[#allocation175_spill] sm:$0xff] }
 0x4b9   : > { %18598 = vst [vmem:[#allocation164_spill] sm:$0xff] %v13713_v33  ;;  %v13719_v12 = vpop.xlane.xlu0 %3652  ;;  %v4167_v33 = vsel %vm3293_vm2, %v13715_v34, 0.0 }
 0x4ba   : > { %18599 = vst [vmem:[#allocation130_spill] sm:$0xff] %v13717_v36  ;;  %v3890_v36 = vmul.f32 1.442695, %v3720_v19  ;;  %v3723_v19 = vsub.f32 %v18607_v59, %v13033_v29 }
 0x4bb   : > { %18600 = vst [vmem:[#allocation133_spill] sm:$0xff] %v13719_v12  ;;  %v4173_v12 = vsel %vm3293_vm2, %v13721_v24, 0.0  ;;  %v13735_v47 = vpop.eup %10277 }
 0x4bc   : > { %v13739_v43 = vpop.eup %10279  ;;  %10283 = vpow2.f32 %v3890_v36  ;;  %v4179_v36 = vsel %vm3293_vm2, %v13735_v47, 0.0 }
 0x4bd   : > { %4168 = vadd.xlane.f32.xlu2 %v4167_v33  ;;  %4174 = vadd.xlane.f32.xlu1 %v4173_v12  ;;  %v13745_v18 = vpop.eup %10281  ;;  %10285 = vpow2.f32 %v3888_v39  ;;  %v18608_v12 = vld [vmem:[#allocation173_spill] sm:$0xff] }
 0x4be   : > { %4171 = vadd.xlane.f32.xlu0 %v4170_v8  ;;  %v3722_v32 = vsub.f32 %v18608_v12, %v13035_v17  ;;  %10287 = vpow2.f32 %v3892_v40  ;;  %v3724_v8 = vsub.f32 %v18609_v30, %v13052_v58  ;;  %v18613_v30 = vld [vmem:[#allocation177_spill] sm:$0xff] }
 0x4c0   : > { %v13737_v52 = vpop.xlane.xlu2 %3658  ;;  %v13741_v38 = vpop.xlane.xlu1 %3664  ;;  %v3894_v29 = vmul.f32 1.442695, %v3722_v32  ;;  %v3898_v17 = vmul.f32 1.442695, %v3724_v8  ;;  %v18615_v8 = vld [vmem:[#allocation178_spill] sm:$0xff] }
 0x4c1   : > { %18604 = vst [vmem:[#allocation165_spill] sm:$0xff] %v13737_v52  ;;  %v13743_v33 = vpop.xlane.xlu0 %3661  ;;  %v4176_v52 = vsel %vm3293_vm2, %v13739_v43, 0.0 }
 0x4c2   : > { %18605 = vst [vmem:[#allocation132_spill] sm:$0xff] %v13741_v38  ;;  %v4182_v38 = vsel %vm3293_vm2, %v13745_v18, 0.0  ;;  %v13759_v39 = vpop.eup %10283 }
 0x4c3   : > { %18606 = vst [vmem:[#allocation166_spill] sm:$0xff] %v13743_v33  ;;  %v3896_v33 = vmul.f32 1.442695, %v3723_v19  ;;  %v13763_v58 = vpop.eup %10285  ;;  %v3726_v19 = vsub.f32 %v18613_v30, %v13057_v61 }
 0x4c4   : > { %v13769_v12 = vpop.eup %10287 }
 0x4c5   : > { %4177 = vadd.xlane.f32.xlu2 %v4176_v52  ;;  %4183 = vadd.xlane.f32.xlu1 %v4182_v38  ;;  %10289 = vpow2.f32 %v3896_v33  ;;  %v18614_v38 = vld [vmem:[#allocation176_spill] sm:$0xff]  ;;  %v4188_v33 = vsel %vm3293_vm2, %v13759_v39, 0.0 }
 0x4c6   : > { %4180 = vadd.xlane.f32.xlu0 %v4179_v36  ;;  %10291 = vpow2.f32 %v3894_v29  ;;  %v3725_v32 = vsub.f32 %v18614_v38, %v13059_v4  ;;  %v3727_v36 = vsub.f32 %v18615_v8, %v13081_v2  ;;  %v18620_v8 = vld [vmem:[#allocation181_spill] sm:$0xff] }
 0x4c7   : > { %10293 = vpow2.f32 %v3898_v17 }
 0x4c8   : > { %v13761_v40 = vpop.xlane.xlu2 %3667  ;;  %v13765_v59 = vpop.xlane.xlu1 %3673  ;;  %v3900_v61 = vmul.f32 1.442695, %v3725_v32  ;;  %v3904_v4 = vmul.f32 1.442695, %v3727_v36  ;;  %v18622_v36 = vld [vmem:[#allocation183_spill] sm:$0xff] }
 0x4c9   : > { %18610 = vst [vmem:[#allocation168_spill] sm:$0xff] %v13761_v40  ;;  %v13767_v52 = vpop.xlane.xlu0 %3670  ;;  %v4185_v40 = vsel %vm3293_vm2, %v13763_v58, 0.0 }
 0x4ca   : > { %18611 = vst [vmem:[#allocation167_spill] sm:$0xff] %v13765_v59  ;;  %v4191_v59 = vsel %vm3293_vm2, %v13769_v12, 0.0 }
 0x4cb   : > { %18612 = vst [vmem:[#allocation169_spill] sm:$0xff] %v13767_v52  ;;  %v3902_v52 = vmul.f32 1.442695, %v3726_v19  ;;  %v13783_v29 = vpop.eup %10289  ;;  %v3729_v19 = vsub.f32 %v18620_v8, %v13091_v37 }
 0x4cc   : > { %v13787_v2 = vpop.eup %10291 }
 0x4cd   : > { %4186 = vadd.xlane.f32.xlu2 %v4185_v40  ;;  %4192 = vadd.xlane.f32.xlu1 %v4191_v59  ;;  %v13793_v38 = vpop.eup %10293  ;;  %10295 = vpow2.f32 %v3902_v52  ;;  %v18621_v59 = vld [vmem:[#allocation180_spill] sm:$0xff]  ;;  %v4197_v52 = vsel %vm3293_vm2, %v13783_v29, 0.0 }
 0x4ce   : > { %4189 = vadd.xlane.f32.xlu0 %v4188_v33  ;;  %18619 = vst [vmem:[#allocation174_spill] sm:$0xff] %v13793_v38  ;;  %10297 = vpow2.f32 %v3900_v61  ;;  %v3728_v32 = vsub.f32 %v18621_v59, %v13093_v51  ;;  %v3730_v33 = vsub.f32 %v18622_v36, %v13112_v28  ;;  %v18628_v36 = vld [vmem:[#allocation186_spill] sm:$0xff] }
 0x4cf   : > { %10299 = vpow2.f32 %v3904_v4 }
 0x4d0   : > { %v13785_v17 = vpop.xlane.xlu2 %3676  ;;  %v13789_v30 = vpop.xlane.xlu1 %4066  ;;  %v3906_v37 = vmul.f32 1.442695, %v3728_v32  ;;  %v3910_v51 = vmul.f32 1.442695, %v3730_v33  ;;  %v18630_v33 = vld [vmem:[#allocation188_spill] sm:$0xff] }
 0x4d1   : > { %18616 = vst [vmem:[#allocation171_spill] sm:$0xff] %v13785_v17  ;;  %v13791_v40 = vpop.xlane.xlu0 %4063  ;;  %v4194_v17 = vsel %vm3293_vm2, %v13787_v2, 0.0 }
 0x4d2   : > { %18617 = vst [vmem:[#allocation170_spill] sm:$0xff] %v13789_v30  ;;  %v4200_v30 = vsel %vm3293_vm2, %v13793_v38, 0.0 }
 0x4d3   : > { %18618 = vst [vmem:[#allocation172_spill] sm:$0xff] %v13791_v40  ;;  %v3908_v40 = vmul.f32 1.442695, %v3729_v19  ;;  %v13807_v61 = vpop.eup %10295  ;;  %v3732_v19 = vsub.f32 %v18628_v36, %v13119_v62 }
 0x4d4   : > { %v13811_v28 = vpop.eup %10297 }
 0x4d5   : > { %4195 = vadd.xlane.f32.xlu2 %v4194_v17  ;;  %4201 = vadd.xlane.f32.xlu1 %v4200_v30  ;;  %18624 = vst [vmem:[#allocation175_spill] sm:$0xff] %v13811_v28  ;;  %v13817_v59 = vpop.eup %10299  ;;  %10301 = vpow2.f32 %v3908_v40  ;;  %v18629_v30 = vld [vmem:[#allocation185_spill] sm:$0xff]  ;;  %v4206_v40 = vsel %vm3293_vm2, %v13807_v61, 0.0 }
 0x4d6   : > { %4198 = vadd.xlane.f32.xlu0 %v4197_v52  ;;  %18627 = vst [vmem:[#allocation178_spill] sm:$0xff] %v13817_v59  ;;  %10303 = vpow2.f32 %v3906_v37  ;;  %v3731_v32 = vsub.f32 %v18629_v30, %v13121_v56  ;;  %v3733_v52 = vsub.f32 %v18630_v33, %v13142_v60  ;;  %v18637_v33 = vld [vmem:[#allocation241_spill] sm:$0xff] }
 0x4d7   : > { %10305 = vpow2.f32 %v3910_v51 }
 0x4d8   : > { %v13809_v4 = vpop.xlane.xlu2 %4069  ;;  %v13813_v8 = vpop.xlane.xlu1 %4075  ;;  %v3912_v62 = vmul.f32 1.442695, %v3731_v32  ;;  %v3916_v56 = vmul.f32 1.442695, %v3733_v52  ;;  %v18640_v32 = vld [vmem:[#allocation191_spill] sm:$0xff]  ;;  %v18641_v52 = vld [vmem:[#allocation245_spill] sm:$0xff] }
 0x4d9   : > { %18623 = vst [vmem:[#allocation173_spill] sm:$0xff] %v13809_v4  ;;  %v13815_v17 = vpop.xlane.xlu0 %4072  ;;  %v4203_v4 = vsel %vm3293_vm2, %v13811_v28, 0.0  ;;  %v18638_v28 = vld [vmem:[#allocation192_spill] sm:$0xff] }
 0x4da   : > { %18625 = vst [vmem:[#allocation177_spill] sm:$0xff] %v13813_v8  ;;  %v4209_v8 = vsel %vm3293_vm2, %v13817_v59, 0.0  ;;  %v18642_v59 = vld [vmem:[#allocation193_spill] sm:$0xff] }
 0x4db   : > { %18626 = vst [vmem:[#allocation176_spill] sm:$0xff] %v13815_v17  ;;  %v3914_v17 = vmul.f32 1.442695, %v3732_v19  ;;  %v13831_v37 = vpop.eup %10301  ;;  %v3735_v19 = vsub.f32 %v18638_v28, %v18637_v33 }
 0x4dc   : > { %18631 = vst [vmem:[#allocation181_spill] sm:$0xff] %v13831_v37  ;;  %v13835_v60 = vpop.eup %10303 }
 0x4dd   : > { %4204 = vadd.xlane.f32.xlu2 %v4203_v4  ;;  %4210 = vadd.xlane.f32.xlu1 %v4209_v8  ;;  %18633 = vst [vmem:[#allocation183_spill] sm:$0xff] %v13835_v60  ;;  %v13841_v30 = vpop.eup %10305  ;;  %10307 = vpow2.f32 %v3914_v17  ;;  %v18639_v8 = vld [vmem:[#allocation242_spill] sm:$0xff]  ;;  %v4212_v38 = vsel %vm3293_vm2, %v13835_v60, 0.0  ;;  %v4215_v17 = vsel %vm3293_vm2, %v13831_v37, 0.0  ;;  %v18650_v37 = vld [vmem:[#allocation197_spill] sm:$0xff] }
 0x4de   : > { %4207 = vadd.xlane.f32.xlu0 %v4206_v40  ;;  %18636 = vst [vmem:[#allocation188_spill] sm:$0xff] %v13841_v30  ;;  %10309 = vpow2.f32 %v3912_v62  ;;  %v3734_v40 = vsub.f32 %v18640_v32, %v18639_v8 }
 0x4df   : > { %10311 = vpow2.f32 %v3916_v56 }
 0x4e0   : > { %v13833_v51 = vpop.xlane.xlu2 %4078  ;;  %v13837_v36 = vpop.xlane.xlu1 %4084  ;;  %v3918_v28 = vmul.f32 1.442695, %v3734_v40  ;;  %v18652_v40 = vld [vmem:[#allocation196_spill] sm:$0xff] }
 0x4e1   : > { %18632 = vst [vmem:[#allocation180_spill] sm:$0xff] %v13833_v51  ;;  %v13839_v4 = vpop.xlane.xlu0 %4081  ;;  %v3736_v51 = vsub.f32 %v18642_v59, %v18641_v52  ;;  %v18649_v52 = vld [vmem:[#allocation247_spill] sm:$0xff] }
 0x4e2   : > { %18634 = vst [vmem:[#allocation186_spill] sm:$0xff] %v13837_v36  ;;  %v4218_v36 = vsel %vm3293_vm2, %v13841_v30, 0.0  ;;  %v18654_v30 = vld [vmem:[#allocation199_spill] sm:$0xff] }
 0x4e3   : > { %18635 = vst [vmem:[#allocation185_spill] sm:$0xff] %v13839_v4  ;;  %v3920_v4 = vmul.f32 1.442695, %v3735_v19  ;;  %v13855_v62 = vpop.eup %10307  ;;  %v3922_v56 = vmul.f32 1.442695, %v3736_v51  ;;  %v3738_v19 = vsub.f32 %v18650_v37, %v18649_v52  ;;  %v18653_v51 = vld [vmem:[#allocation251_spill] sm:$0xff] }
 0x4e4   : > { %18643 = vst [vmem:[#allocation241_spill] sm:$0xff] %v13855_v62  ;;  %v13859_v59 = vpop.eup %10309 }
 0x4e5   : > { %4213 = vadd.xlane.f32.xlu2 %v4212_v38  ;;  %4219 = vadd.xlane.f32.xlu1 %v4218_v36  ;;  %18645 = vst [vmem:[#allocation242_spill] sm:$0xff] %v13859_v59  ;;  %v13865_v32 = vpop.eup %10311  ;;  %10313 = vpow2.f32 %v3920_v4  ;;  %v18651_v36 = vld [vmem:[#allocation248_spill] sm:$0xff]  ;;  %v4221_v60 = vsel %vm3293_vm2, %v13859_v59, 0.0  ;;  %v4224_v4 = vsel %vm3293_vm2, %v13855_v62, 0.0 }
 0x4e6   : > { %4216 = vadd.xlane.f32.xlu0 %v4215_v17  ;;  %18648 = vst [vmem:[#allocation193_spill] sm:$0xff] %v13865_v32  ;;  %10315 = vpow2.f32 %v3918_v28  ;;  %v3737_v17 = vsub.f32 %v18652_v40, %v18651_v36  ;;  %v18666_v62 = vld [vmem:[#allocation204_spill] sm:$0xff] }
 0x4e7   : > { %10317 = vpow2.f32 %v3922_v56 }
 0x4e8   : > { %v13857_v33 = vpop.xlane.xlu2 %4087  ;;  %v13861_v8 = vpop.xlane.xlu1 %4093  ;;  %v3924_v37 = vmul.f32 1.442695, %v3737_v17  ;;  %v18664_v17 = vld [vmem:[#allocation202_spill] sm:$0xff] }
 0x4e9   : > { %18644 = vst [vmem:[#allocation192_spill] sm:$0xff] %v13857_v33  ;;  %v13863_v38 = vpop.xlane.xlu0 %4090  ;;  %v3739_v33 = vsub.f32 %v18654_v30, %v18653_v51  ;;  %v18661_v51 = vld [vmem:[#allocation253_spill] sm:$0xff] }
 0x4ea   : > { %18646 = vst [vmem:[#allocation191_spill] sm:$0xff] %v13861_v8  ;;  %v4227_v8 = vsel %vm3293_vm2, %v13865_v32, 0.0  ;;  %v18662_v32 = vld [vmem:[#allocation203_spill] sm:$0xff] }
 0x4eb   : > { %18647 = vst [vmem:[#allocation245_spill] sm:$0xff] %v13863_v38  ;;  %v3926_v38 = vmul.f32 1.442695, %v3738_v19  ;;  %v13879_v28 = vpop.eup %10313  ;;  %v3928_v56 = vmul.f32 1.442695, %v3739_v33  ;;  %v3741_v19 = vsub.f32 %v18662_v32, %v18661_v51  ;;  %v18665_v33 = vld [vmem:[#allocation257_spill] sm:$0xff] }
 0x4ec   : > { %18655 = vst [vmem:[#allocation247_spill] sm:$0xff] %v13879_v28  ;;  %v13883_v30 = vpop.eup %10315 }
 0x4ed   : > { %4222 = vadd.xlane.f32.xlu2 %v4221_v60  ;;  %4228 = vadd.xlane.f32.xlu1 %v4227_v8  ;;  %18657 = vst [vmem:[#allocation248_spill] sm:$0xff] %v13883_v30  ;;  %v13889_v40 = vpop.eup %10317  ;;  %10319 = vpow2.f32 %v3926_v38  ;;  %v18663_v8 = vld [vmem:[#allocation254_spill] sm:$0xff]  ;;  %v4230_v59 = vsel %vm3293_vm2, %v13883_v30, 0.0  ;;  %v4233_v38 = vsel %vm3293_vm2, %v13879_v28, 0.0 }
 0x4ee   : > { %4225 = vadd.xlane.f32.xlu0 %v4224_v4  ;;  %18660 = vst [vmem:[#allocation199_spill] sm:$0xff] %v13889_v40  ;;  %10321 = vpow2.f32 %v3924_v37  ;;  %v3740_v4 = vsub.f32 %v18664_v17, %v18663_v8  ;;  %v18674_v28 = vld [vmem:[#allocation206_spill] sm:$0xff] }
 0x4ef   : > { %10323 = vpow2.f32 %v3928_v56 }
 0x4f0   : > { %v13881_v52 = vpop.xlane.xlu2 %4096  ;;  %v13885_v36 = vpop.xlane.xlu1 %4102  ;;  %v3930_v32 = vmul.f32 1.442695, %v3740_v4  ;;  %v18676_v4 = vld [vmem:[#allocation205_spill] sm:$0xff] }
 0x4f1   : > { %18656 = vst [vmem:[#allocation197_spill] sm:$0xff] %v13881_v52  ;;  %v13887_v60 = vpop.xlane.xlu0 %4099  ;;  %v3742_v52 = vsub.f32 %v18666_v62, %v18665_v33  ;;  %v18673_v33 = vld [vmem:[#allocation259_spill] sm:$0xff] }
 0x4f2   : > { %18658 = vst [vmem:[#allocation196_spill] sm:$0xff] %v13885_v36  ;;  %v4236_v36 = vsel %vm3293_vm2, %v13889_v40, 0.0  ;;  %v18678_v40 = vld [vmem:[#allocation207_spill] sm:$0xff] }
 0x4f3   : > { %18659 = vst [vmem:[#allocation251_spill] sm:$0xff] %v13887_v60  ;;  %v3932_v60 = vmul.f32 1.442695, %v3741_v19  ;;  %v13903_v37 = vpop.eup %10319  ;;  %v3934_v56 = vmul.f32 1.442695, %v3742_v52  ;;  %v3744_v19 = vsub.f32 %v18674_v28, %v18673_v33  ;;  %v18677_v52 = vld [vmem:[#allocation263_spill] sm:$0xff] }
 0x4f4   : > { %18667 = vst [vmem:[#allocation253_spill] sm:$0xff] %v13903_v37  ;;  %v13907_v62 = vpop.eup %10321 }
 0x4f5   : > { %4231 = vadd.xlane.f32.xlu2 %v4230_v59  ;;  %4237 = vadd.xlane.f32.xlu1 %v4236_v36  ;;  %18669 = vst [vmem:[#allocation254_spill] sm:$0xff] %v13907_v62  ;;  %v13913_v17 = vpop.eup %10323  ;;  %10325 = vpow2.f32 %v3932_v60  ;;  %v18675_v36 = vld [vmem:[#allocation260_spill] sm:$0xff]  ;;  %v4239_v30 = vsel %vm3293_vm2, %v13907_v62, 0.0  ;;  %v4242_v60 = vsel %vm3293_vm2, %v13903_v37, 0.0  ;;  %v18690_v62 = vld [vmem:[#allocation210_spill] sm:$0xff] }
 0x4f6   : > { %4234 = vadd.xlane.f32.xlu0 %v4233_v38  ;;  %18672 = vst [vmem:[#allocation204_spill] sm:$0xff] %v13913_v17  ;;  %10327 = vpow2.f32 %v3930_v32  ;;  %v3743_v38 = vsub.f32 %v18676_v4, %v18675_v36 }
 0x4f7   : > { %10329 = vpow2.f32 %v3934_v56 }
 0x4f8   : > { %v13905_v51 = vpop.xlane.xlu2 %4105  ;;  %v13909_v8 = vpop.xlane.xlu1 %4111  ;;  %v3936_v28 = vmul.f32 1.442695, %v3743_v38  ;;  %v18688_v38 = vld [vmem:[#allocation208_spill] sm:$0xff] }
 0x4f9   : > { %18668 = vst [vmem:[#allocation203_spill] sm:$0xff] %v13905_v51  ;;  %v13911_v59 = vpop.xlane.xlu0 %4108  ;;  %v3745_v51 = vsub.f32 %v18678_v40, %v18677_v52  ;;  %v18685_v52 = vld [vmem:[#allocation265_spill] sm:$0xff] }
 0x4fa   : > { %18670 = vst [vmem:[#allocation202_spill] sm:$0xff] %v13909_v8  ;;  %v4245_v8 = vsel %vm3293_vm2, %v13913_v17, 0.0  ;;  %v18686_v17 = vld [vmem:[#allocation209_spill] sm:$0xff] }
 0x4fb   : > { %18671 = vst [vmem:[#allocation257_spill] sm:$0xff] %v13911_v59  ;;  %v3938_v59 = vmul.f32 1.442695, %v3744_v19  ;;  %v13927_v32 = vpop.eup %10325  ;;  %v3940_v56 = vmul.f32 1.442695, %v3745_v51  ;;  %v3747_v19 = vsub.f32 %v18686_v17, %v18685_v52  ;;  %v18689_v51 = vld [vmem:[#allocation269_spill] sm:$0xff] }
 0x4fc   : > { %18679 = vst [vmem:[#allocation259_spill] sm:$0xff] %v13927_v32  ;;  %v13931_v40 = vpop.eup %10327 }
 0x4fd   : > { %4240 = vadd.xlane.f32.xlu2 %v4239_v30  ;;  %4246 = vadd.xlane.f32.xlu1 %v4245_v8  ;;  %18681 = vst [vmem:[#allocation260_spill] sm:$0xff] %v13931_v40  ;;  %v13937_v4 = vpop.eup %10329  ;;  %10331 = vpow2.f32 %v3938_v59  ;;  %v18687_v8 = vld [vmem:[#allocation266_spill] sm:$0xff]  ;;  %v4248_v37 = vsel %vm3293_vm2, %v13931_v40, 0.0  ;;  %v4251_v59 = vsel %vm3293_vm2, %v13927_v32, 0.0  ;;  %v18697_v32 = vld [vmem:[#allocation212_spill] sm:$0xff]  ;;  %v18701_v40 = vld [vmem:[#allocation213_spill] sm:$0xff] }
 0x4fe   : > { %4243 = vadd.xlane.f32.xlu0 %v4242_v60  ;;  %18684 = vst [vmem:[#allocation207_spill] sm:$0xff] %v13937_v4  ;;  %10333 = vpow2.f32 %v3936_v28  ;;  %v3746_v60 = vsub.f32 %v18688_v38, %v18687_v8 }
 0x4ff   : > { %10335 = vpow2.f32 %v3940_v56 }
 0x500   : > { %v13929_v33 = vpop.xlane.xlu2 %4114  ;;  %v13933_v36 = vpop.xlane.xlu1 %4120  ;;  %v3942_v17 = vmul.f32 1.442695, %v3746_v60  ;;  %v18699_v60 = vld [vmem:[#allocation211_spill] sm:$0xff] }
 0x501   : > { %18680 = vst [vmem:[#allocation206_spill] sm:$0xff] %v13929_v33  ;;  %v13935_v30 = vpop.xlane.xlu0 %4117  ;;  %v3748_v33 = vsub.f32 %v18690_v62, %v18689_v51  ;;  %v18696_v51 = vld [vmem:[#allocation271_spill] sm:$0xff] }
 0x502   : > { %18682 = vst [vmem:[#allocation205_spill] sm:$0xff] %v13933_v36  ;;  %v4254_v36 = vsel %vm3293_vm2, %v13937_v4, 0.0 }
 0x503   : > { %18683 = vst [vmem:[#allocation263_spill] sm:$0xff] %v13935_v30  ;;  %v3944_v30 = vmul.f32 1.442695, %v3747_v19  ;;  %v13951_v28 = vpop.eup %10331  ;;  %v3946_v56 = vmul.f32 1.442695, %v3748_v33  ;;  %v3750_v19 = vsub.f32 %v18697_v32, %v18696_v51  ;;  %v18700_v33 = vld [vmem:[#allocation275_spill] sm:$0xff] }
 0x504   : > { %v13955_v62 = vpop.eup %10333 }
 0x505   : > { %4249 = vadd.xlane.f32.xlu2 %v4248_v37  ;;  %4255 = vadd.xlane.f32.xlu1 %v4254_v36  ;;  %18692 = vst [vmem:[#allocation209_spill] sm:$0xff] %v13955_v62  ;;  %v13961_v38 = vpop.eup %10335  ;;  %10337 = vpow2.f32 %v3944_v30  ;;  %v18698_v36 = vld [vmem:[#allocation272_spill] sm:$0xff]  ;;  %v4257_v4 = vsel %vm3293_vm2, %v13955_v62, 0.0  ;;  %v4260_v30 = vsel %vm3293_vm2, %v13951_v28, 0.0 }
 0x506   : > { %4252 = vadd.xlane.f32.xlu0 %v4251_v59  ;;  %18695 = vst [vmem:[#allocation269_spill] sm:$0xff] %v13961_v38  ;;  %10339 = vpow2.f32 %v3942_v17  ;;  %v3749_v59 = vsub.f32 %v18699_v60, %v18698_v36 }
 0x507   : > { %10341 = vpow2.f32 %v3946_v56 }
 0x508   : > { %v13953_v52 = vpop.xlane.xlu2 %4123  ;;  %v13957_v8 = vpop.xlane.xlu1 %4129  ;;  %v3948_v32 = vmul.f32 1.442695, %v3749_v59  ;;  %v18710_v59 = vld [vmem:[#allocation214_spill] sm:$0xff] }
 0x509   : > { %18691 = vst [vmem:[#allocation265_spill] sm:$0xff] %v13953_v52  ;;  %v13959_v37 = vpop.xlane.xlu0 %4126  ;;  %v3751_v52 = vsub.f32 %v18701_v40, %v18700_v33  ;;  %v18707_v33 = vld [vmem:[#allocation277_spill] sm:$0xff] }
 0x50a   : > { %18693 = vst [vmem:[#allocation266_spill] sm:$0xff] %v13957_v8  ;;  %v4263_v8 = vsel %vm3293_vm2, %v13961_v38, 0.0  ;;  %v18708_v38 = vld [vmem:[#allocation215_spill] sm:$0xff] }
 0x50b   : > { %18694 = vst [vmem:[#allocation208_spill] sm:$0xff] %v13959_v37  ;;  %v3950_v37 = vmul.f32 1.442695, %v3750_v19  ;;  %v13975_v17 = vpop.eup %10337  ;;  %v3952_v56 = vmul.f32 1.442695, %v3751_v52  ;;  %v3753_v19 = vsub.f32 %v18708_v38, %v18707_v33  ;;  %v18711_v52 = vld [vmem:[#allocation216_spill] sm:$0xff] }
 0x50c   : > { %18702 = vst [vmem:[#allocation210_spill] sm:$0xff] %v13975_v17  ;;  %v13979_v40 = vpop.eup %10339 }
 0x50d   : > { %4258 = vadd.xlane.f32.xlu2 %v4257_v4  ;;  %4264 = vadd.xlane.f32.xlu1 %v4263_v8  ;;  %v13985_v60 = vpop.eup %10341  ;;  %10343 = vpow2.f32 %v3950_v37  ;;  %v18709_v8 = vld [vmem:[#allocation278_spill] sm:$0xff]  ;;  %v4266_v62 = vsel %vm3293_vm2, %v13979_v40, 0.0  ;;  %v4269_v37 = vsel %vm3293_vm2, %v13975_v17, 0.0 }
 0x50e   : > { %4261 = vadd.xlane.f32.xlu0 %v4260_v30  ;;  %18706 = vst [vmem:[#allocation211_spill] sm:$0xff] %v13985_v60  ;;  %10345 = vpow2.f32 %v3948_v32  ;;  %v3752_v30 = vsub.f32 %v18710_v59, %v18709_v8 }
 0x50f   : > { %10347 = vpow2.f32 %v3952_v56 }
 0x510   : > { %v13977_v51 = vpop.xlane.xlu2 %4132  ;;  %v13981_v36 = vpop.xlane.xlu1 %4138  ;;  %v3954_v38 = vmul.f32 1.442695, %v3752_v30  ;;  %v18718_v30 = vld [vmem:[#allocation217_spill] sm:$0xff] }
 0x511   : > { %18703 = vst [vmem:[#allocation271_spill] sm:$0xff] %v13977_v51  ;;  %v13983_v4 = vpop.xlane.xlu0 %4135  ;;  %v3754_v51 = vsub.f32 %v18711_v52, %v13352_v7  ;;  %v18715_v52 = vld [vmem:[#allocation282_spill] sm:$0xff] }
 0x512   : > { %18704 = vst [vmem:[#allocation212_spill] sm:$0xff] %v13981_v36  ;;  %v4272_v36 = vsel %vm3293_vm2, %v13985_v60, 0.0  ;;  %v18716_v60 = vld [vmem:[#allocation218_spill] sm:$0xff] }
 0x513   : > { %18705 = vst [vmem:[#allocation272_spill] sm:$0xff] %v13983_v4  ;;  %v3956_v4 = vmul.f32 1.442695, %v3753_v19  ;;  %v13999_v32 = vpop.eup %10343  ;;  %v3958_v56 = vmul.f32 1.442695, %v3754_v51  ;;  %v3756_v19 = vsub.f32 %v18716_v60, %v18715_v52  ;;  %v18719_v51 = vld [vmem:[#allocation219_spill] sm:$0xff] }
 0x514   : > { %v14003_v7 = vpop.eup %10345 }
 0x515   : > { %4267 = vadd.xlane.f32.xlu2 %v4266_v62  ;;  %4273 = vadd.xlane.f32.xlu1 %v4272_v36  ;;  %v14009_v59 = vpop.eup %10347  ;;  %10349 = vpow2.f32 %v3956_v4  ;;  %v18717_v36 = vld [vmem:[#allocation283_spill] sm:$0xff]  ;;  %v4275_v17 = vsel %vm3293_vm2, %v14003_v7, 0.0  ;;  %v4278_v4 = vsel %vm3293_vm2, %v13999_v32, 0.0 }
 0x516   : > { %4270 = vadd.xlane.f32.xlu0 %v4269_v37  ;;  %10351 = vpow2.f32 %v3954_v38  ;;  %v3755_v37 = vsub.f32 %v18718_v30, %v18717_v36 }
 0x517   : > { %10353 = vpow2.f32 %v3958_v56 }
 0x518   : > { %v14001_v33 = vpop.xlane.xlu2 %4141  ;;  %v14005_v8 = vpop.xlane.xlu1 %4147  ;;  %v3960_v60 = vmul.f32 1.442695, %v3755_v37 }
 0x519   : > { %18712 = vst [vmem:[#allocation275_spill] sm:$0xff] %v14001_v33  ;;  %v14007_v62 = vpop.xlane.xlu0 %4144  ;;  %v3757_v33 = vsub.f32 %v18719_v51, %v13386_v41  ;;  %v18723_v51 = vld [vmem:[#allocation221_spill] sm:$0xff] }
 0x51a   : > { %18713 = vst [vmem:[#allocation213_spill] sm:$0xff] %v14005_v8  ;;  %v4281_v8 = vsel %vm3293_vm2, %v14009_v59, 0.0 }
 0x51b   : > { %18714 = vst [vmem:[#allocation277_spill] sm:$0xff] %v14007_v62  ;;  %v3962_v62 = vmul.f32 1.442695, %v3756_v19  ;;  %v14023_v38 = vpop.eup %10349  ;;  %v3964_v56 = vmul.f32 1.442695, %v3757_v33  ;;  %v3759_v19 = vsub.f32 %v18723_v51, %v13393_v20  ;;  %v18725_v33 = vld [vmem:[#allocation222_spill] sm:$0xff] }
 0x51c   : > { %v14027_v41 = vpop.eup %10351 }
 0x51d   : > { %4276 = vadd.xlane.f32.xlu2 %v4275_v17  ;;  %4282 = vadd.xlane.f32.xlu1 %v4281_v8  ;;  %v14033_v30 = vpop.eup %10353  ;;  %10355 = vpow2.f32 %v3962_v62  ;;  %v18724_v8 = vld [vmem:[#allocation220_spill] sm:$0xff]  ;;  %v4287_v62 = vsel %vm3293_vm2, %v14023_v38, 0.0 }
 0x51e   : > { %4279 = vadd.xlane.f32.xlu0 %v4278_v4  ;;  %10357 = vpow2.f32 %v3960_v60  ;;  %v3758_v37 = vsub.f32 %v18724_v8, %v13395_v31  ;;  %v3760_v4 = vsub.f32 %v18725_v33, %v13420_v1  ;;  %v18731_v33 = vld [vmem:[#allocation224_spill] sm:$0xff] }
 0x51f   : > { %10359 = vpow2.f32 %v3964_v56 }
 0x520   : > { %v14025_v52 = vpop.xlane.xlu2 %4150  ;;  %v14029_v36 = vpop.xlane.xlu1 %4156  ;;  %v3966_v20 = vmul.f32 1.442695, %v3758_v37  ;;  %v3970_v31 = vmul.f32 1.442695, %v3760_v4  ;;  %v18733_v4 = vld [vmem:[#allocation225_spill] sm:$0xff] }
 0x521   : > { %18720 = vst [vmem:[#allocation215_spill] sm:$0xff] %v14025_v52  ;;  %v14031_v17 = vpop.xlane.xlu0 %4153  ;;  %v4284_v52 = vsel %vm3293_vm2, %v14027_v41, 0.0 }
 0x522   : > { %18721 = vst [vmem:[#allocation278_spill] sm:$0xff] %v14029_v36  ;;  %v4290_v36 = vsel %vm3293_vm2, %v14033_v30, 0.0 }
 0x523   : > { %18722 = vst [vmem:[#allocation214_spill] sm:$0xff] %v14031_v17  ;;  %v3968_v17 = vmul.f32 1.442695, %v3759_v19  ;;  %v14047_v60 = vpop.eup %10355  ;;  %v3762_v19 = vsub.f32 %v18731_v33, %v13429_v63 }
 0x524   : > { %18726 = vst [vmem:[#allocation216_spill] sm:$0xff] %v14047_v60  ;;  %v14051_v1 = vpop.eup %10357 }
 0x525   : > { %4285 = vadd.xlane.f32.xlu2 %v4284_v52  ;;  %4291 = vadd.xlane.f32.xlu1 %v4290_v36  ;;  %v14057_v8 = vpop.eup %10359  ;;  %10361 = vpow2.f32 %v3968_v17  ;;  %v18732_v36 = vld [vmem:[#allocation223_spill] sm:$0xff]  ;;  %v4296_v17 = vsel %vm3293_vm2, %v14047_v60, 0.0 }
 0x526   : > { %4288 = vadd.xlane.f32.xlu0 %v4287_v62  ;;  %18730 = vst [vmem:[#allocation217_spill] sm:$0xff] %v14057_v8  ;;  %10363 = vpow2.f32 %v3966_v20  ;;  %v3761_v37 = vsub.f32 %v18732_v36, %v13431_v13  ;;  %v3763_v62 = vsub.f32 %v18733_v4, %v13449_v21  ;;  %v18740_v4 = vld [vmem:[#allocation138_spill] sm:$0xff] }
 0x527   : > { %10365 = vpow2.f32 %v3970_v31 }
 0x528   : > { %v14049_v56 = vpop.xlane.xlu2 %4159  ;;  %v14053_v51 = vpop.xlane.xlu1 %4165  ;;  %v3972_v63 = vmul.f32 1.442695, %v3761_v37  ;;  %v3976_v13 = vmul.f32 1.442695, %v3763_v62  ;;  %v18743_v37 = vld [vmem:[#allocation226_spill] sm:$0xff]  ;;  %v18744_v62 = vld [vmem:[#allocation228_spill] sm:$0xff] }
 0x529   : > { %18727 = vst [vmem:[#allocation282_spill] sm:$0xff] %v14049_v56  ;;  %v14055_v52 = vpop.xlane.xlu0 %4162  ;;  %v4293_v56 = vsel %vm3293_vm2, %v14051_v1, 0.0 }
 0x52a   : > { %18728 = vst [vmem:[#allocation218_spill] sm:$0xff] %v14053_v51  ;;  %v4299_v51 = vsel %vm3293_vm2, %v14057_v8, 0.0  ;;  %v18741_v8 = vld [vmem:[#allocation227_spill] sm:$0xff] }
 0x52b   : > { %18729 = vst [vmem:[#allocation283_spill] sm:$0xff] %v14055_v52  ;;  %v3974_v52 = vmul.f32 1.442695, %v3762_v19  ;;  %v14071_v20 = vpop.eup %10361  ;;  %v3765_v19 = vsub.f32 %v18741_v8, %v18740_v4 }
 0x52c   : > { %18734 = vst [vmem:[#allocation219_spill] sm:$0xff] %v14071_v20  ;;  %v14075_v21 = vpop.eup %10363 }
 0x52d   : > { %4294 = vadd.xlane.f32.xlu2 %v4293_v56  ;;  %4300 = vadd.xlane.f32.xlu1 %v4299_v51  ;;  %18736 = vst [vmem:[#allocation220_spill] sm:$0xff] %v14075_v21  ;;  %v14081_v36 = vpop.eup %10365  ;;  %10367 = vpow2.f32 %v3974_v52  ;;  %v18742_v51 = vld [vmem:[#allocation139_spill] sm:$0xff]  ;;  %v4302_v60 = vsel %vm3293_vm2, %v14075_v21, 0.0  ;;  %v4305_v52 = vsel %vm3293_vm2, %v14071_v20, 0.0  ;;  %v18752_v20 = vld [vmem:[#allocation230_spill] sm:$0xff] }
 0x52e   : > { %4297 = vadd.xlane.f32.xlu0 %v4296_v17  ;;  %18739 = vst [vmem:[#allocation223_spill] sm:$0xff] %v14081_v36  ;;  %10369 = vpow2.f32 %v3972_v63  ;;  %v3764_v17 = vsub.f32 %v18743_v37, %v18742_v51 }
 0x52f   : > { %10371 = vpow2.f32 %v3976_v13 }
 0x530   : > { %v14073_v31 = vpop.xlane.xlu2 %4168  ;;  %v14077_v33 = vpop.xlane.xlu1 %4174  ;;  %v3978_v8 = vmul.f32 1.442695, %v3764_v17  ;;  %v18754_v17 = vld [vmem:[#allocation229_spill] sm:$0xff] }
 0x531   : > { %18735 = vst [vmem:[#allocation221_spill] sm:$0xff] %v14073_v31  ;;  %v14079_v56 = vpop.xlane.xlu0 %4171  ;;  %v3766_v31 = vsub.f32 %v18744_v62, %v13473_v5  ;;  %v18751_v62 = vld [vmem:[#allocation184_spill] sm:$0xff] }
 0x532   : > { %18737 = vst [vmem:[#allocation222_spill] sm:$0xff] %v14077_v33  ;;  %v4308_v33 = vsel %vm3293_vm2, %v14081_v36, 0.0  ;;  %v18756_v36 = vld [vmem:[#allocation231_spill] sm:$0xff] }
 0x533   : > { %18738 = vst [vmem:[#allocation224_spill] sm:$0xff] %v14079_v56  ;;  %v3980_v56 = vmul.f32 1.442695, %v3765_v19  ;;  %v14095_v63 = vpop.eup %10367  ;;  %v3982_v13 = vmul.f32 1.442695, %v3766_v31  ;;  %v3768_v19 = vsub.f32 %v18752_v20, %v18751_v62  ;;  %v18755_v31 = vld [vmem:[#allocation189_spill] sm:$0xff] }
 0x534   : > { %18745 = vst [vmem:[#allocation225_spill] sm:$0xff] %v14095_v63  ;;  %v14099_v5 = vpop.eup %10369 }
 0x535   : > { %4303 = vadd.xlane.f32.xlu2 %v4302_v60  ;;  %4309 = vadd.xlane.f32.xlu1 %v4308_v33  ;;  %18747 = vst [vmem:[#allocation227_spill] sm:$0xff] %v14099_v5  ;;  %v14105_v37 = vpop.eup %10371  ;;  %10373 = vpow2.f32 %v3980_v56  ;;  %v18753_v33 = vld [vmem:[#allocation141_spill] sm:$0xff]  ;;  %v4311_v21 = vsel %vm3293_vm2, %v14099_v5, 0.0  ;;  %v4314_v56 = vsel %vm3293_vm2, %v14095_v63, 0.0 }
 0x536   : > { %4306 = vadd.xlane.f32.xlu0 %v4305_v52  ;;  %18750 = vst [vmem:[#allocation228_spill] sm:$0xff] %v14105_v37  ;;  %10375 = vpow2.f32 %v3978_v8  ;;  %v3767_v52 = vsub.f32 %v18754_v17, %v18753_v33  ;;  %v18939_v63 = vld [vmem:[#allocation145_spill] sm:$0xff] }
 0x537   : > { %10377 = vpow2.f32 %v3982_v13 }
 0x538   : > { %v14097_v4 = vpop.xlane.xlu2 %4177  ;;  %v14101_v51 = vpop.xlane.xlu1 %4183  ;;  %v3984_v20 = vmul.f32 1.442695, %v3767_v52  ;;  %v18765_v52 = vld [vmem:[#allocation190_spill] sm:$0xff] }
 0x539   : > { %18746 = vst [vmem:[#allocation138_spill] sm:$0xff] %v14097_v4  ;;  %v14103_v60 = vpop.xlane.xlu0 %4180  ;;  %v3769_v4 = vsub.f32 %v18756_v36, %v18755_v31  ;;  %v18763_v31 = vld [vmem:[#allocation143_spill] sm:$0xff] }
 0x53a   : > { %18748 = vst [vmem:[#allocation139_spill] sm:$0xff] %v14101_v51  ;;  %v4317_v51 = vsel %vm3293_vm2, %v14105_v37, 0.0 }
 0x53b   : > { %18749 = vst [vmem:[#allocation226_spill] sm:$0xff] %v14103_v60  ;;  %v3986_v60 = vmul.f32 1.442695, %v3768_v19  ;;  %v14119_v8 = vpop.eup %10373  ;;  %v3988_v13 = vmul.f32 1.442695, %v3769_v4  ;;  %v18764_v19 = vld [vmem:[#allocation232_spill] sm:$0xff] }
 0x53c   : > { %18757 = vst [vmem:[#allocation184_spill] sm:$0xff] %v14119_v8  ;;  %v14123_v36 = vpop.eup %10375 }
 0x53d   : > { %4312 = vadd.xlane.f32.xlu2 %v4311_v21  ;;  %4318 = vadd.xlane.f32.xlu1 %v4317_v51  ;;  %18759 = vst [vmem:[#allocation141_spill] sm:$0xff] %v14123_v36  ;;  %v14129_v17 = vpop.eup %10377  ;;  %10379 = vpow2.f32 %v3986_v60  ;;  %v3770_v51 = vsub.f32 %v18764_v19, %v18763_v31  ;;  %v4320_v4 = vsel %vm3293_vm2, %v14123_v36, 0.0  ;;  %v18913_v36 = vld [vmem:[#allocation60_spill] sm:$0xff] }
 0x53e   : > { %4315 = vadd.xlane.f32.xlu0 %v4314_v56  ;;  %18762 = vst [vmem:[#allocation231_spill] sm:$0xff] %v14129_v17  ;;  %10381 = vpow2.f32 %v3984_v20  ;;  %v18766_v56 = vld [vmem:[#allocation233_spill] sm:$0xff] }
 0x53f   : > { %10383 = vpow2.f32 %v3988_v13  ;;  %v3771_v37 = vsub.f32 %v18766_v56, %v18765_v52  ;;  %v3990_v60 = vmul.f32 1.442695, %v3770_v51 }
 0x540   : > { %v14121_v62 = vpop.xlane.xlu2 %4186  ;;  %v14125_v33 = vpop.xlane.xlu1 %4192 }
 0x541   : > { %18758 = vst [vmem:[#allocation230_spill] sm:$0xff] %v14121_v62  ;;  %v14127_v21 = vpop.xlane.xlu0 %4189  ;;  %v3992_v31 = vmul.f32 1.442695, %v3771_v37  ;;  %10385 = vpow2.f32 %v3990_v60  ;;  %v18773_v62 = vld [vmem:[#allocation234_spill] sm:$0xff] }
 0x542   : > { %18760 = vst [vmem:[#allocation229_spill] sm:$0xff] %v14125_v33  ;;  %v4326_v33 = vsel %vm3293_vm2, %v14129_v17, 0.0 }
 0x543   : > { %18761 = vst [vmem:[#allocation189_spill] sm:$0xff] %v14127_v21  ;;  %v4323_v21 = vsel %vm3293_vm2, %v14119_v8, 0.0  ;;  %v14141_v20 = vpop.eup %10379  ;;  %v3772_v8 = vsub.f32 %v18773_v62, %v13521_v23  ;;  %10387 = vpow2.f32 %v3992_v31 }
 0x544   : > { %18767 = vst [vmem:[#allocation143_spill] sm:$0xff] %v14141_v20  ;;  %v14145_v19 = vpop.eup %10381 }
 0x545   : > { %4321 = vadd.xlane.f32.xlu2 %v4320_v4  ;;  %4327 = vadd.xlane.f32.xlu1 %v4326_v33  ;;  %18769 = vst [vmem:[#allocation190_spill] sm:$0xff] %v14145_v19  ;;  %v14151_v4 = vpop.eup %10383  ;;  %v4329_v33 = vsel %vm3293_vm2, %v14145_v19, 0.0  ;;  %v3994_v51 = vmul.f32 1.442695, %v3772_v8 }
 0x546   : > { %4324 = vadd.xlane.f32.xlu0 %v4323_v21  ;;  %18772 = vst [vmem:[#allocation290_spill] sm:$0xff] %v14151_v4  ;;  %v4335_v37 = vsel %vm3293_vm2, %v14151_v4, 0.0  ;;  %v4332_v21 = vsel %vm3293_vm2, %v14141_v20, 0.0 }
 0x547   : > { %v14163_v60 = vpop.eup %10385  ;;  %10389 = vpow2.f32 %v3994_v51 }
 0x548   : > { %v14143_v13 = vpop.xlane.xlu2 %4195  ;;  %v14147_v52 = vpop.xlane.xlu1 %4201  ;;  %18775 = vst [vmem:[#allocation291_spill] sm:$0xff] %v14163_v60  ;;  %v4338_v31 = vsel %vm3293_vm2, %v14163_v60, 0.0 }
 0x549   : > { %18768 = vst [vmem:[#allocation232_spill] sm:$0xff] %v14143_v13  ;;  %v14149_v56 = vpop.xlane.xlu0 %4198  ;;  %v14169_v62 = vpop.eup %10387  ;;  %v18786_v13 = vld [vmem:[#allocation8_spill] sm:$0xff] }
 0x54a   : > { %18770 = vst [vmem:[#allocation233_spill] sm:$0xff] %v14147_v52 }
 0x54b   : > { %18771 = vst [vmem:[#allocation289_spill] sm:$0xff] %v14149_v56 }
 0x54c   : > { %18778 = vst [vmem:[#allocation294_spill] sm:$0xff] %v14169_v62 }
 0x54d   : > { %4330 = vadd.xlane.f32.xlu2 %v4329_v33  ;;  %4336 = vadd.xlane.f32.xlu1 %v4335_v37  ;;  %v4341_v33 = vsel %vm3293_vm2, %v14169_v62, 0.0  ;;  %v14177_v37 = vpop.eup %10389 }
 0x54e   : > { %4333 = vadd.xlane.f32.xlu0 %v4332_v21  ;;  %18780 = vst [vmem:[#allocation296_spill] sm:$0xff] %v14177_v37 }
 0x550   : > { %v14161_v52 = vpop.xlane.xlu2 %4204  ;;  %v14165_v56 = vpop.xlane.xlu1 %4210 }
 0x551   : > { %18774 = vst [vmem:[#allocation234_spill] sm:$0xff] %v14161_v52  ;;  %v14167_v23 = vpop.xlane.xlu0 %4207 }
 0x552   : > { %18776 = vst [vmem:[#allocation292_spill] sm:$0xff] %v14165_v56 }
 0x553   : > { %18777 = vst [vmem:[#allocation293_spill] sm:$0xff] %v14167_v23  ;;  %v4344_v23 = vsel %vm3293_vm2, %v14177_v37, 0.0 }
 0x555   : > { %4339 = vadd.xlane.f32.xlu2 %v4338_v31 }
 0x556   : > { %4342 = vadd.xlane.f32.xlu0 %v4341_v33  ;;  %v18787_v33 = vld [vmem:[#allocation2_spill] sm:$0xff] }
 0x557   : > { %v9879_v62 = vpack.i.bf16 %v18787_v33, %v18786_v13  ;;  %v18796_v33 = vld [vmem:[#allocation14_spill] sm:$0xff] }
 0x558   : > { %v14175_v8 = vpop.xlane.xlu2 %4213  ;;  %v14179_v21 = vpop.xlane.xlu1 %4219 }
 0x559   : > { %18779 = vst [vmem:[#allocation295_spill] sm:$0xff] %v14175_v8  ;;  %v14181_v56 = vpop.xlane.xlu0 %4216 }
 0x55a   : > { %18781 = vst [vmem:[#allocation297_spill] sm:$0xff] %v14179_v21  ;;  %v18789_v21 = vld [vmem:[#allocation15_spill] sm:$0xff] }
 0x55b   : > { %18782 = vst [vmem:[#allocation298_spill] sm:$0xff] %v14181_v56  ;;  %v18790_v56 = vld [vmem:[#allocation6_spill] sm:$0xff] }
 0x55c   : > { %v9884_v4 = vpack.i.bf16 %v18790_v56, %v18789_v21  ;;  %v18800_v56 = vld [vmem:[#allocation10_spill] sm:$0xff]  ;;  %v18801_v21 = vld [vmem:[#allocation3_spill] sm:$0xff] }
 0x55d   : > { %4345 = vadd.xlane.f32.xlu2 %v4344_v23 }
 0x560   : > { %v14185_v51 = vpop.xlane.xlu2 %4222  ;;  %v14187_v52 = vpop.xlane.xlu1 %4228 }
 0x561   : > { %18783 = vst [vmem:[#allocation299_spill] sm:$0xff] %v14185_v51  ;;  %v14189_v31 = vpop.xlane.xlu0 %4225  ;;  %v18794_v51 = vld [vmem:[#allocation18_spill] sm:$0xff] }
 0x562   : > { %18784 = vst [vmem:[#allocation300_spill] sm:$0xff] %v14187_v52  ;;  %v18793_v52 = vld [vmem:[#allocation32_spill] sm:$0xff] }
 0x563   : > { %18785 = vst [vmem:[#allocation301_spill] sm:$0xff] %v14189_v31  ;;  %v9894_v31 = vpack.i.bf16 %v18794_v51, %v18793_v52  ;;  %v18803_v52 = vld [vmem:[#allocation4_spill] sm:$0xff] }
 0x566   : > { %9880 = vrot.lane.b32.xlu1 %v9879_v62, %s10760_s27  ;;  %v18797_v62 = vld [vmem:[#allocation9_spill] sm:$0xff] }
 0x567   : > { %v9899_v37 = vpack.i.bf16 %v18797_v62, %v18796_v33  ;;  %v18806_v33 = vld [vmem:[#allocation31_spill] sm:$0xff] }
 0x568   : > { %v14194_v8 = vpop.xlane.xlu2 %4231  ;;  %v14198_v60 = vpop.xlane.xlu1 %4237 }
 0x569   : > { %18788 = vst [vmem:[#allocation8_spill] sm:$0xff] %v14194_v8  ;;  %v14200_v23 = vpop.xlane.xlu0 %4234 }
 0x56a   : > { %18791 = vst [vmem:[#allocation2_spill] sm:$0xff] %v14198_v60  ;;  %9885 = vrot.lane.b32.xlu0 %v9884_v4, %s10760_s27  ;;  %v9889_v60 = vpack.i.bf16 %v18801_v21, %v18800_v56  ;;  %v18802_v4 = vld [vmem:[#allocation11_spill] sm:$0xff]  ;;  %v18810_v56 = vld [vmem:[#allocation21_spill] sm:$0xff] }
 0x56b   : > { %18792 = vst [vmem:[#allocation15_spill] sm:$0xff] %v14200_v23  ;;  %v9904_v51 = vpack.i.bf16 %v18803_v52, %v18802_v4  ;;  %v18812_v4 = vld [vmem:[#allocation7_spill] sm:$0xff] }
 0x56e   : > { %9895 = vrot.lane.b32.xlu1 %v9894_v31, %s10760_s27 }
 0x570   : > { %v14206_v13 = vpop.xlane.xlu2 %4240  ;;  %v14210_v8 = vpop.xlane.xlu1 %4246 }
 0x571   : > { %18795 = vst [vmem:[#allocation6_spill] sm:$0xff] %v14206_v13  ;;  %v14212_v19 = vpop.xlane.xlu0 %4243  ;;  %v18805_v13 = vld [vmem:[#allocation57_spill] sm:$0xff] }
 0x572   : > { %18798 = vst [vmem:[#allocation32_spill] sm:$0xff] %v14210_v8  ;;  %9900 = vrot.lane.b32.xlu0 %v9899_v37, %s10760_s27  ;;  %v9909_v62 = vpack.i.bf16 %v18806_v33, %v18805_v13  ;;  %v18809_v37 = vld [vmem:[#allocation45_spill] sm:$0xff] }
 0x573   : > { %18799 = vst [vmem:[#allocation18_spill] sm:$0xff] %v14212_v19  ;;  %v9914_v21 = vpack.i.bf16 %v18810_v56, %v18809_v37  ;;  %v18815_v13 = vld [vmem:[#allocation5_spill] sm:$0xff]  ;;  %v18819_v37 = vld [vmem:[#allocation40_spill] sm:$0xff] }
 0x575   : > { %9890 = vrot.lane.b32.xlu2 %v9889_v60, %s10760_s27  ;;  %v18811_v60 = vld [vmem:[#allocation19_spill] sm:$0xff] }
 0x576   : > { %9905 = vrot.lane.b32.xlu1 %v9904_v51, %s10760_s27  ;;  %v9919_v52 = vpack.i.bf16 %v18812_v4, %v18811_v60  ;;  %v18821_v60 = vld [vmem:[#allocation27_spill] sm:$0xff] }
 0x578   : > { %v14221_v31 = vpop.xlane.xlu2 %4249  ;;  %v14225_v8 = vpop.xlane.xlu1 %4255 }
 0x579   : > { %18804 = vst [vmem:[#allocation14_spill] sm:$0xff] %v14221_v31  ;;  %v14227_v19 = vpop.xlane.xlu0 %4252  ;;  %v18814_v31 = vld [vmem:[#allocation13_spill] sm:$0xff] }
 0x57a   : > { %18807 = vst [vmem:[#allocation9_spill] sm:$0xff] %v14225_v8  ;;  %9910 = vrot.lane.b32.xlu0 %v9909_v62, %s10760_s27  ;;  %v9924_v33 = vpack.i.bf16 %v18815_v13, %v18814_v31  ;;  %v18818_v62 = vld [vmem:[#allocation58_spill] sm:$0xff] }
 0x57b   : > { %18808 = vst [vmem:[#allocation10_spill] sm:$0xff] %v14227_v19  ;;  %v9929_v56 = vpack.i.bf16 %v18819_v37, %v18818_v62  ;;  %v18829_v37 = vld [vmem:[#allocation66_spill] sm:$0xff] }
 0x57d   : > { %9915 = vrot.lane.b32.xlu2 %v9914_v21, %s10760_s27  ;;  %v18820_v21 = vld [vmem:[#allocation44_spill] sm:$0xff] }
 0x57e   : > { %9920 = vrot.lane.b32.xlu1 %v9919_v52, %s10760_s27  ;;  %v9934_v4 = vpack.i.bf16 %v18821_v60, %v18820_v21  ;;  %v18822_v52 = vld [vmem:[#allocation16_spill] sm:$0xff] }
 0x580   : > { %v14236_v51 = vpop.xlane.xlu2 %4258  ;;  %v14240_v23 = vpop.xlane.xlu1 %4264 }
 0x581   : > { %18813 = vst [vmem:[#allocation3_spill] sm:$0xff] %v14236_v51  ;;  %v14242_v19 = vpop.xlane.xlu0 %4261  ;;  %v18823_v51 = vld [vmem:[#allocation43_spill] sm:$0xff] }
 0x582   : > { %18816 = vst [vmem:[#allocation11_spill] sm:$0xff] %v14240_v23  ;;  %9925 = vrot.lane.b32.xlu0 %v9924_v33, %s10760_s27  ;;  %v9939_v8 = vpack.i.bf16 %v18823_v51, %v18822_v52  ;;  %v18826_v33 = vld [vmem:[#allocation12_spill] sm:$0xff]  ;;  %v18827_v23 = vld [vmem:[#allocation26_spill] sm:$0xff]  ;;  %v18832_v51 = vld [vmem:[#allocation53_spill] sm:$0xff] }
 0x583   : > { %18817 = vst [vmem:[#allocation4_spill] sm:$0xff] %v14242_v19  ;;  %v9944_v19 = vpack.i.bf16 %v18827_v23, %v18826_v33  ;;  %v18836_v23 = vld [vmem:[#allocation48_spill] sm:$0xff] }
 0x585   : > { %9930 = vrot.lane.b32.xlu2 %v9929_v56, %s10760_s27  ;;  %v18830_v56 = vld [vmem:[#allocation36_spill] sm:$0xff] }
 0x586   : > { %9935 = vrot.lane.b32.xlu1 %v9934_v4, %s10760_s27  ;;  %v9949_v21 = vpack.i.bf16 %v18830_v56, %v18829_v37  ;;  %v18833_v4 = vld [vmem:[#allocation23_spill] sm:$0xff]  ;;  %v18840_v37 = vld [vmem:[#allocation62_spill] sm:$0xff]  ;;  %v18841_v56 = vld [vmem:[#allocation77_spill] sm:$0xff] }
 0x587   : > { %v9954_v52 = vpack.i.bf16 %v18833_v4, %v18832_v51 }
 0x588   : > { %v14253_v31 = vpop.xlane.xlu2 %4267  ;;  %v14260_v62 = vpop.xlane.xlu1 %4273 }
 0x589   : > { %18824 = vst [vmem:[#allocation57_spill] sm:$0xff] %v14253_v31  ;;  %v14255_v13 = vpop.xlane.xlu0 %4270  ;;  %v18838_v31 = vld [vmem:[#allocation17_spill] sm:$0xff] }
 0x58a   : > { %18825 = vst [vmem:[#allocation31_spill] sm:$0xff] %v14255_v13  ;;  %9940 = vrot.lane.b32.xlu0 %v9939_v8, %s10760_s27  ;;  %v18835_v8 = vld [vmem:[#allocation67_spill] sm:$0xff] }
 0x58b   : > { %18828 = vst [vmem:[#allocation45_spill] sm:$0xff] %v14260_v62  ;;  %v9959_v33 = vpack.i.bf16 %v18836_v23, %v18835_v8  ;;  %v18837_v62 = vld [vmem:[#allocation50_spill] sm:$0xff]  ;;  %v18845_v8 = vld [vmem:[#allocation64_spill] sm:$0xff] }
 0x58d   : > { %9945 = vrot.lane.b32.xlu2 %v9944_v19, %s10760_s27  ;;  %v9964_v19 = vpack.i.bf16 %v18838_v31, %v18837_v62  ;;  %v18847_v31 = vld [vmem:[#allocation34_spill] sm:$0xff] }
 0x58e   : > { %9950 = vrot.lane.b32.xlu1 %v9949_v21, %s10760_s27  ;;  %v9969_v21 = vpack.i.bf16 %v18841_v56, %v18840_v37  ;;  %v18850_v37 = vld [vmem:[#allocation33_spill] sm:$0xff] }
 0x590   : > { %v14266_v60 = vpop.xlane.xlu2 %4276  ;;  %v14277_v20 = vpop.xlane.xlu1 %4282 }
 0x591   : > { %18831 = vst [vmem:[#allocation21_spill] sm:$0xff] %v14266_v60  ;;  %v14270_v13 = vpop.xlane.xlu0 %4279 }
 0x592   : > { %18834 = vst [vmem:[#allocation19_spill] sm:$0xff] %v14270_v13  ;;  %9955 = vrot.lane.b32.xlu0 %v9954_v52, %s10760_s27  ;;  %v18844_v52 = vld [vmem:[#allocation49_spill] sm:$0xff]  ;;  %v18846_v13 = vld [vmem:[#allocation51_spill] sm:$0xff] }
 0x593   : > { %18839 = vst [vmem:[#allocation7_spill] sm:$0xff] %v14277_v20  ;;  %v9974_v23 = vpack.i.bf16 %v18845_v8, %v18844_v52  ;;  %v9979_v62 = vpack.i.bf16 %v18847_v31, %v18846_v13  ;;  %v18854_v52 = vld [vmem:[#allocation85_spill] sm:$0xff]  ;;  %v18855_v20 = vld [vmem:[#allocation96_spill] sm:$0xff]  ;;  %v18856_v13 = vld [vmem:[#allocation78_spill] sm:$0xff] }
 0x594   : > { %v9994_v31 = vpack.i.bf16 %v18856_v13, %v18855_v20  ;;  %v18865_v20 = vld [vmem:[#allocation93_spill] sm:$0xff] }
 0x595   : > { %9960 = vrot.lane.b32.xlu2 %v9959_v33, %s10760_s27 }
 0x596   : > { %9965 = vrot.lane.b32.xlu1 %v9964_v19, %s10760_s27  ;;  %v18849_v19 = vld [vmem:[#allocation54_spill] sm:$0xff] }
 0x597   : > { %v9984_v56 = vpack.i.bf16 %v18850_v37, %v18849_v19 }
 0x598   : > { %v14283_v51 = vpop.xlane.xlu2 %4285  ;;  %v14293_v33 = vpop.xlane.xlu1 %4291 }
 0x599   : > { %18842 = vst [vmem:[#allocation13_spill] sm:$0xff] %v14283_v51  ;;  %v14285_v4 = vpop.xlane.xlu0 %4288 }
 0x59a   : > { %18843 = vst [vmem:[#allocation5_spill] sm:$0xff] %v14285_v4  ;;  %9970 = vrot.lane.b32.xlu0 %v9969_v21, %s10760_s27  ;;  %v18853_v21 = vld [vmem:[#allocation103_spill] sm:$0xff] }
 0x59b   : > { %18848 = vst [vmem:[#allocation58_spill] sm:$0xff] %v14293_v33  ;;  %v9989_v8 = vpack.i.bf16 %v18854_v52, %v18853_v21  ;;  %v18864_v52 = vld [vmem:[#allocation105_spill] sm:$0xff] }
 0x59c   : > { %v10009_v13 = vpack.i.bf16 %v18865_v20, %v18864_v52  ;;  %v18875_v52 = vld [vmem:[#allocation101_spill] sm:$0xff]  ;;  %v18876_v20 = vld [vmem:[#allocation80_spill] sm:$0xff] }
 0x59d   : > { %9975 = vrot.lane.b32.xlu2 %v9974_v23, %s10760_s27  ;;  %v18857_v23 = vld [vmem:[#allocation76_spill] sm:$0xff] }
 0x59e   : > { %9980 = vrot.lane.b32.xlu1 %v9979_v62, %s10760_s27  ;;  %v18858_v62 = vld [vmem:[#allocation41_spill] sm:$0xff] }
 0x59f   : > { %v9999_v33 = vpack.i.bf16 %v18858_v62, %v18857_v23 }
 0x5a0   : > { %v14298_v51 = vpop.xlane.xlu2 %4294  ;;  %v14313_v37 = vpop.xlane.xlu1 %4300 }
 0x5a1   : > { %18851 = vst [vmem:[#allocation40_spill] sm:$0xff] %v14298_v51  ;;  %v14300_v4 = vpop.xlane.xlu0 %4297 }
 0x5a2   : > { %18852 = vst [vmem:[#allocation44_spill] sm:$0xff] %v14300_v4  ;;  %9985 = vrot.lane.b32.xlu0 %v9984_v56, %s10760_s27  ;;  %v18861_v56 = vld [vmem:[#allocation69_spill] sm:$0xff]  ;;  %v18862_v4 = vld [vmem:[#allocation35_spill] sm:$0xff] }
 0x5a3   : > { %18860 = vst [vmem:[#allocation16_spill] sm:$0xff] %v14313_v37  ;;  %v10004_v51 = vpack.i.bf16 %v18862_v4, %v18861_v56  ;;  %v18872_v56 = vld [vmem:[#allocation42_spill] sm:$0xff] }
 0x5a5   : > { %9990 = vrot.lane.b32.xlu2 %v9989_v8, %s10760_s27  ;;  %v18866_v8 = vld [vmem:[#allocation86_spill] sm:$0xff] }
 0x5a6   : > { %9995 = vrot.lane.b32.xlu1 %v9994_v31, %s10760_s27  ;;  %v18867_v31 = vld [vmem:[#allocation74_spill] sm:$0xff] }
 0x5a7   : > { %v10014_v23 = vpack.i.bf16 %v18867_v31, %v18866_v8  ;;  %v18878_v31 = vld [vmem:[#allocation100_spill] sm:$0xff] }
 0x5a8   : > { %v14311_v19 = vpop.xlane.xlu2 %4303  ;;  %v14331_v4 = vpop.xlane.xlu1 %4309 }
 0x5a9   : > { %18859 = vst [vmem:[#allocation27_spill] sm:$0xff] %v14311_v19  ;;  %v14318_v21 = vpop.xlane.xlu0 %4306  ;;  %v18870_v19 = vld [vmem:[#allocation52_spill] sm:$0xff] }
 0x5aa   : > { %10000 = vrot.lane.b32.xlu0 %v9999_v33, %s10760_s27  ;;  %18863 = vst [vmem:[#allocation43_spill] sm:$0xff] %v14318_v21  ;;  %v18869_v33 = vld [vmem:[#allocation72_spill] sm:$0xff] }
 0x5ab   : > { %v10019_v37 = vpack.i.bf16 %v18870_v19, %v18869_v33  ;;  %18871 = vst [vmem:[#allocation26_spill] sm:$0xff] %v14331_v4  ;;  %v18873_v21 = vld [vmem:[#allocation20_spill] sm:$0xff]  ;;  %v18879_v19 = vld [vmem:[#allocation79_spill] sm:$0xff] }
 0x5ac   : > { %v10024_v60 = vpack.i.bf16 %v18873_v21, %v18872_v56  ;;  %v18880_v33 = vld [vmem:[#allocation55_spill] sm:$0xff] }
 0x5ad   : > { %10005 = vrot.lane.b32.xlu2 %v10004_v51, %s10760_s27 }
 0x5ae   : > { %10010 = vrot.lane.b32.xlu1 %v10009_v13, %s10760_s27  ;;  %v10029_v13 = vpack.i.bf16 %v18876_v20, %v18875_v52 }
 0x5b0   : > { %v14326_v62 = vpop.xlane.xlu2 %4312  ;;  %v14348_v21 = vpop.xlane.xlu1 %4318 }
 0x5b1   : > { %18868 = vst [vmem:[#allocation12_spill] sm:$0xff] %v14326_v62  ;;  %v14336_v51 = vpop.xlane.xlu0 %4315  ;;  %v18881_v62 = vld [vmem:[#allocation25_spill] sm:$0xff] }
 0x5b2   : > { %10015 = vrot.lane.b32.xlu0 %v10014_v23, %s10760_s27  ;;  %18874 = vst [vmem:[#allocation66_spill] sm:$0xff] %v14336_v51  ;;  %v10034_v23 = vpack.i.bf16 %v18879_v19, %v18878_v31  ;;  %v10039_v4 = vpack.i.bf16 %v18881_v62, %v18880_v33  ;;  %v18888_v31 = vld [vmem:[#allocation88_spill] sm:$0xff]  ;;  %v18890_v62 = vld [vmem:[#allocation81_spill] sm:$0xff]  ;;  %v18912_v51 = vld [vmem:[#allocation82_spill] sm:$0xff] }
 0x5b3   : > { %18882 = vst [vmem:[#allocation53_spill] sm:$0xff] %v14348_v21  ;;  %v18898_v21 = vld [vmem:[#allocation108_spill] sm:$0xff] }
 0x5b5   : > { %10020 = vrot.lane.b32.xlu2 %v10019_v37, %s10760_s27  ;;  %v18884_v37 = vld [vmem:[#allocation24_spill] sm:$0xff] }
 0x5b6   : > { %10025 = vrot.lane.b32.xlu1 %v10024_v60, %s10760_s27  ;;  %v18883_v60 = vld [vmem:[#allocation59_spill] sm:$0xff] }
 0x5b7   : > { %v10044_v56 = vpack.i.bf16 %v18884_v37, %v18883_v60  ;;  %v18893_v60 = vld [vmem:[#allocation46_spill] sm:$0xff] }
 0x5b8   : > { %v14341_v8 = vpop.xlane.xlu2 %4321 }
 0x5b9   : > { %18877 = vst [vmem:[#allocation36_spill] sm:$0xff] %v14341_v8  ;;  %v14354_v52 = vpop.xlane.xlu0 %4324  ;;  %v18889_v8 = vld [vmem:[#allocation99_spill] sm:$0xff] }
 0x5ba   : > { %10030 = vrot.lane.b32.xlu0 %v10029_v13, %s10760_s27  ;;  %18885 = vst [vmem:[#allocation23_spill] sm:$0xff] %v14354_v52  ;;  %v18887_v13 = vld [vmem:[#allocation106_spill] sm:$0xff]  ;;  %v10054_v33 = vpack.i.bf16 %v18890_v62, %v18889_v8  ;;  %v18899_v8 = vld [vmem:[#allocation87_spill] sm:$0xff] }
 0x5bb   : > { %v10049_v19 = vpack.i.bf16 %v18888_v31, %v18887_v13  ;;  %v18897_v13 = vld [vmem:[#allocation39_spill] sm:$0xff]  ;;  %v10069_v62 = vpack.i.bf16 %v18899_v8, %v18898_v21  ;;  %v18908_v21 = vld [vmem:[#allocation22_spill] sm:$0xff] }
 0x5bd   : > { %10035 = vrot.lane.b32.xlu2 %v10034_v23, %s10760_s27  ;;  %v14364_v23 = vpop.xlane.xlu1 %4327 }
 0x5be   : > { %10040 = vrot.lane.b32.xlu1 %v10039_v4, %s10760_s27  ;;  %18891 = vst [vmem:[#allocation48_spill] sm:$0xff] %v14364_v23  ;;  %v18892_v4 = vld [vmem:[#allocation70_spill] sm:$0xff] }
 0x5bf   : > { %v10059_v37 = vpack.i.bf16 %v18893_v60, %v18892_v4 }
 0x5c0   : > { %v14356_v20 = vpop.xlane.xlu2 %4330 }
 0x5c1   : > { %18886 = vst [vmem:[#allocation67_spill] sm:$0xff] %v14356_v20  ;;  %v14371_v20 = vpop.xlane.xlu0 %4333 }
 0x5c2   : > { %10045 = vrot.lane.b32.xlu0 %v10044_v56, %s10760_s27  ;;  %18895 = vst [vmem:[#allocation17_spill] sm:$0xff] %v14371_v20  ;;  %v18896_v56 = vld [vmem:[#allocation61_spill] sm:$0xff] }
 0x5c3   : > { %v10064_v31 = vpack.i.bf16 %v18897_v13, %v18896_v56  ;;  %v18907_v13 = vld [vmem:[#allocation47_spill] sm:$0xff] }
 0x5c4   : > { %v10084_v8 = vpack.i.bf16 %v18908_v21, %v18907_v13  ;;  %v18914_v13 = vld [vmem:[#allocation29_spill] sm:$0xff] }
 0x5c5   : > { %10050 = vrot.lane.b32.xlu2 %v10049_v19, %s10760_s27  ;;  %v18900_v19 = vld [vmem:[#allocation89_spill] sm:$0xff]  ;;  %v14384_v60 = vpop.xlane.xlu1 %4336  ;;  %v10099_v21 = vpack.i.bf16 %v18914_v13, %v18913_v36  ;;  %v18920_v13 = vld [vmem:[#allocation179_spill] sm:$0xff] }
 0x5c6   : > { %10055 = vrot.lane.b32.xlu1 %v10054_v33, %s10760_s27  ;;  %v18901_v33 = vld [vmem:[#allocation68_spill] sm:$0xff]  ;;  %18903 = vst [vmem:[#allocation77_spill] sm:$0xff] %v14384_v60 }
 0x5c7   : > { %v10074_v23 = vpack.i.bf16 %v18901_v33, %v18900_v19 }
 0x5c8   : > { %v14369_v52 = vpop.xlane.xlu2 %4339 }
 0x5c9   : > { %18894 = vst [vmem:[#allocation50_spill] sm:$0xff] %v14369_v52  ;;  %v18905_v52 = vld [vmem:[#allocation56_spill] sm:$0xff]  ;;  %v14389_v56 = vpop.xlane.xlu0 %4342 }
 0x5ca   : > { %10060 = vrot.lane.b32.xlu0 %v10059_v37, %s10760_s27  ;;  %v18904_v37 = vld [vmem:[#allocation75_spill] sm:$0xff]  ;;  %18906 = vst [vmem:[#allocation49_spill] sm:$0xff] %v14389_v56 }
 0x5cb   : > { %v10079_v20 = vpack.i.bf16 %v18905_v52, %v18904_v37 }
 0x5cd   : > { %10065 = vrot.lane.b32.xlu2 %v10064_v31, %s10760_s27  ;;  %v18909_v31 = vld [vmem:[#allocation95_spill] sm:$0xff] }
 0x5ce   : > { %10070 = vrot.lane.b32.xlu1 %v10069_v62, %s10760_s27  ;;  %v18910_v62 = vld [vmem:[#allocation83_spill] sm:$0xff] }
 0x5cf   : > { %v10089_v19 = vpack.i.bf16 %v18910_v62, %v18909_v31 }
 0x5d0   : > { %v14382_v4 = vpop.xlane.xlu2 %4345 }
 0x5d1   : > { %18902 = vst [vmem:[#allocation62_spill] sm:$0xff] %v14382_v4 }
 0x5d2   : > { %10075 = vrot.lane.b32.xlu0 %v10074_v23, %s10760_s27  ;;  %v18911_v23 = vld [vmem:[#allocation94_spill] sm:$0xff] }
 0x5d3   : > { %v10094_v52 = vpack.i.bf16 %v18912_v51, %v18911_v23 }
 0x5d5   : > { %10080 = vrot.lane.b32.xlu2 %v10079_v20, %s10760_s27 }
 0x5d6   : > { %10085 = vrot.lane.b32.xlu1 %v10084_v8, %s10760_s27  ;;  %v18915_v8 = vld [vmem:[#allocation135_spill] sm:$0xff] }
 0x5d8   : > { %v9891_v33 = vpop.permute.xlu2 %9890  ;;  %v9881_v4 = vpop.permute.xlu1 %9880 }
 0x5d9   : > { %v9882_v60 = vunpack.i.l.bf16 %v9881_v4  ;;  %v9883_v37 = vunpack.i.h.bf16 %v9881_v4  ;;  %v9893_v31 = vunpack.i.h.bf16 %v9891_v33  ;;  %v9892_v62 = vunpack.i.l.bf16 %v9891_v33  ;;  %v18916_v4 = vld [vmem:[#allocation63_spill] sm:$0xff]  ;;  %v18921_v33 = vld [vmem:[#allocation102_spill] sm:$0xff] }
 0x5da   : > { %10090 = vrot.lane.b32.xlu0 %v10089_v19, %s10760_s27 }
 0x5db   : > { %4472 = vmatpush.msrb.mxu0 %v9882_v60  ;;  %v18917_v60 = vld [vmem:[#allocation28_spill] sm:$0xff] }
 0x5dc   : > { %v9886_v56 = vpop.permute.xlu0 %9885  ;;  %v10104_v19 = vpack.i.bf16 %v18917_v60, %v18916_v4 }
 0x5dd   : > { %v9888_v20 = vunpack.i.h.bf16 %v9886_v56  ;;  %v9887_v17 = vunpack.i.l.bf16 %v9886_v56  ;;  %10095 = vrot.lane.b32.xlu2 %v10094_v52, %s10760_s27  ;;  %4473 = vmatpush.msrb.mxu0 %v9883_v37  ;;  %v18918_v56 = vld [vmem:[#allocation109_spill] sm:$0xff]  ;;  %v18919_v52 = vld [vmem:[#allocation91_spill] sm:$0xff] }
 0x5de   : > { %10100 = vrot.lane.b32.xlu1 %v10099_v21, %s10760_s27  ;;  %9689 = vmatmul.msk.f32.vlgmr.msrb.gmra.mxu0 %vm3293_vm2, %v18915_v8  ;;  %v10109_v37 = vpack.i.bf16 %v18919_v52, %v18918_v56 }
 0x5df   : > { %4507 = vmatpush.msrb.mxu1 %v9887_v17  ;;  %4612 = vmatpush.msra.mxu0 %v9888_v20  ;;  %v18922_v20 = vld [vmem:[#allocation84_spill] sm:$0xff] }
 0x5e0   : > { %v9916_v51 = vpop.permute.xlu2 %9915  ;;  %v9896_v23 = vpop.permute.xlu1 %9895  ;;  %v10114_v8 = vpack.i.bf16 %v18922_v20, %v18921_v33  ;;  %v18929_v33 = vld [vmem:[#allocation137_spill] sm:$0xff] }
 0x5e1   : > { %v9897_v36 = vunpack.i.l.bf16 %v9896_v23  ;;  %4508 = vmatpush.msrb.mxu1 %v9892_v62  ;;  %4613 = vmatpush.msra.mxu0 %v9893_v31  ;;  %v9898_v21 = vunpack.i.h.bf16 %v9896_v23  ;;  %v18923_v31 = vld [vmem:[#allocation136_spill] sm:$0xff]  ;;  %v18926_v23 = vld [vmem:[#allocation65_spill] sm:$0xff] }
 0x5e2   : > { %10105 = vrot.lane.b32.xlu0 %v10104_v19, %s10760_s27  ;;  %9691 = vmatmul.msk.f32.vlgmr.msrb.gmra.mxu1 %vm3293_vm2, %v18920_v13  ;;  %v18924_v62 = vld [vmem:[#allocation288_spill] sm:$0xff]  ;;  %v18925_v19 = vld [vmem:[#allocation73_spill] sm:$0xff] }
 0x5e3   : > { %4542 = vmatpush.msrb.mxu2 %v9897_v36  ;;  %v10119_v36 = vpack.i.bf16 %v18926_v23, %v18925_v19  ;;  %v18932_v23 = vld [vmem:[#allocation140_spill] sm:$0xff] }
 0x5e4   : > { %v9901_v17 = vpop.permute.xlu0 %9900 }
 0x5e5   : > { %v9903_v5 = vunpack.i.h.bf16 %v9901_v17  ;;  %v9902_v4 = vunpack.i.l.bf16 %v9901_v17  ;;  %10110 = vrot.lane.b32.xlu2 %v10109_v37, %s10760_s27  ;;  %4543 = vmatpush.msrb.mxu2 %v9898_v21  ;;  %v18927_v17 = vld [vmem:[#allocation111_spill] sm:$0xff]  ;;  %v18928_v37 = vld [vmem:[#allocation90_spill] sm:$0xff] }
 0x5e6   : > { %10115 = vrot.lane.b32.xlu1 %v10114_v8, %s10760_s27  ;;  %9690 = vmatmul.msk.f32.gmra.mxu0 %vm3293_vm2, %v18923_v31  ;;  %v10124_v21 = vpack.i.bf16 %v18928_v37, %v18927_v17  ;;  %v18930_v8 = vld [vmem:[#allocation92_spill] sm:$0xff]  ;;  %v9918_v37 = vunpack.i.h.bf16 %v9916_v51 }
 0x5e7   : > { %9693 = vmatmul.msk.f32.vlgmr.msrb.gmra.mxu2 %vm3293_vm2, %v18924_v62  ;;  %4647 = vmatpush.msra.mxu1 %v9902_v4  ;;  %v18931_v4 = vld [vmem:[#allocation71_spill] sm:$0xff] }
 0x5e8   : > { %v9931_v60 = vpop.permute.xlu2 %9930  ;;  %4752 = vmatpush.msrb.mxu0 %v9903_v5  ;;  %v9906_v56 = vpop.permute.xlu1 %9905  ;;  %v10129_v31 = vpack.i.bf16 %v18931_v4, %v18930_v8  ;;  %v9917_v5 = vunpack.i.l.bf16 %v9916_v51  ;;  %v18936_v4 = vld [vmem:[#allocation182_spill] sm:$0xff] }
 0x5e9   : > { %v9908_v52 = vunpack.i.h.bf16 %v9906_v56  ;;  %v9907_v13 = vunpack.i.l.bf16 %v9906_v56 }
 0x5ea   : > { %10120 = vrot.lane.b32.xlu0 %v10119_v36, %s10760_s27  ;;  %9692 = vmatmul.msk.f32.gmra.mxu1 %vm3293_vm2, %v18929_v33  ;;  %v18933_v36 = vld [vmem:[#allocation144_spill] sm:$0xff] }
 0x5eb   : > { %4648 = vmatpush.msra.mxu1 %v9907_v13  ;;  %4753 = vmatpush.msrb.mxu0 %v9908_v52  ;;  %v18934_v13 = vld [vmem:[#allocation98_spill] sm:$0xff]  ;;  %v18935_v52 = vld [vmem:[#allocation97_spill] sm:$0xff] }
 0x5ec   : > { %v9911_v20 = vpop.permute.xlu0 %9910  ;;  %v10134_v17 = vpack.i.bf16 %v18935_v52, %v18934_v13 }
 0x5ed   : > { %v9913_v62 = vunpack.i.h.bf16 %v9911_v20  ;;  %v9912_v19 = vunpack.i.l.bf16 %v9911_v20  ;;  %10125 = vrot.lane.b32.xlu2 %v10124_v21, %s10760_s27  ;;  %v9932_v20 = vunpack.i.l.bf16 %v9931_v60 }
 0x5ee   : > { %10130 = vrot.lane.b32.xlu1 %v10129_v31, %s10760_s27  ;;  %9697 = vmatmul.msk.f32.vlgmr.msra.gmra.mxu0 %vm3293_vm2, %v18933_v36  ;;  %v9933_v31 = vunpack.i.h.bf16 %v9931_v60  ;;  %v18942_v60 = vld [vmem:[#allocation142_spill] sm:$0xff] }
 0x5ef   : > { %4577 = vmatpush.msrb.mxu3 %v9912_v19  ;;  %9694 = vmatmul.msk.f32.gmra.mxu2 %vm3293_vm2, %v18932_v23  ;;  %v18937_v19 = vld [vmem:[#allocation37_spill] sm:$0xff]  ;;  %v18938_v23 = vld [vmem:[#allocation30_spill] sm:$0xff] }
 0x5f0   : > { %v9946_v56 = vpop.permute.xlu2 %9945  ;;  %4682 = vmatpush.msra.mxu2 %v9913_v62  ;;  %v9921_v33 = vpop.permute.xlu1 %9920  ;;  %v10139_v36 = vpack.i.bf16 %v18938_v23, %v18937_v19  ;;  %v18940_v62 = vld [vmem:[#allocation114_spill] sm:$0xff]  ;;  %v18946_v19 = vld [vmem:[#allocation115_spill] sm:$0xff]  ;;  %v18947_v23 = vld [vmem:[#allocation117_spill] sm:$0xff] }
 0x5f1   : > { %4578 = vmatpush.msrb.mxu3 %v9917_v5  ;;  %v9923_v21 = vunpack.i.h.bf16 %v9921_v33  ;;  %v9922_v8 = vunpack.i.l.bf16 %v9921_v33  ;;  %v18941_v5 = vld [vmem:[#allocation38_spill] sm:$0xff] }
 0x5f2   : > { %9695 = vmatmul.msk.f32.vlgmr.msrb.gmra.mxu3 %vm3293_vm2, %v18936_v4  ;;  %4683 = vmatpush.msra.mxu2 %v9918_v37  ;;  %v10144_v13 = vpack.i.bf16 %v18941_v5, %v18940_v62  ;;  %v9947_v5 = vunpack.i.l.bf16 %v9946_v56 }
 0x5f3   : > { %10135 = vrot.lane.b32.xlu0 %v10134_v17, %s10760_s27  ;;  %9699 = vmatmul.msk.f32.vlgmr.msra.gmra.mxu1 %vm3293_vm2, %v18939_v63  ;;  %v18943_v63 = vld [vmem:[#allocation104_spill] sm:$0xff] }
 0x5f4   : > { %4717 = vmatpush.msra.mxu3 %v9932_v20  ;;  %v9926_v51 = vpop.permute.xlu0 %9925  ;;  %4822 = vmatpush.msrb.mxu2 %v9933_v31  ;;  %v18944_v17 = vld [vmem:[#allocation112_spill] sm:$0xff] }
 0x5f5   : > { %v9928_v52 = vunpack.i.h.bf16 %v9926_v51  ;;  %v9927_v33 = vunpack.i.l.bf16 %v9926_v51  ;;  %4787 = vmatpush.msrb.mxu1 %v9922_v8  ;;  %4892 = vmatpush.msra.mxu0 %v9923_v21  ;;  %v10149_v37 = vpack.i.bf16 %v18944_v17, %v18943_v63  ;;  %v18945_v21 = vld [vmem:[#allocation187_spill] sm:$0xff] }
 0x5f6   : > { %10140 = vrot.lane.b32.xlu2 %v10139_v36, %s10760_s27  ;;  %10145 = vrot.lane.b32.xlu1 %v10144_v13, %s10760_s27  ;;  %v10154_v36 = vpack.i.bf16 %v18947_v23, %v18946_v19  ;;  %v9948_v13 = vunpack.i.h.bf16 %v9946_v56 }
 0x5f7   : > { %4788 = vmatpush.msrb.mxu1 %v9927_v33  ;;  %9698 = vmatmul.msk.f32.gmra.mxu0 %vm3293_vm2, %v18942_v60 }
 0x5f8   : > { %9701 = vmatmul.msk.f32.vlgmr.msra.gmra.mxu2 %vm3293_vm2, %v13519_v3  ;;  %4893 = vmatpush.msra.mxu0 %v9928_v52  ;;  %v9936_v20 = vpop.permute.xlu1 %9935  ;;  %v9961_v4 = vpop.permute.xlu2 %9960 }
 0x5f9   : > { %v9938_v31 = vunpack.i.h.bf16 %v9936_v20  ;;  %v9937_v8 = vunpack.i.l.bf16 %v9936_v20  ;;  %v9962_v60 = vunpack.i.l.bf16 %v9961_v4 }
 0x5fa   : > { %9696 = vmatmul.msk.f32.gmra.mxu3 %vm3293_vm2, %v18945_v21  ;;  %v18949_v21 = vld [vmem:[#allocation236_spill] sm:$0xff] }
 0x5fb   : > { %10150 = vrot.lane.b32.xlu0 %v10149_v37, %s10760_s27  ;;  %9700 = vmatmul.msk.f32.gmra.mxu1 %vm3293_vm2, %v13523_v14 }
 0x5fc   : > { %v9941_v3 = vpop.permute.xlu0 %9940  ;;  %4718 = vmatpush.msra.mxu3 %v9937_v8  ;;  %4823 = vmatpush.msrb.mxu2 %v9938_v31  ;;  %v18948_v8 = vld [vmem:[#allocation194_spill] sm:$0xff] }
 0x5fd   : > { %v9943_v51 = vunpack.i.h.bf16 %v9941_v3  ;;  %v9942_v62 = vunpack.i.l.bf16 %v9941_v3  ;;  %v3774_v19 = vsub.f32 %v18949_v21, %v18948_v8 }
 0x5fe   : > { %10155 = vrot.lane.b32.xlu2 %v10154_v36, %s10760_s27 }
 0x5ff   : > { %4927 = vmatpush.msra.mxu1 %v9942_v62  ;;  %9705 = vmatmul.msk.f32.vlgmr.msrb.gmra.mxu0 %vm3293_vm2, %v13553_v35  ;;  %v18951_v62 = vld [vmem:[#allocation237_spill] sm:$0xff] }
 0x600   : > { %9702 = vmatmul.msk.f32.gmra.mxu2 %vm3293_vm2, %v13529_v45  ;;  %5032 = vmatpush.msrb.mxu0 %v9943_v51  ;;  %v9951_v52 = vpop.permute.xlu1 %9950  ;;  %v9976_v63 = vpop.permute.xlu2 %9975  ;;  %v18950_v51 = vld [vmem:[#allocation195_spill] sm:$0xff] }
 0x601   : > { %4928 = vmatpush.msra.mxu1 %v9947_v5  ;;  %v9953_v14 = vunpack.i.h.bf16 %v9951_v52  ;;  %v9952_v33 = vunpack.i.l.bf16 %v9951_v52  ;;  %v9977_v23 = vunpack.i.l.bf16 %v9976_v63  ;;  %v3775_v5 = vsub.f32 %v18951_v62, %v18950_v51 }
 0x602   : > { %9703 = vmatmul.msk.f32.vlgmr.msra.gmra.mxu3 %vm3293_vm2, %v13547_v50  ;;  %5033 = vmatpush.msrb.mxu0 %v9948_v13  ;;  %v18953_v13 = vld [vmem:[#allocation238_spill] sm:$0xff] }
 0x603   : > { %9707 = vmatmul.msk.f32.vlgmr.msrb.gmra.mxu1 %vm3293_vm2, %v13567_v16  ;;  %4857 = vmatpush.msrb.mxu3 %v9952_v33  ;;  %v4000_v33 = vmul.f32 1.442695, %v3775_v5 }
 0x604   : > { %v9956_v17 = vpop.permute.xlu0 %9955  ;;  %5067 = vmatpush.msrb.mxu1 %v9962_v60  ;;  %4962 = vmatpush.msra.mxu2 %v9953_v14 }
 0x605   : > { %v9958_v45 = vunpack.i.h.bf16 %v9956_v17  ;;  %v9957_v35 = vunpack.i.l.bf16 %v9956_v17 }
 0x607   : > { %4858 = vmatpush.msrb.mxu3 %v9957_v35  ;;  %4963 = vmatpush.msra.mxu2 %v9958_v45  ;;  %v18954_v45 = vld [vmem:[#allocation146_spill] sm:$0xff]  ;;  %v18955_v35 = vld [vmem:[#allocation239_spill] sm:$0xff] }
 0x608   : > { %9706 = vmatmul.msk.f32.gmra.mxu0 %vm3293_vm2, %v13571_v55  ;;  %9709 = vmatmul.msk.f32.vlgmr.msrb.gmra.mxu2 %vm3293_vm2, %v13595_v11  ;;  %v9966_v50 = vpop.permute.xlu1 %9965  ;;  %v9991_v31 = vpop.permute.xlu2 %9990  ;;  %v9963_v55 = vunpack.i.h.bf16 %v9961_v4  ;;  %v9978_v11 = vunpack.i.h.bf16 %v9976_v63  ;;  %v3998_v4 = vmul.f32 1.442695, %v3774_v19 }
 0x609   : > { %v9967_v56 = vunpack.i.l.bf16 %v9966_v50  ;;  %v9993_v60 = vunpack.i.h.bf16 %v9991_v31 }
 0x60a   : > { %9704 = vmatmul.msk.f32.gmra.mxu3 %vm3293_vm2, %v13543_v46  ;;  %v9992_v46 = vunpack.i.l.bf16 %v9991_v31  ;;  %10391 = vpow2.f32 %v3998_v4 }
 0x60b   : > { %9708 = vmatmul.msk.f32.gmra.mxu1 %vm3293_vm2, %v13577_v49  ;;  %v9968_v49 = vunpack.i.h.bf16 %v9966_v50  ;;  %10393 = vpow2.f32 %v4000_v33  ;;  %v3777_v50 = vsub.f32 %v18955_v35, %v18954_v45  ;;  %v18961_v35 = vld [vmem:[#allocation107_spill] sm:$0xff] }
 0x60c   : > { %v9971_v16 = vpop.permute.xlu0 %9970  ;;  %5068 = vmatpush.msrb.mxu1 %v9967_v56 }
 0x60d   : > { %v9973_v37 = vunpack.i.h.bf16 %v9971_v16  ;;  %v9972_v20 = vunpack.i.l.bf16 %v9971_v16  ;;  %v18956_v16 = vld [vmem:[#allocation148_spill] sm:$0xff]  ;;  %v4004_v31 = vmul.f32 1.442695, %v3777_v50 }
 0x60f   : > { %4997 = vmatpush.msra.mxu3 %v9972_v20  ;;  %5102 = vmatpush.msrb.mxu2 %v9973_v37  ;;  %v18957_v37 = vld [vmem:[#allocation240_spill] sm:$0xff] }
 0x610   : > { %9710 = vmatmul.msk.f32.gmra.mxu2 %vm3293_vm2, %v13591_v22  ;;  %9713 = vmatmul.msk.f32.vlgmr.msra.gmra.mxu0 %vm3293_vm2, %v13615_v9  ;;  %v9981_v36 = vpop.permute.xlu1 %9980  ;;  %v18952_v9 = vld [vmem:[#allocation198_spill] sm:$0xff]  ;;  %v14501_v56 = vpop.permute.xlu2 %10005  ;;  %v3778_v20 = vsub.f32 %v18957_v37, %v18956_v16 }
 0x611   : > { %5172 = vmatpush.msra.mxu0 %v9963_v55  ;;  %4998 = vmatpush.msra.mxu3 %v9977_v23  ;;  %v9982_v3 = vunpack.i.l.bf16 %v9981_v36  ;;  %v3776_v52 = vsub.f32 %v18953_v13, %v18952_v9  ;;  %v10007_v4 = vunpack.i.l.bf16 %v14501_v56  ;;  %v18962_v16 = vld [vmem:[#allocation110_spill] sm:$0xff] }
 0x612   : > { %5103 = vmatpush.msrb.mxu2 %v9978_v11  ;;  %9711 = vmatmul.msk.f32.vlgmr.msrb.gmra.mxu3 %vm3293_vm2, %v13601_v53  ;;  %v4006_v21 = vmul.f32 1.442695, %v3778_v20  ;;  %v18963_v37 = vld [vmem:[#allocation118_spill] sm:$0xff] }
 0x613   : > { %5173 = vmatpush.msra.mxu0 %v9968_v49  ;;  %5137 = vmatpush.msrb.mxu3 %v9992_v46  ;;  %v4002_v53 = vmul.f32 1.442695, %v3776_v52  ;;  %v18958_v49 = vld [vmem:[#allocation150_spill] sm:$0xff]  ;;  %v10164_v20 = vpack.i.bf16 %v18963_v37, %v18962_v16  ;;  %v18984_v16 = vld [vmem:[#allocation193_spill] sm:$0xff] }
 0x614   : > { %9715 = vmatmul.msk.f32.vlgmr.msra.gmra.mxu1 %vm3293_vm2, %v13643_v6  ;;  %v9986_v22 = vpop.permute.xlu0 %9985  ;;  %v18985_v37 = vld [vmem:[#allocation254_spill] sm:$0xff] }
 0x615   : > { %v9987_v14 = vunpack.i.l.bf16 %v9986_v22  ;;  %5207 = vmatpush.msra.mxu1 %v9982_v3  ;;  %10395 = vpow2.f32 %v4002_v53  ;;  %v9988_v19 = vunpack.i.h.bf16 %v9986_v22 }
 0x616   : > { %10397 = vpow2.f32 %v4004_v31  ;;  %v18964_v31 = vld [vmem:[#allocation124_spill] sm:$0xff] }
 0x617   : > { %5208 = vmatpush.msra.mxu1 %v9987_v14  ;;  %10399 = vpow2.f32 %v4006_v21 }
 0x618   : > { %9714 = vmatmul.msk.f32.gmra.mxu0 %vm3293_vm2, %v13625_v48  ;;  %9717 = vmatmul.msk.f32.vlgmr.msra.gmra.mxu2 %vm3293_vm2, %v13649_v27  ;;  %v9996_v63 = vpop.permute.xlu1 %9995  ;;  %v14505_v27 = vpop.eup %10391 }
 0x619   : > { %5242 = vmatpush.msra.mxu2 %v9993_v60  ;;  %v9998_v6 = vunpack.i.h.bf16 %v9996_v63  ;;  %v9997_v17 = vunpack.i.l.bf16 %v9996_v63  ;;  %v14515_v8 = vpop.eup %10393  ;;  %v14528_v51 = vpop.permute.xlu2 %10020 }
 0x61a   : > { %9712 = vmatmul.msk.f32.gmra.mxu3 %vm3293_vm2, %v13619_v54  ;;  %v9983_v54 = vunpack.i.h.bf16 %v9981_v36  ;;  %v18959_v36 = vld [vmem:[#allocation243_spill] sm:$0xff]  ;;  %v10022_v63 = vunpack.i.l.bf16 %v14528_v51 }
 0x61b   : > { %5138 = vmatpush.msrb.mxu3 %v9997_v17  ;;  %5243 = vmatpush.msra.mxu2 %v9998_v6  ;;  %v14519_v11 = vpop.eup %10395  ;;  %v3779_v3 = vsub.f32 %v18959_v36, %v18958_v49  ;;  %v18970_v36 = vld [vmem:[#allocation175_spill] sm:$0xff] }
 0x61c   : > { %9716 = vmatmul.msk.f32.gmra.mxu1 %vm3293_vm2, %v13639_v57  ;;  %v10001_v48 = vpop.permute.xlu0 %10000  ;;  %v4350_v57 = vsel %vm3293_vm2, %v14505_v27, 0.0  ;;  %v4356_v62 = vsel %vm3293_vm2, %v14519_v11, 0.0  ;;  %v14536_v5 = vpop.eup %10397 }
 0x61d   : > { %v4008_v22 = vmul.f32 1.442695, %v3779_v3  ;;  %v14540_v13 = vpop.eup %10399  ;;  %v10003_v33 = vunpack.i.h.bf16 %v10001_v48 }
 0x61e   : > { %v4362_v14 = vsel %vm3293_vm2, %v14540_v13, 0.0 }
 0x61f   : > { %10401 = vpow2.f32 %v4008_v22 }
 0x620   : > { %9718 = vmatmul.msk.f32.gmra.mxu2 %vm3293_vm2, %v13667_v44  ;;  %9721 = vmatmul.msk.f32.vlgmr.msrb.gmra.mxu0 %vm3293_vm2, %v13691_v10  ;;  %v10011_v55 = vpop.permute.xlu1 %10010  ;;  %v10002_v44 = vunpack.i.l.bf16 %v10001_v48  ;;  %v4353_v10 = vsel %vm3293_vm2, %v14515_v8, 0.0 }
 0x621   : > { %5312 = vmatpush.msrb.mxu0 %v9983_v54  ;;  %4351 = vadd.xlane.f32.xlu1 %v4350_v57  ;;  %v10012_v23 = vunpack.i.l.bf16 %v10011_v55  ;;  %v10036_v60 = vpop.permute.xlu2 %10035 }
 0x622   : > { %9719 = vmatmul.msk.f32.vlgmr.msra.gmra.mxu3 %vm3293_vm2, %v13663_v15  ;;  %v10037_v6 = vunpack.i.l.bf16 %v10036_v60 }
 0x623   : > { %5313 = vmatpush.msrb.mxu0 %v9988_v19  ;;  %5277 = vmatpush.msra.mxu3 %v10012_v23  ;;  %v18967_v23 = vld [vmem:[#allocation183_spill] sm:$0xff] }
 0x624   : > { %9723 = vmatmul.msk.f32.vlgmr.msrb.gmra.mxu1 %vm3293_vm2, %v13697_v26  ;;  %v10016_v46 = vpop.permute.xlu0 %10015  ;;  %v10013_v26 = vunpack.i.h.bf16 %v10011_v55 }
 0x625   : > { %5347 = vmatpush.msrb.mxu1 %v10002_v44  ;;  %4354 = vadd.xlane.f32.xlu0 %v4353_v10  ;;  %v10017_v15 = vunpack.i.l.bf16 %v10016_v46  ;;  %v10018_v9 = vunpack.i.h.bf16 %v10016_v46  ;;  %v14555_v53 = vpop.eup %10401  ;;  %v18968_v10 = vld [vmem:[#allocation178_spill] sm:$0xff]  ;;  %v18969_v46 = vld [vmem:[#allocation188_spill] sm:$0xff] }
 0x626   : > { %v4365_v17 = vsel %vm3293_vm2, %v14555_v53, 0.0 }
 0x627   : > { %5348 = vmatpush.msrb.mxu1 %v10007_v4  ;;  %4357 = vadd.xlane.f32.xlu2 %v4356_v62  ;;  %v18971_v4 = vld [vmem:[#allocation181_spill] sm:$0xff] }
 0x628   : > { %9722 = vmatmul.msk.f32.gmra.mxu0 %vm3293_vm2, %v13687_v25  ;;  %9725 = vmatmul.msk.f32.vlgmr.msrb.gmra.mxu2 %vm3293_vm2, %v13711_v0  ;;  %v10026_v52 = vpop.permute.xlu1 %10025  ;;  %v4359_v25 = vsel %vm3293_vm2, %v14536_v5, 0.0 }
 0x629   : > { %5278 = vmatpush.msra.mxu3 %v10017_v15  ;;  %5382 = vmatpush.msrb.mxu2 %v10013_v26  ;;  %v10051_v48 = vpop.permute.xlu2 %10050  ;;  %v10028_v21 = vunpack.i.h.bf16 %v10026_v52  ;;  %v18972_v15 = vld [vmem:[#allocation116_spill] sm:$0xff] }
 0x62a   : > { %9720 = vmatmul.msk.f32.gmra.mxu3 %vm3293_vm2, %v13673_v42  ;;  %v10008_v42 = vunpack.i.h.bf16 %v14501_v56  ;;  %v10053_v44 = vunpack.i.h.bf16 %v10051_v48 }
 0x62b   : > { %5383 = vmatpush.msrb.mxu2 %v10018_v9 }
 0x62c   : > { %9724 = vmatmul.msk.f32.gmra.mxu1 %vm3293_vm2, %v13715_v34  ;;  %v10031_v0 = vpop.permute.xlu0 %10030 }
 0x62d   : > { %4360 = vadd.xlane.f32.xlu0 %v4359_v25  ;;  %v10032_v34 = vunpack.i.l.bf16 %v10031_v0  ;;  %v10033_v45 = vunpack.i.h.bf16 %v10031_v0  ;;  %v18975_v25 = vld [vmem:[#allocation248_spill] sm:$0xff] }
 0x62f   : > { %4363 = vadd.xlane.f32.xlu2 %v4362_v14 }
 0x630   : > { %9726 = vmatmul.msk.f32.gmra.mxu2 %vm3293_vm2, %v13721_v24  ;;  %9729 = vmatmul.msk.f32.vlgmr.msra.gmra.mxu0 %vm3293_vm2, %v13745_v18  ;;  %v10027_v24 = vunpack.i.l.bf16 %v10026_v52  ;;  %v10041_v18 = vpop.permute.xlu1 %10040  ;;  %v18974_v52 = vld [vmem:[#allocation242_spill] sm:$0xff] }
 0x631   : > { %5452 = vmatpush.msra.mxu0 %v10003_v33  ;;  %v10042_v19 = vunpack.i.l.bf16 %v10041_v18  ;;  %v10066_v3 = vpop.permute.xlu2 %10065  ;;  %v10043_v22 = vunpack.i.h.bf16 %v10041_v18  ;;  %v18976_v33 = vld [vmem:[#allocation241_spill] sm:$0xff]  ;;  %v18978_v18 = vld [vmem:[#allocation247_spill] sm:$0xff] }
 0x632   : > { %9727 = vmatmul.msk.f32.vlgmr.msrb.gmra.mxu3 %vm3293_vm2, %v13739_v43  ;;  %v18960_v43 = vld [vmem:[#allocation120_spill] sm:$0xff] }
 0x633   : > { %5453 = vmatpush.msra.mxu0 %v10008_v42  ;;  %5417 = vmatpush.msrb.mxu3 %v10032_v34  ;;  %v10159_v50 = vpack.i.bf16 %v18961_v35, %v18960_v43  ;;  %v18977_v34 = vld [vmem:[#allocation199_spill] sm:$0xff]  ;;  %v18981_v43 = vld [vmem:[#allocation244_spill] sm:$0xff] }
 0x634   : > { %9731 = vmatmul.msk.f32.vlgmr.msra.gmra.mxu1 %vm3293_vm2, %v13759_v39  ;;  %v10038_v39 = vunpack.i.h.bf16 %v10036_v60  ;;  %v10046_v56 = vpop.permute.xlu0 %10045 }
 0x635   : > { %5487 = vmatpush.msra.mxu1 %v10022_v63  ;;  %5418 = vmatpush.msrb.mxu3 %v10037_v6  ;;  %v10048_v0 = vunpack.i.h.bf16 %v10046_v56  ;;  %v10067_v63 = vunpack.i.l.bf16 %v10066_v3 }
 0x637   : > { %5488 = vmatpush.msra.mxu1 %v10027_v24  ;;  %4366 = vadd.xlane.f32.xlu2 %v4365_v17  ;;  %v18979_v17 = vld [vmem:[#allocation253_spill] sm:$0xff] }
 0x638   : > { %9730 = vmatmul.msk.f32.gmra.mxu0 %vm3293_vm2, %v13763_v58  ;;  %9733 = vmatmul.msk.f32.vlgmr.msra.gmra.mxu2 %vm3293_vm2, %v13787_v2  ;;  %v10023_v58 = vunpack.i.h.bf16 %v14528_v51  ;;  %v18965_v2 = vld [vmem:[#allocation123_spill] sm:$0xff]  ;;  %v10056_v57 = vpop.permute.xlu1 %10055  ;;  %v18973_v51 = vld [vmem:[#allocation121_spill] sm:$0xff] }
 0x639   : > { %5522 = vmatpush.msra.mxu2 %v10033_v45  ;;  %v10174_v54 = vpack.i.bf16 %v18965_v2, %v18964_v31  ;;  %v10057_v55 = vunpack.i.l.bf16 %v10056_v57  ;;  %v10058_v49 = vunpack.i.h.bf16 %v10056_v57  ;;  %v10169_v62 = vpack.i.bf16 %v18973_v51, %v18972_v15  ;;  %v14607_v6 = vpop.permute.xlu2 %10080  ;;  %v18980_v45 = vld [vmem:[#allocation200_spill] sm:$0xff] }
 0x63a   : > { %10160 = vrot.lane.b32.xlu1 %v10159_v50, %s10760_s27  ;;  %9728 = vmatmul.msk.f32.gmra.mxu3 %vm3293_vm2, %v13735_v47  ;;  %v10052_v47 = vunpack.i.l.bf16 %v10051_v48  ;;  %v3780_v35 = vsub.f32 %v18981_v43, %v18980_v45 }
 0x63b   : > { %5523 = vmatpush.msra.mxu2 %v10038_v39  ;;  %v18982_v39 = vld [vmem:[#allocation201_spill] sm:$0xff] }
 0x63c   : > { %9732 = vmatmul.msk.f32.gmra.mxu1 %vm3293_vm2, %v13769_v12  ;;  %v18966_v12 = vld [vmem:[#allocation174_spill] sm:$0xff] }
 0x640   : > { %9734 = vmatmul.msk.f32.gmra.mxu2 %vm3293_vm2, %v13783_v29  ;;  %9737 = vmatmul.msk.f32.vlgmr.msrb.gmra.mxu0 %vm3293_vm2, %v13807_v61  ;;  %v10047_v29 = vunpack.i.l.bf16 %v10046_v56  ;;  %v10061_v61 = vpop.permute.xlu0 %10060  ;;  %v10071_v26 = vpop.permute.xlu1 %10070  ;;  %v18983_v56 = vld [vmem:[#allocation246_spill] sm:$0xff] }
 0x641   : > { %5592 = vmatpush.msrb.mxu0 %v10023_v58  ;;  %10165 = vrot.lane.b32.xlu0 %v10164_v20, %s10760_s27  ;;  %v10072_v14 = vunpack.i.l.bf16 %v10071_v26  ;;  %v10062_v60 = vunpack.i.l.bf16 %v10061_v61  ;;  %v10073_v24 = vunpack.i.h.bf16 %v10071_v26  ;;  %v3781_v48 = vsub.f32 %v18983_v56, %v18982_v39 }
 0x642   : > { %10175 = vrot.lane.b32.xlu1 %v10174_v54, %s10760_s27  ;;  %9735 = vmatmul.msk.f32.vlgmr.msra.gmra.mxu3 %vm3293_vm2, %v18966_v12  ;;  %v4010_v58 = vmul.f32 1.442695, %v3780_v35  ;;  %v10063_v57 = vunpack.i.h.bf16 %v10061_v61  ;;  %v18986_v12 = vld [vmem:[#allocation204_spill] sm:$0xff]  ;;  %v10082_v61 = vunpack.i.l.bf16 %v14607_v6  ;;  %v18997_v35 = vld [vmem:[#allocation211_spill] sm:$0xff] }
 0x643   : > { %5593 = vmatpush.msrb.mxu0 %v10028_v21  ;;  %5557 = vmatpush.msra.mxu3 %v10052_v47  ;;  %v4012_v2 = vmul.f32 1.442695, %v3781_v48  ;;  %v10096_v47 = vpop.permute.xlu2 %10095 }
 0x644   : > { %9739 = vmatmul.msk.f32.vlgmr.msrb.gmra.mxu1 %vm3293_vm2, %v18967_v23  ;;  %10403 = vpow2.f32 %v4010_v58  ;;  %v18989_v23 = vld [vmem:[#allocation249_spill] sm:$0xff] }
 0x645   : > { %5627 = vmatpush.msrb.mxu1 %v10042_v19  ;;  %5558 = vmatpush.msra.mxu3 %v10057_v55  ;;  %v18987_v19 = vld [vmem:[#allocation207_spill] sm:$0xff]  ;;  %10405 = vpow2.f32 %v4012_v2  ;;  %v19002_v2 = vld [vmem:[#allocation282_spill] sm:$0xff] }
 0x646   : > { %v18988_v55 = vld [vmem:[#allocation151_spill] sm:$0xff]  ;;  %vm7139_vm4 = vweird.f32 %v19002_v2 }
 0x647   : > { %5628 = vmatpush.msrb.mxu1 %v10047_v29  ;;  %v3782_v29 = vsub.f32 %v18989_v23, %v18988_v55 }
 0x648   : > { %9738 = vmatmul.msk.f32.gmra.mxu0 %vm3293_vm2, %v18968_v10  ;;  %9741 = vmatmul.msk.f32.vlgmr.msrb.gmra.mxu2 %vm3293_vm2, %v18969_v46  ;;  %v10076_v9 = vpop.permute.xlu0 %10075  ;;  %v10086_v31 = vpop.permute.xlu1 %10085  ;;  %v18990_v46 = vld [vmem:[#allocation260_spill] sm:$0xff] }
 0x649   : > { %5662 = vmatpush.msrb.mxu2 %v10053_v44  ;;  %v10077_v42 = vunpack.i.l.bf16 %v10076_v9  ;;  %v10078_v50 = vunpack.i.h.bf16 %v10076_v9  ;;  %v10068_v44 = vunpack.i.h.bf16 %v10066_v3  ;;  %v10087_v15 = vunpack.i.l.bf16 %v10086_v31  ;;  %v18991_v9 = vld [vmem:[#allocation209_spill] sm:$0xff] }
 0x64a   : > { %9736 = vmatmul.msk.f32.gmra.mxu3 %vm3293_vm2, %v18970_v36  ;;  %v14638_v3 = vpop.eup %10403 }
 0x64b   : > { %5663 = vmatpush.msrb.mxu2 %v10058_v49  ;;  %v10097_v49 = vunpack.i.l.bf16 %v10096_v47  ;;  %v14640_v26 = vpop.eup %10405 }
 0x64c   : > { %9740 = vmatmul.msk.f32.gmra.mxu1 %vm3293_vm2, %v18971_v4  ;;  %v4014_v4 = vmul.f32 1.442695, %v3782_v29 }
 0x64e   : > { %10407 = vpow2.f32 %v4014_v4 }
 0x64f   : > { %10170 = vrot.lane.b32.xlu2 %v10169_v62, %s10760_s27  ;;  %10409 = vrcp.f32 %v19002_v2 }
 0x650   : > { %9742 = vmatmul.msk.f32.gmra.mxu2 %vm3293_vm2, %v18974_v52  ;;  %9745 = vmatmul.msk.f32.vlgmr.msra.gmra.mxu0 %vm3293_vm2, %v18975_v25  ;;  %v10091_v54 = vpop.permute.xlu0 %10090  ;;  %v10101_v62 = vpop.permute.xlu1 %10100  ;;  %v4368_v52 = vsel %vm3293_vm2, %v14638_v3, 0.0  ;;  %v18992_v25 = vld [vmem:[#allocation259_spill] sm:$0xff] }
 0x651   : > { %5732 = vmatpush.msra.mxu0 %v10043_v22  ;;  %v10092_v10 = vunpack.i.l.bf16 %v10091_v54  ;;  %v10093_v51 = vunpack.i.h.bf16 %v10091_v54  ;;  %v10103_v58 = vunpack.i.h.bf16 %v10101_v62 }
 0x652   : > { %9743 = vmatmul.msk.f32.vlgmr.msrb.gmra.mxu3 %vm3293_vm2, %v18976_v33 }
 0x653   : > { %5733 = vmatpush.msra.mxu0 %v10048_v0  ;;  %5697 = vmatpush.msrb.mxu3 %v10072_v14  ;;  %v4371_v0 = vsel %vm3293_vm2, %v14640_v26, 0.0  ;;  %v18993_v14 = vld [vmem:[#allocation269_spill] sm:$0xff] }
 0x654   : > { %9747 = vmatmul.msk.f32.vlgmr.msra.gmra.mxu1 %vm3293_vm2, %v18977_v34  ;;  %v18995_v34 = vld [vmem:[#allocation210_spill] sm:$0xff] }
 0x655   : > { %5767 = vmatpush.msra.mxu1 %v10062_v60  ;;  %5698 = vmatpush.msrb.mxu3 %v10077_v42  ;;  %v10083_v60 = vunpack.i.h.bf16 %v14607_v6  ;;  %v10111_v42 = vpop.permute.xlu2 %10110  ;;  %v10102_v6 = vunpack.i.l.bf16 %v10101_v62 }
 0x656   : > { %v10113_v56 = vunpack.i.h.bf16 %v10111_v42 }
 0x657   : > { %5768 = vmatpush.msra.mxu1 %v10067_v63  ;;  %v10088_v63 = vunpack.i.h.bf16 %v10086_v31 }
 0x658   : > { %9746 = vmatmul.msk.f32.gmra.mxu0 %vm3293_vm2, %v18978_v18  ;;  %9749 = vmatmul.msk.f32.vlgmr.msra.gmra.mxu2 %vm3293_vm2, %v18979_v17  ;;  %v10112_v17 = vunpack.i.l.bf16 %v10111_v42  ;;  %v10106_v45 = vpop.permute.xlu0 %10105 }
 0x659   : > { %5802 = vmatpush.msra.mxu2 %v10073_v24  ;;  %v10116_v24 = vpop.permute.xlu1 %10115 }
 0x65a   : > { %9744 = vmatmul.msk.f32.gmra.mxu3 %vm3293_vm2, %v18984_v16  ;;  %v10118_v48 = vunpack.i.h.bf16 %v10116_v24 }
 0x65b   : > { %5803 = vmatpush.msra.mxu2 %v10078_v50  ;;  %v14621_v20 = vpop.f32.mrf.mxu0  ;;  %v10117_v50 = vunpack.i.l.bf16 %v10116_v24 }
 0x65c   : > { %9748 = vmatmul.msk.f32.gmra.mxu1 %vm3293_vm2, %v18985_v37 }
 0x65d   : > { %v10126_v37 = vpop.permute.xlu2 %10125 }
 0x65e   : > { %v10127_v54 = vunpack.i.l.bf16 %v10126_v37 }
 0x65f   : > { %v14623_v21 = vpop.f32.mrf.mxu1 }
 0x660   : > { %9750 = vmatmul.msk.f32.gmra.mxu2 %vm3293_vm2, %v18986_v12  ;;  %9753 = vmatmul.msk.f32.vlgmr.msrb.gmra.mxu0 %vm3293_vm2, %v18987_v19  ;;  %v10121_v31 = vpop.permute.xlu0 %10120 }
 0x661   : > { %5872 = vmatpush.msrb.mxu0 %v10063_v57  ;;  %v10123_v55 = vunpack.i.h.bf16 %v10121_v31 }
 0x662   : > { %9751 = vmatmul.msk.f32.vlgmr.msra.gmra.mxu3 %vm3293_vm2, %v18990_v46  ;;  %v19007_v46 = vld [vmem:[#allocation219_spill] sm:$0xff] }
 0x663   : > { %5873 = vmatpush.msrb.mxu0 %v10068_v44  ;;  %5837 = vmatpush.msra.mxu3 %v10092_v10  ;;  %v14636_v36 = vpop.f32.mrf.mxu0  ;;  %v10128_v44 = vunpack.i.h.bf16 %v10126_v37 }
 0x664   : > { %9755 = vmatmul.msk.f32.vlgmr.msrb.gmra.mxu1 %vm3293_vm2, %v13951_v28  ;;  %v10098_v28 = vunpack.i.h.bf16 %v10096_v47  ;;  %v10122_v47 = vunpack.i.l.bf16 %v10121_v31 }
 0x665   : > { %5907 = vmatpush.msrb.mxu1 %v10082_v61  ;;  %5838 = vmatpush.msra.mxu3 %v10097_v49  ;;  %v10141_v10 = vpop.permute.xlu2 %10140  ;;  %v19008_v61 = vld [vmem:[#allocation225_spill] sm:$0xff]  ;;  %v19009_v49 = vld [vmem:[#allocation283_spill] sm:$0xff] }
 0x666   : > { %10411 = vrcp.f32 %v19009_v49  ;;  %v10143_v24 = vunpack.i.h.bf16 %v10141_v10  ;;  %vm7153_vm8 = vweird.f32 %v19009_v49 }
 0x667   : > { %5908 = vmatpush.msrb.mxu1 %v10087_v15  ;;  %v14642_v22 = vpop.f32.mrf.mxu1 }
 0x668   : > { %9754 = vmatmul.msk.f32.gmra.mxu0 %vm3293_vm2, %v18991_v9  ;;  %9757 = vmatmul.msk.f32.vlgmr.msrb.gmra.mxu2 %vm3293_vm2, %v13979_v40  ;;  %v14658_v40 = vpop.eup %10407  ;;  %v10136_v62 = vpop.permute.xlu0 %10135  ;;  %v19011_v9 = vld [vmem:[#allocation217_spill] sm:$0xff] }
 0x669   : > { %5942 = vmatpush.msrb.mxu2 %v10093_v51  ;;  %v4374_v43 = vsel %vm3293_vm2, %v14658_v40, 0.0  ;;  %v14702_v29 = vpop.eup %10409 }
 0x66a   : > { %9752 = vmatmul.msk.f32.gmra.mxu3 %vm3293_vm2, %v18992_v25  ;;  %v14696_v19 = vpop.f32.mrf.mxu2  ;;  %v7135_v51 = vmul.f32 %v14702_v29, %v19002_v2  ;;  %vm7140_vm3 = vweird.f32 %v14702_v29 }
 0x66b   : > { %5943 = vmatpush.msrb.mxu2 %v10098_v28  ;;  %4369 = vadd.xlane.f32.xlu0 %v4368_v52  ;;  %v14656_v33 = vpop.f32.mrf.mxu0  ;;  %v19012_v28 = vld [vmem:[#allocation227_spill] sm:$0xff]  ;;  %vm7141_vm5 = vmor %vm7139_vm4, %vm7140_vm3 }
 0x66c   : > { %9756 = vmatmul.msk.f32.gmra.mxu1 %vm3293_vm2, %v18993_v14  ;;  %4372 = vadd.xlane.f32.xlu1 %v4371_v0  ;;  %18994 = vst [vmem:[#allocation64_spill] sm:$0xff] %v14656_v33  ;;  %v7136_v25 = vsub.f32 1.0, %v7135_v51  ;;  %v14721_v14 = vpop.eup %10411  ;;  %v19025_v51 = vld [vmem:[#allocation184_spill] sm:$0xff] }
 0x66d   : > { %vm7154_vm7 = vweird.f32 %v14721_v14 }
 0x66e   : > { %vm14783_vm9 = vmor %vm7153_vm8, %vm7154_vm7 }
 0x670   : > { %9758 = vmatmul.msk.f32.gmra.mxu2 %vm3293_vm2, %v18995_v34  ;;  %9761 = vmatmul.msk.f32.vlgmr.msra.gmra.mxu0 %vm3293_vm2, %v13999_v32  ;;  %v14665_v18 = vpop.f32.mrf.mxu1  ;;  %v10107_v32 = vunpack.i.l.bf16 %v10106_v45  ;;  %v19014_v34 = vld [vmem:[#allocation228_spill] sm:$0xff]  ;;  %v10151_v37 = vpop.permute.xlu0 %10150 }
 0x671   : > { %18996 = vst [vmem:[#allocation51_spill] sm:$0xff] %v14665_v18  ;;  %6012 = vmatpush.msra.mxu0 %v10083_v60  ;;  %v10142_v60 = vunpack.i.l.bf16 %v10141_v10  ;;  %v10153_v10 = vunpack.i.h.bf16 %v10151_v37 }
 0x672   : > { %9759 = vmatmul.msk.f32.vlgmr.msrb.gmra.mxu3 %vm3293_vm2, %v18997_v35  ;;  %v14719_v0 = vpop.f32.mrf.mxu2  ;;  %v7149_v35 = vmul.f32 %v14721_v14, %v19009_v49 }
 0x673   : > { %6013 = vmatpush.msra.mxu0 %v10088_v63  ;;  %4375 = vadd.xlane.f32.xlu0 %v4374_v43  ;;  %v19015_v63 = vld [vmem:[#allocation231_spill] sm:$0xff]  ;;  %v19017_v43 = vld [vmem:[#allocation218_spill] sm:$0xff] }
 0x674   : > { %9763 = vmatmul.msk.f32.vlgmr.msra.gmra.mxu1 %vm3293_vm2, %v14027_v41  ;;  %5977 = vmatpush.msrb.mxu3 %v10112_v17  ;;  %v14673_v39 = vpop.f32.mrf.mxu0  ;;  %v10137_v17 = vunpack.i.l.bf16 %v10136_v62  ;;  %10413 = vrcp.f32 %v19017_v43  ;;  %vm7167_vm12 = vweird.f32 %v19017_v43 }
 0x675   : > { %6047 = vmatpush.msra.mxu1 %v10102_v6  ;;  %18998 = vst [vmem:[#allocation34_spill] sm:$0xff] %v14673_v39  ;;  %v14732_v6 = vpop.permute.xlu2 %10155  ;;  %v19116_v39 = vld [vmem:[#allocation11_spill] sm:$0xff] }
 0x676   : > { %5978 = vmatpush.msrb.mxu3 %v10117_v50  ;;  %v19018_v50 = vld [vmem:[#allocation141_spill] sm:$0xff] }
 0x677   : > { %6048 = vmatpush.msra.mxu1 %v10107_v32  ;;  %v7137_v32 = vmul.f32 %v14702_v29, %v7136_v25  ;;  %v19027_v25 = vld [vmem:[#allocation235_spill] sm:$0xff] }
 0x678   : > { %9762 = vmatmul.msk.f32.gmra.mxu0 %vm3293_vm2, %v14009_v59  ;;  %9765 = vmatmul.msk.f32.vlgmr.msra.gmra.mxu2 %vm3293_vm2, %v14033_v30  ;;  %v14679_v16 = vpop.f32.mrf.mxu1  ;;  %v10131_v59 = vpop.permute.xlu1 %10130  ;;  %v19001_v30 = vld [vmem:[#allocation220_spill] sm:$0xff] }
 0x679   : > { %18999 = vst [vmem:[#allocation54_spill] sm:$0xff] %v14679_v16  ;;  %6082 = vmatpush.msra.mxu2 %v10113_v56  ;;  %v10132_v12 = vunpack.i.l.bf16 %v10131_v59  ;;  %v10133_v4 = vunpack.i.h.bf16 %v10131_v59  ;;  %v10138_v56 = vunpack.i.h.bf16 %v10136_v62 }
 0x67a   : > { %9760 = vmatmul.msk.f32.gmra.mxu3 %vm3293_vm2, %v14003_v7  ;;  %v10108_v7 = vunpack.i.h.bf16 %v10106_v45 }
 0x67b   : > { %6083 = vmatpush.msra.mxu2 %v10118_v48 }
 0x67c   : > { %9764 = vmatmul.msk.f32.gmra.mxu1 %vm3293_vm2, %v14023_v38  ;;  %v14685_v41 = vpop.f32.mrf.mxu0  ;;  %v19004_v38 = vld [vmem:[#allocation216_spill] sm:$0xff] }
 0x67d   : > { %19000 = vst [vmem:[#allocation33_spill] sm:$0xff] %v14685_v41 }
 0x680   : > { %9766 = vmatmul.msk.f32.gmra.mxu2 %vm3293_vm2, %v14051_v1  ;;  %9769 = vmatmul.msk.f32.vlgmr.msrb.gmra.mxu0 %vm3293_vm2, %v19001_v30  ;;  %v14692_v57 = vpop.f32.mrf.mxu1  ;;  %v19005_v1 = vld [vmem:[#allocation223_spill] sm:$0xff]  ;;  %v10146_v42 = vpop.permute.xlu1 %10145  ;;  %v7150_v30 = vsub.f32 1.0, %v7149_v35 }
 0x681   : > { %19003 = vst [vmem:[#allocation103_spill] sm:$0xff] %v14692_v57  ;;  %6152 = vmatpush.msrb.mxu0 %v10103_v58  ;;  %v10147_v48 = vunpack.i.l.bf16 %v10146_v42  ;;  %v19019_v58 = vld [vmem:[#allocation143_spill] sm:$0xff]  ;;  %v10148_v31 = vunpack.i.h.bf16 %v10146_v42 }
 0x682   : > { %9767 = vmatmul.msk.f32.vlgmr.msra.gmra.mxu3 %vm3293_vm2, %v19004_v38  ;;  %v7145_v38 = vand.u32 2147483648, %v19002_v2 }
 0x683   : > { %6153 = vmatpush.msrb.mxu0 %v10108_v7  ;;  %6117 = vmatpush.msra.mxu3 %v10127_v54  ;;  %v7138_v54 = vadd.f32 %v14702_v29, %v7137_v32  ;;  %v10152_v7 = vunpack.i.l.bf16 %v10151_v37  ;;  %v7159_v32 = vand.u32 2147483648, %v19009_v49  ;;  %v10157_v37 = vunpack.i.l.bf16 %v14732_v6 }
 0x684   : > { %9771 = vmatmul.msk.f32.vlgmr.msrb.gmra.mxu1 %vm3293_vm2, %v19005_v1  ;;  %v19022_v1 = vld [vmem:[#allocation190_spill] sm:$0xff]  ;;  %v7146_v42 = vor.u32 1.1754944e-38, %v7145_v38  ;;  %v10158_v38 = vunpack.i.h.bf16 %v14732_v6 }
 0x685   : > { %6187 = vmatpush.msrb.mxu1 %v10122_v47  ;;  %v14700_v23 = vpop.f32.mrf.mxu0  ;;  %6118 = vmatpush.msra.mxu3 %v10132_v12  ;;  %v14744_v47 = vpop.eup %10413  ;;  %v7142_v62 = vsel %vm7141_vm5, %v14702_v29, %v7138_v54 }
 0x686   : > { %19006 = vst [vmem:[#allocation85_spill] sm:$0xff] %v14700_v23  ;;  %v14746_v12 = vpop.f32.mrf.mxu2  ;;  %vm7168_vm11 = vweird.f32 %v14744_v47 }
 0x687   : > { %6188 = vmatpush.msrb.mxu1 %v10123_v55  ;;  %19021 = vst [vmem:[#allocation69_spill] sm:$0xff] %v14746_v12  ;;  %v19023_v55 = vld [vmem:[#allocation291_spill] sm:$0xff]  ;;  %vm14824_vm13 = vmor %vm7167_vm12, %vm7168_vm11 }
 0x688   : > { %9770 = vmatmul.msk.f32.gmra.mxu0 %vm3293_vm2, %v19007_v46  ;;  %9773 = vmatmul.msk.f32.vlgmr.msrb.gmra.mxu2 %vm3293_vm2, %v19008_v61  ;;  %v14709_v15 = vpop.f32.mrf.mxu1  ;;  %v14756_v61 = vpop.f32.mrf.mxu3 }
 0x689   : > { %19010 = vst [vmem:[#allocation96_spill] sm:$0xff] %v14709_v15  ;;  %6222 = vmatpush.msrb.mxu2 %v10128_v44  ;;  %v7143_v44 = vand.u32 2147483647, %v19002_v2  ;;  %v7163_v2 = vmul.f32 %v14744_v47, %v19017_v43 }
 0x68a   : > { %9768 = vmatmul.msk.f32.gmra.mxu3 %vm3293_vm2, %v19011_v9  ;;  %v7151_v9 = vmul.f32 %v14721_v14, %v7150_v30 }
 0x68b   : > { %6223 = vmatpush.msrb.mxu2 %v10133_v4  ;;  %vm7144_vm6 = vcmp.eq.f32.partialorder %v7143_v44, 8.507059e+37 }
 0x68c   : > { %9772 = vmatmul.msk.f32.gmra.mxu1 %vm3293_vm2, %v19012_v28  ;;  %v19026_v28 = vld [vmem:[#allocation147_spill] sm:$0xff]  ;;  %v7152_v35 = vadd.f32 %v14721_v14, %v7151_v9 }
 0x68d   : > { %v14717_v52 = vpop.f32.mrf.mxu0 }
 0x68e   : > { %19013 = vst [vmem:[#allocation78_spill] sm:$0xff] %v14717_v52  ;;  %v14787_v54 = vpop.f32.mrf.mxu2 }
 0x68f   : > { %19032 = vst [vmem:[#allocation105_spill] sm:$0xff] %v14787_v54 }
 0x690   : > { %9774 = vmatmul.msk.f32.gmra.mxu2 %vm3293_vm2, %v19014_v34  ;;  %9777 = vmatmul.msk.f32.vlgmr.msra.gmra.mxu0 %vm3293_vm2, %v19015_v63  ;;  %v19028_v34 = vld [vmem:[#allocation290_spill] sm:$0xff]  ;;  %v14798_v44 = vpop.f32.mrf.mxu3 }
 0x691   : > { %v14727_v45 = vpop.f32.mrf.mxu1  ;;  %6292 = vmatpush.msra.mxu0 %v10142_v60  ;;  %v3773_v60 = vsub.f32 %v19027_v25, %v19026_v28  ;;  %19034 = vst [vmem:[#allocation93_spill] sm:$0xff] %v14798_v44 }
 0x692   : > { %19016 = vst [vmem:[#allocation76_spill] sm:$0xff] %v14727_v45  ;;  %9775 = vmatmul.msk.f32.vlgmr.msrb.gmra.mxu3 %vm3293_vm2, %v19018_v50  ;;  %v7164_v50 = vsub.f32 1.0, %v7163_v2  ;;  %v19038_v2 = vld [vmem:[#allocation250_spill] sm:$0xff] }
 0x693   : > { %6293 = vmatpush.msra.mxu0 %v10143_v24  ;;  %6257 = vmatpush.msrb.mxu3 %v10137_v17  ;;  %v7147_v24 = vsel %vm7144_vm6, %v7146_v42, %v7142_v62  ;;  %v3996_v29 = vmul.f32 1.442695, %v3773_v60  ;;  %v19036_v62 = vld [vmem:[#allocation252_spill] sm:$0xff]  ;;  %v19037_v60 = vld [vmem:[#allocation149_spill] sm:$0xff] }
 0x694   : > { %9779 = vmatmul.msk.f32.vlgmr.msra.gmra.mxu1 %vm3293_vm2, %v19019_v58  ;;  %v3783_v42 = vsub.f32 %v19038_v2, %v19037_v60  ;;  %v19051_v2 = vld [vmem:[#allocation264_spill] sm:$0xff] }
 0x695   : > { %6327 = vmatpush.msra.mxu1 %v10147_v48  ;;  %v14739_v59 = vpop.f32.mrf.mxu0  ;;  %6258 = vmatpush.msrb.mxu3 %v10138_v56  ;;  %v19029_v56 = vld [vmem:[#allocation294_spill] sm:$0xff]  ;;  %v7157_v48 = vand.u32 2147483647, %v19009_v49  ;;  %v7156_v49 = vsel %vm14783_vm9, %v14721_v14, %v7152_v35  ;;  %10415 = vpow2.f32 %v3996_v29  ;;  %v7171_v29 = vand.u32 2147483647, %v19017_v43 }
 0x696   : > { %19020 = vst [vmem:[#allocation41_spill] sm:$0xff] %v14739_v59 }
 0x697   : > { %6328 = vmatpush.msra.mxu1 %v10148_v31  ;;  %vm7158_vm10 = vcmp.eq.f32.partialorder %v7157_v48, 8.507059e+37  ;;  %v19044_v48 = vld [vmem:[#allocation154_spill] sm:$0xff]  ;;  %vm7172_vm14 = vcmp.eq.f32.partialorder %v7171_v29, 8.507059e+37 }
 0x698   : > { %9778 = vmatmul.msk.f32.gmra.mxu0 %vm3293_vm2, %v19022_v1  ;;  %9781 = vmatmul.msk.f32.vlgmr.msra.gmra.mxu2 %vm3293_vm2, %v19023_v55  ;;  %v14780_v58 = vpop.xlane.xlu0 %4354  ;;  %v7165_v1 = vmul.f32 %v14744_v47, %v7164_v50  ;;  %v7160_v55 = vor.u32 1.1754944e-38, %v7159_v32 }
 0x699   : > { %v14754_v46 = vpop.f32.mrf.mxu1  ;;  %6362 = vmatpush.msra.mxu2 %v10152_v7 }
 0x69a   : > { %19024 = vst [vmem:[#allocation35_spill] sm:$0xff] %v14754_v46  ;;  %v14758_v4 = vpop.xlane.xlu2 %4357  ;;  %9776 = vmatmul.msk.f32.gmra.mxu3 %vm3293_vm2, %v19025_v51  ;;  %v19035_v51 = vld [vmem:[#allocation153_spill] sm:$0xff]  ;;  %v7161_v14 = vsel %vm7158_vm10, %v7160_v55, %v7156_v49  ;;  %v7166_v6 = vadd.f32 %v14744_v47, %v7165_v1 }
 0x69b   : > { %6363 = vmatpush.msra.mxu2 %v10153_v10  ;;  %v14800_v10 = vpop.xlane.xlu1 %4351  ;;  %v3784_v9 = vsub.f32 %v19036_v62, %v19035_v51  ;;  %v14845_v62 = vpop.f32.mrf.mxu3  ;;  %vm8063_vm11 = vweird.f32 %v14758_v4 }
 0x69c   : > { %9780 = vmatmul.msk.f32.gmra.mxu1 %vm3293_vm2, %v19028_v34  ;;  %v7173_v34 = vand.u32 2147483648, %v19017_v43  ;;  %v4016_v43 = vmul.f32 1.442695, %v3783_v42  ;;  %19047 = vst [vmem:[#allocation72_spill] sm:$0xff] %v14845_v62  ;;  %v19110_v62 = vld [vmem:[#allocation221_spill] sm:$0xff]  ;;  %vm8035_vm7 = vweird.f32 %v14800_v10 }
 0x69d   : > { %v5035_v63 = vpop.f32.mrf.mxu0 }
 0x69e   : > { %v8510_v17 = vmul.f32 %v7147_v24, %v5035_v63  ;;  %v4018_v63 = vmul.f32 1.442695, %v3784_v9  ;;  %v19040_v24 = vld [vmem:[#allocation152_spill] sm:$0xff]  ;;  %v7174_v49 = vor.u32 1.1754944e-38, %v7173_v34 }
 0x6a0   : > { %9782 = vmatmul.msk.f32.gmra.mxu2 %vm3293_vm2, %v19029_v56  ;;  %9785 = vmatmul.msk.f32.vlgmr.msrb.gmra.mxu0 %vm3293_vm2, %v14505_v27  ;;  %v19033_v27 = vld [vmem:[#allocation296_spill] sm:$0xff]  ;;  %v7170_v56 = vsel %vm14824_vm13, %v14744_v47, %v7166_v6  ;;  %10417 = vpow2.f32 %v4018_v63  ;;  %v19049_v6 = vld [vmem:[#allocation258_spill] sm:$0xff] }
 0x6a1   : > { %8638 = vrot.lane.b32.xlu2 %v8510_v17, %s10761_s28  ;;  %v5070_v31 = vpop.f32.mrf.mxu1  ;;  %v19041_v17 = vld [vmem:[#allocation256_spill] sm:$0xff]  ;;  %v7175_v47 = vsel %vm7172_vm14, %v7174_v49, %v7170_v56  ;;  %10419 = vpow2.f32 %v4016_v43 }
 0x6a2   : > { %v14789_v7 = vpop.xlane.xlu2 %4363  ;;  %9783 = vmatmul.msk.f32.vlgmr.msra.gmra.mxu3 %vm3293_vm2, %v19033_v27  ;;  %v3786_v35 = vsub.f32 %v19041_v17, %v19040_v24  ;;  %v14839_v27 = vpop.f32.mrf.mxu2  ;;  %v8512_v9 = vmul.f32 %v7175_v47, %v5070_v31  ;;  %v19053_v24 = vld [vmem:[#allocation157_spill] sm:$0xff] }
 0x6a3   : > { %6397 = vmatpush.msra.mxu3 %v10157_v37  ;;  %v19045_v37 = vld [vmem:[#allocation255_spill] sm:$0xff]  ;;  %19046 = vst [vmem:[#allocation74_spill] sm:$0xff] %v14839_v27 }
 0x6a4   : > { %9787 = vmatmul.msk.f32.vlgmr.msrb.gmra.mxu1 %vm3293_vm2, %v14519_v11  ;;  %v14815_v11 = vpop.eup %10415  ;;  %v3785_v30 = vsub.f32 %v19045_v37, %v19044_v48  ;;  %v4022_v1 = vmul.f32 1.442695, %v3786_v35  ;;  %v19055_v37 = vld [vmem:[#allocation158_spill] sm:$0xff] }
 0x6a5   : > { %v5038_v28 = vpop.f32.mrf.mxu0  ;;  %6398 = vmatpush.msra.mxu3 %v10158_v38  ;;  %19039 = vst [vmem:[#allocation86_spill] sm:$0xff] %v14815_v11 }
 0x6a6   : > { %v8511_v25 = vmul.f32 %v7161_v14, %v5038_v28  ;;  %v4020_v14 = vmul.f32 1.442695, %v3785_v30  ;;  %10421 = vpow2.f32 %v4022_v1  ;;  %v14860_v63 = vpop.eup %10417  ;;  %v19056_v30 = vld [vmem:[#allocation268_spill] sm:$0xff] }
 0x6a7   : > { %v3792_v49 = vsub.f32 %v19056_v30, %v19055_v37 }
 0x6a8   : > { %9786 = vmatmul.msk.f32.gmra.mxu0 %vm3293_vm2, %v14515_v8  ;;  %9789 = vmatmul.msk.f32.vlgmr.msrb.gmra.mxu2 %vm3293_vm2, %v14540_v13  ;;  %v14832_v13 = vpop.xlane.xlu0 %4360  ;;  %10423 = vpow2.f32 %v4020_v14  ;;  %v19058_v14 = vld [vmem:[#allocation160_spill] sm:$0xff] }
 0x6a9   : > { %8640 = vrot.lane.b32.xlu1 %v8511_v25, %s10761_s28  ;;  %v14822_v50 = vpop.f32.mrf.mxu1  ;;  %v19048_v25 = vld [vmem:[#allocation156_spill] sm:$0xff] }
 0x6aa   : > { %v14828_v8 = vpop.xlane.xlu2 %4366  ;;  %9784 = vmatmul.msk.f32.gmra.mxu3 %vm3293_vm2, %v14815_v11  ;;  %v3787_v60 = vsub.f32 %v19049_v6, %v19048_v25  ;;  %v14872_v47 = vpop.f32.mrf.mxu2  ;;  %v19059_v25 = vld [vmem:[#allocation267_spill] sm:$0xff] }
 0x6ab   : > { %19057 = vst [vmem:[#allocation42_spill] sm:$0xff] %v14872_v47  ;;  %v3791_v6 = vsub.f32 %v19059_v25, %v19058_v14  ;;  %v19070_v14 = vld [vmem:[#allocation274_spill] sm:$0xff] }
 0x6ac   : > { %9788 = vmatmul.msk.f32.gmra.mxu1 %vm3293_vm2, %v14536_v5  ;;  %v10161_v38 = vpop.permute.xlu1 %10160  ;;  %v19050_v5 = vld [vmem:[#allocation159_spill] sm:$0xff]  ;;  %v4024_v32 = vmul.f32 1.442695, %v3787_v60 }
 0x6ad   : > { %v10162_v55 = vunpack.i.l.bf16 %v10161_v38  ;;  %v14843_v51 = vpop.f32.mrf.mxu0  ;;  %v10163_v28 = vunpack.i.h.bf16 %v10161_v38  ;;  %v3790_v42 = vsub.f32 %v19051_v2, %v19050_v5  ;;  %v19060_v5 = vld [vmem:[#allocation163_spill] sm:$0xff]  ;;  %v19061_v2 = vld [vmem:[#allocation273_spill] sm:$0xff] }
 0x6ae   : > { %10425 = vpow2.f32 %v4024_v32  ;;  %v4032_v32 = vmul.f32 1.442695, %v3791_v6 }
 0x6af   : > { %6432 = vmatpush.msrb.mxu0 %v10162_v55  ;;  %v4030_v48 = vmul.f32 1.442695, %v3790_v42  ;;  %v14870_v55 = vpop.eup %10419  ;;  %v3794_v42 = vsub.f32 %v19061_v2, %v19060_v5  ;;  %v19072_v5 = vld [vmem:[#allocation130_spill] sm:$0xff]  ;;  %v19073_v2 = vld [vmem:[#allocation280_spill] sm:$0xff] }
 0x6b0   : > { %9790 = vmatmul.msk.f32.gmra.mxu2 %vm3293_vm2, %v14555_v53  ;;  %9793 = vmatmul.msk.f32.vlgmr.msra.gmra.mxu0 %vm3293_vm2, %v14658_v40  ;;  %v19054_v53 = vld [vmem:[#allocation261_spill] sm:$0xff] }
 0x6b1   : > { %8642 = vrot.lane.b32.xlu1 %v8512_v9, %s10761_s28  ;;  %v14856_v31 = vpop.f32.mrf.mxu1  ;;  %6433 = vmatpush.msrb.mxu0 %v10163_v28  ;;  %v3788_v17 = vsub.f32 %v19054_v53, %v19053_v24  ;;  %v14874_v9 = vpop.eup %10421  ;;  %10427 = vpow2.f32 %v4030_v48  ;;  %v4034_v24 = vmul.f32 1.442695, %v3792_v49  ;;  %v19067_v48 = vld [vmem:[#allocation270_spill] sm:$0xff] }
 0x6b2   : > { %19052 = vst [vmem:[#allocation52_spill] sm:$0xff] %v14856_v31  ;;  %v10171_v34 = vpop.permute.xlu2 %10170  ;;  %9791 = vmatmul.msk.f32.vlgmr.msrb.gmra.mxu3 %vm3293_vm2, %v14638_v3  ;;  %v14906_v25 = vpop.f32.mrf.mxu2 }
 0x6b3   : > { %v10173_v35 = vunpack.i.h.bf16 %v10171_v34  ;;  %v10172_v40 = vunpack.i.l.bf16 %v10171_v34  ;;  %v10166_v29 = vpop.permute.xlu0 %10165  ;;  %v4026_v28 = vmul.f32 1.442695, %v3788_v17  ;;  %v14880_v34 = vpop.f32.mrf.mxu3  ;;  %19071 = vst [vmem:[#allocation100_spill] sm:$0xff] %v14906_v25 }
 0x6b4   : > { %v10167_v56 = vunpack.i.l.bf16 %v10166_v29  ;;  %9795 = vmatmul.msk.f32.vlgmr.msra.gmra.mxu1 %vm3293_vm2, %v14860_v63  ;;  %v10176_v43 = vpop.permute.xlu1 %10175  ;;  %v10168_v60 = vunpack.i.h.bf16 %v10166_v29  ;;  %19062 = vst [vmem:[#allocation20_spill] sm:$0xff] %v14880_v34  ;;  %v14888_v17 = vpop.eup %10423 }
 0x6b5   : > { %v10178_v3 = vunpack.i.h.bf16 %v10176_v43  ;;  %v10177_v38 = vunpack.i.l.bf16 %v10176_v43  ;;  %v14868_v1 = vpop.f32.mrf.mxu0  ;;  %6502 = vmatpush.msrb.mxu2 %v10173_v35  ;;  %6572 = vmatpush.msra.mxu0 %v10172_v40  ;;  %v19064_v35 = vld [vmem:[#allocation155_spill] sm:$0xff]  ;;  %v19065_v40 = vld [vmem:[#allocation262_spill] sm:$0xff]  ;;  %10429 = vpow2.f32 %v4026_v28  ;;  %v14900_v49 = vpop.eup %10425 }
 0x6b6   : > { %6467 = vmatpush.msrb.mxu1 %v10167_v56  ;;  %v3789_v29 = vsub.f32 %v19065_v40, %v19064_v35  ;;  %v4038_v56 = vmul.f32 1.442695, %v3794_v42  ;;  %10431 = vpow2.f32 %v4034_v24  ;;  %v19066_v43 = vld [vmem:[#allocation162_spill] sm:$0xff]  ;;  %v3798_v42 = vsub.f32 %v19073_v2, %v19072_v5  ;;  %v19074_v24 = vld [vmem:[#allocation9_spill] sm:$0xff] }
 0x6b7   : > { %6503 = vmatpush.msrb.mxu2 %v10178_v3  ;;  %6573 = vmatpush.msra.mxu0 %v10177_v38  ;;  %v3793_v37 = vsub.f32 %v19067_v48, %v19066_v43  ;;  %v14902_v3 = vpop.eup %10427  ;;  %10433 = vpow2.f32 %v4032_v32  ;;  %v19069_v38 = vld [vmem:[#allocation161_spill] sm:$0xff]  ;;  %v7593_v47 = vand.u32 2147483648, %v19074_v24  ;;  %vm7587_vm3 = vweird.f32 %v19074_v24 }
 0x6b8   : > { %9794 = vmatmul.msk.f32.gmra.mxu0 %vm3293_vm2, %v14870_v55  ;;  %9797 = vmatmul.msk.f32.vlgmr.msra.gmra.mxu2 %vm3293_vm2, %v14874_v9  ;;  %v3795_v28 = vsub.f32 %v19070_v14, %v19069_v38  ;;  %10435 = vpow2.f32 %v4038_v56  ;;  %v4046_v43 = vmul.f32 1.442695, %v3798_v42  ;;  %v19080_v14 = vld [vmem:[#allocation165_spill] sm:$0xff] }
 0x6b9   : > { %v14886_v53 = vpop.f32.mrf.mxu1  ;;  %6468 = vmatpush.msrb.mxu1 %v10168_v60  ;;  %v4036_v60 = vmul.f32 1.442695, %v3793_v37  ;;  %10437 = vrcp.f32 %v19074_v24 }
 0x6ba   : > { %19063 = vst [vmem:[#allocation101_spill] sm:$0xff] %v14886_v53  ;;  %9792 = vmatmul.msk.f32.gmra.mxu3 %vm3293_vm2, %v14640_v26  ;;  %v4028_v26 = vmul.f32 1.442695, %v3789_v29  ;;  %v4040_v32 = vmul.f32 1.442695, %v3795_v28  ;;  %v19081_v28 = vld [vmem:[#allocation281_spill] sm:$0xff]  ;;  %v14944_v42 = vpop.f32.mrf.mxu2 }
 0x6bb   : > { %v14912_v6 = vpop.eup %10429  ;;  %v14919_v40 = vpop.f32.mrf.mxu3  ;;  %v3799_v5 = vsub.f32 %v19081_v28, %v19080_v14  ;;  %19083 = vst [vmem:[#allocation88_spill] sm:$0xff] %v14944_v42 }
 0x6bc   : > { %9796 = vmatmul.msk.f32.gmra.mxu1 %vm3293_vm2, %v14888_v17  ;;  %19076 = vst [vmem:[#allocation55_spill] sm:$0xff] %v14919_v40  ;;  %v14923_v29 = vpop.eup %10431  ;;  %10439 = vpow2.f32 %v4028_v26 }
 0x6bd   : > { %v14898_v30 = vpop.f32.mrf.mxu0  ;;  %19077 = vst [vmem:[#allocation25_spill] sm:$0xff] %v14923_v29  ;;  %v14927_v56 = vpop.eup %10433  ;;  %10441 = vpow2.f32 %v4036_v60 }
 0x6be   : > { %19068 = vst [vmem:[#allocation80_spill] sm:$0xff] %v14898_v30  ;;  %v14931_v37 = vpop.eup %10435  ;;  %10443 = vpow2.f32 %v4040_v32  ;;  %v19112_v30 = vld [vmem:[#allocation4_spill] sm:$0xff] }
 0x6bf   : > { %19079 = vst [vmem:[#allocation24_spill] sm:$0xff] %v14931_v37  ;;  %v10438_v38 = vpop.eup %10437  ;;  %10445 = vpow2.f32 %v4046_v43  ;;  %v4048_v43 = vmul.f32 1.442695, %v3799_v5 }
 0x6c0   : > { %9798 = vmatmul.msk.f32.gmra.mxu2 %vm3293_vm2, %v14900_v49  ;;  %9801 = vmatmul.msk.f32.vlgmr.msrb.gmra.mxu0 %vm3293_vm2, %v14902_v3  ;;  %v7583_v2 = vmul.f32 %v10438_v38, %v19074_v24  ;;  %vm7588_vm15 = vweird.f32 %v10438_v38 }
 0x6c1   : > { %v14917_v35 = vpop.f32.mrf.mxu1  ;;  %10447 = vpow2.f32 %v4048_v43  ;;  %v7591_v43 = vand.u32 2147483647, %v19074_v24  ;;  %vm7589_vm4 = vmor %vm7587_vm3, %vm7588_vm15  ;;  %v19095_v24 = vld [vmem:[#allocation125_spill] sm:$0xff] }
 0x6c2   : > { %19075 = vst [vmem:[#allocation79_spill] sm:$0xff] %v14917_v35  ;;  %9799 = vmatmul.msk.f32.vlgmr.msra.gmra.mxu3 %vm3293_vm2, %v14912_v6  ;;  %v14937_v26 = vpop.eup %10439  ;;  %v7584_v28 = vsub.f32 1.0, %v7583_v2  ;;  %v14966_v52 = vpop.f32.mrf.mxu2  ;;  %10449 = vrcp.f32 %v14800_v10  ;;  %v19107_v35 = vld [vmem:[#allocation3_spill] sm:$0xff] }
 0x6c3   : > { %v14948_v32 = vpop.eup %10441  ;;  %v14950_v25 = vpop.f32.mrf.mxu3  ;;  %vm7592_vm5 = vcmp.eq.f32.partialorder %v7591_v43, 8.507059e+37  ;;  %10451 = vrcp.f32 %v14758_v4  ;;  %vm7601_vm15 = vweird.f32 %v19107_v35 }
 0x6c4   : > { %9803 = vmatmul.msk.f32.vlgmr.msrb.gmra.mxu1 %vm3293_vm2, %v14923_v29  ;;  %19084 = vst [vmem:[#allocation99_spill] sm:$0xff] %v14948_v32  ;;  %v14956_v14 = vpop.eup %10443  ;;  %v7585_v59 = vmul.f32 %v10438_v38, %v7584_v28  ;;  %10453 = vrcp.f32 %v19107_v35 }
 0x6c5   : > { %v14929_v48 = vpop.f32.mrf.mxu0  ;;  %19085 = vst [vmem:[#allocation81_spill] sm:$0xff] %v14950_v25  ;;  %v14958_v45 = vpop.eup %10445  ;;  %10455 = vrcp.f32 %v14780_v58 }
 0x6c6   : > { %19078 = vst [vmem:[#allocation59_spill] sm:$0xff] %v14929_v48  ;;  %v7586_v40 = vadd.f32 %v10438_v38, %v7585_v59  ;;  %10457 = vrcp.f32 %v19110_v62 }
 0x6c7   : > { %19087 = vst [vmem:[#allocation46_spill] sm:$0xff] %v14956_v14  ;;  %v14972_v2 = vpop.eup %10447  ;;  %10459 = vrcp.f32 %v19112_v30 }
 0x6c8   : > { %9802 = vmatmul.msk.f32.gmra.mxu0 %vm3293_vm2, %v14927_v56  ;;  %9805 = vmatmul.msk.f32.vlgmr.msrb.gmra.mxu2 %vm3293_vm2, %v14931_v37  ;;  %19088 = vst [vmem:[#allocation61_spill] sm:$0xff] %v14958_v45  ;;  %v7590_v27 = vsel %vm7589_vm4, %v10438_v38, %v7586_v40  ;;  %10461 = vrcp.f32 %v19116_v39 }
 0x6c9   : > { %v14941_v60 = vpop.f32.mrf.mxu1  ;;  %19092 = vst [vmem:[#allocation89_spill] sm:$0xff] %v14972_v2 }
 0x6ca   : > { %19082 = vst [vmem:[#allocation106_spill] sm:$0xff] %v14941_v60  ;;  %9800 = vmatmul.msk.f32.gmra.mxu3 %vm3293_vm2, %v14937_v26  ;;  %v14981_v11 = vpop.f32.mrf.mxu2  ;;  %v10450_v60 = vpop.eup %10449 }
 0x6cb   : > { %v14970_v25 = vpop.f32.mrf.mxu3  ;;  %v15033_v54 = vpop.eup %10451  ;;  %vm8036_vm6 = vweird.f32 %v10450_v60 }
 0x6cc   : > { %9804 = vmatmul.msk.f32.gmra.mxu1 %vm3293_vm2, %v14948_v32  ;;  %19091 = vst [vmem:[#allocation87_spill] sm:$0xff] %v14970_v25  ;;  %v8059_v12 = vmul.f32 %v15033_v54, %v14758_v4  ;;  %vm15074_vm8 = vmor %vm8035_vm7, %vm8036_vm6  ;;  %vm8064_vm9 = vweird.f32 %v15033_v54 }
 0x6cd   : > { %v14954_v46 = vpop.f32.mrf.mxu0  ;;  %vm15095_vm13 = vmor %vm8063_vm11, %vm8064_vm9 }
 0x6ce   : > { %19086 = vst [vmem:[#allocation70_spill] sm:$0xff] %v14954_v46 }
 0x6d0   : > { %9806 = vmatmul.msk.f32.gmra.mxu2 %vm3293_vm2, %v14956_v14  ;;  %9809 = vmatmul.msk.f32.vlgmr.msra.gmra.mxu0 %vm3293_vm2, %v14958_v45  ;;  %v8031_v45 = vmul.f32 %v10450_v60, %v14800_v10  ;;  %v8060_v14 = vsub.f32 1.0, %v8059_v12  ;;  %v8041_v12 = vand.u32 2147483648, %v14800_v10 }
 0x6d1   : > { %v14964_v42 = vpop.f32.mrf.mxu1 }
 0x6d2   : > { %19089 = vst [vmem:[#allocation39_spill] sm:$0xff] %v14964_v42  ;;  %v7594_v42 = vor.u32 1.1754944e-38, %v7593_v47  ;;  %v14992_v40 = vpop.f32.mrf.mxu2 }
 0x6d3   : > { %19097 = vst [vmem:[#allocation56_spill] sm:$0xff] %v14992_v40 }
 0x6d4   : > { %v7595_v59 = vsel %vm7592_vm5, %v7594_v42, %v7590_v27  ;;  %vm8049_vm5 = vweird.f32 %v14780_v58 }
 0x6d5   : > { %v14968_v5 = vpop.f32.mrf.mxu0 }
 0x6d6   : > { %19090 = vst [vmem:[#allocation108_spill] sm:$0xff] %v14968_v5  ;;  %v14983_v5 = vpop.f32.mrf.mxu3 }
 0x6d7   : > { %19094 = vst [vmem:[#allocation75_spill] sm:$0xff] %v14983_v5 }
 0x6d8   : > { %9810 = vmatmul.msk.f32.gmra.mxu0 %vm3293_vm2, %v14972_v2 }
 0x6d9   : > { %v14979_v28 = vpop.f32.mrf.mxu1 }
 0x6da   : > { %19093 = vst [vmem:[#allocation68_spill] sm:$0xff] %v14979_v28  ;;  %v19096_v28 = vld [vmem:[#allocation113_spill] sm:$0xff] }
 0x6db   : > { %v10179_v23 = vpack.i.bf16 %v19096_v28, %v19095_v24 }
 0x6dd   : > { %v5595_v25 = vpop.f32.mrf.mxu0 }
 0x6de   : > { %v8542_v15 = vmul.f32 %v7595_v59, %v5595_v25  ;;  %v14997_v47 = vpop.f32.mrf.mxu3 }
 0x6e0   : > { %8766 = vrot.lane.b32.xlu2 %v8542_v15, %s10762_s29  ;;  %v15003_v15 = vpop.f32.mrf.mxu2 }
 0x6e1   : > { %v14986_v46 = vpop.f32.mrf.mxu1  ;;  %19099 = vst [vmem:[#allocation22_spill] sm:$0xff] %v15003_v15 }
 0x6e5   : > { %v14988_v57 = vpop.f32.mrf.mxu0 }
 0x6e6   : > { %v15005_v42 = vpop.f32.mrf.mxu3 }
 0x6e8   : > { %10180 = vrot.lane.b32.xlu2 %v10179_v23, %s10760_s27  ;;  %v15011_v28 = vpop.f32.mrf.mxu2 }
 0x6e9   : > { %v14995_v27 = vpop.f32.mrf.mxu1  ;;  %19101 = vst [vmem:[#allocation83_spill] sm:$0xff] %v15011_v28 }
 0x6ed   : > { %v14999_v25 = vpop.f32.mrf.mxu0 }
 0x6ee   : > { %v15015_v23 = vpop.f32.mrf.mxu3 }
 0x6ef   : > { %19103 = vst [vmem:[#allocation82_spill] sm:$0xff] %v15015_v23 }
 0x6f0   : > { %v15023_v34 = vpop.f32.mrf.mxu2 }
 0x6f1   : > { %v15001_v38 = vpop.f32.mrf.mxu1  ;;  %19106 = vst [vmem:[#allocation135_spill] sm:$0xff] %v15023_v34  ;;  %v8032_v34 = vsub.f32 1.0, %v8031_v45 }
 0x6f2   : > { %19098 = vst [vmem:[#allocation47_spill] sm:$0xff] %v15001_v38 }
 0x6f5   : > { %v15007_v43 = vpop.f32.mrf.mxu0 }
 0x6f6   : > { %v15026_v2 = vpop.f32.mrf.mxu3 }
 0x6f7   : > { %19108 = vst [vmem:[#allocation63_spill] sm:$0xff] %v15026_v2 }
 0x6f9   : > { %v15009_v59 = vpop.f32.mrf.mxu1 }
 0x6fa   : > { %19100 = vst [vmem:[#allocation95_spill] sm:$0xff] %v15009_v59 }
 0x6fd   : > { %v15013_v24 = vpop.f32.mrf.mxu0 }
 0x6fe   : > { %19102 = vst [vmem:[#allocation94_spill] sm:$0xff] %v15013_v24  ;;  %v15054_v18 = vpop.f32.mrf.mxu3 }
 0x6ff   : > { %19115 = vst [vmem:[#allocation102_spill] sm:$0xff] %v15054_v18  ;;  %v8039_v18 = vand.u32 2147483647, %v14800_v10 }
 0x701   : > { %v15018_v5 = vpop.f32.mrf.mxu1  ;;  %vm8040_vm10 = vcmp.eq.f32.partialorder %v8039_v18, 8.507059e+37 }
 0x702   : > { %19104 = vst [vmem:[#allocation60_spill] sm:$0xff] %v15018_v5 }
 0x705   : > { %v15021_v41 = vpop.f32.mrf.mxu0 }
 0x706   : > { %19105 = vst [vmem:[#allocation29_spill] sm:$0xff] %v15021_v41  ;;  %v15037_v41 = vpop.eup %10453  ;;  %v15089_v53 = vpop.f32.mrf.mxu3 }
 0x707   : > { %v15041_v48 = vpop.eup %10455  ;;  %v7597_v2 = vmul.f32 %v15037_v41, %v19107_v35  ;;  %19122 = vst [vmem:[#allocation73_spill] sm:$0xff] %v15089_v53  ;;  %vm7602_vm12 = vweird.f32 %v15037_v41 }
 0x708   : > { %v15043_v24 = vpop.eup %10457  ;;  %v8045_v45 = vmul.f32 %v15041_v48, %v14780_v58  ;;  %vm8050_vm14 = vweird.f32 %v15041_v48  ;;  %vm15107_vm3 = vmor %vm7601_vm15, %vm7602_vm12 }
 0x709   : > { %v15029_v28 = vpop.f32.mrf.mxu1  ;;  %v7177_v23 = vmul.f32 %v15043_v24, %v19110_v62  ;;  %v7598_v15 = vsub.f32 1.0, %v7597_v2  ;;  %vm7182_vm6 = vweird.f32 %v15043_v24  ;;  %vm15120_vm7 = vmor %vm8049_vm5, %vm8050_vm14  ;;  %vm7615_vm14 = vweird.f32 %v19112_v30 }
 0x70a   : > { %19109 = vst [vmem:[#allocation28_spill] sm:$0xff] %v15029_v28  ;;  %v15046_v28 = vpop.f32.mrf.mxu2  ;;  %v8046_v40 = vsub.f32 1.0, %v8045_v45  ;;  %vm7629_vm5 = vweird.f32 %v19116_v39 }
 0x70b   : > { %19113 = vst [vmem:[#allocation91_spill] sm:$0xff] %v15046_v28  ;;  %v15061_v28 = vpop.eup %10459 }
 0x70c   : > { %v15067_v33 = vpop.eup %10461  ;;  %v7611_v2 = vmul.f32 %v15061_v28, %v19112_v30  ;;  %vm7616_vm12 = vweird.f32 %v15061_v28 }
 0x70d   : > { %v15035_v5 = vpop.f32.mrf.mxu0  ;;  %v7625_v59 = vmul.f32 %v15067_v33, %v19116_v39  ;;  %vm7617_vm15 = vmor %vm7615_vm14, %vm7616_vm12 }
 0x70e   : > { %19111 = vst [vmem:[#allocation109_spill] sm:$0xff] %v15035_v5  ;;  %v8033_v5 = vmul.f32 %v10450_v60, %v8032_v34  ;;  %v8061_v34 = vmul.f32 %v15033_v54, %v8060_v14  ;;  %v8047_v14 = vmul.f32 %v15041_v48, %v8046_v40  ;;  %v8067_v40 = vand.u32 2147483647, %v14758_v4 }
 0x710   : > { %v8034_v32 = vadd.f32 %v10450_v60, %v8033_v5  ;;  %v8062_v45 = vadd.f32 %v15033_v54, %v8061_v34  ;;  %vm8068_vm4 = vcmp.eq.f32.partialorder %v8067_v40, 8.507059e+37 }
 0x711   : > { %v15050_v16 = vpop.f32.mrf.mxu1 }
 0x712   : > { %19114 = vst [vmem:[#allocation179_spill] sm:$0xff] %v15050_v16  ;;  %v7178_v16 = vsub.f32 1.0, %v7177_v23  ;;  %v15079_v23 = vpop.f32.mrf.mxu2  ;;  %v8038_v10 = vsel %vm15074_vm8, %v10450_v60, %v8034_v32  ;;  %v7612_v60 = vsub.f32 1.0, %v7611_v2  ;;  %v8066_v18 = vsel %vm15095_vm13, %v15033_v54, %v8062_v45 }
 0x713   : > { %19121 = vst [vmem:[#allocation288_spill] sm:$0xff] %v15079_v23  ;;  %v8048_v23 = vadd.f32 %v15041_v48, %v8047_v14  ;;  %v8055_v2 = vand.u32 2147483648, %v14780_v58  ;;  %v8053_v54 = vand.u32 2147483647, %v14780_v58  ;;  %vm7181_vm8 = vweird.f32 %v19110_v62 }
 0x714   : > { %v7179_v44 = vmul.f32 %v15043_v24, %v7178_v16  ;;  %vm15132_vm9 = vmor %vm7181_vm8, %vm7182_vm6 }
 0x715   : > { %v15059_v37 = vpop.f32.mrf.mxu0  ;;  %vm8054_vm11 = vcmp.eq.f32.partialorder %v8053_v54, 8.507059e+37  ;;  %v7621_v54 = vand.u32 2147483648, %v19112_v30 }
 0x716   : > { %19117 = vst [vmem:[#allocation84_spill] sm:$0xff] %v15059_v37  ;;  %v7599_v37 = vmul.f32 %v15037_v41, %v7598_v15  ;;  %v8042_v15 = vor.u32 1.1754944e-38, %v8041_v12  ;;  %v7180_v14 = vadd.f32 %v15043_v24, %v7179_v44  ;;  %v8052_v44 = vsel %vm15120_vm7, %v15041_v48, %v8048_v23 }
 0x718   : > { %v7600_v32 = vadd.f32 %v15037_v41, %v7599_v37  ;;  %v8043_v16 = vsel %vm8040_vm10, %v8042_v15, %v8038_v10  ;;  %v7605_v15 = vand.u32 2147483647, %v19107_v35  ;;  %v7184_v48 = vsel %vm15132_vm9, %v15043_v24, %v7180_v14 }
 0x719   : > { %v15072_v29 = vpop.f32.mrf.mxu1  ;;  %v7619_v24 = vand.u32 2147483647, %v19112_v30  ;;  %v7633_v30 = vand.u32 2147483647, %v19116_v39  ;;  %vm8077_vm9 = vweird.f32 %v14832_v13 }
 0x71a   : > { %19118 = vst [vmem:[#allocation136_spill] sm:$0xff] %v15072_v29  ;;  %v8069_v29 = vand.u32 2147483648, %v14758_v4  ;;  %v7607_v4 = vand.u32 2147483648, %v19107_v35  ;;  %v7604_v40 = vsel %vm15107_vm3, %v15037_v41, %v7600_v32  ;;  %vm7606_vm10 = vcmp.eq.f32.partialorder %v7605_v15, 8.507059e+37  ;;  %v15137_v41 = vpop.f32.mrf.mxu2 }
 0x71b   : > { %vm7630_vm3 = vweird.f32 %v15067_v33  ;;  %v7622_v35 = vor.u32 1.1754944e-38, %v7621_v54  ;;  %vm7634_vm7 = vcmp.eq.f32.partialorder %v7633_v30, 8.507059e+37  ;;  %v4377_v30 = vsel %vm3293_vm2, %v14870_v55, 0.0 }
 0x71c   : > { %v8070_v37 = vor.u32 1.1754944e-38, %v8069_v29  ;;  %v7613_v29 = vmul.f32 %v15061_v28, %v7612_v60  ;;  %v7187_v60 = vand.u32 2147483648, %v19110_v62  ;;  %v7608_v12 = vor.u32 1.1754944e-38, %v7607_v4  ;;  %vm7631_vm6 = vmor %vm7629_vm5, %vm7630_vm3 }
 0x71d   : > { %v6155_v34 = vpop.f32.mrf.mxu0 }
 0x71e   : > { %v8574_v5 = vmul.f32 %v8043_v16, %v6155_v34  ;;  %v8071_v34 = vsel %vm8068_vm4, %v8070_v37, %v8066_v18  ;;  %v7626_v16 = vsub.f32 1.0, %v7625_v59  ;;  %v7185_v37 = vand.u32 2147483647, %v19110_v62  ;;  %v15146_v62 = vpop.f32.mrf.mxu3 }
 0x71f   : > { %v7609_v59 = vsel %vm7606_vm10, %v7608_v12, %v7604_v40  ;;  %v7614_v4 = vadd.f32 %v15061_v28, %v7613_v29  ;;  %19131 = vst [vmem:[#allocation65_spill] sm:$0xff] %v15146_v62  ;;  %v7635_v40 = vand.u32 2147483648, %v19116_v39  ;;  %vm7620_vm4 = vcmp.eq.f32.partialorder %v7619_v24, 8.507059e+37  ;;  %v15172_v39 = vpop.permute.xlu2 %8638 }
 0x720   : > { %8894 = vrot.lane.b32.xlu2 %v8574_v5, %s10763_s8  ;;  %v8056_v5 = vor.u32 1.1754944e-38, %v8055_v2  ;;  %v8543_v2 = vmul.f32 %v7609_v59, %v14988_v57  ;;  %v7627_v10 = vmul.f32 %v15067_v33, %v7626_v16  ;;  %vm7186_vm13 = vcmp.eq.f32.partialorder %v7185_v37, 8.507059e+37  ;;  %v19135_v37 = vld [vmem:[#allocation276_spill] sm:$0xff] }
 0x721   : > { %v6190_v45 = vpop.f32.mrf.mxu1  ;;  %v7618_v29 = vsel %vm7617_vm15, %v15061_v28, %v7614_v4  ;;  %v19137_v4 = vld [vmem:[#allocation279_spill] sm:$0xff] }
 0x722   : > { %v8576_v58 = vmul.f32 %v8071_v34, %v6190_v45  ;;  %v8057_v32 = vsel %vm8054_vm11, %v8056_v5, %v8052_v44  ;;  %v7188_v45 = vor.u32 1.1754944e-38, %v7187_v60  ;;  %v7628_v34 = vadd.f32 %v15067_v33, %v7627_v10 }
 0x723   : > { %v7623_v16 = vsel %vm7620_vm4, %v7622_v35, %v7618_v29  ;;  %v7636_v44 = vor.u32 1.1754944e-38, %v7635_v40  ;;  %v19143_v35 = vld [vmem:[#allocation57_spill] sm:$0xff] }
 0x724   : > { %8898 = vrot.lane.b32.xlu1 %v8576_v58, %s10763_s8  ;;  %v7189_v14 = vsel %vm7186_vm13, %v7188_v45, %v7184_v48  ;;  %v7632_v28 = vsel %vm7631_vm6, %v15067_v33, %v7628_v34  ;;  %v15166_v58 = vpop.f32.mrf.mxu2  ;;  %vm7643_vm15 = vweird.f32 %v19143_v35 }
 0x725   : > { %v6158_v23 = vpop.f32.mrf.mxu0  ;;  %v8513_v57 = vmul.f32 %v7189_v14, %v14822_v50  ;;  %v8544_v50 = vmul.f32 %v7623_v16, %v14986_v46  ;;  %v7637_v12 = vsel %vm7634_vm7, %v7636_v44, %v7632_v28  ;;  %v19134_v46 = vld [vmem:[#allocation164_spill] sm:$0xff]  ;;  %v9090_v16 = vld [vmem:[%s17648_s3 + $0x18] sm:$0xff] }
 0x726   : > { %v8575_v15 = vmul.f32 %v8057_v32, %v6158_v23  ;;  %v15168_v60 = vpop.f32.mrf.mxu3  ;;  %v8545_v5 = vmul.f32 %v7637_v12, %v14995_v27  ;;  %v3796_v33 = vsub.f32 %v19135_v37, %v19134_v46  ;;  %v19136_v32 = vld [vmem:[#allocation133_spill] sm:$0xff]  ;;  %9203 = vmatpush.msrb.mxu0 %v9090_v16  ;;  %v19145_v28 = vld [vmem:[#allocation172_spill] sm:$0xff] }
 0x727   : > { %19132 = vst [vmem:[#allocation111_spill] sm:$0xff] %v15168_v60  ;;  %v9089_v37 = vld [vmem:[%s17648_s3 + $0x10] sm:$0xff]  ;;  %vm6691_vm11 = vweird.f32 %v19145_v28 }
 0x728   : > { %8768 = vrot.lane.b32.xlu2 %v8543_v2, %s10762_s29  ;;  %8896 = vrot.lane.b32.xlu0 %v8575_v15, %s10763_s8  ;;  %v4042_v23 = vmul.f32 1.442695, %v3796_v33  ;;  %v3797_v2 = vsub.f32 %v19137_v4, %v19136_v32  ;;  %v9088_v33 = vld [vmem:[%s17648_s3 + $0x8] sm:$0xff] }
 0x729   : > { %9204 = vmatpush.msrb.mxu0 %v9089_v37  ;;  %v4383_v37 = vsel %vm3293_vm2, %v14888_v17, 0.0  ;;  %v8083_v17 = vand.u32 2147483648, %v14832_v13 }
 0x72a   : > { %10463 = vpow2.f32 %v4042_v23  ;;  %v4044_v54 = vmul.f32 1.442695, %v3797_v2 }
 0x72b   : > { %9205 = vmatpush.msrb.mxu0 %v9088_v33 }
 0x72c   : > { %8644 = vrot.lane.b32.xlu1 %v8513_v57, %s10761_s28  ;;  %v15175_v18 = vpop.f32.mrf.mxu2  ;;  %10465 = vpow2.f32 %v4044_v54 }
 0x72d   : > { %19133 = vst [vmem:[#allocation90_spill] sm:$0xff] %v15175_v18  ;;  %10467 = vrcp.f32 %v14832_v13 }
 0x72e   : > { %v15179_v48 = vpop.f32.mrf.mxu3  ;;  %10469 = vrcp.f32 %v19143_v35 }
 0x730   : > { %8770 = vrot.lane.b32.xlu0 %v8544_v50, %s10762_s29  ;;  %v15189_v14 = vpop.eup %10463  ;;  %v19144_v50 = vld [vmem:[#allocation224_spill] sm:$0xff] }
 0x731   : > { %19139 = vst [vmem:[#allocation92_spill] sm:$0xff] %v15189_v14  ;;  %10471 = vrcp.f32 %v19144_v50  ;;  %vm7195_vm5 = vweird.f32 %v19144_v50 }
 0x732   : > { %v15198_v34 = vpop.eup %10465  ;;  %10473 = vrcp.f32 %v19145_v28 }
 0x733   : > { %19142 = vst [vmem:[#allocation144_spill] sm:$0xff] %v15198_v34  ;;  %v15201_v40 = vpop.eup %10467 }
 0x734   : > { %8772 = vrot.lane.b32.xlu1 %v8545_v5, %s10762_s29  ;;  %v15185_v10 = vpop.f32.mrf.mxu2  ;;  %v8073_v44 = vmul.f32 %v15201_v40, %v14832_v13  ;;  %v15214_v12 = vpop.eup %10469  ;;  %v19146_v5 = vld [vmem:[#allocation222_spill] sm:$0xff]  ;;  %vm8078_vm8 = vweird.f32 %v15201_v40 }
 0x735   : > { %19138 = vst [vmem:[#allocation137_spill] sm:$0xff] %v15185_v10  ;;  %10475 = vrcp.f32 %v19146_v5  ;;  %v7639_v32 = vmul.f32 %v15214_v12, %v19143_v35  ;;  %vm15269_vm10 = vmor %vm8077_vm9, %vm8078_vm8  ;;  %vm7644_vm12 = vweird.f32 %v15214_v12  ;;  %v8084_v10 = vor.u32 1.1754944e-38, %v8083_v17 }
 0x736   : > { %v15187_v45 = vpop.f32.mrf.mxu3  ;;  %v8074_v55 = vsub.f32 1.0, %v8073_v44  ;;  %10477 = vrcp.f32 %v14789_v7  ;;  %v19149_v44 = vld [vmem:[#allocation138_spill] sm:$0xff]  ;;  %vm15297_vm3 = vmor %vm7643_vm15, %vm7644_vm12  ;;  %vm8091_vm15 = vweird.f32 %v14789_v7 }
 0x737   : > { %v15225_v23 = vpop.eup %10471  ;;  %10479 = vrcp.f32 %v19149_v44 }
 0x738   : > { %v15231_v2 = vpop.eup %10473  ;;  %v7191_v54 = vmul.f32 %v15225_v23, %v19144_v50  ;;  %vm7196_vm13 = vweird.f32 %v15225_v23 }
 0x739   : > { %v6687_v16 = vmul.f32 %v15231_v2, %v19145_v28  ;;  %vm6692_vm4 = vweird.f32 %v15231_v2  ;;  %vm15315_vm6 = vmor %vm7195_vm5, %vm7196_vm13 }
 0x73a   : > { %v15181_v59 = vpop.permute.xlu2 %8766  ;;  %vm15331_vm9 = vmor %vm6691_vm11, %vm6692_vm4  ;;  %vm7223_vm4 = vweird.f32 %v19149_v44 }
 0x73b   : > { %v6688_v53 = vsub.f32 1.0, %v6687_v16 }
 0x73c   : > { %v15194_v57 = vpop.f32.mrf.mxu2 }
 0x73d   : > { %19140 = vst [vmem:[#allocation71_spill] sm:$0xff] %v15194_v57  ;;  %v19153_v57 = vld [vmem:[#allocation127_spill] sm:$0xff] }
 0x73e   : > { %v15196_v29 = vpop.f32.mrf.mxu3 }
 0x73f   : > { %19141 = vst [vmem:[#allocation140_spill] sm:$0xff] %v15196_v29  ;;  %v6193_v29 = vpop.f32.mrf.mxu1 }
 0x742   : > { %v10181_v27 = vpop.permute.xlu2 %10180 }
 0x743   : > { %v10182_v15 = vunpack.i.l.bf16 %v10181_v27  ;;  %v10183_v24 = vunpack.i.h.bf16 %v10181_v27  ;;  %v4380_v27 = vsel %vm3293_vm2, %v14860_v63, 0.0  ;;  %v7640_v63 = vsub.f32 1.0, %v7639_v32 }
 0x744   : > { %v15217_v46 = vpop.f32.mrf.mxu2 }
 0x745   : > { %6537 = vmatpush.msrb.mxu3 %v10182_v15  ;;  %19147 = vst [vmem:[#allocation98_spill] sm:$0xff] %v15217_v46  ;;  %v15236_v15 = vpop.eup %10475  ;;  %v7641_v32 = vmul.f32 %v15214_v12, %v7640_v63  ;;  %v6697_v63 = vand.u32 2147483648, %v19145_v28 }
 0x746   : > { %v15229_v4 = vpop.f32.mrf.mxu3  ;;  %v7205_v33 = vmul.f32 %v15236_v15, %v19146_v5  ;;  %v15254_v62 = vpop.eup %10477  ;;  %vm7210_vm7 = vweird.f32 %v15236_v15 }
 0x747   : > { %6538 = vmatpush.msrb.mxu3 %v10183_v24  ;;  %19148 = vst [vmem:[#allocation97_spill] sm:$0xff] %v15229_v4  ;;  %v8075_v24 = vmul.f32 %v15201_v40, %v8074_v55  ;;  %v7192_v55 = vsub.f32 1.0, %v7191_v54  ;;  %v15262_v46 = vpop.eup %10479  ;;  %v19152_v54 = vld [vmem:[#allocation126_spill] sm:$0xff] }
 0x748   : > { %9807 = vmatmul.msk.f32.vlgmr.msrb.gmra.mxu3 %vm3293_vm2, %v15189_v14  ;;  %v7206_v14 = vsub.f32 1.0, %v7205_v33  ;;  %v6689_v33 = vmul.f32 %v15231_v2, %v6688_v53  ;;  %v7219_v38 = vmul.f32 %v15262_v46, %v19149_v44  ;;  %v7647_v53 = vand.u32 2147483647, %v19143_v35 }
 0x749   : > { %v8076_v60 = vadd.f32 %v15201_v40, %v8075_v24  ;;  %vm7224_vm5 = vweird.f32 %v15262_v46 }
 0x74a   : > { %vm7648_vm8 = vcmp.eq.f32.partialorder %v7647_v53, 8.507059e+37 }
 0x74b   : > { %v8080_v24 = vsel %vm15269_vm10, %v15201_v40, %v8076_v60  ;;  %v7207_v60 = vmul.f32 %v15236_v15, %v7206_v14  ;;  %vm7209_vm10 = vweird.f32 %v19146_v5 }
 0x74c   : > { %vm15347_vm11 = vmor %vm7209_vm10, %vm7210_vm7 }
 0x74e   : > { %v15267_v4 = vpop.f32.mrf.mxu3 }
 0x74f   : > { %19154 = vst [vmem:[#allocation37_spill] sm:$0xff] %v15267_v4  ;;  %v7642_v4 = vadd.f32 %v15214_v12, %v7641_v32 }
 0x750   : > { %9808 = vmatmul.msk.f32.gmra.mxu3 %vm3293_vm2, %v15198_v34  ;;  %v6695_v34 = vand.u32 2147483647, %v19145_v28 }
 0x751   : > { %4378 = vadd.xlane.f32.xlu2 %v4377_v30  ;;  %v9087_v30 = vld [vmem:[%s17648_s3] sm:$0xff] }
 0x752   : > { %9206 = vmatpush.msrb.mxu0 %v9087_v30  ;;  %v15257_v30 = vpop.f32.mrf.mxu2  ;;  %vm15341_vm12 = vcmp.eq.f32.partialorder %v6695_v34, 8.507059e+37 }
 0x753   : > { %19151 = vst [vmem:[#allocation182_spill] sm:$0xff] %v15257_v30  ;;  %v7193_v30 = vmul.f32 %v15225_v23, %v7192_v55  ;;  %v7649_v55 = vand.u32 2147483648, %v19143_v35  ;;  %v7201_v35 = vand.u32 2147483648, %v19144_v50 }
 0x755   : > { %v7194_v17 = vadd.f32 %v15225_v23, %v7193_v30  ;;  %v7199_v30 = vand.u32 2147483647, %v19144_v50 }
 0x757   : > { %v7198_v50 = vsel %vm15315_vm6, %v15225_v23, %v7194_v17  ;;  %vm7200_vm13 = vcmp.eq.f32.partialorder %v7199_v30, 8.507059e+37  ;;  %v7215_v17 = vand.u32 2147483648, %v19146_v5 }
 0x75a   : > { %4381 = vadd.xlane.f32.xlu0 %v4380_v27  ;;  %v19150_v27 = vld [vmem:[#allocation31_spill] sm:$0xff] }
 0x75b   : > { %10481 = vrcp.f32 %v19150_v27  ;;  %vm7657_vm10 = vweird.f32 %v19150_v27 }
 0x75c   : > { %10483 = vrcp.f32 %v14828_v8 }
 0x75e   : > { %4384 = vadd.xlane.f32.xlu1 %v4383_v37  ;;  %v8081_v37 = vand.u32 2147483647, %v14832_v13  ;;  %v8087_v13 = vmul.f32 %v15254_v62, %v14789_v7 }
 0x760   : > { %vm8082_vm14 = vcmp.eq.f32.partialorder %v8081_v37, 8.507059e+37  ;;  %v8088_v32 = vsub.f32 1.0, %v8087_v13  ;;  %v19159_v37 = vld [vmem:[#allocation45_spill] sm:$0xff]  ;;  %v15337_v13 = vpop.f32.mrf.mxu3 }
 0x761   : > { %v15284_v18 = vpop.eup %10481  ;;  %v8085_v40 = vsel %vm8082_vm14, %v8084_v10, %v8080_v24  ;;  %10485 = vrcp.f32 %v19159_v37  ;;  %v7646_v10 = vsel %vm15297_vm3, %v15214_v12, %v7642_v4  ;;  %v7650_v24 = vor.u32 1.1754944e-38, %v7649_v55  ;;  %v15321_v12 = vpop.f32.mrf.mxu2 }
 0x762   : > { %v8577_v31 = vmul.f32 %v8085_v40, %v6193_v29  ;;  %v7653_v14 = vmul.f32 %v15284_v18, %v19150_v27  ;;  %v6690_v29 = vadd.f32 %v15231_v2, %v6689_v33  ;;  %v7208_v40 = vadd.f32 %v15236_v15, %v7207_v60 }
 0x763   : > { %v7651_v4 = vsel %vm7648_vm8, %v7650_v24, %v7646_v10  ;;  %v8089_v33 = vmul.f32 %v15254_v62, %v8088_v32  ;;  %v7202_v60 = vor.u32 1.1754944e-38, %v7201_v35  ;;  %v6698_v32 = vor.u32 1.1754944e-38, %v6697_v63 }
 0x764   : > { %v8546_v53 = vmul.f32 %v7651_v4, %v15137_v41  ;;  %v7654_v16 = vsub.f32 1.0, %v7653_v14  ;;  %v15352_v41 = vpop.xlane.xlu0 %4369  ;;  %v6694_v34 = vsel %vm15331_vm9, %v15231_v2, %v6690_v29  ;;  %v7212_v63 = vsel %vm15347_vm11, %v15236_v15, %v7208_v40  ;;  %vm15401_vm9 = vmor %vm7223_vm4, %vm7224_vm5 }
 0x765   : > { %v7203_v35 = vsel %vm7200_vm13, %v7202_v60, %v7198_v50  ;;  %v7213_v10 = vand.u32 2147483647, %v19146_v5  ;;  %v8090_v4 = vadd.f32 %v15254_v62, %v8089_v33  ;;  %vm8092_vm14 = vweird.f32 %v15254_v62 }
 0x766   : > { %v8514_v30 = vmul.f32 %v7203_v35, %v14966_v52  ;;  %10487 = vrcp.f32 %v15352_v41  ;;  %v7655_v29 = vmul.f32 %v15284_v18, %v7654_v16  ;;  %v8097_v15 = vand.u32 2147483648, %v14789_v7  ;;  %vm15382_vm6 = vmor %vm8091_vm15, %vm8092_vm14 }
 0x767   : > { %v7216_v40 = vor.u32 1.1754944e-38, %v7215_v17  ;;  %v8095_v52 = vand.u32 2147483647, %v14789_v7  ;;  %v6699_v50 = vsel %vm15341_vm12, %v6698_v32, %v6694_v34  ;;  %vm7214_vm3 = vcmp.eq.f32.partialorder %v7213_v10, 8.507059e+37 }
 0x768   : > { %v7229_v60 = vand.u32 2147483648, %v19149_v44  ;;  %v8094_v7 = vsel %vm15382_vm6, %v15254_v62, %v8090_v4  ;;  %v7656_v16 = vadd.f32 %v15284_v18, %v7655_v29  ;;  %vm7658_vm7 = vweird.f32 %v15284_v18  ;;  %v15408_v10 = vpop.f32.mrf.mxu3 }
 0x769   : > { %8900 = vrot.lane.b32.xlu2 %v8577_v31, %s10763_s8  ;;  %v7220_v31 = vsub.f32 1.0, %v7219_v38  ;;  %v15339_v38 = vpop.eup %10483  ;;  %v7217_v33 = vsel %vm7214_vm3, %v7216_v40, %v7212_v63  ;;  %v6225_v23 = vpop.f32.mrf.mxu2  ;;  %v8098_v32 = vor.u32 1.1754944e-38, %v8097_v15  ;;  %v7663_v17 = vand.u32 2147483648, %v19150_v27  ;;  %vm15420_vm12 = vmor %vm7657_vm10, %vm7658_vm7  ;;  %v19175_v40 = vld [vmem:[#allocation170_spill] sm:$0xff] }
 0x76a   : > { %v15354_v14 = vpop.eup %10485  ;;  %v8101_v2 = vmul.f32 %v15339_v38, %v14828_v8  ;;  %v8515_v28 = vmul.f32 %v7217_v33, %v14981_v11  ;;  %vm8096_vm8 = vcmp.eq.f32.partialorder %v8095_v52, 8.507059e+37  ;;  %v7227_v63 = vand.u32 2147483647, %v19149_v44 }
 0x76b   : > { %v7221_v24 = vmul.f32 %v15262_v46, %v7220_v31  ;;  %v7667_v5 = vmul.f32 %v15354_v14, %v19159_v37  ;;  %v7661_v11 = vand.u32 2147483647, %v19150_v27  ;;  %v8478_v4 = vmul.f32 %v6699_v50, %v14621_v20 }
 0x76c   : > { %v15395_v35 = vpop.eup %10487  ;;  %v7230_v29 = vor.u32 1.1754944e-38, %v7229_v60  ;;  %vm9054_vm13 = vcmask 195584   ;;  %10489 = vrcp.f32 %v19175_v40  ;;  %vm7228_vm11 = vcmp.eq.f32.partialorder %v7227_v63, 8.507059e+37 }
 0x76d   : > { %v7222_v55 = vadd.f32 %v15262_v46, %v7221_v24  ;;  %v7668_v34 = vsub.f32 1.0, %v7667_v5  ;;  %v19172_v24 = vpack.i.bf16 %v19153_v57, %v19152_v54  ;;  %v7660_v57 = vsel %vm15420_vm12, %v15284_v18, %v7656_v16 }
 0x76e   : > { %8774 = vrot.lane.b32.xlu0 %v8546_v53, %s10762_s29  ;;  %v8102_v53 = vsub.f32 1.0, %v8101_v2  ;;  %v7664_v54 = vor.u32 1.1754944e-38, %v7663_v17  ;;  %v8990_v5 = vsel %vm760_vm1, %v8478_v4, %v15172_v39  ;;  %vm7662_vm14 = vcmp.eq.f32.partialorder %v7661_v11, 8.507059e+37 }
 0x76f   : > { %v7226_v2 = vsel %vm15401_vm9, %v15262_v46, %v7222_v55  ;;  %v8115_v46 = vmul.f32 %v15395_v35, %v15352_v41  ;;  %v7669_v15 = vmul.f32 %v15354_v14, %v7668_v34  ;;  %v9022_v18 = vsel %vm3293_vm2, %v8990_v5, %v15181_v59 }
 0x770   : > { %v8103_v20 = vmul.f32 %v15339_v38, %v8102_v53  ;;  %v7231_v50 = vsel %vm7228_vm11, %v7230_v29, %v7226_v2  ;;  %v7665_v31 = vsel %vm7662_vm14, %v7664_v54, %v7660_v57  ;;  %vm7672_vm15 = vweird.f32 %v15354_v14 }
 0x771   : > { %8646 = vrot.lane.b32.xlu2 %v8514_v30, %s10761_s28  ;;  %v8099_v30 = vsel %vm8096_vm8, %v8098_v32, %v8094_v7  ;;  %v8547_v55 = vmul.f32 %v7665_v31, %v15166_v58  ;;  %vm8106_vm3 = vweird.f32 %v15339_v38  ;;  %v8516_v60 = vmul.f32 %v7231_v50, %v14997_v47  ;;  %v6228_v34 = vpop.f32.mrf.mxu2 }
 0x772   : > { %v8578_v27 = vmul.f32 %v8099_v30, %v6225_v23  ;;  %v8104_v39 = vadd.f32 %v15339_v38, %v8103_v20  ;;  %v8116_v7 = vsub.f32 1.0, %v8115_v46  ;;  %v7670_v59 = vadd.f32 %v15354_v14, %v7669_v15  ;;  %v10490_v47 = vpop.eup %10489  ;;  %v19178_v30 = vld [vmem:[#allocation173_spill] sm:$0xff]  ;;  %v15477_v20 = vpop.xlane.xlu1 %4372 }
 0x773   : > { %v8111_v53 = vand.u32 2147483648, %v14828_v8  ;;  %v7677_v16 = vand.u32 2147483648, %v19159_v37  ;;  %vm8105_vm4 = vweird.f32 %v14828_v8  ;;  %v8109_v58 = vand.u32 2147483647, %v14828_v8 }
 0x774   : > { %vm7671_vm5 = vweird.f32 %v19159_v37  ;;  %v7675_v23 = vand.u32 2147483647, %v19159_v37  ;;  %vm15453_vm6 = vmor %vm8105_vm4, %vm8106_vm3  ;;  %v8117_v62 = vmul.f32 %v15395_v35, %v8116_v7  ;;  %v6701_v11 = vmul.f32 %v10490_v47, %v19175_v40 }
 0x775   : > { %vm7673_vm7 = vmor %vm7671_vm5, %vm7672_vm15  ;;  %v8108_v8 = vsel %vm15453_vm6, %v15339_v38, %v8104_v39  ;;  %v8112_v37 = vor.u32 1.1754944e-38, %v8111_v53  ;;  %v7678_v63 = vor.u32 1.1754944e-38, %v7677_v16  ;;  %vm8110_vm8 = vcmp.eq.f32.partialorder %v8109_v58, 8.507059e+37 }
 0x776   : > { %10185 = vrot.lane.b32.xlu0 %v19172_v24, %s10760_s27  ;;  %v7674_v17 = vsel %vm7673_vm7, %v15354_v14, %v7670_v59  ;;  %10491 = vrcp.f32 %v19178_v30  ;;  %vm7676_vm9 = vcmp.eq.f32.partialorder %v7675_v23, 8.507059e+37  ;;  %v8118_v38 = vadd.f32 %v15395_v35, %v8117_v62 }
 0x777   : > { %8648 = vrot.lane.b32.xlu1 %v8515_v28, %s10761_s28  ;;  %v15460_v28 = vpop.f32.mrf.mxu3  ;;  %v8113_v24 = vsel %vm8110_vm8, %v8112_v37, %v8108_v8  ;;  %v7679_v4 = vsel %vm7676_vm9, %v7678_v63, %v7674_v17  ;;  %vm8120_vm10 = vweird.f32 %v15395_v35  ;;  %v8125_v14 = vand.u32 2147483648, %v15352_v41 }
 0x778   : > { %v8579_v2 = vmul.f32 %v8113_v24, %v6228_v34  ;;  %v8548_v44 = vmul.f32 %v7679_v4, %v15179_v48  ;;  %vm8119_vm12 = vweird.f32 %v15352_v41  ;;  %v8123_v29 = vand.u32 2147483647, %v15352_v41  ;;  %v19179_v4 = vld [vmem:[#allocation226_spill] sm:$0xff] }
 0x779   : > { %8902 = vrot.lane.b32.xlu2 %v8578_v27, %s10763_s8  ;;  %v6702_v27 = vsub.f32 1.0, %v6701_v11  ;;  %vm8121_vm11 = vmor %vm8119_vm12, %vm8120_vm10  ;;  %v8126_v54 = vor.u32 1.1754944e-38, %v8125_v14  ;;  %vm6706_vm15 = vweird.f32 %v10490_v47  ;;  %v6711_v31 = vand.u32 2147483648, %v19175_v40  ;;  %v19180_v14 = vld [vmem:[#allocation21_spill] sm:$0xff] }
 0x77a   : > { %v8895_v52 = vpop.permute.xlu2 %8894  ;;  %v8122_v48 = vsel %vm8121_vm11, %v15395_v35, %v8118_v38  ;;  %vm8124_vm14 = vcmp.eq.f32.partialorder %v8123_v29, 8.507059e+37  ;;  %vm6705_vm3 = vweird.f32 %v19175_v40  ;;  %v8641_v35 = vpop.permute.xlu1 %8640  ;;  %v6725_v23 = vand.u32 2147483648, %v19178_v30 }
 0x77b   : > { %v9055_v33 = vsel %vm9054_vm13, %v9022_v18, %v8895_v52  ;;  %v6703_v15 = vmul.f32 %v10490_v47, %v6702_v27  ;;  %v8127_v18 = vsel %vm8124_vm14, %v8126_v54, %v8122_v48  ;;  %vm6707_vm4 = vmor %vm6705_vm3, %vm6706_vm15  ;;  %v6712_v7 = vor.u32 1.1754944e-38, %v6711_v31 }
 0x77c   : > { %9817 = vmatmul.msk.f32.vlgmr.msrb.gmra.mxu0 %vm322_vm0, %v9055_v33  ;;  %v10492_v57 = vpop.eup %10491  ;;  %v6709_v33 = vand.u32 2147483647, %v19175_v40  ;;  %vm6719_vm7 = vweird.f32 %v19178_v30  ;;  %v6723_v40 = vand.u32 2147483647, %v19178_v30  ;;  %v4386_v11 = vsel %vm3293_vm2, %v14874_v9, 0.0  ;;  %v19182_v9 = vld [vmem:[#allocation139_spill] sm:$0xff] }
 0x77d   : > { %v6715_v5 = vmul.f32 %v10492_v57, %v19178_v30  ;;  %v6704_v50 = vadd.f32 %v10490_v47, %v6703_v15  ;;  %vm6720_vm6 = vweird.f32 %v10492_v57  ;;  %10493 = vrcp.f32 %v19179_v4 }
 0x77e   : > { %8776 = vrot.lane.b32.xlu0 %v8547_v55, %s10762_s29  ;;  %v15485_v55 = vpop.xlane.xlu0 %4375  ;;  %vm6710_vm5 = vcmp.eq.f32.partialorder %v6709_v33, 8.507059e+37  ;;  %vm6721_vm8 = vmor %vm6719_vm7, %vm6720_vm6  ;;  %vm6724_vm9 = vcmp.eq.f32.partialorder %v6723_v40, 8.507059e+37  ;;  %10495 = vrcp.f32 %v19180_v14  ;;  %v7243_v40 = vand.u32 2147483648, %v19179_v4 }
 0x77f   : > { %8650 = vrot.lane.b32.xlu1 %v8516_v60, %s10761_s28  ;;  %v6260_v46 = vpop.f32.mrf.mxu3  ;;  %v6716_v41 = vsub.f32 1.0, %v6715_v5  ;;  %v6708_v39 = vsel %vm6707_vm4, %v10490_v47, %v6704_v50  ;;  %vm7237_vm12 = vweird.f32 %v19179_v4  ;;  %vm7685_vm15 = vweird.f32 %v19180_v14 }
 0x780   : > { %v8580_v52 = vmul.f32 %v8127_v18, %v6260_v46  ;;  %v6713_v59 = vsel %vm6710_vm5, %v6712_v7, %v6708_v39  ;;  %v4389_v46 = vsel %vm3293_vm2, %v14900_v49, 0.0  ;;  %v19183_v49 = vld [vmem:[#allocation19_spill] sm:$0xff]  ;;  %v19184_v39 = vld [vmem:[#allocation129_spill] sm:$0xff] }
 0x781   : > { %v6717_v60 = vmul.f32 %v10492_v57, %v6716_v41  ;;  %v8479_v53 = vmul.f32 %v6713_v59, %v14636_v36  ;;  %v6726_v36 = vor.u32 1.1754944e-38, %v6725_v23  ;;  %v19186_v23 = vld [vmem:[#allocation177_spill] sm:$0xff] }
 0x782   : > { %v8769_v16 = vpop.permute.xlu2 %8768  ;;  %v8643_v17 = vpop.permute.xlu1 %8642 }
 0x783   : > { %v6718_v58 = vadd.f32 %v10492_v57, %v6717_v60  ;;  %v8991_v32 = vsel %vm760_vm1, %v8479_v53, %v8641_v35  ;;  %v10494_v27 = vpop.eup %10493  ;;  %v19185_v60 = vld [vmem:[#allocation119_spill] sm:$0xff] }
 0x784   : > { %v9023_v8 = vsel %vm3293_vm2, %v8991_v32, %v8769_v16  ;;  %v15505_v29 = vpop.eup %10495  ;;  %v10189_v7 = vpack.i.bf16 %v19185_v60, %v19184_v39  ;;  %vm7238_vm10 = vweird.f32 %v10494_v27 }
 0x785   : > { %v6722_v37 = vsel %vm6721_vm8, %v10492_v57, %v6718_v58  ;;  %v7233_v57 = vmul.f32 %v10494_v27, %v19179_v4  ;;  %v7681_v48 = vmul.f32 %v15505_v29, %v19180_v14  ;;  %v4392_v58 = vsel %vm3293_vm2, %v14912_v6, 0.0  ;;  %vm15544_vm14 = vmor %vm7237_vm12, %vm7238_vm10 }
 0x786   : > { %8904 = vrot.lane.b32.xlu0 %v8579_v2, %s10763_s8  ;;  %v6727_v62 = vsel %vm6724_vm9, %v6726_v36, %v6722_v37  ;;  %vm7686_vm11 = vweird.f32 %v15505_v29  ;;  %v7691_v36 = vand.u32 2147483648, %v19180_v14  ;;  %vm8133_vm9 = vweird.f32 %v15477_v20 }
 0x787   : > { %8778 = vrot.lane.b32.xlu1 %v8548_v44, %s10762_s29  ;;  %v8480_v63 = vmul.f32 %v6727_v62, %v14623_v21  ;;  %v19181_v21 = vld [vmem:[#allocation176_spill] sm:$0xff]  ;;  %v7234_v15 = vsub.f32 1.0, %v7233_v57  ;;  %vm15556_vm3 = vmor %vm7685_vm15, %vm7686_vm11 }
 0x788   : > { %10497 = vrcp.f32 %v19181_v21  ;;  %vm6733_vm10 = vweird.f32 %v19181_v21 }
 0x789   : > { %v8992_v30 = vsel %vm760_vm1, %v8480_v63, %v8643_v17  ;;  %10499 = vrcp.f32 %v15477_v20  ;;  %v7235_v41 = vmul.f32 %v10494_v27, %v7234_v15  ;;  %v7689_v63 = vand.u32 2147483647, %v19180_v14 }
 0x78a   : > { %10501 = vrcp.f32 %v19182_v9 }
 0x78b   : > { %10503 = vrcp.f32 %v19183_v49  ;;  %v7236_v53 = vadd.f32 %v10494_v27, %v7235_v41  ;;  %vm7690_vm6 = vcmp.eq.f32.partialorder %v7689_v63, 8.507059e+37 }
 0x78c   : > { %10505 = vrcp.f32 %v19186_v23 }
 0x78d   : > { %v7240_v62 = vsel %vm15544_vm14, %v10494_v27, %v7236_v53  ;;  %vm7251_vm14 = vweird.f32 %v19182_v9 }
 0x78e   : > { %v15514_v54 = vpop.eup %10497 }
 0x78f   : > { %8906 = vrot.lane.b32.xlu1 %v8580_v52, %s10763_s8  ;;  %v15516_v5 = vpop.eup %10499  ;;  %v7682_v52 = vsub.f32 1.0, %v7681_v48  ;;  %v6729_v50 = vmul.f32 %v15514_v54, %v19181_v21  ;;  %vm6734_vm5 = vweird.f32 %v15514_v54  ;;  %v7692_v48 = vor.u32 1.1754944e-38, %v7691_v36 }
 0x790   : > { %v15518_v18 = vpop.eup %10501  ;;  %v8129_v31 = vmul.f32 %v15516_v5, %v15477_v20  ;;  %vm8134_vm7 = vweird.f32 %v15516_v5  ;;  %vm15599_vm11 = vmor %vm6733_vm10, %vm6734_vm5 }
 0x791   : > { %v7247_v33 = vmul.f32 %v15518_v18, %v19182_v9  ;;  %v7683_v35 = vmul.f32 %v15505_v29, %v7682_v52  ;;  %v6730_v59 = vsub.f32 1.0, %v6729_v50  ;;  %v15539_v17 = vpop.eup %10503  ;;  %vm7252_vm8 = vweird.f32 %v15518_v18  ;;  %vm15591_vm12 = vmor %vm8133_vm9, %vm8134_vm7 }
 0x792   : > { %v8130_v16 = vsub.f32 1.0, %v8129_v31  ;;  %v15566_v14 = vpop.eup %10505  ;;  %vm15616_vm15 = vmor %vm7251_vm14, %vm7252_vm8  ;;  %vm7699_vm7 = vweird.f32 %v19183_v49  ;;  %vm6747_vm14 = vweird.f32 %v19186_v23 }
 0x793   : > { %v7248_v32 = vsub.f32 1.0, %v7247_v33  ;;  %v6731_v6 = vmul.f32 %v15514_v54, %v6730_v59  ;;  %v8139_v33 = vand.u32 2147483648, %v15477_v20  ;;  %v7257_v59 = vand.u32 2147483648, %v19182_v9 }
 0x794   : > { %v6743_v37 = vmul.f32 %v15566_v14, %v19186_v23 }
 0x795   : > { %v6732_v27 = vadd.f32 %v15514_v54, %v6731_v6  ;;  %v7258_v36 = vor.u32 1.1754944e-38, %v7257_v59 }
 0x796   : > { %v8899_v2 = vpop.permute.xlu1 %8898 }
 0x79a   : > { %v8897_v47 = vpop.permute.xlu0 %8896 }
 0x79b   : > { %v9056_v34 = vsel %vm9054_vm13, %v9023_v8, %v8897_v47  ;;  %v7241_v8 = vand.u32 2147483647, %v19179_v4  ;;  %v7684_v47 = vadd.f32 %v15505_v29, %v7683_v35 }
 0x79c   : > { %9818 = vmatmul.msk.f32.gmra.mxu0 %vm322_vm0, %v9056_v34  ;;  %v19187_v34 = vld [vmem:[#allocation7_spill] sm:$0xff] }
 0x79d   : > { %10507 = vrcp.f32 %v19187_v34  ;;  %vm7242_vm4 = vcmp.eq.f32.partialorder %v7241_v8, 8.507059e+37 }
 0x79e   : > { %10509 = vrcp.f32 %v15485_v55  ;;  %v8645_v15 = vpop.permute.xlu1 %8644 }
 0x7a2   : > { %v8771_v24 = vpop.permute.xlu0 %8770  ;;  %4387 = vadd.xlane.f32.xlu2 %v4386_v11  ;;  %v8131_v11 = vmul.f32 %v15516_v5, %v8130_v16 }
 0x7a3   : > { %v9024_v44 = vsel %vm3293_vm2, %v8992_v30, %v8771_v24  ;;  %v7249_v30 = vmul.f32 %v15518_v18, %v7248_v32  ;;  %v7244_v24 = vor.u32 1.1754944e-38, %v7243_v40  ;;  %v15575_v41 = vpop.eup %10507  ;;  %v6736_v32 = vsel %vm15599_vm11, %v15514_v54, %v6732_v27 }
 0x7a4   : > { %v9057_v38 = vsel %vm9054_vm13, %v9024_v44, %v8899_v2  ;;  %v7695_v2 = vmul.f32 %v15539_v17, %v19183_v49  ;;  %v6739_v44 = vand.u32 2147483648, %v19181_v21  ;;  %v8132_v50 = vadd.f32 %v15516_v5, %v8131_v11  ;;  %v15584_v60 = vpop.eup %10509 }
 0x7a5   : > { %9819 = vmatmul.msk.f32.gmra.mxu0 %vm322_vm0, %v9057_v38  ;;  %v7688_v38 = vsel %vm15556_vm3, %v15505_v29, %v7684_v47  ;;  %v7245_v57 = vsel %vm7242_vm4, %v7244_v24, %v7240_v62  ;;  %v7250_v29 = vadd.f32 %v15518_v18, %v7249_v30  ;;  %v8140_v47 = vor.u32 1.1754944e-38, %v8139_v33 }
 0x7a6   : > { %v8517_v52 = vmul.f32 %v7245_v57, %v15005_v42  ;;  %v7693_v31 = vsel %vm7690_vm6, %v7692_v48, %v7688_v38  ;;  %v7696_v35 = vsub.f32 1.0, %v7695_v2  ;;  %v8137_v42 = vand.u32 2147483647, %v15477_v20  ;;  %v8773_v2 = vpop.permute.xlu1 %8772 }
 0x7a7   : > { %v8549_v39 = vmul.f32 %v7693_v31, %v15187_v45  ;;  %v7709_v45 = vmul.f32 %v15575_v41, %v19187_v34  ;;  %v8136_v16 = vsel %vm15591_vm12, %v15516_v5, %v8132_v50  ;;  %v6740_v40 = vor.u32 1.1754944e-38, %v6739_v44 }
 0x7a8   : > { %v7254_v5 = vsel %vm15616_vm15, %v15518_v18, %v7250_v29  ;;  %v8143_v6 = vmul.f32 %v15584_v60, %v15485_v55  ;;  %v7697_v54 = vmul.f32 %v15539_v17, %v7696_v35  ;;  %vm8138_vm3 = vcmp.eq.f32.partialorder %v8137_v42, 8.507059e+37 }
 0x7a9   : > { %v8141_v62 = vsel %vm8138_vm3, %v8140_v47, %v8136_v16  ;;  %v7710_v63 = vsub.f32 1.0, %v7709_v45  ;;  %vm7700_vm6 = vweird.f32 %v15539_v17  ;;  %v6744_v48 = vsub.f32 1.0, %v6743_v37 }
 0x7aa   : > { %v8144_v38 = vsub.f32 1.0, %v8143_v6  ;;  %v7698_v27 = vadd.f32 %v15539_v17, %v7697_v54  ;;  %v7703_v50 = vand.u32 2147483647, %v19183_v49  ;;  %vm7701_vm8 = vmor %vm7699_vm7, %vm7700_vm6  ;;  %vm7714_vm10 = vweird.f32 %v15575_v41 }
 0x7ab   : > { %v6745_v45 = vmul.f32 %v15566_v14, %v6744_v48  ;;  %vm7713_vm12 = vweird.f32 %v19187_v34  ;;  %v7717_v16 = vand.u32 2147483647, %v19187_v34  ;;  %vm8148_vm11 = vweird.f32 %v15584_v60 }
 0x7ac   : > { %v7702_v42 = vsel %vm7701_vm8, %v15539_v17, %v7698_v27  ;;  %vm7704_vm9 = vcmp.eq.f32.partialorder %v7703_v50, 8.507059e+37  ;;  %v7719_v17 = vand.u32 2147483648, %v19187_v34  ;;  %vm15665_vm15 = vmor %vm7713_vm12, %vm7714_vm10  ;;  %v8153_v47 = vand.u32 2147483648, %v15485_v55 }
 0x7ad   : > { %vm8147_vm3 = vweird.f32 %v15485_v55  ;;  %v8151_v6 = vand.u32 2147483647, %v15485_v55  ;;  %v6746_v54 = vadd.f32 %v15566_v14, %v6745_v45  ;;  %v6753_v37 = vand.u32 2147483648, %v19186_v23 }
 0x7ae   : > { %vm7718_vm6 = vcmp.eq.f32.partialorder %v7717_v16, 8.507059e+37 }
 0x7b0   : > { %4390 = vadd.xlane.f32.xlu0 %v4389_v46  ;;  %v15570_v46 = vpop.f32.mrf.mxu0 }
 0x7b8   : > { %v15630_v18 = vpop.f32.mrf.mxu0 }
 0x7b9   : > { %4393 = vadd.xlane.f32.xlu1 %v4392_v58 }
 0x7ba   : > { %10190 = vrot.lane.b32.xlu2 %v10189_v7, %s10760_s27  ;;  %v6737_v7 = vand.u32 2147483647, %v19181_v21  ;;  %v7255_v21 = vand.u32 2147483647, %v19182_v9  ;;  %v6263_v9 = vpop.f32.mrf.mxu3 }
 0x7bb   : > { %v8581_v30 = vmul.f32 %v8141_v62, %v6263_v9 }
 0x7bc   : > { %vm6738_vm4 = vcmp.eq.f32.partialorder %v6737_v7, 8.507059e+37  ;;  %vm7256_vm5 = vcmp.eq.f32.partialorder %v7255_v21, 8.507059e+37  ;;  %v19199_v7 = vld [vmem:[#allocation128_spill] sm:$0xff] }
 0x7bd   : > { %v6741_v11 = vsel %vm6738_vm4, %v6740_v40, %v6736_v32  ;;  %v7259_v4 = vsel %vm7256_vm5, %v7258_v36, %v7254_v5  ;;  %vm6748_vm4 = vweird.f32 %v15566_v14  ;;  %v7720_v36 = vor.u32 1.1754944e-38, %v7719_v17  ;;  %vm15684_vm5 = vmor %vm8147_vm3, %vm8148_vm11 }
 0x7be   : > { %v8481_v24 = vmul.f32 %v6741_v11, %v14642_v22  ;;  %v8518_v44 = vmul.f32 %v7259_v4, %v14843_v51  ;;  %v7705_v22 = vand.u32 2147483648, %v19183_v49  ;;  %v7711_v51 = vmul.f32 %v15575_v41, %v7710_v63  ;;  %v19198_v49 = vld [vmem:[#allocation122_spill] sm:$0xff]  ;;  %v19204_v63 = vld [vmem:[#allocation180_spill] sm:$0xff]  ;;  %vm15697_vm8 = vmor %vm6747_vm14, %vm6748_vm4 }
 0x7bf   : > { %v10194_v59 = vpack.i.bf16 %v19199_v7, %v19198_v49  ;;  %v6750_v48 = vsel %vm15697_vm8, %v15566_v14, %v6746_v54  ;;  %v19207_v14 = vld [vmem:[#allocation166_spill] sm:$0xff]  ;;  %v6767_v62 = vand.u32 2147483648, %v19204_v63  ;;  %vm6761_vm3 = vweird.f32 %v19204_v63 }
 0x7c0   : > { %v7706_v53 = vor.u32 1.1754944e-38, %v7705_v22  ;;  %v7712_v20 = vadd.f32 %v15575_v41, %v7711_v51  ;;  %v15670_v5 = vpop.f32.mrf.mxu0 }
 0x7c2   : > { %8652 = vrot.lane.b32.xlu2 %v8517_v52, %s10761_s28  ;;  %v8993_v52 = vsel %vm760_vm1, %v8481_v24, %v8645_v15  ;;  %v7707_v21 = vsel %vm7704_vm9, %v7706_v53, %v7702_v42  ;;  %v7716_v34 = vsel %vm15665_vm15, %v15575_v41, %v7712_v20  ;;  %vm8152_vm9 = vcmp.eq.f32.partialorder %v8151_v6, 8.507059e+37  ;;  %v19212_v6 = vld [vmem:[#allocation230_spill] sm:$0xff] }
 0x7c3   : > { %v9025_v29 = vsel %vm3293_vm2, %v8993_v52, %v8773_v2  ;;  %v8550_v32 = vmul.f32 %v7707_v21, %v14999_v25  ;;  %v6751_v25 = vand.u32 2147483647, %v19186_v23  ;;  %v7721_v11 = vsel %vm7718_vm6, %v7720_v36, %v7716_v34  ;;  %v19211_v21 = vld [vmem:[#allocation285_spill] sm:$0xff] }
 0x7c4   : > { %v15608_v58 = vpop.xlane.xlu2 %4378  ;;  %8780 = vrot.lane.b32.xlu0 %v8549_v39, %s10762_s29  ;;  %v8145_v39 = vmul.f32 %v15584_v60, %v8144_v38  ;;  %v6768_v2 = vor.u32 1.1754944e-38, %v6767_v62 }
 0x7c5   : > { %10511 = vrcp.f32 %v15608_v58  ;;  %v8167_v24 = vand.u32 2147483648, %v15608_v58  ;;  %vm8161_vm10 = vweird.f32 %v15608_v58  ;;  %vm6752_vm11 = vcmp.eq.f32.partialorder %v6751_v25, 8.507059e+37 }
 0x7c6   : > { %v8146_v40 = vadd.f32 %v15584_v60, %v8145_v39  ;;  %10513 = vrcp.f32 %v19204_v63 }
 0x7c7   : > { %v8168_v52 = vor.u32 1.1754944e-38, %v8167_v24 }
 0x7c8   : > { %v8150_v55 = vsel %vm15684_vm5, %v15584_v60, %v8146_v40  ;;  %v8165_v60 = vand.u32 2147483647, %v15608_v58  ;;  %v15713_v51 = vpop.f32.mrf.mxu0 }
 0x7ca   : > { %8908 = vrot.lane.b32.xlu2 %v8581_v30, %s10763_s8  ;;  %v8154_v30 = vor.u32 1.1754944e-38, %v8153_v47  ;;  %vm8166_vm14 = vcmp.eq.f32.partialorder %v8165_v60, 8.507059e+37  ;;  %v4395_v60 = vsel %vm3293_vm2, %v14937_v26, 0.0  ;;  %v15764_v26 = vld [vmem:[%s17649_s4] ss:$0 sm:$0xff] }
 0x7cb   : > { %v15636_v57 = vpop.eup %10511 }
 0x7cc   : > { %v8157_v31 = vmul.f32 %v15636_v57, %v15608_v58  ;;  %8654 = vrot.lane.b32.xlu0 %v8518_v44, %s10761_s28  ;;  %v8901_v33 = vpop.permute.xlu2 %8900  ;;  %vm8162_vm7 = vweird.f32 %v15636_v57  ;;  %v8551_v44 = vmul.f32 %v7721_v11, %v15007_v43  ;;  %v8155_v27 = vsel %vm8152_vm9, %v8154_v30, %v8150_v55  ;;  %v10514_v58 = vpop.eup %10513 }
 0x7cd   : > { %v9058_v35 = vsel %vm9054_vm13, %v9025_v29, %v8901_v33  ;;  %v15704_v38 = vpop.xlane.xlu0 %4381  ;;  %vm8163_vm12 = vmor %vm8161_vm10, %vm8162_vm7  ;;  %v8582_v23 = vmul.f32 %v8155_v27, %v15570_v46  ;;  %v6754_v43 = vor.u32 1.1754944e-38, %v6753_v37  ;;  %v19208_v33 = vld [vmem:[#allocation284_spill] sm:$0xff]  ;;  %v6757_v42 = vmul.f32 %v10514_v58, %v19204_v63  ;;  %v19213_v27 = vld [vmem:[#allocation189_spill] sm:$0xff] }
 0x7ce   : > { %v8158_v15 = vsub.f32 1.0, %v8157_v31  ;;  %9820 = vmatmul.msk.f32.gmra.mxu0 %vm322_vm0, %v9058_v35  ;;  %v3800_v46 = vsub.f32 %v19208_v33, %v19207_v14  ;;  %vm6762_vm15 = vweird.f32 %v10514_v58  ;;  %v6765_v55 = vand.u32 2147483647, %v19204_v63 }
 0x7cf   : > { %v6755_v50 = vsel %vm6752_vm11, %v6754_v43, %v6750_v48  ;;  %v6758_v45 = vsub.f32 1.0, %v6757_v42  ;;  %vm6763_vm4 = vmor %vm6761_vm3, %vm6762_vm15  ;;  %vm7279_vm3 = vweird.f32 %v19213_v27  ;;  %v8181_v14 = vand.u32 2147483648, %v15704_v38 }
 0x7d0   : > { %v8159_v8 = vmul.f32 %v15636_v57, %v8158_v15  ;;  %v8482_v31 = vmul.f32 %v6755_v50, %v14696_v19  ;;  %v19209_v15 = vld [vmem:[#allocation185_spill] sm:$0xff]  ;;  %v4050_v53 = vmul.f32 1.442695, %v3800_v46  ;;  %v15732_v17 = vpop.f32.mrf.mxu0  ;;  %vm6766_vm5 = vcmp.eq.f32.partialorder %v6765_v55, 8.507059e+37 }
 0x7d1   : > { %10515 = vrcp.f32 %v19209_v15  ;;  %v15722_v49 = vpop.xlane.xlu1 %4384  ;;  %v6759_v40 = vmul.f32 %v10514_v58, %v6758_v45  ;;  %vm6775_vm7 = vweird.f32 %v19209_v15  ;;  %v4398_v55 = vsel %vm3293_vm2, %v14902_v3, 0.0 }
 0x7d2   : > { %10195 = vrot.lane.b32.xlu1 %v10194_v59, %s10760_s27  ;;  %v8160_v41 = vadd.f32 %v15636_v57, %v8159_v8  ;;  %10517 = vpow2.f32 %v4050_v53 }
 0x7d3   : > { %10519 = vrcp.f32 %v19212_v6  ;;  %v6760_v37 = vadd.f32 %v10514_v58, %v6759_v40 }
 0x7d4   : > { %8782 = vrot.lane.b32.xlu0 %v8550_v32, %s10762_s29  ;;  %v8647_v4 = vpop.permute.xlu2 %8646  ;;  %v8164_v22 = vsel %vm8163_vm12, %v15636_v57, %v8160_v41  ;;  %vm7265_vm12 = vweird.f32 %v19212_v6 }
 0x7d5   : > { %v8169_v29 = vsel %vm8166_vm14, %v8168_v52, %v8164_v22  ;;  %v8994_v35 = vsel %vm760_vm1, %v8482_v31, %v8647_v4  ;;  %v6764_v11 = vsel %vm6763_vm4, %v10514_v58, %v6760_v37  ;;  %v6781_v52 = vand.u32 2147483648, %v19209_v15 }
 0x7d6   : > { %v8583_v57 = vmul.f32 %v8169_v29, %v15630_v18  ;;  %v19210_v18 = vld [vmem:[#allocation132_spill] sm:$0xff]  ;;  %v6769_v48 = vsel %vm6766_vm5, %v6768_v2, %v6764_v11  ;;  %v19218_v11 = vld [vmem:[#allocation5_spill] sm:$0xff] }
 0x7d7   : > { %v15728_v20 = vpop.eup %10515  ;;  %v3801_v16 = vsub.f32 %v19211_v21, %v19210_v18  ;;  %v8483_v22 = vmul.f32 %v6769_v48, %v14719_v0  ;;  %v6779_v0 = vand.u32 2147483647, %v19209_v15 }
 0x7d8   : > { %v6771_v47 = vmul.f32 %v15728_v20, %v19209_v15  ;;  %v15737_v54 = vpop.eup %10517  ;;  %v15744_v30 = vpop.f32.mrf.mxu0  ;;  %vm6776_vm6 = vweird.f32 %v15728_v20  ;;  %v6782_v15 = vor.u32 1.1754944e-38, %v6781_v52 }
 0x7d9   : > { %v4052_v25 = vmul.f32 1.442695, %v3801_v16  ;;  %v15746_v4 = vpop.eup %10519  ;;  %vm15771_vm8 = vmor %vm6775_vm7, %vm6776_vm6  ;;  %vm6780_vm9 = vcmp.eq.f32.partialorder %v6779_v0, 8.507059e+37  ;;  %vm8175_vm7 = vweird.f32 %v15704_v38 }
 0x7da   : > { %8784 = vrot.lane.b32.xlu1 %v8551_v44, %s10762_s29  ;;  %v6772_v36 = vsub.f32 1.0, %v6771_v47  ;;  %vm7266_vm10 = vweird.f32 %v15746_v4  ;;  %v7271_v47 = vand.u32 2147483648, %v19212_v6 }
 0x7db   : > { %10521 = vpow2.f32 %v4052_v25  ;;  %vm7267_vm11 = vmor %vm7265_vm12, %vm7266_vm10 }
 0x7dc   : > { %8910 = vrot.lane.b32.xlu0 %v8582_v23, %s10763_s8  ;;  %v8903_v7 = vpop.permute.xlu2 %8902  ;;  %v6773_v44 = vmul.f32 %v15728_v20, %v6772_v36  ;;  %10523 = vrcp.f32 %v19213_v27  ;;  %v7261_v23 = vmul.f32 %v15746_v4, %v19212_v6 }
 0x7dd   : > { %10525 = vrcp.f32 %v15704_v38 }
 0x7de   : > { %v6774_v43 = vadd.f32 %v15728_v20, %v6773_v44  ;;  %v7262_v31 = vsub.f32 1.0, %v7261_v23 }
 0x7e0   : > { %v8775_v39 = vpop.permute.xlu0 %8774  ;;  %v7263_v53 = vmul.f32 %v15746_v4, %v7262_v31 }
 0x7e1   : > { %v9026_v59 = vsel %vm3293_vm2, %v8994_v35, %v8775_v39  ;;  %v15752_v63 = vpop.eup %10521 }
 0x7e2   : > { %8912 = vrot.lane.b32.xlu1 %v8583_v57, %s10763_s8  ;;  %v9059_v19 = vsel %vm9054_vm13, %v9026_v59, %v8903_v7  ;;  %v15784_v39 = vpop.eup %10523  ;;  %v6778_v57 = vsel %vm15771_vm8, %v15728_v20, %v6774_v43  ;;  %v19216_v7 = vld [vmem:[#allocation13_spill] sm:$0xff]  ;;  %v4401_v43 = vsel %vm3293_vm2, %v14927_v56, 0.0 }
 0x7e3   : > { %9821 = vmatmul.msk.f32.gmra.mxu0 %vm322_vm0, %v9059_v19  ;;  %10527 = vrcp.f32 %v19216_v7  ;;  %v7275_v59 = vmul.f32 %v15784_v39, %v19213_v27  ;;  %v6783_v19 = vsel %vm6780_vm9, %v6782_v15, %v6778_v57  ;;  %v15798_v18 = vpop.eup %10525  ;;  %v19217_v20 = vld [vmem:[#allocation229_spill] sm:$0xff]  ;;  %vm7280_vm15 = vweird.f32 %v15784_v39  ;;  %v19223_v15 = vld [vmem:[#allocation52_spill] sm:$0xff] }
 0x7e4   : > { %v8484_v45 = vmul.f32 %v6783_v19, %v14756_v61  ;;  %10529 = vrcp.f32 %v19217_v20  ;;  %v8171_v61 = vmul.f32 %v15798_v18, %v15704_v38  ;;  %vm7281_vm4 = vmor %vm7279_vm3, %vm7280_vm15  ;;  %vm8176_vm5 = vweird.f32 %v15798_v18 }
 0x7e5   : > { %v7276_v16 = vsub.f32 1.0, %v7275_v59  ;;  %10531 = vrcp.f32 %v19218_v11  ;;  %v8179_v57 = vand.u32 2147483647, %v15704_v38  ;;  %vm15856_vm9 = vmor %vm8175_vm7, %vm8176_vm5  ;;  %vm7727_vm10 = vweird.f32 %v19216_v7 }
 0x7e6   : > { %v8172_v2 = vsub.f32 1.0, %v8171_v61  ;;  %10533 = vrcp.f32 %v15722_v49  ;;  %vm7293_vm3 = vweird.f32 %v19217_v20  ;;  %vm7741_vm7 = vweird.f32 %v19218_v11 }
 0x7e7   : > { %v7277_v36 = vmul.f32 %v15784_v39, %v7276_v16 }
 0x7e8   : > { %v10186_v32 = vpop.permute.xlu0 %10185  ;;  %v8173_v23 = vmul.f32 %v15798_v18, %v8172_v2 }
 0x7e9   : > { %v10187_v8 = vunpack.i.l.bf16 %v10186_v32  ;;  %v8649_v9 = vpop.permute.xlu1 %8648  ;;  %v10188_v34 = vunpack.i.h.bf16 %v10186_v32  ;;  %v7264_v32 = vadd.f32 %v15746_v4, %v7263_v53 }
 0x7ea   : > { %v8995_v58 = vsel %vm760_vm1, %v8483_v22, %v8649_v9  ;;  %v15805_v9 = vpop.eup %10527  ;;  %v7283_v22 = vand.u32 2147483647, %v19213_v27  ;;  %v8174_v31 = vadd.f32 %v15798_v18, %v8173_v23 }
 0x7eb   : > { %6607 = vmatpush.msra.mxu1 %v10187_v8  ;;  %v7723_v37 = vmul.f32 %v15805_v9, %v19216_v7  ;;  %v7268_v62 = vsel %vm7267_vm11, %v15746_v4, %v7264_v32  ;;  %vm7728_vm8 = vweird.f32 %v15805_v9  ;;  %v7731_v32 = vand.u32 2147483647, %v19216_v7 }
 0x7ec   : > { %vm7284_vm6 = vcmp.eq.f32.partialorder %v7283_v22, 8.507059e+37  ;;  %v8178_v38 = vsel %vm15856_vm9, %v15798_v18, %v8174_v31  ;;  %vm15872_vm12 = vmor %vm7727_vm10, %vm7728_vm8  ;;  %vm8180_vm11 = vcmp.eq.f32.partialorder %v8179_v57, 8.507059e+37  ;;  %v7297_v22 = vand.u32 2147483647, %v19217_v20 }
 0x7ed   : > { %6608 = vmatpush.msra.mxu1 %v10188_v34  ;;  %v7269_v34 = vand.u32 2147483647, %v19212_v6  ;;  %v7285_v6 = vand.u32 2147483648, %v19213_v27  ;;  %v7724_v48 = vsub.f32 1.0, %v7723_v37  ;;  %vm7732_vm15 = vcmp.eq.f32.partialorder %v7731_v32, 8.507059e+37  ;;  %v19235_v32 = vld [vmem:[#allocation101_spill] sm:$0xff] }
 0x7ee   : > { %9811 = vmatmul.msk.f32.vlgmr.msra.gmra.mxu1 %vm3293_vm2, %v15737_v54  ;;  %vm8189_vm10 = vweird.f32 %v15722_v49 }
 0x7ef   : > { %vm7270_vm14 = vcmp.eq.f32.partialorder %v7269_v34, 8.507059e+37  ;;  %v7725_v0 = vmul.f32 %v15805_v9, %v7724_v48  ;;  %v19229_v34 = vld [vmem:[#allocation286_spill] sm:$0xff] }
 0x7f0   : > { %v8777_v41 = vpop.permute.xlu0 %8776 }
 0x7f1   : > { %v8651_v24 = vpop.permute.xlu1 %8650  ;;  %v9027_v50 = vsel %vm3293_vm2, %v8995_v58, %v8777_v41  ;;  %v15820_v41 = vpop.eup %10529  ;;  %v7286_v58 = vor.u32 1.1754944e-38, %v7285_v6  ;;  %v7726_v19 = vadd.f32 %v15805_v9, %v7725_v0 }
 0x7f2   : > { %v8996_v21 = vsel %vm760_vm1, %v8484_v45, %v8651_v24  ;;  %v7272_v24 = vor.u32 1.1754944e-38, %v7271_v47  ;;  %v7289_v3 = vmul.f32 %v15820_v41, %v19217_v20  ;;  %v15836_v52 = vpop.eup %10531 }
 0x7f3   : > { %4396 = vadd.xlane.f32.xlu2 %v4395_v60  ;;  %v7278_v60 = vadd.f32 %v15784_v39, %v7277_v36  ;;  %v15843_v27 = vpop.eup %10533  ;;  %v7737_v56 = vmul.f32 %v15836_v52, %v19218_v11  ;;  %vm7742_vm5 = vweird.f32 %v15836_v52 }
 0x7f4   : > { %v7273_v44 = vsel %vm7270_vm14, %v7272_v24, %v7268_v62  ;;  %v8185_v16 = vmul.f32 %v15843_v27, %v15722_v49  ;;  %vm7294_vm14 = vweird.f32 %v15820_v41  ;;  %vm15923_vm8 = vmor %vm7741_vm7, %vm7742_vm5  ;;  %vm8190_vm9 = vweird.f32 %v15843_v27 }
 0x7f5   : > { %v8519_v4 = vmul.f32 %v7273_v44, %v14868_v1  ;;  %v7282_v1 = vsel %vm7281_vm4, %v15784_v39, %v7278_v60  ;;  %vm15895_vm4 = vmor %vm7293_vm3, %vm7294_vm14 }
 0x7f6   : > { %9812 = vmatmul.msk.f32.gmra.mxu1 %vm3293_vm2, %v15752_v63  ;;  %v7287_v39 = vsel %vm7284_vm6, %v7286_v58, %v7282_v1  ;;  %v8186_v24 = vsub.f32 1.0, %v8185_v16  ;;  %vm7298_vm6 = vcmp.eq.f32.partialorder %v7297_v22, 8.507059e+37 }
 0x7f7   : > { %v8520_v59 = vmul.f32 %v7287_v39, %v19223_v15  ;;  %v7745_v39 = vand.u32 2147483647, %v19218_v11 }
 0x7f8   : > { %v8905_v29 = vpop.permute.xlu0 %8904 }
 0x7f9   : > { %v9060_v33 = vsel %vm9054_vm13, %v9027_v50, %v8905_v29  ;;  %v8779_v46 = vpop.permute.xlu1 %8778  ;;  %v9208_v35 = vpop.f32.mrf.mxu0  ;;  %v19219_v50 = vld [vmem:[#allocation58_spill] sm:$0xff]  ;;  %v7290_v29 = vsub.f32 1.0, %v7289_v3 }
 0x7fa   : > { %v9209_v42 = vadd.f32 %v15764_v26, %v9208_v35  ;;  %9822 = vmatmul.msk.f32.gmra.mxu0 %vm322_vm0, %v9060_v33  ;;  %v9028_v40 = vsel %vm3293_vm2, %v8996_v21, %v8779_v46  ;;  %10535 = vrcp.f32 %v19219_v50  ;;  %v19220_v33 = vld [vmem:[#allocation168_spill] sm:$0xff]  ;;  %v19221_v46 = vld [vmem:[#allocation131_spill] sm:$0xff]  ;;  %v7733_v21 = vand.u32 2147483648, %v19216_v7 }
 0x7fb   : > { %v3802_v35 = vsub.f32 %v19221_v46, %v19220_v33  ;;  %v7291_v45 = vmul.f32 %v15820_v41, %v7290_v29  ;;  %v7730_v7 = vsel %vm15872_vm12, %v15805_v9, %v7726_v19  ;;  %v7299_v9 = vand.u32 2147483648, %v19217_v20  ;;  %v6365_v19 = vpop.f32.mrf.mxu2 }
 0x7fc   : > { %9304 = vst.msk [vmem:[%s15782_s22] sm:$0xff] %vm322_vm0, %v9209_v42  ;;  %v19222_v42 = vld [vmem:[#allocation186_spill] sm:$0xff]  ;;  %v8187_v29 = vmul.f32 %v15843_v27, %v8186_v24  ;;  %v7747_v20 = vand.u32 2147483648, %v19218_v11  ;;  %vm7746_vm12 = vcmp.eq.f32.partialorder %v7745_v39, 8.507059e+37  ;;  %vm7755_vm3 = vweird.f32 %v19219_v50 }
 0x7fd   : > { %10537 = vrcp.f32 %v19222_v42  ;;  %v7292_v62 = vadd.f32 %v15820_v41, %v7291_v45  ;;  %v4054_v6 = vmul.f32 1.442695, %v3802_v35  ;;  %v7300_v35 = vor.u32 1.1754944e-38, %v7299_v9 }
 0x7fe   : > { %v8188_v53 = vadd.f32 %v15843_v27, %v8187_v29  ;;  %v19239_v29 = vld [vmem:[#allocation90_spill] sm:$0xff] }
 0x7ff   : > { %v7296_v0 = vsel %vm15895_vm4, %v15820_v41, %v7292_v62 }
 0x800   : > { %v15870_v47 = vpop.eup %10535 }
 0x801   : > { %v8907_v8 = vpop.permute.xlu1 %8906  ;;  %v7751_v44 = vmul.f32 %v15870_v47, %v19219_v50  ;;  %vm7756_vm14 = vweird.f32 %v15870_v47 }
 0x802   : > { %v9061_v25 = vsel %vm9054_vm13, %v9028_v40, %v8907_v8  ;;  %v7738_v40 = vsub.f32 1.0, %v7737_v56  ;;  %v8182_v8 = vor.u32 1.1754944e-38, %v8181_v14  ;;  %vm7757_vm4 = vmor %vm7755_vm3, %vm7756_vm14 }
 0x803   : > { %9823 = vmatmul.msk.f32.gmra.mxu0 %vm322_vm0, %v9061_v25  ;;  %v19228_v25 = vld [vmem:[#allocation169_spill] sm:$0xff]  ;;  %v15886_v2 = vpop.eup %10537  ;;  %v7752_v14 = vsub.f32 1.0, %v7751_v44 }
 0x804   : > { %v3803_v37 = vsub.f32 %v19229_v34, %v19228_v25  ;;  %v8183_v36 = vsel %vm8180_vm11, %v8182_v8, %v8178_v38  ;;  %v7739_v60 = vmul.f32 %v15836_v52, %v7738_v40  ;;  %v6785_v41 = vmul.f32 %v15886_v2, %v19222_v42  ;;  %vm15937_vm11 = vmor %vm8189_vm10, %vm8190_vm9 }
 0x805   : > { %v7753_v16 = vmul.f32 %v15870_v47, %v7752_v14  ;;  %v8195_v38 = vand.u32 2147483648, %v15722_v49  ;;  %v8193_v8 = vand.u32 2147483647, %v15722_v49  ;;  %v8192_v49 = vsel %vm15937_vm11, %v15843_v27, %v8188_v53 }
 0x806   : > { %4399 = vadd.xlane.f32.xlu0 %v4398_v55  ;;  %v7734_v55 = vor.u32 1.1754944e-38, %v7733_v21  ;;  %v7740_v56 = vadd.f32 %v15836_v52, %v7739_v60  ;;  %v4056_v46 = vmul.f32 1.442695, %v3803_v37  ;;  %v7748_v21 = vor.u32 1.1754944e-38, %v7747_v20 }
 0x807   : > { %v8196_v24 = vor.u32 1.1754944e-38, %v8195_v38  ;;  %v6786_v44 = vsub.f32 1.0, %v6785_v41  ;;  %v7761_v60 = vand.u32 2147483648, %v19219_v50  ;;  %v6795_v20 = vand.u32 2147483648, %v19222_v42  ;;  %v19240_v41 = vld [vmem:[#allocation192_spill] sm:$0xff] }
 0x808   : > { %v7735_v48 = vsel %vm7732_vm15, %v7734_v55, %v7730_v7  ;;  %v7744_v11 = vsel %vm15923_vm8, %v15836_v52, %v7740_v56  ;;  %v7754_v55 = vadd.f32 %v15870_v47, %v7753_v16  ;;  %vm8194_vm15 = vcmp.eq.f32.partialorder %v8193_v8, 8.507059e+37  ;;  %v19242_v8 = vld [vmem:[#allocation167_spill] sm:$0xff] }
 0x809   : > { %v7749_v37 = vsel %vm7746_vm12, %v7748_v21, %v7744_v11  ;;  %v8197_v9 = vsel %vm8194_vm15, %v8196_v24, %v8192_v49  ;;  %v6787_v23 = vmul.f32 %v15886_v2, %v6786_v44  ;;  %v7762_v22 = vor.u32 1.1754944e-38, %v7761_v60  ;;  %v19241_v11 = vld [vmem:[#allocation93_spill] sm:$0xff]  ;;  %v19246_v24 = vld [vmem:[#allocation134_spill] sm:$0xff] }
 0x80a   : > { %vm6790_vm8 = vweird.f32 %v15886_v2  ;;  %vm6789_vm10 = vweird.f32 %v19222_v42  ;;  %v19247_v60 = vld [vmem:[#allocation289_spill] sm:$0xff]  ;;  %vm6803_vm3 = vweird.f32 %v19240_v41 }
 0x80b   : > { %8656 = vrot.lane.b32.xlu2 %v8519_v4, %s10761_s28  ;;  %v6330_v4 = vpop.f32.mrf.mxu1  ;;  %v6788_v56 = vadd.f32 %v15886_v2, %v6787_v23  ;;  %vm6791_vm12 = vmor %vm6789_vm10, %vm6790_vm8  ;;  %v6807_v23 = vand.u32 2147483647, %v19240_v41 }
 0x80c   : > { %4402 = vadd.xlane.f32.xlu1 %v4401_v43  ;;  %v8584_v3 = vmul.f32 %v8183_v36, %v6330_v4  ;;  %v19232_v43 = vld [vmem:[#allocation47_spill] sm:$0xff]  ;;  %v7759_v4 = vand.u32 2147483647, %v19219_v50 }
 0x80d   : > { %v8552_v1 = vmul.f32 %v7735_v48, %v19232_v43  ;;  %v19238_v36 = vld [vmem:[#allocation95_spill] sm:$0xff]  ;;  %v7758_v48 = vsel %vm7757_vm4, %v15870_v47, %v7754_v55 }
 0x80e   : > { %v8553_v62 = vmul.f32 %v7749_v37, %v19238_v36  ;;  %vm7760_vm5 = vcmp.eq.f32.partialorder %v7759_v4, 8.507059e+37  ;;  %v19245_v55 = vld [vmem:[#allocation171_spill] sm:$0xff] }
 0x813   : > { %8658 = vrot.lane.b32.xlu2 %v8520_v59, %s10761_s28  ;;  %v7301_v59 = vsel %vm7298_vm6, %v7300_v35, %v7296_v0 }
 0x814   : > { %v8521_v40 = vmul.f32 %v7301_v59, %v19235_v32  ;;  %v6796_v59 = vor.u32 1.1754944e-38, %v6795_v20  ;;  %v19249_v20 = vld [vmem:[#allocation40_spill] sm:$0xff] }
 0x815   : > { %v15882_v18 = vpop.xlane.xlu2 %4387 }
 0x816   : > { %10539 = vrcp.f32 %v15882_v18  ;;  %v8209_v0 = vand.u32 2147483648, %v15882_v18  ;;  %vm8203_vm7 = vweird.f32 %v15882_v18  ;;  %v8207_v47 = vand.u32 2147483647, %v15882_v18 }
 0x817   : > { %10541 = vpow2.f32 %v4054_v6 }
 0x818   : > { %10543 = vpow2.f32 %v4056_v46  ;;  %v8210_v35 = vor.u32 1.1754944e-38, %v8209_v0  ;;  %vm8208_vm11 = vcmp.eq.f32.partialorder %v8207_v47, 8.507059e+37 }
 0x819   : > { %v9211_v58 = vpop.f32.mrf.mxu0  ;;  %10545 = vrcp.f32 %v19240_v41 }
 0x81a   : > { %v9212_v31 = vadd.f32 %v15764_v26, %v9211_v58  ;;  %8914 = vrot.lane.b32.xlu0 %v8584_v3, %s10763_s8  ;;  %v6333_v3 = vpop.f32.mrf.mxu1  ;;  %v7763_v58 = vsel %vm7760_vm5, %v7762_v22, %v7758_v48  ;;  %v6809_v48 = vand.u32 2147483648, %v19240_v41  ;;  %vm6808_vm5 = vcmp.eq.f32.partialorder %v6807_v23, 8.507059e+37 }
 0x81b   : > { %8786 = vrot.lane.b32.xlu2 %v8552_v1, %s10762_s29  ;;  %v8585_v43 = vmul.f32 %v8197_v9, %v6333_v3 }
 0x81c   : > { %v15911_v33 = vpop.eup %10539  ;;  %9305 = vst.msk [vmem:[%s15782_s22 + $0x8] sm:$0xff] %vm322_vm0, %v9212_v31  ;;  %v8554_v31 = vmul.f32 %v7763_v58, %v19239_v29  ;;  %v6810_v47 = vor.u32 1.1754944e-38, %v6809_v48 }
 0x81d   : > { %v8199_v57 = vmul.f32 %v15911_v33, %v15882_v18  ;;  %v10191_v15 = vpop.permute.xlu2 %10190  ;;  %v15941_v52 = vpop.eup %10541  ;;  %vm8204_vm6 = vweird.f32 %v15911_v33  ;;  %v6793_v18 = vand.u32 2147483647, %v19222_v42 }
 0x81e   : > { %v10192_v45 = vunpack.i.l.bf16 %v10191_v15  ;;  %v10193_v61 = vunpack.i.h.bf16 %v10191_v15  ;;  %v15966_v1 = vpop.eup %10543  ;;  %vm8205_vm9 = vmor %vm8203_vm7, %vm8204_vm6 }
 0x81f   : > { %v8200_v34 = vsub.f32 1.0, %v8199_v57  ;;  %v6792_v57 = vsel %vm6791_vm12, %v15886_v2, %v6788_v56  ;;  %vm6794_vm14 = vcmp.eq.f32.partialorder %v6793_v18, 8.507059e+37  ;;  %vm7321_vm12 = vweird.f32 %v19247_v60 }
 0x820   : > { %6642 = vmatpush.msra.mxu2 %v10192_v45  ;;  %v6797_v53 = vsel %vm6794_vm14, %v6796_v59, %v6792_v57  ;;  %v19251_v57 = vld [vmem:[#allocation245_spill] sm:$0xff] }
 0x821   : > { %v8201_v27 = vmul.f32 %v15911_v33, %v8200_v34  ;;  %v8485_v21 = vmul.f32 %v6797_v53, %v19241_v11  ;;  %v19252_v53 = vld [vmem:[#allocation233_spill] sm:$0xff]  ;;  %vm6817_vm14 = vweird.f32 %v19251_v57 }
 0x822   : > { %6643 = vmatpush.msra.mxu2 %v10193_v61  ;;  %v9214_v7 = vpop.f32.mrf.mxu0  ;;  %8660 = vrot.lane.b32.xlu0 %v8521_v40, %s10761_s28  ;;  %v19243_v61 = vld [vmem:[#allocation287_spill] sm:$0xff] }
 0x823   : > { %v9215_v6 = vadd.f32 %v15764_v26, %v9214_v7  ;;  %9813 = vmatmul.msk.f32.vlgmr.msra.gmra.mxu2 %vm3293_vm2, %v15941_v52  ;;  %v8202_v50 = vadd.f32 %v15911_v33, %v8201_v27  ;;  %v15983_v39 = vpop.xlane.xlu0 %4390  ;;  %v3804_v25 = vsub.f32 %v19243_v61, %v19242_v8  ;;  %v19244_v7 = vld [vmem:[#allocation232_spill] sm:$0xff]  ;;  %v19248_v27 = vld [vmem:[#allocation25_spill] sm:$0xff] }
 0x824   : > { %10547 = vrcp.f32 %v19244_v7  ;;  %v4404_v9 = vsel %vm3293_vm2, %v19248_v27, 0.0  ;;  %v7311_v61 = vand.u32 2147483647, %v19244_v7  ;;  %vm7307_vm7 = vweird.f32 %v19244_v7 }
 0x825   : > { %9306 = vst.msk [vmem:[%s15782_s22 + $0x10] sm:$0xff] %vm322_vm0, %v9215_v6  ;;  %8788 = vrot.lane.b32.xlu1 %v8553_v62, %s10762_s29  ;;  %v8653_v14 = vpop.permute.xlu2 %8652  ;;  %v8206_v46 = vsel %vm8205_vm9, %v15911_v33, %v8202_v50  ;;  %v10546_v33 = vpop.eup %10545  ;;  %v4058_v49 = vmul.f32 1.442695, %v3804_v25  ;;  %v3805_v6 = vsub.f32 %v19246_v24, %v19245_v55  ;;  %v7313_v25 = vand.u32 2147483648, %v19244_v7 }
 0x826   : > { %v8211_v15 = vsel %vm8208_vm11, %v8210_v35, %v8206_v46  ;;  %v8997_v42 = vsel %vm760_vm1, %v8485_v21, %v8653_v14  ;;  %v6799_v38 = vmul.f32 %v10546_v33, %v19240_v41  ;;  %vm6804_vm15 = vweird.f32 %v10546_v33  ;;  %v19250_v41 = vld [vmem:[#allocation64_spill] sm:$0xff] }
 0x827   : > { %v8586_v45 = vmul.f32 %v8211_v15, %v6365_v19  ;;  %10549 = vpow2.f32 %v4058_v49  ;;  %vm6805_vm4 = vmor %vm6803_vm3, %vm6804_vm15  ;;  %vm7312_vm9 = vcmp.eq.f32.partialorder %v7311_v61, 8.507059e+37 }
 0x828   : > { %v6800_v34 = vsub.f32 1.0, %v6799_v38  ;;  %10551 = vrcp.f32 %v19247_v60 }
 0x829   : > { %10553 = vrcp.f32 %v19249_v20 }
 0x82a   : > { %8916 = vrot.lane.b32.xlu0 %v8585_v43, %s10763_s8  ;;  %v6801_v62 = vmul.f32 %v10546_v33, %v6800_v34  ;;  %v16000_v44 = vpop.eup %10547  ;;  %v4060_v43 = vmul.f32 1.442695, %v3805_v6  ;;  %v19253_v34 = vld [vmem:[#allocation99_spill] sm:$0xff] }
 0x82b   : > { %9814 = vmatmul.msk.f32.gmra.mxu2 %vm3293_vm2, %v15966_v1  ;;  %v7303_v50 = vmul.f32 %v16000_v44, %v19244_v7  ;;  %vm7308_vm6 = vweird.f32 %v16000_v44  ;;  %v4407_v49 = vsel %vm3293_vm2, %v19253_v34, 0.0  ;;  %v19254_v7 = vld [vmem:[#allocation44_spill] sm:$0xff]  ;;  %v19260_v34 = vld [vmem:[#allocation22_spill] sm:$0xff] }
 0x82c   : > { %v15995_v37 = vpop.xlane.xlu1 %4393  ;;  %v6802_v4 = vadd.f32 %v10546_v33, %v6801_v62  ;;  %10555 = vpow2.f32 %v4060_v43  ;;  %vm7309_vm8 = vmor %vm7307_vm7, %vm7308_vm6  ;;  %v7327_v43 = vand.u32 2147483648, %v19247_v60  ;;  %vm8217_vm7 = vweird.f32 %v15983_v39 }
 0x82d   : > { %8790 = vrot.lane.b32.xlu1 %v8554_v31, %s10762_s29  ;;  %v8909_v32 = vpop.permute.xlu2 %8908  ;;  %v16010_v31 = vpop.eup %10549  ;;  %v7304_v46 = vsub.f32 1.0, %v7303_v50  ;;  %10557 = vrcp.f32 %v15983_v39 }
 0x82e   : > { %v6806_v0 = vsel %vm6805_vm4, %v10546_v33, %v6802_v4  ;;  %v16012_v56 = vpop.eup %10551  ;;  %10559 = vrcp.f32 %v19251_v57  ;;  %vm7769_vm4 = vweird.f32 %v19249_v20 }
 0x82f   : > { %v6811_v14 = vsel %vm6808_vm5, %v6810_v47, %v6806_v0  ;;  %v7317_v15 = vmul.f32 %v16012_v56, %v19247_v60  ;;  %10561 = vrcp.f32 %v19252_v53  ;;  %v16029_v21 = vpop.eup %10553  ;;  %vm7322_vm10 = vweird.f32 %v16012_v56 }
 0x830   : > { %v8486_v18 = vmul.f32 %v6811_v14, %v19250_v41  ;;  %10563 = vrcp.f32 %v15995_v37  ;;  %vm7323_vm11 = vmor %vm7321_vm12, %vm7322_vm10  ;;  %vm7770_vm3 = vweird.f32 %v16029_v21 }
 0x831   : > { %v7318_v38 = vsub.f32 1.0, %v7317_v15  ;;  %10565 = vrcp.f32 %v19254_v7  ;;  %v19256_v15 = vld [vmem:[#allocation24_spill] sm:$0xff]  ;;  %vm16093_vm6 = vmor %vm7769_vm4, %vm7770_vm3  ;;  %vm7335_vm3 = vweird.f32 %v19252_v53 }
 0x833   : > { %v7319_v62 = vmul.f32 %v16012_v56, %v7318_v38 }
 0x835   : > { %8918 = vrot.lane.b32.xlu1 %v8586_v45, %s10763_s8  ;;  %v7305_v45 = vmul.f32 %v16000_v44, %v7304_v46  ;;  %v7320_v48 = vadd.f32 %v16012_v56, %v7319_v62 }
 0x836   : > { %v8781_v16 = vpop.permute.xlu0 %8780 }
 0x837   : > { %v9029_v40 = vsel %vm3293_vm2, %v8997_v42, %v8781_v16  ;;  %v16032_v16 = vpop.eup %10555  ;;  %v7306_v8 = vadd.f32 %v16000_v44, %v7305_v45  ;;  %v7324_v47 = vsel %vm7323_vm11, %v16012_v56, %v7320_v48  ;;  %v4410_v56 = vsel %vm3293_vm2, %v19256_v15, 0.0  ;;  %v6368_v15 = vpop.f32.mrf.mxu2 }
 0x838   : > { %v9062_v2 = vsel %vm9054_vm13, %v9029_v40, %v8909_v32  ;;  %v16035_v32 = vpop.eup %10557  ;;  %v7775_v45 = vand.u32 2147483648, %v19249_v20 }
 0x839   : > { %9824 = vmatmul.msk.f32.gmra.mxu0 %vm322_vm0, %v9062_v2  ;;  %v16037_v40 = vpop.eup %10559  ;;  %v7765_v2 = vmul.f32 %v16029_v21, %v19249_v20  ;;  %v8213_v55 = vmul.f32 %v16035_v32, %v15983_v39  ;;  %v7310_v6 = vsel %vm7309_vm8, %v16000_v44, %v7306_v8  ;;  %v19255_v44 = vld [vmem:[#allocation56_spill] sm:$0xff]  ;;  %vm8218_vm5 = vweird.f32 %v16035_v32 }
 0x83a   : > { %v6813_v24 = vmul.f32 %v16037_v40, %v19251_v57  ;;  %vm6818_vm8 = vweird.f32 %v16037_v40 }
 0x83b   : > { %v7766_v4 = vsub.f32 1.0, %v7765_v2  ;;  %v19257_v2 = vld [vmem:[#allocation16_spill] sm:$0xff] }
 0x83c   : > { %v6814_v23 = vsub.f32 1.0, %v6813_v24  ;;  %10567 = vrcp.f32 %v19257_v2 }
 0x83d   : > { %v7767_v0 = vmul.f32 %v16029_v21, %v7766_v4  ;;  %v7776_v4 = vor.u32 1.1754944e-38, %v7775_v45 }
 0x83e   : > { %v8655_v36 = vpop.permute.xlu0 %8654  ;;  %v6815_v41 = vmul.f32 %v16037_v40, %v6814_v23 }
 0x83f   : > { %v8998_v19 = vsel %vm760_vm1, %v8486_v18, %v8655_v36  ;;  %v16049_v36 = vpop.eup %10561  ;;  %v7328_v18 = vor.u32 1.1754944e-38, %v7327_v43  ;;  %v7341_v43 = vand.u32 2147483648, %v19252_v53 }
 0x840   : > { %v7331_v27 = vmul.f32 %v16049_v36, %v19252_v53  ;;  %v16072_v46 = vpop.eup %10563  ;;  %v6816_v24 = vadd.f32 %v16037_v40, %v6815_v41  ;;  %vm7336_vm10 = vweird.f32 %v16049_v36 }
 0x841   : > { %vm16142_vm4 = vmor %vm7335_vm3, %vm7336_vm10 }
 0x844   : > { %v10196_v3 = vpop.permute.xlu1 %10195  ;;  %4405 = vadd.xlane.f32.xlu2 %v4404_v9  ;;  %v7314_v9 = vor.u32 1.1754944e-38, %v7313_v25 }
 0x845   : > { %v10197_v22 = vunpack.i.l.bf16 %v10196_v3  ;;  %v10198_v29 = vunpack.i.h.bf16 %v10196_v3  ;;  %v8214_v3 = vsub.f32 1.0, %v8213_v55  ;;  %v8221_v55 = vand.u32 2147483647, %v15983_v39 }
 0x846   : > { %v8783_v58 = vpop.permute.xlu0 %8782 }
 0x847   : > { %6677 = vmatpush.msra.mxu3 %v10197_v22  ;;  %v9030_v33 = vsel %vm3293_vm2, %v8998_v19, %v8783_v58  ;;  %v7315_v22 = vsel %vm7312_vm9, %v7314_v9, %v7310_v6  ;;  %v7325_v58 = vand.u32 2147483647, %v19247_v60  ;;  %v8215_v14 = vmul.f32 %v16035_v32, %v8214_v3  ;;  %vm16110_vm9 = vmor %vm8217_vm7, %vm8218_vm5 }
 0x848   : > { %v8522_v50 = vmul.f32 %v7315_v22, %v19255_v44  ;;  %v7768_v60 = vadd.f32 %v16029_v21, %v7767_v0  ;;  %v6821_v6 = vand.u32 2147483647, %v19251_v57  ;;  %v6823_v22 = vand.u32 2147483648, %v19251_v57  ;;  %v19263_v44 = vld [vmem:[#allocation137_spill] sm:$0xff] }
 0x849   : > { %6678 = vmatpush.msra.mxu3 %v10198_v29  ;;  %v7332_v29 = vsub.f32 1.0, %v7331_v27  ;;  %vm7326_vm15 = vcmp.eq.f32.partialorder %v7325_v58, 8.507059e+37  ;;  %vm8222_vm11 = vcmp.eq.f32.partialorder %v8221_v55, 8.507059e+37  ;;  %v7787_v27 = vand.u32 2147483647, %v19254_v7 }
 0x84a   : > { %9815 = vmatmul.msk.f32.vlgmr.msra.gmra.mxu3 %vm3293_vm2, %v16010_v31  ;;  %v7772_v62 = vsel %vm16093_vm6, %v16029_v21, %v7768_v60  ;;  %vm8232_vm6 = vweird.f32 %v16072_v46 }
 0x84b   : > { %v9217_v35 = vpop.f32.mrf.mxu0  ;;  %v7333_v19 = vmul.f32 %v16049_v36, %v7332_v29 }
 0x84c   : > { %v9218_v59 = vadd.f32 %v15764_v26, %v9217_v35  ;;  %v16075_v35 = vpop.eup %10565  ;;  %v8785_v58 = vpop.permute.xlu1 %8784 }
 0x84d   : > { %v7779_v8 = vmul.f32 %v16075_v35, %v19254_v7  ;;  %v7334_v9 = vadd.f32 %v16049_v36, %v7333_v19  ;;  %v16127_v29 = vpop.eup %10567  ;;  %v7342_v19 = vor.u32 1.1754944e-38, %v7341_v43  ;;  %vm7784_vm7 = vweird.f32 %v16075_v35 }
 0x84e   : > { %9307 = vst.msk [vmem:[%s15782_s22 + $0x18] sm:$0xff] %vm322_vm0, %v9218_v59  ;;  %v8911_v11 = vpop.permute.xlu0 %8910  ;;  %v7329_v59 = vsel %vm7326_vm15, %v7328_v18, %v7324_v47  ;;  %vm16133_vm15 = vmor %vm6817_vm14, %vm6818_vm8  ;;  %v7339_v47 = vand.u32 2147483647, %v19252_v53  ;;  %vm6822_vm14 = vcmp.eq.f32.partialorder %v6821_v6, 8.507059e+37  ;;  %vm8231_vm8 = vweird.f32 %v15995_v37 }
 0x84f   : > { %v9063_v42 = vsel %vm9054_vm13, %v9030_v33, %v8911_v11  ;;  %v7773_v33 = vand.u32 2147483647, %v19249_v20  ;;  %v8216_v11 = vadd.f32 %v16035_v32, %v8215_v14  ;;  %v8223_v20 = vand.u32 2147483648, %v15983_v39  ;;  %vm16172_vm10 = vmor %vm8231_vm8, %vm8232_vm6 }
 0x850   : > { %9825 = vmatmul.msk.f32.gmra.mxu0 %vm322_vm0, %v9063_v42  ;;  %v8227_v42 = vmul.f32 %v16072_v46, %v15995_v37  ;;  %v7780_v3 = vsub.f32 1.0, %v7779_v8  ;;  %v6820_v57 = vsel %vm16133_vm15, %v16037_v40, %v6816_v24  ;;  %v7338_v53 = vsel %vm16142_vm4, %v16049_v36, %v7334_v9 }
 0x851   : > { %vm7774_vm12 = vcmp.eq.f32.partialorder %v7773_v33, 8.507059e+37  ;;  %v8220_v39 = vsel %vm16110_vm9, %v16035_v32, %v8216_v11  ;;  %v8224_v23 = vor.u32 1.1754944e-38, %v8223_v20  ;;  %v19268_v33 = vld [vmem:[#allocation191_spill] sm:$0xff]  ;;  %vm7340_vm5 = vcmp.eq.f32.partialorder %v7339_v47, 8.507059e+37  ;;  %v6400_v32 = vpop.f32.mrf.mxu3  ;;  %v19273_v47 = vld [vmem:[#allocation140_spill] sm:$0xff] }
 0x852   : > { %9816 = vmatmul.msk.f32.gmra.mxu3 %vm3293_vm2, %v16032_v16  ;;  %v8228_v21 = vsub.f32 1.0, %v8227_v42  ;;  %v7777_v48 = vsel %vm7774_vm12, %v7776_v4, %v7772_v62  ;;  %v7781_v60 = vmul.f32 %v16075_v35, %v7780_v3  ;;  %v7343_v42 = vsel %vm7340_vm5, %v7342_v19, %v7338_v53 }
 0x853   : > { %v8225_v14 = vsel %vm8222_vm11, %v8224_v23, %v8220_v39  ;;  %v8237_v20 = vand.u32 2147483648, %v15995_v37  ;;  %v8235_v62 = vand.u32 2147483647, %v15995_v37  ;;  %vm7783_vm9 = vweird.f32 %v19254_v7 }
 0x854   : > { %4408 = vadd.xlane.f32.xlu0 %v4407_v49  ;;  %v8523_v49 = vmul.f32 %v7329_v59, %v19260_v34  ;;  %v8229_v18 = vmul.f32 %v16072_v46, %v8228_v21  ;;  %v6824_v59 = vor.u32 1.1754944e-38, %v6823_v22  ;;  %v8587_v45 = vmul.f32 %v8225_v14, %v6368_v15  ;;  %v8913_v21 = vpop.permute.xlu1 %8912  ;;  %vm7785_vm12 = vmor %vm7783_vm9, %vm7784_vm7 }
 0x855   : > { %v7782_v61 = vadd.f32 %v16075_v35, %v7781_v60  ;;  %v7789_v24 = vand.u32 2147483648, %v19254_v7  ;;  %v8238_v3 = vor.u32 1.1754944e-38, %v8237_v20  ;;  %vm8236_vm11 = vcmp.eq.f32.partialorder %v8235_v62, 8.507059e+37 }
 0x856   : > { %v6825_v11 = vsel %vm6822_vm14, %v6824_v59, %v6820_v57  ;;  %v8230_v40 = vadd.f32 %v16072_v46, %v8229_v18  ;;  %vm7788_vm15 = vcmp.eq.f32.partialorder %v7787_v27, 8.507059e+37  ;;  %vm7798_vm3 = vweird.f32 %v16127_v29  ;;  %v19274_v59 = vld [vmem:[#allocation197_spill] sm:$0xff] }
 0x857   : > { %v7786_v23 = vsel %vm7785_vm12, %v16075_v35, %v7782_v61  ;;  %v7790_v43 = vor.u32 1.1754944e-38, %v7789_v24  ;;  %v7803_v18 = vand.u32 2147483648, %v19257_v2  ;;  %vm7797_vm4 = vweird.f32 %v19257_v2 }
 0x858   : > { %v8234_v37 = vsel %vm16172_vm10, %v16072_v46, %v8230_v40  ;;  %v7801_v53 = vand.u32 2147483647, %v19257_v2  ;;  %vm7799_vm14 = vmor %vm7797_vm4, %vm7798_vm3  ;;  %v6837_v24 = vand.u32 2147483648, %v19268_v33  ;;  %vm6831_vm12 = vweird.f32 %v19268_v33 }
 0x859   : > { %vm6845_vm4 = vweird.f32 %v19274_v59 }
 0x85a   : > { %vm7802_vm5 = vcmp.eq.f32.partialorder %v7801_v53, 8.507059e+37  ;;  %v19280_v53 = vld [vmem:[#allocation46_spill] sm:$0xff] }
 0x85c   : > { %8662 = vrot.lane.b32.xlu2 %v8522_v50, %s10761_s28  ;;  %v8555_v50 = vmul.f32 %v7777_v48, %v19263_v44  ;;  %v8239_v44 = vsel %vm8236_vm11, %v8238_v3, %v8234_v37 }
 0x85d   : > { %v8588_v35 = vmul.f32 %v8239_v44, %v6400_v32  ;;  %v6851_v32 = vand.u32 2147483648, %v19274_v59 }
 0x85f   : > { %4411 = vadd.xlane.f32.xlu1 %v4410_v56  ;;  %v7793_v56 = vmul.f32 %v16127_v29, %v19257_v2 }
 0x860   : > { %v9220_v38 = vpop.f32.mrf.mxu0 }
 0x861   : > { %v9221_v25 = vadd.f32 %v15764_v26, %v9220_v38  ;;  %v19269_v38 = vld [vmem:[#allocation34_spill] sm:$0xff] }
 0x862   : > { %v8487_v8 = vmul.f32 %v6825_v11, %v19269_v38  ;;  %v19275_v38 = vld [vmem:[#allocation97_spill] sm:$0xff] }
 0x863   : > { %9308 = vst.msk [vmem:[%s15782_s22 + $0x20] sm:$0xff] %vm322_vm0, %v9221_v25  ;;  %v19270_v25 = vld [vmem:[#allocation82_spill] sm:$0xff] }
 0x864   : > { %8664 = vrot.lane.b32.xlu2 %v8523_v49, %s10761_s28  ;;  %v8524_v34 = vmul.f32 %v7343_v42, %v19270_v25  ;;  %v7794_v49 = vsub.f32 1.0, %v7793_v56 }
 0x866   : > { %v16125_v0 = vpop.xlane.xlu2 %4396  ;;  %v7795_v22 = vmul.f32 %v16127_v29, %v7794_v49 }
 0x867   : > { %10569 = vrcp.f32 %v16125_v0  ;;  %v8251_v40 = vand.u32 2147483648, %v16125_v0  ;;  %vm8245_vm7 = vweird.f32 %v16125_v0  ;;  %v8249_v61 = vand.u32 2147483647, %v16125_v0 }
 0x868   : > { %8792 = vrot.lane.b32.xlu0 %v8555_v50, %s10762_s29  ;;  %10571 = vrcp.f32 %v19268_v33  ;;  %v7796_v41 = vadd.f32 %v16127_v29, %v7795_v22 }
 0x869   : > { %10573 = vrcp.f32 %v19274_v59  ;;  %vm8250_vm10 = vcmp.eq.f32.partialorder %v8249_v61, 8.507059e+37 }
 0x86a   : > { %v7800_v19 = vsel %vm7799_vm14, %v16127_v29, %v7796_v41 }
 0x86c   : > { %8920 = vrot.lane.b32.xlu2 %v8587_v45, %s10763_s8  ;;  %v7804_v45 = vor.u32 1.1754944e-38, %v7803_v18  ;;  %v6852_v18 = vor.u32 1.1754944e-38, %v6851_v32 }
 0x86d   : > { %v16161_v36 = vpop.eup %10569 }
 0x86e   : > { %v8657_v55 = vpop.permute.xlu2 %8656  ;;  %v8241_v39 = vmul.f32 %v16161_v36, %v16125_v0  ;;  %v16185_v48 = vpop.eup %10571  ;;  %vm8246_vm6 = vweird.f32 %v16161_v36  ;;  %v7805_v42 = vsel %vm7802_vm5, %v7804_v45, %v7800_v19 }
 0x86f   : > { %v8999_v4 = vsel %vm760_vm1, %v8487_v8, %v8657_v55  ;;  %v6827_v46 = vmul.f32 %v16185_v48, %v19268_v33  ;;  %v8557_v8 = vmul.f32 %v7805_v42, %v19275_v38  ;;  %vm16216_vm8 = vmor %vm8245_vm7, %vm8246_vm6  ;;  %v10574_v25 = vpop.eup %10573  ;;  %vm6832_vm9 = vweird.f32 %v16185_v48  ;;  %v19284_v38 = vld [vmem:[#allocation251_spill] sm:$0xff] }
 0x870   : > { %v9031_v9 = vsel %vm3293_vm2, %v8999_v4, %v8785_v58  ;;  %8666 = vrot.lane.b32.xlu0 %v8524_v34, %s10761_s28  ;;  %v8242_v50 = vsub.f32 1.0, %v8241_v39  ;;  %v7791_v58 = vsel %vm7788_vm15, %v7790_v43, %v7786_v23  ;;  %v8252_v55 = vor.u32 1.1754944e-38, %v8251_v40  ;;  %vm6833_vm11 = vmor %vm6831_vm12, %vm6832_vm9  ;;  %v6403_v39 = vpop.f32.mrf.mxu3 }
 0x871   : > { %v9064_v7 = vsel %vm9054_vm13, %v9031_v9, %v8913_v21  ;;  %v8556_v14 = vmul.f32 %v7791_v58, %v19273_v47  ;;  %v6828_v56 = vsub.f32 1.0, %v6827_v46  ;;  %v6841_v6 = vmul.f32 %v10574_v25, %v19274_v59 }
 0x872   : > { %9826 = vmatmul.msk.f32.gmra.mxu0 %vm322_vm0, %v9064_v7  ;;  %v8243_v60 = vmul.f32 %v16161_v36, %v8242_v50  ;;  %v6835_v4 = vand.u32 2147483647, %v19268_v33  ;;  %v6838_v9 = vor.u32 1.1754944e-38, %v6837_v24  ;;  %v19278_v7 = vld [vmem:[#allocation51_spill] sm:$0xff]  ;;  %vm6846_vm3 = vweird.f32 %v10574_v25  ;;  %v19286_v24 = vld [vmem:[#allocation92_spill] sm:$0xff] }
 0x873   : > { %v6829_v11 = vmul.f32 %v16185_v48, %v6828_v56  ;;  %v6842_v37 = vsub.f32 1.0, %v6841_v6  ;;  %v6849_v47 = vand.u32 2147483647, %v19274_v59  ;;  %vm6847_vm14 = vmor %vm6845_vm4, %vm6846_vm3  ;;  %v19282_v56 = vld [vmem:[#allocation27_spill] sm:$0xff]  ;;  %v19283_v59 = vld [vmem:[#allocation54_spill] sm:$0xff]  ;;  %v4416_v6 = vsel %vm3293_vm2, %v19286_v24, 0.0 }
 0x874   : > { %v8244_v2 = vadd.f32 %v16161_v36, %v8243_v60  ;;  %vm6836_vm15 = vcmp.eq.f32.partialorder %v6835_v4, 8.507059e+37  ;;  %v4413_v60 = vsel %vm3293_vm2, %v19280_v53, 0.0  ;;  %vm7811_vm3 = vweird.f32 %v19282_v56  ;;  %v19294_v24 = vld [vmem:[#allocation26_spill] sm:$0xff] }
 0x875   : > { %v6830_v62 = vadd.f32 %v16185_v48, %v6829_v11  ;;  %v6843_v33 = vmul.f32 %v10574_v25, %v6842_v37  ;;  %vm6850_vm5 = vcmp.eq.f32.partialorder %v6849_v47, 8.507059e+37 }
 0x876   : > { %v8659_v20 = vpop.permute.xlu2 %8658  ;;  %v8248_v49 = vsel %vm16216_vm8, %v16161_v36, %v8244_v2 }
 0x877   : > { %v9223_v57 = vpop.f32.mrf.mxu0  ;;  %v8253_v27 = vsel %vm8250_vm10, %v8252_v55, %v8248_v49  ;;  %v6834_v21 = vsel %vm6833_vm11, %v16185_v48, %v6830_v62  ;;  %v19279_v48 = vld [vmem:[#allocation234_spill] sm:$0xff]  ;;  %v6844_v58 = vadd.f32 %v10574_v25, %v6843_v33 }
 0x878   : > { %v9224_v15 = vadd.f32 %v15764_v26, %v9223_v57  ;;  %8922 = vrot.lane.b32.xlu1 %v8588_v35, %s10763_s8  ;;  %8794 = vrot.lane.b32.xlu0 %v8556_v14, %s10762_s29  ;;  %v6839_v3 = vsel %vm6836_vm15, %v6838_v9, %v6834_v21  ;;  %10575 = vrcp.f32 %v19279_v48  ;;  %v7355_v9 = vand.u32 2147483648, %v19279_v48 }
 0x879   : > { %v16233_v36 = vpop.xlane.xlu0 %4399  ;;  %v8488_v23 = vmul.f32 %v6839_v3, %v19278_v7  ;;  %v6848_v41 = vsel %vm6847_vm14, %v10574_v25, %v6844_v58  ;;  %vm7349_vm7 = vweird.f32 %v19279_v48  ;;  %v7353_v3 = vand.u32 2147483647, %v19279_v48 }
 0x87a   : > { %9309 = vst.msk [vmem:[%s15782_s22 + $0x28] sm:$0xff] %vm322_vm0, %v9224_v15  ;;  %v19281_v15 = vld [vmem:[#allocation293_spill] sm:$0xff]  ;;  %v6853_v19 = vsel %vm6850_vm5, %v6852_v18, %v6848_v41  ;;  %v19288_v41 = vld [vmem:[#allocation63_spill] sm:$0xff] }
 0x87b   : > { %v9000_v43 = vsel %vm760_vm1, %v8488_v23, %v8659_v20  ;;  %10577 = vrcp.f32 %v19281_v15  ;;  %v8489_v2 = vmul.f32 %v6853_v19, %v19283_v59  ;;  %v19287_v23 = vld [vmem:[#allocation43_spill] sm:$0xff]  ;;  %vm7354_vm9 = vcmp.eq.f32.partialorder %v7353_v3, 8.507059e+37 }
 0x87c   : > { %10579 = vrcp.f32 %v19282_v56  ;;  %vm7363_vm11 = vweird.f32 %v19281_v15  ;;  %v7369_v53 = vand.u32 2147483648, %v19281_v15  ;;  %v7815_v59 = vand.u32 2147483647, %v19282_v56 }
 0x87d   : > { %10581 = vrcp.f32 %v19284_v38 }
 0x87e   : > { %v8787_v22 = vpop.permute.xlu2 %8786  ;;  %v10576_v35 = vpop.eup %10575  ;;  %10583 = vrcp.f32 %v16233_v36  ;;  %vm7816_vm5 = vcmp.eq.f32.partialorder %v7815_v59, 8.507059e+37 }
 0x87f   : > { %v9032_v44 = vsel %vm3293_vm2, %v9000_v43, %v8787_v22  ;;  %v16246_v14 = vpop.xlane.xlu1 %4402  ;;  %v7345_v45 = vmul.f32 %v10576_v35, %v19279_v48  ;;  %vm7350_vm6 = vweird.f32 %v10576_v35  ;;  %v7367_v48 = vand.u32 2147483647, %v19281_v15 }
 0x880   : > { %v9226_v34 = vpop.f32.mrf.mxu0  ;;  %8796 = vrot.lane.b32.xlu1 %v8557_v8, %s10762_s29  ;;  %vm7351_vm8 = vmor %vm7349_vm7, %vm7350_vm6  ;;  %vm8259_vm7 = vweird.f32 %v16233_v36 }
 0x881   : > { %v9227_v0 = vadd.f32 %v15764_v26, %v9226_v34  ;;  %v8589_v26 = vmul.f32 %v8253_v27, %v6403_v39  ;;  %v16255_v40 = vpop.eup %10577  ;;  %v7346_v8 = vsub.f32 1.0, %v7345_v45  ;;  %v19285_v34 = vld [vmem:[#allocation292_spill] sm:$0xff]  ;;  %vm7368_vm14 = vcmp.eq.f32.partialorder %v7367_v48, 8.507059e+37 }
 0x882   : > { %v16258_v61 = vpop.eup %10579  ;;  %10585 = vrcp.f32 %v19285_v34  ;;  %v7359_v49 = vmul.f32 %v16255_v40, %v19281_v15  ;;  %vm7364_vm10 = vweird.f32 %v16255_v40 }
 0x883   : > { %9310 = vst.msk [vmem:[%s15782_s22 + $0x30] sm:$0xff] %vm322_vm0, %v9227_v0  ;;  %v7807_v62 = vmul.f32 %v16258_v61, %v19282_v56  ;;  %v7347_v55 = vmul.f32 %v10576_v35, %v7346_v8  ;;  %v16269_v0 = vpop.eup %10581  ;;  %10587 = vrcp.f32 %v19287_v23  ;;  %vm7812_vm12 = vweird.f32 %v16258_v61  ;;  %vm16301_vm15 = vmor %vm7363_vm11, %vm7364_vm10 }
 0x884   : > { %v16273_v4 = vpop.eup %10583  ;;  %v7360_v27 = vsub.f32 1.0, %v7359_v49  ;;  %v6855_v37 = vmul.f32 %v16269_v0, %v19284_v38  ;;  %10589 = vrcp.f32 %v16246_v14  ;;  %vm16309_vm4 = vmor %vm7811_vm3, %vm7812_vm12  ;;  %vm6860_vm10 = vweird.f32 %v16269_v0 }
 0x885   : > { %v7808_v21 = vsub.f32 1.0, %v7807_v62  ;;  %v7348_v39 = vadd.f32 %v10576_v35, %v7347_v55  ;;  %v8255_v7 = vmul.f32 %v16273_v4, %v16233_v36  ;;  %vm8260_vm6 = vweird.f32 %v16273_v4 }
 0x886   : > { %v7361_v22 = vmul.f32 %v16255_v40, %v7360_v27  ;;  %10591 = vrcp.f32 %v19294_v24  ;;  %v8265_v27 = vand.u32 2147483648, %v16233_v36  ;;  %vm7377_vm12 = vweird.f32 %v19285_v34 }
 0x887   : > { %v7352_v33 = vsel %vm7351_vm8, %v10576_v35, %v7348_v39  ;;  %v7809_v43 = vmul.f32 %v16258_v61, %v7808_v21  ;;  %v8256_v58 = vsub.f32 1.0, %v8255_v7  ;;  %v19295_v21 = vld [vmem:[#allocation80_spill] sm:$0xff]  ;;  %vm6859_vm3 = vweird.f32 %v19284_v38 }
 0x888   : > { %8924 = vrot.lane.b32.xlu1 %v8589_v26, %s10763_s8  ;;  %v16276_v26 = vpop.eup %10585  ;;  %v7362_v47 = vadd.f32 %v16255_v40, %v7361_v22  ;;  %v19296_v22 = vld [vmem:[#allocation94_spill] sm:$0xff]  ;;  %v8266_v48 = vor.u32 1.1754944e-38, %v8265_v27 }
 0x889   : > { %v7810_v18 = vadd.f32 %v16258_v61, %v7809_v43  ;;  %v16299_v19 = vpop.eup %10587  ;;  %vm7378_vm8 = vweird.f32 %v16276_v26 }
 0x88a   : > { %vm16359_vm11 = vmor %vm7377_vm12, %vm7378_vm8 }
 0x88b   : > { %v7814_v8 = vsel %vm16309_vm4, %v16258_v61, %v7810_v18  ;;  %vm16381_vm4 = vmor %vm6859_vm3, %vm6860_vm10  ;;  %vm8273_vm10 = vweird.f32 %v16246_v14 }
 0x88c   : > { %v8915_v50 = vpop.permute.xlu0 %8914 }
 0x88d   : > { %v9065_v46 = vsel %vm9054_vm13, %v9032_v44, %v8915_v50  ;;  %v7373_v44 = vmul.f32 %v16276_v26, %v19285_v34  ;;  %v7356_v50 = vor.u32 1.1754944e-38, %v7355_v9  ;;  %v8263_v9 = vand.u32 2147483647, %v16233_v36 }
 0x88e   : > { %9827 = vmatmul.msk.f32.gmra.mxu0 %vm322_vm0, %v9065_v46  ;;  %v6856_v46 = vsub.f32 1.0, %v6855_v37  ;;  %v6863_v36 = vand.u32 2147483647, %v19284_v38 }
 0x88f   : > { %v7357_v32 = vsel %vm7354_vm9, %v7356_v50, %v7352_v33  ;;  %vm16341_vm9 = vmor %vm8259_vm7, %vm8260_vm6  ;;  %vm7826_vm6 = vweird.f32 %v16299_v19  ;;  %vm7825_vm7 = vweird.f32 %v19287_v23 }
 0x890   : > { %v8525_v35 = vmul.f32 %v7357_v32, %v19288_v41  ;;  %v6857_v15 = vmul.f32 %v16269_v0, %v6856_v46  ;;  %vm16406_vm8 = vmor %vm7825_vm7, %vm7826_vm6 }
 0x892   : > { %v6858_v46 = vadd.f32 %v16269_v0, %v6857_v15 }
 0x894   : > { %v8661_v57 = vpop.permute.xlu0 %8660 }
 0x895   : > { %4414 = vadd.xlane.f32.xlu2 %v4413_v60  ;;  %v9001_v11 = vsel %vm760_vm1, %v8489_v2, %v8661_v57  ;;  %v7374_v57 = vsub.f32 1.0, %v7373_v44  ;;  %v7817_v60 = vand.u32 2147483648, %v19282_v56  ;;  %v8257_v2 = vmul.f32 %v16273_v4, %v8256_v58  ;;  %v16320_v56 = vpop.eup %10589 }
 0x896   : > { %v8269_v37 = vmul.f32 %v16320_v56, %v16246_v14  ;;  %v7383_v44 = vand.u32 2147483648, %v19285_v34  ;;  %v7381_v58 = vand.u32 2147483647, %v19285_v34  ;;  %v16366_v34 = vld [vmem:[%s17649_s4] ss:$0 sm:$0xff] }
 0x897   : > { %v8789_v42 = vpop.permute.xlu1 %8788  ;;  %v7818_v49 = vor.u32 1.1754944e-38, %v7817_v60  ;;  %v8258_v62 = vadd.f32 %v16273_v4, %v8257_v2  ;;  %v19301_v2 = vld [vmem:[#allocation196_spill] sm:$0xff] }
 0x898   : > { %v9033_v29 = vsel %vm3293_vm2, %v9001_v11, %v8789_v42  ;;  %v7366_v42 = vsel %vm16301_vm15, %v16255_v40, %v7362_v47  ;;  %v19293_v40 = vld [vmem:[#allocation144_spill] sm:$0xff]  ;;  %v6865_v47 = vand.u32 2147483648, %v19284_v38  ;;  %vm8264_vm15 = vcmp.eq.f32.partialorder %v8263_v9, 8.507059e+37 }
 0x899   : > { %v4419_v55 = vsel %vm3293_vm2, %v19293_v40, 0.0  ;;  %v8262_v50 = vsel %vm16341_vm9, %v16273_v4, %v8258_v62  ;;  %v8270_v4 = vsub.f32 1.0, %v8269_v37  ;;  %10593 = vrcp.f32 %v19301_v2 }
 0x89a   : > { %v8267_v59 = vsel %vm8264_vm15, %v8266_v48, %v8262_v50  ;;  %v7384_v15 = vor.u32 1.1754944e-38, %v7383_v44  ;;  %v6862_v38 = vsel %vm16381_vm4, %v16269_v0, %v6858_v46  ;;  %v7831_v40 = vand.u32 2147483648, %v19287_v23  ;;  %v19308_v48 = vld [vmem:[#allocation29_spill] sm:$0xff] }
 0x89b   : > { %vm8274_vm9 = vweird.f32 %v16320_v56  ;;  %vm7839_vm4 = vweird.f32 %v19294_v24 }
 0x89c   : > { %v8917_v20 = vpop.permute.xlu0 %8916 }
 0x89d   : > { %v9066_v25 = vsel %vm9054_vm13, %v9033_v29, %v8917_v20  ;;  %v7821_v29 = vmul.f32 %v16299_v19, %v19287_v23  ;;  %v7370_v20 = vor.u32 1.1754944e-38, %v7369_v53  ;;  %v16371_v53 = vpop.eup %10591 }
 0x89e   : > { %9828 = vmatmul.msk.f32.gmra.mxu0 %vm322_vm0, %v9066_v25  ;;  %v7375_v25 = vmul.f32 %v16276_v26, %v7374_v57  ;;  %vm7840_vm3 = vweird.f32 %v16371_v53 }
 0x89f   : > { %v7371_v61 = vsel %vm7368_vm14, %v7370_v20, %v7366_v42  ;;  %v7822_v3 = vsub.f32 1.0, %v7821_v29  ;;  %vm6864_vm14 = vcmp.eq.f32.partialorder %v6863_v36, 8.507059e+37  ;;  %v8590_v29 = vmul.f32 %v8267_v59, %v15670_v5 }
 0x8a0   : > { %v8526_v39 = vmul.f32 %v7371_v61, %v19295_v21  ;;  %v7376_v7 = vadd.f32 %v16276_v26, %v7375_v25  ;;  %v7835_v20 = vmul.f32 %v16371_v53, %v19294_v24  ;;  %v19304_v25 = vld [vmem:[#allocation59_spill] sm:$0xff]  ;;  %v7829_v5 = vand.u32 2147483647, %v19287_v23 }
 0x8a1   : > { %v7823_v45 = vmul.f32 %v16299_v19, %v7822_v3  ;;  %v8279_v3 = vand.u32 2147483648, %v16246_v14  ;;  %v7843_v59 = vand.u32 2147483647, %v19294_v24 }
 0x8a2   : > { %4417 = vadd.xlane.f32.xlu0 %v4416_v6  ;;  %v7819_v6 = vsel %vm7816_vm5, %v7818_v49, %v7814_v8  ;;  %v7380_v60 = vsel %vm16359_vm11, %v16276_v26, %v7376_v7  ;;  %vm7382_vm5 = vcmp.eq.f32.partialorder %v7381_v58, 8.507059e+37  ;;  %v6866_v26 = vor.u32 1.1754944e-38, %v6865_v47  ;;  %vm8275_vm11 = vmor %vm8273_vm10, %vm8274_vm9 }
 0x8a3   : > { %v8558_v33 = vmul.f32 %v7819_v6, %v19296_v22  ;;  %v7385_v42 = vsel %vm7382_vm5, %v7384_v15, %v7380_v60  ;;  %v8271_v8 = vmul.f32 %v16320_v56, %v8270_v4  ;;  %v7824_v62 = vadd.f32 %v16299_v19, %v7823_v45  ;;  %v16404_v6 = vpop.eup %10593  ;;  %v19309_v45 = vld [vmem:[#allocation203_spill] sm:$0xff] }
 0x8a4   : > { %v8527_v49 = vmul.f32 %v7385_v42, %v19304_v25  ;;  %v6867_v0 = vsel %vm6864_vm14, %v6866_v26, %v6862_v38  ;;  %v7836_v37 = vsub.f32 1.0, %v7835_v20  ;;  %v7832_v22 = vor.u32 1.1754944e-38, %v7831_v40  ;;  %vm7841_vm14 = vmor %vm7839_vm4, %vm7840_vm3 }
 0x8a5   : > { %v8272_v21 = vadd.f32 %v16320_v56, %v8271_v8  ;;  %v7828_v23 = vsel %vm16406_vm8, %v16299_v19, %v7824_v62  ;;  %vm7830_vm12 = vcmp.eq.f32.partialorder %v7829_v5, 8.507059e+37  ;;  %v6869_v58 = vmul.f32 %v16404_v6, %v19301_v2 }
 0x8a6   : > { %v7833_v50 = vsel %vm7830_vm12, %v7832_v22, %v7828_v23  ;;  %v7837_v47 = vmul.f32 %v16371_v53, %v7836_v37  ;;  %v7845_v60 = vand.u32 2147483648, %v19294_v24  ;;  %vm7844_vm5 = vcmp.eq.f32.partialorder %v7843_v59, 8.507059e+37  ;;  %v6470_v22 = vpop.f32.mrf.mxu1  ;;  %v19315_v59 = vld [vmem:[#allocation298_spill] sm:$0xff] }
 0x8a7   : > { %v8276_v46 = vsel %vm8275_vm11, %v16320_v56, %v8272_v21  ;;  %vm6874_vm7 = vweird.f32 %v16404_v6  ;;  %vm6873_vm9 = vweird.f32 %v19301_v2  ;;  %vm6887_vm4 = vweird.f32 %v19309_v45 }
 0x8a8   : > { %vm6875_vm12 = vmor %vm6873_vm9, %vm6874_vm7 }
 0x8ad   : > { %8668 = vrot.lane.b32.xlu2 %v8525_v35, %s10761_s28  ;;  %v8791_v35 = vpop.permute.xlu1 %8790 }
 0x8b2   : > { %4420 = vadd.xlane.f32.xlu1 %v4419_v55  ;;  %v19305_v55 = vld [vmem:[#allocation69_spill] sm:$0xff] }
 0x8b3   : > { %v8490_v61 = vmul.f32 %v6867_v0, %v19305_v55  ;;  %v6877_v55 = vand.u32 2147483647, %v19301_v2 }
 0x8b5   : > { %8670 = vrot.lane.b32.xlu2 %v8526_v39, %s10761_s28  ;;  %v8919_v43 = vpop.permute.xlu1 %8918 }
 0x8b6   : > { %v9229_v32 = vpop.f32.mrf.mxu0  ;;  %8798 = vrot.lane.b32.xlu0 %v8558_v33, %s10762_s29  ;;  %v8277_v33 = vand.u32 2147483647, %v16246_v14  ;;  %v8559_v14 = vmul.f32 %v7833_v50, %v19308_v48  ;;  %v6891_v48 = vand.u32 2147483647, %v19309_v45 }
 0x8b7   : > { %v9230_v18 = vadd.f32 %v16366_v34, %v9229_v32  ;;  %v16369_v57 = vpop.xlane.xlu2 %4405  ;;  %v8280_v32 = vor.u32 1.1754944e-38, %v8279_v3 }
 0x8b8   : > { %10595 = vrcp.f32 %v16369_v57  ;;  %vm8278_vm15 = vcmp.eq.f32.partialorder %v8277_v33, 8.507059e+37  ;;  %v8293_v20 = vand.u32 2147483648, %v16369_v57  ;;  %vm8287_vm8 = vweird.f32 %v16369_v57 }
 0x8b9   : > { %9311 = vst.msk [vmem:[%s15782_s22 + $0x38] sm:$0xff] %vm322_vm0, %v9230_v18  ;;  %v8281_v41 = vsel %vm8278_vm15, %v8280_v32, %v8276_v46  ;;  %v7838_v18 = vadd.f32 %v16371_v53, %v7837_v47  ;;  %10597 = vrcp.f32 %v19309_v45  ;;  %v8291_v0 = vand.u32 2147483647, %v16369_v57 }
 0x8ba   : > { %v8591_v56 = vmul.f32 %v8281_v41, %v15713_v51  ;;  %v7846_v51 = vor.u32 1.1754944e-38, %v7845_v60  ;;  %vm6878_vm15 = vcmp.eq.f32.partialorder %v6877_v55, 8.507059e+37 }
 0x8bb   : > { %v7842_v38 = vsel %vm7841_vm14, %v16371_v53, %v7838_v18  ;;  %v6879_v53 = vand.u32 2147483648, %v19301_v2  ;;  %vm8292_vm11 = vcmp.eq.f32.partialorder %v8291_v0, 8.507059e+37  ;;  %v19311_v2 = vld [vmem:[#allocation105_spill] sm:$0xff] }
 0x8bc   : > { %v19314_v18 = vld [vmem:[#allocation61_spill] sm:$0xff] }
 0x8bd   : > { %8926 = vrot.lane.b32.xlu2 %v8590_v29, %s10763_s8  ;;  %v7847_v29 = vsel %vm7844_vm5, %v7846_v51, %v7842_v38  ;;  %v6880_v37 = vor.u32 1.1754944e-38, %v6879_v53  ;;  %vm6892_vm5 = vcmp.eq.f32.partialorder %v6891_v48, 8.507059e+37 }
 0x8be   : > { %8672 = vrot.lane.b32.xlu0 %v8527_v49, %s10761_s28  ;;  %v16412_v9 = vpop.eup %10595  ;;  %v19310_v49 = vld [vmem:[#allocation60_spill] sm:$0xff] }
 0x8bf   : > { %v8663_v39 = vpop.permute.xlu2 %8662  ;;  %v8283_v19 = vmul.f32 %v16412_v9, %v16369_v57  ;;  %vm8288_vm6 = vweird.f32 %v16412_v9  ;;  %v10598_v25 = vpop.eup %10597  ;;  %v8560_v62 = vmul.f32 %v7847_v29, %v19310_v49 }
 0x8c0   : > { %v9002_v7 = vsel %vm760_vm1, %v8490_v61, %v8663_v39  ;;  %vm8289_vm10 = vmor %vm8287_vm8, %vm8288_vm6  ;;  %v6883_v27 = vmul.f32 %v10598_v25, %v19309_v45  ;;  %v8294_v39 = vor.u32 1.1754944e-38, %v8293_v20  ;;  %vm6888_vm3 = vweird.f32 %v10598_v25  ;;  %v19318_v20 = vld [vmem:[#allocation297_spill] sm:$0xff] }
 0x8c1   : > { %v9034_v36 = vsel %vm3293_vm2, %v9002_v7, %v8791_v35  ;;  %v8284_v4 = vsub.f32 1.0, %v8283_v19  ;;  %v6870_v35 = vsub.f32 1.0, %v6869_v58  ;;  %v19312_v19 = vld [vmem:[#allocation295_spill] sm:$0xff]  ;;  %v6893_v58 = vand.u32 2147483648, %v19309_v45  ;;  %vm6889_vm14 = vmor %vm6887_vm4, %vm6888_vm3  ;;  %v19316_v45 = vld [vmem:[#allocation72_spill] sm:$0xff] }
 0x8c2   : > { %v9067_v44 = vsel %vm9054_vm13, %v9034_v36, %v8919_v43  ;;  %v6884_v3 = vsub.f32 1.0, %v6883_v27  ;;  %10599 = vrcp.f32 %v19312_v19  ;;  %vm7391_vm7 = vweird.f32 %v19312_v19 }
 0x8c3   : > { %9829 = vmatmul.msk.f32.gmra.mxu0 %vm322_vm0, %v9067_v44  ;;  %v8285_v11 = vmul.f32 %v16412_v9, %v8284_v4  ;;  %v6871_v15 = vmul.f32 %v16404_v6, %v6870_v35  ;;  %v19313_v4 = vld [vmem:[#allocation12_spill] sm:$0xff]  ;;  %v6894_v35 = vor.u32 1.1754944e-38, %v6893_v58  ;;  %vm7405_vm3 = vweird.f32 %v19315_v59 }
 0x8c4   : > { %10601 = vrcp.f32 %v19313_v4 }
 0x8c5   : > { %v8286_v8 = vadd.f32 %v16412_v9, %v8285_v11  ;;  %v6872_v24 = vadd.f32 %v16404_v6, %v6871_v15  ;;  %10603 = vrcp.f32 %v19315_v59 }
 0x8c6   : > { %8800 = vrot.lane.b32.xlu0 %v8559_v14, %s10762_s29 }
 0x8c7   : > { %v8665_v40 = vpop.permute.xlu2 %8664  ;;  %v16457_v61 = vpop.xlane.xlu0 %4408  ;;  %v8290_v5 = vsel %vm8289_vm10, %v16412_v9, %v8286_v8  ;;  %v6876_v21 = vsel %vm6875_vm12, %v16404_v6, %v6872_v24  ;;  %v6885_v6 = vmul.f32 %v10598_v25, %v6884_v3  ;;  %v19317_v8 = vld [vmem:[#allocation257_spill] sm:$0xff]  ;;  %v7397_v3 = vand.u32 2147483648, %v19312_v19 }
 0x8c8   : > { %v8295_v57 = vsel %vm8292_vm11, %v8294_v39, %v8290_v5  ;;  %v6881_v23 = vsel %vm6878_vm15, %v6880_v37, %v6876_v21  ;;  %v10600_v32 = vpop.eup %10599  ;;  %10605 = vrcp.f32 %v19317_v8  ;;  %vm7853_vm11 = vweird.f32 %v19313_v4 }
 0x8c9   : > { %v8491_v7 = vmul.f32 %v6881_v23, %v19311_v2  ;;  %v8592_v33 = vmul.f32 %v8295_v57, %v6470_v22  ;;  %v6886_v46 = vadd.f32 %v10598_v25, %v6885_v6  ;;  %v7387_v60 = vmul.f32 %v10600_v32, %v19312_v19 }
 0x8ca   : > { %10607 = vrcp.f32 %v19318_v20  ;;  %vm7392_vm6 = vweird.f32 %v10600_v32  ;;  %v7395_v2 = vand.u32 2147483647, %v19312_v19  ;;  %v7398_v6 = vor.u32 1.1754944e-38, %v7397_v3 }
 0x8cb   : > { %8928 = vrot.lane.b32.xlu1 %v8591_v56, %s10763_s8  ;;  %v9003_v43 = vsel %vm760_vm1, %v8491_v7, %v8665_v40  ;;  %v6890_v41 = vsel %vm6889_vm14, %v10598_v25, %v6886_v46  ;;  %v4422_v56 = vsel %vm3293_vm2, %v19314_v18, 0.0  ;;  %v7388_v38 = vsub.f32 1.0, %v7387_v60  ;;  %v19319_v40 = vld [vmem:[#allocation89_spill] sm:$0xff]  ;;  %vm7393_vm8 = vmor %vm7391_vm7, %vm7392_vm6 }
 0x8cc   : > { %v6895_v11 = vsel %vm6892_vm5, %v6894_v35, %v6890_v41  ;;  %10609 = vrcp.f32 %v16457_v61  ;;  %v4425_v55 = vsel %vm3293_vm2, %v19319_v40, 0.0  ;;  %vm7396_vm9 = vcmp.eq.f32.partialorder %v7395_v2, 8.507059e+37 }
 0x8cd   : > { %v9232_v26 = vpop.f32.mrf.mxu0  ;;  %v8492_v15 = vmul.f32 %v6895_v11, %v19316_v45  ;;  %v7409_v41 = vand.u32 2147483647, %v19315_v59  ;;  %v7411_v35 = vand.u32 2147483648, %v19315_v59  ;;  %v7859_v18 = vand.u32 2147483648, %v19313_v4 }
 0x8ce   : > { %v9233_v42 = vadd.f32 %v16366_v34, %v9232_v26  ;;  %v7857_v45 = vand.u32 2147483647, %v19313_v4  ;;  %vm7419_vm5 = vweird.f32 %v19318_v20 }
 0x8cf   : > { %v8921_v44 = vpop.permute.xlu2 %8920  ;;  %vm16554_vm14 = vcmp.eq.f32.partialorder %v7409_v41, 8.507059e+37 }
 0x8d0   : > { %9312 = vst.msk [vmem:[%s15782_s22 + $0x40] sm:$0xff] %vm322_vm0, %v9233_v42  ;;  %v16482_v42 = vpop.eup %10601  ;;  %vm7858_vm6 = vcmp.eq.f32.partialorder %v7857_v45, 8.507059e+37  ;;  %v6905_v45 = vand.u32 2147483647, %v19317_v8 }
 0x8d1   : > { %v16488_v53 = vpop.eup %10603  ;;  %v7849_v49 = vmul.f32 %v16482_v42, %v19313_v4  ;;  %vm7854_vm12 = vweird.f32 %v16482_v42  ;;  %v19325_v4 = vld [vmem:[#allocation299_spill] sm:$0xff] }
 0x8d2   : > { %v16473_v47 = vpop.xlane.xlu1 %4411  ;;  %v7401_v5 = vmul.f32 %v16488_v53, %v19315_v59  ;;  %v16499_v21 = vpop.eup %10605  ;;  %vm7406_vm10 = vweird.f32 %v16488_v53  ;;  %vm16534_vm15 = vmor %vm7853_vm11, %vm7854_vm12 }
 0x8d3   : > { %8802 = vrot.lane.b32.xlu1 %v8560_v62, %s10762_s29  ;;  %v7389_v62 = vmul.f32 %v10600_v32, %v7388_v38  ;;  %v16501_v39 = vpop.eup %10607  ;;  %v7850_v57 = vsub.f32 1.0, %v7849_v49  ;;  %v6897_v22 = vmul.f32 %v16499_v21, %v19317_v8  ;;  %vm16550_vm4 = vmor %vm7405_vm3, %vm7406_vm10  ;;  %vm8301_vm10 = vweird.f32 %v16457_v61 }
 0x8d4   : > { %v16505_v23 = vpop.eup %10609  ;;  %v7402_v7 = vsub.f32 1.0, %v7401_v5  ;;  %vm7420_vm7 = vweird.f32 %v16501_v39  ;;  %v7423_v5 = vand.u32 2147483647, %v19318_v20  ;;  %vm6902_vm12 = vweird.f32 %v16499_v21 }
 0x8d5   : > { %v7390_v37 = vadd.f32 %v10600_v32, %v7389_v62  ;;  %v6898_v19 = vsub.f32 1.0, %v6897_v22  ;;  %v7860_v62 = vor.u32 1.1754944e-38, %v7859_v18  ;;  %v7425_v22 = vand.u32 2147483648, %v19318_v20 }
 0x8d6   : > { %vm7424_vm3 = vcmp.eq.f32.partialorder %v7423_v5, 8.507059e+37 }
 0x8d7   : > { %v7426_v18 = vor.u32 1.1754944e-38, %v7425_v22 }
 0x8da   : > { %v8793_v36 = vpop.permute.xlu0 %8792 }
 0x8db   : > { %v9035_v9 = vsel %vm3293_vm2, %v9003_v43, %v8793_v36  ;;  %8930 = vrot.lane.b32.xlu1 %v8592_v33, %s10763_s8  ;;  %v7415_v33 = vmul.f32 %v16501_v39, %v19318_v20  ;;  %v19320_v43 = vld [vmem:[#allocation66_spill] sm:$0xff]  ;;  %v7394_v36 = vsel %vm7393_vm8, %v10600_v32, %v7390_v37  ;;  %v19330_v37 = vld [vmem:[#allocation28_spill] sm:$0xff]  ;;  %vm8302_vm8 = vweird.f32 %v16505_v23 }
 0x8dc   : > { %v9068_v50 = vsel %vm9054_vm13, %v9035_v9, %v8921_v44  ;;  %10611 = vrcp.f32 %v19320_v43  ;;  %v7851_v44 = vmul.f32 %v16482_v42, %v7850_v57  ;;  %v8297_v9 = vmul.f32 %v16505_v23, %v16457_v61  ;;  %vm16596_vm11 = vmor %vm8301_vm10, %vm8302_vm8 }
 0x8dd   : > { %9830 = vmatmul.msk.f32.gmra.mxu0 %vm322_vm0, %v9068_v50  ;;  %v7403_v50 = vmul.f32 %v16488_v53, %v7402_v7  ;;  %v7399_v46 = vsel %vm7396_vm9, %v7398_v6, %v7394_v36  ;;  %v7416_v58 = vsub.f32 1.0, %v7415_v33  ;;  %10613 = vrcp.f32 %v16473_v47  ;;  %vm16581_vm9 = vmor %vm7419_vm5, %vm7420_vm7 }
 0x8de   : > { %v7852_v48 = vadd.f32 %v16482_v42, %v7851_v44  ;;  %v8307_v33 = vand.u32 2147483648, %v16457_v61  ;;  %v4428_v36 = vsel %vm3293_vm2, %v15737_v54, 0.0  ;;  %v19331_v44 = vld [vmem:[#allocation106_spill] sm:$0xff]  ;;  %v6907_v54 = vand.u32 2147483648, %v19317_v8 }
 0x8df   : > { %v7404_v11 = vadd.f32 %v16488_v53, %v7403_v50  ;;  %v7417_v38 = vmul.f32 %v16501_v39, %v7416_v58  ;;  %v8305_v50 = vand.u32 2147483647, %v16457_v61  ;;  %v7871_v59 = vand.u32 2147483647, %v19320_v43 }
 0x8e0   : > { %vm6906_vm7 = vcmp.eq.f32.partialorder %v6905_v45, 8.507059e+37 }
 0x8e2   : > { %v8667_v14 = vpop.permute.xlu0 %8666  ;;  %v16522_v32 = vpop.eup %10611 }
 0x8e3   : > { %v9004_v26 = vsel %vm760_vm1, %v8492_v15, %v8667_v14  ;;  %v8298_v14 = vsub.f32 1.0, %v8297_v9  ;;  %v19322_v15 = vld [vmem:[#allocation202_spill] sm:$0xff]  ;;  %v16562_v40 = vpop.eup %10613  ;;  %vm7868_vm5 = vweird.f32 %v16522_v32 }
 0x8e4   : > { %10615 = vrcp.f32 %v19322_v15  ;;  %vm8316_vm10 = vweird.f32 %v16562_v40 }
 0x8e5   : > { %10617 = vrcp.f32 %v19325_v4 }
 0x8e6   : > { %4423 = vadd.xlane.f32.xlu2 %v4422_v56  ;;  %v19321_v56 = vld [vmem:[#allocation79_spill] sm:$0xff] }
 0x8e7   : > { %v8528_v60 = vmul.f32 %v7399_v46, %v19321_v56  ;;  %v8308_v56 = vor.u32 1.1754944e-38, %v8307_v33 }
 0x8ea   : > { %v8795_v51 = vpop.permute.xlu0 %8794  ;;  %v8923_v24 = vpop.permute.xlu1 %8922 }
 0x8eb   : > { %v9036_v29 = vsel %vm3293_vm2, %v9004_v26, %v8795_v51  ;;  %v7863_v51 = vmul.f32 %v16522_v32, %v19320_v43 }
 0x8ec   : > { %v9069_v25 = vsel %vm9054_vm13, %v9036_v29, %v8923_v24  ;;  %v7856_v24 = vsel %vm16534_vm15, %v16482_v42, %v7852_v48  ;;  %v8299_v29 = vmul.f32 %v16505_v23, %v8298_v14  ;;  %v7408_v42 = vsel %vm16550_vm4, %v16488_v53, %v7404_v11  ;;  %v16570_v53 = vpop.eup %10615 }
 0x8ed   : > { %9831 = vmatmul.msk.f32.gmra.mxu0 %vm322_vm0, %v9069_v25  ;;  %v6899_v25 = vmul.f32 %v16499_v21, %v6898_v19  ;;  %v7864_v3 = vsub.f32 1.0, %v7863_v51  ;;  %v8311_v19 = vmul.f32 %v16562_v40, %v16473_v47  ;;  %v16590_v46 = vpop.eup %10617  ;;  %v16611_v41 = vmul.f32 %v16570_v53, %v19322_v15 }
 0x8ee   : > { %v8300_v2 = vadd.f32 %v16505_v23, %v8299_v29  ;;  %vm6901_vm15 = vweird.f32 %v19317_v8  ;;  %vm8306_vm4 = vcmp.eq.f32.partialorder %v8305_v50, 8.507059e+37  ;;  %v19339_v29 = vld [vmem:[#allocation83_spill] sm:$0xff]  ;;  %v6473_v8 = vpop.f32.mrf.mxu1  ;;  %v8321_v50 = vand.u32 2147483648, %v16473_v47 }
 0x8ef   : > { %v9235_v0 = vpop.f32.mrf.mxu0  ;;  %v6900_v61 = vadd.f32 %v16499_v21, %v6899_v25  ;;  %v7865_v48 = vmul.f32 %v16522_v32, %v7864_v3 }
 0x8f0   : > { %v9236_v27 = vadd.f32 %v16366_v34, %v9235_v0  ;;  %4426 = vadd.xlane.f32.xlu0 %v4425_v55  ;;  %v7412_v0 = vor.u32 1.1754944e-38, %v7411_v35  ;;  %v7418_v55 = vadd.f32 %v16501_v39, %v7417_v38  ;;  %v8304_v14 = vsel %vm16596_vm11, %v16505_v23, %v8300_v2  ;;  %v19336_v35 = vld [vmem:[#allocation53_spill] sm:$0xff]  ;;  %v19342_v2 = vld [vmem:[#allocation20_spill] sm:$0xff] }
 0x8f1   : > { %10619 = vrcp.f32 %v19336_v35  ;;  %v6908_v38 = vor.u32 1.1754944e-38, %v6907_v54  ;;  %v8309_v51 = vsel %vm8306_vm4, %v8308_v56, %v8304_v14  ;;  %v7866_v49 = vadd.f32 %v16522_v32, %v7865_v48  ;;  %v19343_v54 = vld [vmem:[#allocation71_spill] sm:$0xff] }
 0x8f2   : > { %9313 = vst.msk [vmem:[%s15782_s22 + $0x48] sm:$0xff] %vm322_vm0, %v9236_v27  ;;  %v7861_v27 = vsel %vm7858_vm6, %v7860_v62, %v7856_v24  ;;  %v7413_v7 = vsel %vm16554_vm14, %v7412_v0, %v7408_v42  ;;  %v7422_v58 = vsel %vm16581_vm9, %v16501_v39, %v7418_v55  ;;  %v8312_v39 = vsub.f32 1.0, %v8311_v19  ;;  %vm16619_vm14 = vmor %vm6901_vm15, %vm6902_vm12 }
 0x8f3   : > { %v8561_v57 = vmul.f32 %v7861_v27, %v19330_v37  ;;  %v8529_v9 = vmul.f32 %v7413_v7, %v19331_v44  ;;  %v7427_v26 = vsel %vm7424_vm3, %v7426_v18, %v7422_v58  ;;  %v6904_v24 = vsel %vm16619_vm14, %v16499_v21, %v6900_v61  ;;  %v19356_v37 = vld [vmem:[#allocation23_spill] sm:$0xff] }
 0x8f4   : > { %v8530_v25 = vmul.f32 %v7427_v26, %v19339_v29  ;;  %vm7867_vm6 = vweird.f32 %v19320_v43  ;;  %v7873_v62 = vand.u32 2147483648, %v19320_v43  ;;  %v8313_v0 = vmul.f32 %v16562_v40, %v8312_v39  ;;  %v6505_v29 = vpop.f32.mrf.mxu2 }
 0x8f5   : > { %v4434_v55 = vsel %vm3293_vm2, %v15941_v52, 0.0  ;;  %v8593_v5 = vmul.f32 %v8309_v51, %v6473_v8  ;;  %v7429_v43 = vmul.f32 %v16590_v46, %v19325_v4  ;;  %vm16645_vm8 = vmor %vm7867_vm6, %vm7868_vm5  ;;  %v6912_v52 = vsub.f32 1.0, %v16611_v41  ;;  %v19344_v41 = vld [vmem:[#allocation301_spill] sm:$0xff] }
 0x8f6   : > { %v7870_v3 = vsel %vm16645_vm8, %v16522_v32, %v7866_v49  ;;  %v7874_v22 = vor.u32 1.1754944e-38, %v7873_v62  ;;  %vm7872_vm9 = vcmp.eq.f32.partialorder %v7871_v59, 8.507059e+37  ;;  %vm8315_vm12 = vweird.f32 %v16473_v47 }
 0x8f7   : > { %v16639_v27 = vpop.eup %10619  ;;  %v7430_v32 = vsub.f32 1.0, %v7429_v43  ;;  %v8319_v61 = vand.u32 2147483647, %v16473_v47  ;;  %vm8317_vm11 = vmor %vm8315_vm12, %vm8316_vm10  ;;  %v8322_v23 = vor.u32 1.1754944e-38, %v8321_v50  ;;  %v6913_v47 = vmul.f32 %v16570_v53, %v6912_v52 }
 0x8f8   : > { %v7877_v33 = vmul.f32 %v16639_v27, %v19336_v35  ;;  %v7875_v6 = vsel %vm7872_vm9, %v7874_v22, %v7870_v3  ;;  %vm6916_vm3 = vweird.f32 %v16570_v53  ;;  %vm7434_vm4 = vweird.f32 %v16590_v46 }
 0x8f9   : > { %v8562_v20 = vmul.f32 %v7875_v6, %v19343_v54  ;;  %vm8320_vm15 = vcmp.eq.f32.partialorder %v8319_v61, 8.507059e+37  ;;  %vm7433_vm14 = vweird.f32 %v19325_v4  ;;  %v7437_v62 = vand.u32 2147483647, %v19325_v4 }
 0x8fa   : > { %v7878_v18 = vsub.f32 1.0, %v7877_v33  ;;  %v7439_v8 = vand.u32 2147483648, %v19325_v4  ;;  %vm7882_vm5 = vweird.f32 %v16639_v27  ;;  %vm6915_vm6 = vweird.f32 %v19322_v15 }
 0x8fb   : > { %v7887_v43 = vand.u32 2147483648, %v19336_v35  ;;  %vm16707_vm8 = vmor %vm6915_vm6, %vm6916_vm3  ;;  %vm7881_vm9 = vweird.f32 %v19336_v35  ;;  %v7885_v3 = vand.u32 2147483647, %v19336_v35  ;;  %v6921_v22 = vand.u32 2147483648, %v19322_v15 }
 0x8fc   : > { %v7440_v33 = vor.u32 1.1754944e-38, %v7439_v8  ;;  %vm16727_vm10 = vmor %vm7881_vm9, %vm7882_vm5  ;;  %vm7438_vm12 = vcmp.eq.f32.partialorder %v7437_v62, 8.507059e+37 }
 0x8fd   : > { %v7888_v6 = vor.u32 1.1754944e-38, %v7887_v43 }
 0x8fe   : > { %8674 = vrot.lane.b32.xlu2 %v8528_v60, %s10761_s28  ;;  %v8797_v60 = vpop.permute.xlu1 %8796 }
 0x904   : > { %8804 = vrot.lane.b32.xlu0 %v8561_v57, %s10762_s29  ;;  %v6909_v57 = vsel %vm6906_vm7, %v6908_v38, %v6904_v24  ;;  %v7879_v38 = vmul.f32 %v16639_v27, %v7878_v18  ;;  %v19345_v24 = vld [vmem:[#allocation206_spill] sm:$0xff]  ;;  %vm16700_vm7 = vmor %vm7433_vm14, %vm7434_vm4 }
 0x905   : > { %4429 = vadd.xlane.f32.xlu1 %v4428_v36  ;;  %v8493_v7 = vmul.f32 %v6909_v57, %v19342_v2  ;;  %v8314_v36 = vadd.f32 %v16562_v40, %v8313_v0 }
 0x906   : > { %8676 = vrot.lane.b32.xlu2 %v8529_v9, %s10761_s28  ;;  %v8925_v58 = vpop.permute.xlu1 %8924  ;;  %v7880_v0 = vadd.f32 %v16639_v27, %v7879_v38 }
 0x907   : > { %v8318_v39 = vsel %vm8317_vm11, %v16562_v40, %v8314_v36  ;;  %v6914_v40 = vadd.f32 %v16570_v53, %v6913_v47  ;;  %v19355_v47 = vld [vmem:[#allocation33_spill] sm:$0xff] }
 0x908   : > { %v16615_v11 = vpop.xlane.xlu2 %4414  ;;  %v8323_v45 = vsel %vm8320_vm15, %v8322_v23, %v8318_v39  ;;  %v7884_v36 = vsel %vm16727_vm10, %v16639_v27, %v7880_v0  ;;  %vm7886_vm15 = vcmp.eq.f32.partialorder %v7885_v3, 8.507059e+37  ;;  %v6922_v27 = vor.u32 1.1754944e-38, %v6921_v22 }
 0x909   : > { %10621 = vrcp.f32 %v16615_v11  ;;  %v8594_v59 = vmul.f32 %v8323_v45, %v6505_v29  ;;  %v6918_v2 = vsel %vm16707_vm8, %v16570_v53, %v6914_v40  ;;  %v8335_v50 = vand.u32 2147483648, %v16615_v11 }
 0x90a   : > { %10623 = vrcp.f32 %v19344_v41  ;;  %vm8329_vm3 = vweird.f32 %v16615_v11  ;;  %v7889_v61 = vsel %vm7886_vm15, %v7888_v6, %v7884_v36  ;;  %v19357_v36 = vld [vmem:[#allocation102_spill] sm:$0xff] }
 0x90b   : > { %v9238_v42 = vpop.f32.mrf.mxu0  ;;  %10625 = vrcp.f32 %v19345_v24 }
 0x90c   : > { %v9239_v21 = vadd.f32 %v16366_v34, %v9238_v42  ;;  %8678 = vrot.lane.b32.xlu0 %v8530_v25, %s10761_s28 }
 0x90d   : > { %4435 = vadd.xlane.f32.xlu1 %v4434_v55 }
 0x90e   : > { %9314 = vst.msk [vmem:[%s15782_s22 + $0x50] sm:$0xff] %vm322_vm0, %v9239_v21  ;;  %8932 = vrot.lane.b32.xlu2 %v8593_v5, %s10763_s8 }
 0x90f   : > { %v16661_v9 = vpop.eup %10621 }
 0x910   : > { %v8669_v44 = vpop.permute.xlu2 %8668  ;;  %v8325_v56 = vmul.f32 %v16661_v9, %v16615_v11  ;;  %v16683_v25 = vpop.eup %10623  ;;  %vm8330_vm11 = vweird.f32 %v16661_v9 }
 0x911   : > { %v9005_v19 = vsel %vm760_vm1, %v8493_v7, %v8669_v44  ;;  %v7443_v5 = vmul.f32 %v16683_v25, %v19344_v41  ;;  %v16718_v52 = vpop.eup %10625  ;;  %v6919_v7 = vand.u32 2147483647, %v19322_v15  ;;  %vm8331_vm14 = vmor %vm8329_vm3, %vm8330_vm11  ;;  %vm7448_vm6 = vweird.f32 %v16683_v25 }
 0x912   : > { %v9037_v48 = vsel %vm3293_vm2, %v9005_v19, %v8797_v60  ;;  %v7431_v60 = vmul.f32 %v16590_v46, %v7430_v32  ;;  %v8326_v26 = vsub.f32 1.0, %v8325_v56  ;;  %v19352_v19 = vld [vmem:[#allocation135_spill] sm:$0xff]  ;;  %v6925_v39 = vmul.f32 %v16718_v52, %v19345_v24 }
 0x913   : > { %v9070_v14 = vsel %vm9054_vm13, %v9037_v48, %v8925_v58  ;;  %v7444_v32 = vsub.f32 1.0, %v7443_v5  ;;  %vm6920_vm4 = vcmp.eq.f32.partialorder %v6919_v7, 8.507059e+37  ;;  %v19353_v58 = vld [vmem:[#allocation300_spill] sm:$0xff]  ;;  %v19354_v48 = vld [vmem:[#allocation98_spill] sm:$0xff]  ;;  %v7451_v5 = vand.u32 2147483647, %v19344_v41 }
 0x914   : > { %8806 = vrot.lane.b32.xlu0 %v8562_v20, %s10762_s29  ;;  %9832 = vmatmul.msk.f32.gmra.mxu0 %vm322_vm0, %v9070_v14  ;;  %v7432_v49 = vadd.f32 %v16590_v46, %v7431_v60  ;;  %v8327_v21 = vmul.f32 %v16661_v9, %v8326_v26  ;;  %v8333_v20 = vand.u32 2147483647, %v16615_v11  ;;  %v8563_v14 = vmul.f32 %v7889_v61, %v19354_v48 }
 0x915   : > { %v16679_v51 = vpop.xlane.xlu0 %4417  ;;  %v6923_v23 = vsel %vm6920_vm4, %v6922_v27, %v6918_v2  ;;  %v8336_v11 = vor.u32 1.1754944e-38, %v8335_v50  ;;  %v7445_v45 = vmul.f32 %v16683_v25, %v7444_v32  ;;  %vm7452_vm9 = vcmp.eq.f32.partialorder %v7451_v5, 8.507059e+37  ;;  %v19364_v5 = vld [vmem:[#allocation73_spill] sm:$0xff] }
 0x916   : > { %10627 = vrcp.f32 %v16679_v51  ;;  %v7436_v57 = vsel %vm16700_vm7, %v16590_v46, %v7432_v49  ;;  %v8328_v44 = vadd.f32 %v16661_v9, %v8327_v21  ;;  %v8494_v60 = vmul.f32 %v6923_v23, %v19355_v47  ;;  %v19361_v23 = vld [vmem:[#allocation85_spill] sm:$0xff] }
 0x917   : > { %v7441_v15 = vsel %vm7438_vm12, %v7440_v33, %v7436_v57  ;;  %10629 = vrcp.f32 %v19353_v58  ;;  %vm8334_vm5 = vcmp.eq.f32.partialorder %v8333_v20, 8.507059e+37  ;;  %v6926_v49 = vsub.f32 1.0, %v6925_v39  ;;  %v6540_v39 = vpop.f32.mrf.mxu3 }
 0x918   : > { %v8671_v35 = vpop.permute.xlu2 %8670  ;;  %v8531_v54 = vmul.f32 %v7441_v15, %v19352_v19  ;;  %v8332_v56 = vsel %vm8331_vm14, %v16661_v9, %v8328_v44  ;;  %vm7447_vm7 = vweird.f32 %v19344_v41  ;;  %10631 = vrcp.f32 %v19356_v37 }
 0x919   : > { %v8337_v38 = vsel %vm8334_vm5, %v8336_v11, %v8332_v56  ;;  %v9006_v29 = vsel %vm760_vm1, %v8494_v60, %v8671_v35  ;;  %vm7449_vm8 = vmor %vm7447_vm7, %vm7448_vm6  ;;  %v6927_v57 = vmul.f32 %v16718_v52, %v6926_v49  ;;  %vm6930_vm12 = vweird.f32 %v16718_v52 }
 0x91a   : > { %v8349_v46 = vand.u32 2147483648, %v16679_v51  ;;  %vm8343_vm11 = vweird.f32 %v16679_v51  ;;  %v6935_v32 = vand.u32 2147483648, %v19345_v24  ;;  %vm6929_vm3 = vweird.f32 %v19345_v24 }
 0x91b   : > { %v9241_v42 = vpop.f32.mrf.mxu0  ;;  %v6928_v35 = vadd.f32 %v16718_v52, %v6927_v57  ;;  %v6933_v50 = vand.u32 2147483647, %v19345_v24  ;;  %vm6931_vm4 = vmor %vm6929_vm3, %vm6930_vm12  ;;  %v4431_v24 = vsel %vm3293_vm2, %v15752_v63, 0.0  ;;  %vm7461_vm7 = vweird.f32 %v19353_v58  ;;  %v19365_v57 = vld [vmem:[#allocation263_spill] sm:$0xff] }
 0x91c   : > { %v9242_v55 = vadd.f32 %v16366_v34, %v9241_v42  ;;  %8934 = vrot.lane.b32.xlu0 %v8594_v59, %s10763_s8  ;;  %v16736_v53 = vpop.eup %10627  ;;  %v6508_v59 = vpop.f32.mrf.mxu2  ;;  %v7446_v42 = vadd.f32 %v16683_v25, %v7445_v45  ;;  %v6936_v48 = vor.u32 1.1754944e-38, %v6935_v32  ;;  %v7467_v63 = vand.u32 2147483648, %v19353_v58 }
 0x91d   : > { %v8339_v18 = vmul.f32 %v16736_v53, %v16679_v51  ;;  %v16755_v8 = vpop.eup %10629  ;;  %v8595_v21 = vmul.f32 %v8337_v38, %v6508_v59  ;;  %vm8344_vm10 = vweird.f32 %v16736_v53  ;;  %v6932_v61 = vsel %vm6931_vm4, %v16718_v52, %v6928_v35 }
 0x91e   : > { %9315 = vst.msk [vmem:[%s15782_s22 + $0x58] sm:$0xff] %vm322_vm0, %v9242_v55  ;;  %v7453_v55 = vand.u32 2147483648, %v19344_v41  ;;  %v7457_v43 = vmul.f32 %v16755_v8, %v19353_v58  ;;  %v7450_v3 = vsel %vm7449_vm8, %v16683_v25, %v7446_v42  ;;  %v8347_v25 = vand.u32 2147483647, %v16679_v51  ;;  %v16779_v15 = vpop.eup %10631  ;;  %vm16782_vm15 = vmor %vm8343_vm11, %vm8344_vm10 }
 0x91f   : > { %v8340_v26 = vsub.f32 1.0, %v8339_v18  ;;  %v7905_v27 = vmul.f32 %v16779_v15, %v19356_v37  ;;  %vm6934_vm5 = vcmp.eq.f32.partialorder %v6933_v50, 8.507059e+37  ;;  %vm7462_vm6 = vweird.f32 %v16755_v8 }
 0x920   : > { %v8927_v9 = vpop.permute.xlu2 %8926  ;;  %v7454_v2 = vor.u32 1.1754944e-38, %v7453_v55  ;;  %v7458_v33 = vsub.f32 1.0, %v7457_v43  ;;  %vm8348_vm14 = vcmp.eq.f32.partialorder %v8347_v25, 8.507059e+37  ;;  %v6937_v18 = vsel %vm6934_vm5, %v6936_v48, %v6932_v61  ;;  %vm16808_vm8 = vmor %vm7461_vm7, %vm7462_vm6 }
 0x921   : > { %v8341_v4 = vmul.f32 %v16736_v53, %v8340_v26  ;;  %v8495_v11 = vmul.f32 %v6937_v18, %v19361_v23  ;;  %v7906_v47 = vsub.f32 1.0, %v7905_v27  ;;  %v7465_v38 = vand.u32 2147483647, %v19353_v58  ;;  %v19367_v27 = vld [vmem:[#allocation15_spill] sm:$0xff]  ;;  %v19368_v18 = vld [vmem:[#allocation37_spill] sm:$0xff] }
 0x922   : > { %v7455_v22 = vsel %vm7452_vm9, %v7454_v2, %v7450_v3  ;;  %v7459_v51 = vmul.f32 %v16755_v8, %v7458_v33  ;;  %v4437_v58 = vsel %vm3293_vm2, %v15966_v1, 0.0  ;;  %v7468_v42 = vor.u32 1.1754944e-38, %v7467_v63 }
 0x923   : > { %v8342_v7 = vadd.f32 %v16736_v53, %v8341_v4  ;;  %v8532_v44 = vmul.f32 %v7455_v22, %v19357_v36  ;;  %vm7466_vm9 = vcmp.eq.f32.partialorder %v7465_v38, 8.507059e+37  ;;  %vm7910_vm10 = vweird.f32 %v16779_v15  ;;  %v19366_v36 = vld [vmem:[#allocation8_spill] sm:$0xff] }
 0x924   : > { %8680 = vrot.lane.b32.xlu0 %v8531_v54, %s10761_s28  ;;  %v8350_v54 = vor.u32 1.1754944e-38, %v8349_v46  ;;  %v7460_v56 = vadd.f32 %v16755_v8, %v7459_v51  ;;  %v7915_v1 = vand.u32 2147483648, %v19356_v37  ;;  %vm7909_vm12 = vweird.f32 %v19356_v37 }
 0x925   : > { %v8346_v19 = vsel %vm16782_vm15, %v16736_v53, %v8342_v7  ;;  %v16795_v20 = vpop.xlane.xlu1 %4420  ;;  %v7913_v2 = vand.u32 2147483647, %v19356_v37  ;;  %vm7911_vm11 = vmor %vm7909_vm12, %vm7910_vm10  ;;  %vm6943_vm12 = vweird.f32 %v19365_v57  ;;  %v7493_v23 = vand.u32 2147483647, %v19367_v27 }
 0x926   : > { %8808 = vrot.lane.b32.xlu1 %v8563_v14, %s10762_s29  ;;  %v8351_v53 = vsel %vm8348_vm14, %v8350_v54, %v8346_v19  ;;  %v19360_v14 = vld [vmem:[#allocation36_spill] sm:$0xff]  ;;  %v4440_v19 = vsel %vm3293_vm2, %v16010_v31, 0.0  ;;  %v8363_v31 = vand.u32 2147483648, %v16795_v20  ;;  %vm8357_vm7 = vweird.f32 %v16795_v20 }
 0x927   : > { %10633 = vrcp.f32 %v19360_v14  ;;  %v8596_v60 = vmul.f32 %v8351_v53, %v6540_v39  ;;  %vm7914_vm15 = vcmp.eq.f32.partialorder %v7913_v2, 8.507059e+37  ;;  %vm7895_vm4 = vweird.f32 %v19360_v14 }
 0x928   : > { %v8799_v40 = vpop.permute.xlu0 %8798  ;;  %10635 = vrcp.f32 %v16795_v20  ;;  %v7899_v6 = vand.u32 2147483647, %v19360_v14  ;;  %v8361_v39 = vand.u32 2147483647, %v16795_v20  ;;  %v8364_v45 = vor.u32 1.1754944e-38, %v8363_v31 }
 0x929   : > { %v9038_v62 = vsel %vm3293_vm2, %v9006_v29, %v8799_v40  ;;  %v7464_v29 = vsel %vm16808_vm8, %v16755_v8, %v7460_v56  ;;  %10637 = vrcp.f32 %v19365_v57 }
 0x92a   : > { %v9071_v0 = vsel %vm9054_vm13, %v9038_v62, %v8927_v9  ;;  %v7907_v9 = vmul.f32 %v16779_v15, %v7906_v47  ;;  %10639 = vrcp.f32 %v19366_v36  ;;  %vm7900_vm5 = vcmp.eq.f32.partialorder %v7899_v6, 8.507059e+37 }
 0x92b   : > { %9833 = vmatmul.msk.f32.gmra.mxu0 %vm322_vm0, %v9071_v0  ;;  %10641 = vrcp.f32 %v19367_v27  ;;  %vm8362_vm10 = vcmp.eq.f32.partialorder %v8361_v39, 8.507059e+37  ;;  %v7495_v39 = vand.u32 2147483648, %v19367_v27 }
 0x92c   : > { %8936 = vrot.lane.b32.xlu0 %v8595_v21, %s10763_s8  ;;  %v7469_v21 = vsel %vm7466_vm9, %v7468_v42, %v7464_v29  ;;  %v7908_v43 = vadd.f32 %v16779_v15, %v7907_v9  ;;  %v6947_v29 = vand.u32 2147483647, %v19365_v57 }
 0x92d   : > { %v10634_v59 = vpop.eup %10633  ;;  %v8533_v4 = vmul.f32 %v7469_v21, %v19364_v5 }
 0x92e   : > { %v7891_v0 = vmul.f32 %v10634_v59, %v19360_v14  ;;  %v10636_v3 = vpop.eup %10635  ;;  %v7912_v7 = vsel %vm7911_vm11, %v16779_v15, %v7908_v43  ;;  %vm7896_vm3 = vweird.f32 %v10634_v59  ;;  %v7901_v15 = vand.u32 2147483648, %v19360_v14 }
 0x92f   : > { %v8353_v22 = vmul.f32 %v10636_v3, %v16795_v20  ;;  %v16839_v33 = vpop.eup %10637  ;;  %vm7897_vm14 = vmor %vm7895_vm4, %vm7896_vm3  ;;  %vm8358_vm6 = vweird.f32 %v10636_v3  ;;  %v6949_v20 = vand.u32 2147483648, %v19365_v57  ;;  %vm7475_vm4 = vweird.f32 %v19366_v36 }
 0x930   : > { %v8673_v41 = vpop.permute.xlu0 %8672  ;;  %v6939_v37 = vmul.f32 %v16839_v33, %v19365_v57  ;;  %v16851_v51 = vpop.eup %10639  ;;  %v7902_v61 = vor.u32 1.1754944e-38, %v7901_v15  ;;  %vm16861_vm8 = vmor %vm8357_vm7, %vm8358_vm6  ;;  %vm6944_vm9 = vweird.f32 %v16839_v33  ;;  %vm7489_vm7 = vweird.f32 %v19367_v27 }
 0x931   : > { %v9007_v26 = vsel %vm760_vm1, %v8495_v11, %v8673_v41  ;;  %v7916_v41 = vor.u32 1.1754944e-38, %v7915_v1  ;;  %v8354_v25 = vsub.f32 1.0, %v8353_v22  ;;  %v19371_v11 = vld [vmem:[#allocation205_spill] sm:$0xff]  ;;  %vm6945_vm11 = vmor %vm6943_vm12, %vm6944_vm9  ;;  %v6950_v5 = vor.u32 1.1754944e-38, %v6949_v20 }
 0x932   : > { %10643 = vrcp.f32 %v19371_v11  ;;  %vm7476_vm3 = vweird.f32 %v16851_v51  ;;  %v7481_v22 = vand.u32 2147483648, %v19366_v36  ;;  %vm6957_vm12 = vweird.f32 %v19371_v11 }
 0x933   : > { %v7917_v35 = vsel %vm7914_vm15, %v7916_v41, %v7912_v7  ;;  %v8355_v50 = vmul.f32 %v10636_v3, %v8354_v25  ;;  %vm6948_vm15 = vcmp.eq.f32.partialorder %v6947_v29, 8.507059e+37  ;;  %v19375_v7 = vld [vmem:[#allocation103_spill] sm:$0xff]  ;;  %v19381_v29 = vld [vmem:[#allocation48_spill] sm:$0xff] }
 0x934   : > { %8682 = vrot.lane.b32.xlu0 %v8532_v44, %s10761_s28  ;;  %v8565_v44 = vmul.f32 %v7917_v35, %v15337_v13  ;;  %v6940_v13 = vsub.f32 1.0, %v6939_v37 }
 0x935   : > { %v8356_v48 = vadd.f32 %v10636_v3, %v8355_v50 }
 0x936   : > { %v6941_v53 = vmul.f32 %v16839_v33, %v6940_v13 }
 0x937   : > { %4432 = vadd.xlane.f32.xlu2 %v4431_v24  ;;  %v7471_v24 = vmul.f32 %v16851_v51, %v19366_v36 }
 0x938   : > { %v8801_v52 = vpop.permute.xlu0 %8800  ;;  %v6942_v63 = vadd.f32 %v16839_v33, %v6941_v53  ;;  %v19377_v53 = vld [vmem:[#allocation70_spill] sm:$0xff] }
 0x939   : > { %v9039_v40 = vsel %vm3293_vm2, %v9007_v26, %v8801_v52  ;;  %v7472_v47 = vsub.f32 1.0, %v7471_v24  ;;  %v8360_v52 = vsel %vm16861_vm8, %v10636_v3, %v8356_v48  ;;  %v19372_v26 = vld [vmem:[#allocation67_spill] sm:$0xff] }
 0x93a   : > { %10645 = vrcp.f32 %v19372_v26 }
 0x93c   : > { %8938 = vrot.lane.b32.xlu0 %v8596_v60, %s10763_s8  ;;  %v16869_v60 = vpop.eup %10641 }
 0x93d   : > { %v8929_v49 = vpop.permute.xlu1 %8928  ;;  %v7485_v9 = vmul.f32 %v16869_v60, %v19367_v27  ;;  %v16889_v21 = vpop.eup %10643  ;;  %vm7490_vm6 = vweird.f32 %v16869_v60 }
 0x93e   : > { %v9072_v62 = vsel %vm9054_vm13, %v9039_v40, %v8929_v49  ;;  %v6953_v2 = vmul.f32 %v16889_v21, %v19371_v11  ;;  %vm6958_vm8 = vweird.f32 %v16889_v21  ;;  %vm16939_vm9 = vmor %vm7489_vm7, %vm7490_vm6 }
 0x93f   : > { %9834 = vmatmul.msk.f32.gmra.mxu0 %vm322_vm0, %v9072_v62  ;;  %4438 = vadd.xlane.f32.xlu2 %v4437_v58  ;;  %v7473_v62 = vmul.f32 %v16851_v51, %v7472_v47  ;;  %v16885_v58 = vld [vmem:[%s17649_s4] ss:$0 sm:$0xff]  ;;  %v7486_v43 = vsub.f32 1.0, %v7485_v9 }
 0x940   : > { %v9244_v8 = vpop.f32.mrf.mxu0  ;;  %v16897_v3 = vpop.eup %10645  ;;  %v6954_v50 = vsub.f32 1.0, %v6953_v2  ;;  %v19385_v2 = vld [vmem:[#allocation108_spill] sm:$0xff] }
 0x941   : > { %v9245_v55 = vadd.f32 %v16366_v34, %v9244_v8  ;;  %v7892_v34 = vsub.f32 1.0, %v7891_v0  ;;  %v6946_v8 = vsel %vm6945_vm11, %v16839_v33, %v6942_v63  ;;  %v6543_v0 = vpop.f32.mrf.mxu3  ;;  %v7474_v1 = vadd.f32 %v16851_v51, %v7473_v62  ;;  %v19376_v33 = vld [vmem:[#allocation2_spill] sm:$0xff]  ;;  %vm16963_vm11 = vmor %vm6957_vm12, %vm6958_vm8 }
 0x942   : > { %v6951_v57 = vsel %vm6948_vm15, %v6950_v5, %v6946_v8  ;;  %v7933_v37 = vmul.f32 %v16897_v3, %v19372_v26  ;;  %v7487_v15 = vmul.f32 %v16869_v60, %v7486_v43  ;;  %v6963_v62 = vand.u32 2147483648, %v19371_v11 }
 0x943   : > { %9316 = vst.msk [vmem:[%s15782_s22 + $0x60] sm:$0xff] %vm322_vm0, %v9245_v55  ;;  %v7893_v46 = vmul.f32 %v10634_v59, %v7892_v34  ;;  %v19373_v55 = vld [vmem:[#allocation265_spill] sm:$0xff]  ;;  %v19374_v34 = vld [vmem:[#allocation208_spill] sm:$0xff]  ;;  %v8496_v41 = vmul.f32 %v6951_v57, %v19375_v7  ;;  %vm7938_vm15 = vweird.f32 %v16897_v3 }
 0x944   : > { %8684 = vrot.lane.b32.xlu0 %v8533_v4, %s10761_s28  ;;  %10647 = vrcp.f32 %v19373_v55  ;;  %v7488_v31 = vadd.f32 %v16869_v60, %v7487_v15 }
 0x945   : > { %v7894_v32 = vadd.f32 %v10634_v59, %v7893_v46  ;;  %v8803_v40 = vpop.permute.xlu1 %8802  ;;  %10649 = vrcp.f32 %v19374_v34  ;;  %v7479_v46 = vand.u32 2147483647, %v19366_v36 }
 0x946   : > { %10651 = vrcp.f32 %v19376_v33  ;;  %v7492_v27 = vsel %vm16939_vm9, %v16869_v60, %v7488_v31  ;;  %v6961_v60 = vand.u32 2147483647, %v19371_v11 }
 0x947   : > { %v7898_v54 = vsel %vm7897_vm14, %v10634_v59, %v7894_v32  ;;  %v8365_v59 = vsel %vm8362_vm10, %v8364_v45, %v8360_v52  ;;  %vm7477_vm14 = vmor %vm7475_vm4, %vm7476_vm3  ;;  %vm7494_vm10 = vcmp.eq.f32.partialorder %v7493_v23, 8.507059e+37  ;;  %vm7937_vm3 = vweird.f32 %v19372_v26 }
 0x948   : > { %v7903_v14 = vsel %vm7900_vm5, %v7902_v61, %v7898_v54  ;;  %v8597_v4 = vmul.f32 %v8365_v59, %v6543_v0  ;;  %v7478_v32 = vsel %vm7477_vm14, %v16851_v51, %v7474_v1  ;;  %vm7480_vm5 = vcmp.eq.f32.partialorder %v7479_v46, 8.507059e+37  ;;  %v19382_v59 = vld [vmem:[#allocation18_spill] sm:$0xff]  ;;  %vm16990_vm6 = vmor %vm7937_vm3, %vm7938_vm15 }
 0x949   : > { %v8564_v56 = vmul.f32 %v7903_v14, %v19368_v18  ;;  %v7934_v51 = vsub.f32 1.0, %v7933_v37  ;;  %v19378_v18 = vld [vmem:[#allocation6_spill] sm:$0xff]  ;;  %v6964_v46 = vor.u32 1.1754944e-38, %v6963_v62  ;;  %vm6962_vm4 = vcmp.eq.f32.partialorder %v6961_v60, 8.507059e+37 }
 0x94a   : > { %v16908_v25 = vpop.eup %10647  ;;  %10653 = vrcp.f32 %v19378_v18  ;;  %vm6971_vm14 = vweird.f32 %v19373_v55  ;;  %v7507_v60 = vand.u32 2147483647, %v19376_v33 }
 0x94b   : > { %v16916_v54 = vpop.eup %10649  ;;  %v6967_v61 = vmul.f32 %v16908_v25, %v19373_v55  ;;  %10655 = vrcp.f32 %v19381_v29 }
 0x94c   : > { %8812 = vrot.lane.b32.xlu0 %v8565_v44, %s10762_s29  ;;  %v16921_v48 = vpop.eup %10651  ;;  %v16934_v52 = vmul.f32 %v16916_v54, %v19374_v34  ;;  %10657 = vrcp.f32 %v19382_v59  ;;  %vm7508_vm15 = vcmp.eq.f32.partialorder %v7507_v60, 8.507059e+37 }
 0x94d   : > { %v8931_v13 = vpop.permute.xlu1 %8930  ;;  %v6968_v47 = vsub.f32 1.0, %v6967_v61  ;;  %v7499_v63 = vmul.f32 %v16921_v48, %v19376_v33  ;;  %vm7504_vm9 = vweird.f32 %v16921_v48 }
 0x94e   : > { %v6982_v11 = vsub.f32 1.0, %v16934_v52 }
 0x94f   : > { %v6969_v5 = vmul.f32 %v16908_v25, %v6968_v47  ;;  %v7500_v1 = vsub.f32 1.0, %v7499_v63  ;;  %v6977_v47 = vand.u32 2147483648, %v19373_v55 }
 0x950   : > { %4441 = vadd.xlane.f32.xlu1 %v4440_v19  ;;  %v7482_v19 = vor.u32 1.1754944e-38, %v7481_v22  ;;  %v16954_v0 = vpop.eup %10653 }
 0x951   : > { %v7513_v37 = vmul.f32 %v16954_v0, %v19378_v18  ;;  %vm7518_vm3 = vweird.f32 %v16954_v0 }
 0x952   : > { %v7483_v24 = vsel %vm7480_vm5, %v7482_v19, %v7478_v32  ;;  %v7941_v32 = vand.u32 2147483647, %v19372_v26  ;;  %vm6972_vm5 = vweird.f32 %v16908_v25  ;;  %v7501_v19 = vmul.f32 %v16921_v48, %v7500_v1  ;;  %v19394_v1 = vld [vmem:[#allocation266_spill] sm:$0xff] }
 0x953   : > { %v8534_v14 = vmul.f32 %v7483_v24, %v19377_v53  ;;  %v19389_v24 = vld [vmem:[#allocation96_spill] sm:$0xff]  ;;  %vm17005_vm7 = vmor %vm6971_vm14, %vm6972_vm5  ;;  %vm7517_vm14 = vweird.f32 %v19378_v18 }
 0x954   : > { %vm7942_vm8 = vcmp.eq.f32.partialorder %v7941_v32, 8.507059e+37  ;;  %vm17073_vm5 = vmor %vm7517_vm14, %vm7518_vm3 }
 0x957   : > { %8810 = vrot.lane.b32.xlu2 %v8564_v56, %s10762_s29  ;;  %v6955_v56 = vmul.f32 %v16889_v21, %v6954_v50  ;;  %v6975_v50 = vand.u32 2147483647, %v19373_v55  ;;  %v7509_v55 = vand.u32 2147483648, %v19376_v33 }
 0x959   : > { %v16874_v38 = vpop.xlane.xlu2 %4423  ;;  %v6956_v9 = vadd.f32 %v16889_v21, %v6955_v56  ;;  %v7514_v56 = vsub.f32 1.0, %v7513_v37  ;;  %v7510_v37 = vor.u32 1.1754944e-38, %v7509_v55 }
 0x95a   : > { %v9247_v49 = vpop.f32.mrf.mxu0 }
 0x95b   : > { %v9248_v42 = vadd.f32 %v16885_v58, %v9247_v49  ;;  %v6960_v22 = vsel %vm16963_vm11, %v16889_v21, %v6956_v9  ;;  %v6970_v21 = vadd.f32 %v16908_v25, %v6969_v5  ;;  %v7515_v5 = vmul.f32 %v16954_v0, %v7514_v56 }
 0x95c   : > { %vm6976_vm11 = vcmp.eq.f32.partialorder %v6975_v50, 8.507059e+37  ;;  %v7521_v56 = vand.u32 2147483647, %v19378_v18 }
 0x95d   : > { %9317 = vst.msk [vmem:[%s15782_s22 + $0x68] sm:$0xff] %vm322_vm0, %v9248_v42  ;;  %v7496_v42 = vor.u32 1.1754944e-38, %v7495_v39  ;;  %v19392_v39 = vld [vmem:[#allocation86_spill] sm:$0xff]  ;;  %v6974_v23 = vsel %vm17005_vm7, %v16908_v25, %v6970_v21  ;;  %v7516_v21 = vadd.f32 %v16954_v0, %v7515_v5  ;;  %vm6985_vm7 = vweird.f32 %v19374_v34 }
 0x95f   : > { %8940 = vrot.lane.b32.xlu2 %v8597_v4, %s10763_s8  ;;  %v7497_v4 = vsel %vm7494_vm10, %v7496_v42, %v7492_v27  ;;  %v7502_v27 = vadd.f32 %v16921_v48, %v7501_v19  ;;  %vm7503_vm10 = vweird.f32 %v19376_v33 }
 0x960   : > { %v8535_v7 = vmul.f32 %v7497_v4, %v19385_v2  ;;  %v6978_v2 = vor.u32 1.1754944e-38, %v6977_v47  ;;  %vm17037_vm12 = vmor %vm7503_vm10, %vm7504_vm9  ;;  %vm7923_vm9 = vweird.f32 %v19381_v29  ;;  %vm7531_vm10 = vweird.f32 %v19382_v59 }
 0x961   : > { %v8675_v35 = vpop.permute.xlu2 %8674 }
 0x962   : > { %v9008_v44 = vsel %vm760_vm1, %v8496_v41, %v8675_v35  ;;  %v7943_v35 = vand.u32 2147483648, %v19372_v26  ;;  %v6965_v26 = vsel %vm6962_vm4, %v6964_v46, %v6960_v22  ;;  %v7506_v22 = vsel %vm17037_vm12, %v16921_v48, %v7502_v27  ;;  %v19402_v27 = vld [vmem:[#allocation10_spill] sm:$0xff] }
 0x963   : > { %v9040_v6 = vsel %vm3293_vm2, %v9008_v44, %v8803_v40  ;;  %v7935_v40 = vmul.f32 %v16897_v3, %v7934_v51  ;;  %v16959_v43 = vpop.xlane.xlu0 %4426  ;;  %v16975_v44 = vpop.eup %10655  ;;  %v8497_v51 = vmul.f32 %v6965_v26, %v19389_v24  ;;  %v17047_v46 = vsel %vm6976_vm11, %v6978_v2, %v6974_v23 }
 0x964   : > { %v9073_v36 = vsel %vm9054_vm13, %v9040_v6, %v8931_v13  ;;  %10659 = vrcp.f32 %v16959_v43  ;;  %v16983_v15 = vpop.eup %10657  ;;  %v7919_v61 = vmul.f32 %v16975_v44, %v19381_v29  ;;  %v7944_v53 = vor.u32 1.1754944e-38, %v7943_v35 }
 0x965   : > { %9835 = vmatmul.msk.f32.gmra.mxu0 %vm322_vm0, %v9073_v36  ;;  %v7936_v41 = vadd.f32 %v16897_v3, %v7935_v40  ;;  %v19388_v36 = vld [vmem:[#allocation32_spill] sm:$0xff]  ;;  %v6983_v35 = vmul.f32 %v16916_v54, %v6982_v11  ;;  %v6989_v48 = vand.u32 2147483647, %v19374_v34  ;;  %v7511_v50 = vsel %vm7508_vm15, %v7510_v37, %v7506_v22 }
 0x966   : > { %10661 = vrcp.f32 %v19388_v36  ;;  %v19393_v40 = vld [vmem:[#allocation84_spill] sm:$0xff]  ;;  %v7920_v42 = vsub.f32 1.0, %v7919_v61  ;;  %vm6986_vm4 = vweird.f32 %v16916_v54  ;;  %v19398_v61 = vld [vmem:[#allocation39_spill] sm:$0xff]  ;;  %v7520_v23 = vsel %vm17073_vm5, %v16954_v0, %v7516_v21 }
 0x967   : > { %v7940_v13 = vsel %vm16990_vm6, %v16897_v3, %v7936_v41  ;;  %v4347_v3 = vsel %vm3293_vm2, %v19392_v39, 0.0  ;;  %v19397_v41 = vld [vmem:[#allocation271_spill] sm:$0xff]  ;;  %v8536_v24 = vmul.f32 %v7511_v50, %v19398_v61  ;;  %vm7924_vm6 = vweird.f32 %v16975_v44 }
 0x968   : > { %v7945_v52 = vsel %vm7942_vm8, %v7944_v53, %v7940_v13  ;;  %v7921_v32 = vmul.f32 %v16975_v44, %v7920_v42  ;;  %vm7532_vm8 = vweird.f32 %v16983_v15  ;;  %v17097_v0 = vadd.f32 %v16916_v54, %v6983_v35  ;;  %vm17102_vm12 = vmor %vm7923_vm9, %vm7924_vm6 }
 0x969   : > { %8686 = vrot.lane.b32.xlu1 %v8534_v14, %s10761_s28  ;;  %v8677_v8 = vpop.permute.xlu2 %8676  ;;  %v7527_v14 = vmul.f32 %v16983_v15, %v19382_v59  ;;  %vm7522_vm11 = vcmp.eq.f32.partialorder %v7521_v56, 8.507059e+37  ;;  %vm17106_vm15 = vmor %vm7531_vm10, %vm7532_vm8  ;;  %v8391_v37 = vand.u32 2147483648, %v16959_v43  ;;  %vm8385_vm5 = vweird.f32 %v16959_v43 }
 0x96a   : > { %v9250_v20 = vpop.f32.mrf.mxu0  ;;  %v9009_v63 = vsel %vm760_vm1, %v8497_v51, %v8677_v8  ;;  %v7523_v51 = vand.u32 2147483648, %v19378_v18  ;;  %v7922_v39 = vadd.f32 %v16975_v44, %v7921_v32  ;;  %v7927_v18 = vand.u32 2147483647, %v19381_v29  ;;  %v19408_v32 = vld [vmem:[#allocation109_spill] sm:$0xff]  ;;  %vm17152_vm8 = vmor %vm6985_vm7, %vm6986_vm4 }
 0x96b   : > { %v9251_v49 = vadd.f32 %v16885_v58, %v9250_v20  ;;  %v17016_v20 = vpop.eup %10659  ;;  %v7528_v4 = vsub.f32 1.0, %v7527_v14  ;;  %v19399_v14 = vld [vmem:[#allocation14_spill] sm:$0xff]  ;;  %v6991_v61 = vand.u32 2147483648, %v19374_v34  ;;  %vm7545_vm4 = vweird.f32 %v19388_v36 }
 0x96c   : > { %v17032_v57 = vpop.eup %10661  ;;  %v8381_v33 = vmul.f32 %v17016_v20, %v16959_v43  ;;  %v7926_v42 = vsel %vm17102_vm12, %v16975_v44, %v7922_v39  ;;  %vm7928_vm3 = vcmp.eq.f32.partialorder %v7927_v18, 8.507059e+37  ;;  %vm8386_vm14 = vweird.f32 %v17016_v20  ;;  %v19407_v44 = vld [vmem:[#allocation68_spill] sm:$0xff] }
 0x96d   : > { %9318 = vst.msk [vmem:[%s15782_s22 + $0x70] sm:$0xff] %vm322_vm0, %v9251_v49  ;;  %v8567_v49 = vmul.f32 %v7945_v52, %v19393_v40  ;;  %v7529_v6 = vmul.f32 %v16983_v15, %v7528_v4  ;;  %v17056_v26 = vmul.f32 %v17032_v57, %v19388_v36  ;;  %v7929_v52 = vand.u32 2147483648, %v19381_v29  ;;  %vm17141_vm6 = vmor %vm8385_vm5, %vm8386_vm14 }
 0x96e   : > { %v8382_v19 = vsub.f32 1.0, %v8381_v33  ;;  %v7524_v40 = vor.u32 1.1754944e-38, %v7523_v51  ;;  %vm7546_vm7 = vweird.f32 %v17032_v57 }
 0x96f   : > { %v7530_v47 = vadd.f32 %v16983_v15, %v7529_v6  ;;  %v7542_v5 = vsub.f32 1.0, %v17056_v26  ;;  %v7930_v4 = vor.u32 1.1754944e-38, %v7929_v52  ;;  %v8389_v26 = vand.u32 2147483647, %v16959_v43 }
 0x970   : > { %v6988_v52 = vsel %vm17152_vm8, %v16916_v54, %v17097_v0 }
 0x971   : > { %8688 = vrot.lane.b32.xlu1 %v8535_v7, %s10761_s28  ;;  %v8933_v9 = vpop.permute.xlu2 %8932  ;;  %v7534_v60 = vsel %vm17106_vm15, %v16983_v15, %v7530_v47  ;;  %v7931_v35 = vsel %vm7928_vm3, %v7930_v4, %v7926_v42  ;;  %v4443_v15 = vsel %vm3293_vm2, %v16032_v16, 0.0  ;;  %v7543_v51 = vmul.f32 %v17032_v57, %v7542_v5  ;;  %v19415_v42 = vld [vmem:[#allocation91_spill] sm:$0xff] }
 0x972   : > { %v8566_v21 = vmul.f32 %v7931_v35, %v19408_v32  ;;  %vm8390_vm10 = vcmp.eq.f32.partialorder %v8389_v26, 8.507059e+37  ;;  %vm6990_vm3 = vcmp.eq.f32.partialorder %v6989_v48, 8.507059e+37 }
 0x976   : > { %4348 = vadd.xlane.f32.xlu0 %v4347_v3  ;;  %v8805_v45 = vpop.permute.xlu0 %8804 }
 0x977   : > { %v9041_v62 = vsel %vm3293_vm2, %v9009_v63, %v8805_v45  ;;  %v8383_v63 = vmul.f32 %v17016_v20, %v8382_v19  ;;  %v19409_v19 = vld [vmem:[#allocation17_spill] sm:$0xff] }
 0x978   : > { %v17024_v25 = vpop.xlane.xlu1 %4429  ;;  %v9074_v8 = vsel %vm9054_vm13, %v9041_v62, %v8933_v9  ;;  %v7535_v9 = vand.u32 2147483647, %v19382_v59  ;;  %v7537_v62 = vand.u32 2147483648, %v19382_v59 }
 0x979   : > { %10663 = vrcp.f32 %v17024_v25  ;;  %8816 = vrot.lane.b32.xlu1 %v8567_v49, %s10762_s29  ;;  %9836 = vmatmul.msk.f32.gmra.mxu0 %vm322_vm0, %v9074_v8  ;;  %v7525_v8 = vsel %vm7522_vm11, %v7524_v40, %v7520_v23  ;;  %v8384_v7 = vadd.f32 %v17016_v20, %v8383_v63  ;;  %v19414_v23 = vld [vmem:[#allocation74_spill] sm:$0xff]  ;;  %v8392_v63 = vor.u32 1.1754944e-38, %v8391_v37  ;;  %vm17186_vm11 = vmor %vm7545_vm4, %vm7546_vm7 }
 0x97a   : > { %10665 = vrcp.f32 %v19394_v1  ;;  %v8537_v22 = vmul.f32 %v7525_v8, %v19407_v44  ;;  %vm7536_vm9 = vcmp.eq.f32.partialorder %v7535_v9, 8.507059e+37  ;;  %v8498_v47 = vmul.f32 %v17047_v46, %v19414_v23  ;;  %v19418_v44 = vld [vmem:[#allocation77_spill] sm:$0xff] }
 0x97b   : > { %10667 = vrcp.f32 %v19397_v41  ;;  %v8388_v39 = vsel %vm17141_vm6, %v17016_v20, %v8384_v7  ;;  %v7544_v40 = vadd.f32 %v17032_v57, %v7543_v51  ;;  %v7549_v20 = vand.u32 2147483647, %v19388_v36 }
 0x97c   : > { %10669 = vrcp.f32 %v16874_v38  ;;  %v8393_v49 = vsel %vm8390_vm10, %v8392_v63, %v8388_v39  ;;  %v8405_v5 = vand.u32 2147483648, %v17024_v25  ;;  %vm8399_vm15 = vweird.f32 %v17024_v25  ;;  %v19421_v39 = vld [vmem:[#allocation288_spill] sm:$0xff]  ;;  %v19432_v63 = vld [vmem:[#allocation111_spill] sm:$0xff] }
 0x97d   : > { %10671 = vrcp.f32 %v19399_v14  ;;  %vm7550_vm5 = vcmp.eq.f32.partialorder %v7549_v20, 8.507059e+37  ;;  %vm8371_vm4 = vweird.f32 %v16874_v38  ;;  %vm7559_vm7 = vweird.f32 %v19399_v14 }
 0x97e   : > { %v17059_v13 = vpop.permute.xlu0 %8678  ;;  %10673 = vrcp.f32 %v19402_v27 }
 0x97f   : > { %v17061_v11 = vpop.eup %10663  ;;  %10675 = vrcp.f32 %v19409_v19  ;;  %v9010_v46 = vsel %vm760_vm1, %v8498_v47, %v17059_v13  ;;  %v7565_v47 = vand.u32 2147483648, %v19399_v14 }
 0x980   : > { %v17068_v53 = vpop.eup %10665  ;;  %v8395_v45 = vmul.f32 %v17061_v11, %v17024_v25  ;;  %vm8400_vm12 = vweird.f32 %v17061_v11  ;;  %10677 = vrcp.f32 %v19418_v44 }
 0x981   : > { %v17080_v3 = vpop.eup %10667  ;;  %8690 = vrot.lane.b32.xlu1 %v8536_v24, %s10761_s28  ;;  %v7538_v24 = vor.u32 1.1754944e-38, %v7537_v62  ;;  %vm17203_vm14 = vmor %vm8399_vm15, %vm8400_vm12 }
 0x982   : > { %v17115_v55 = vpop.eup %10669  ;;  %v8396_v59 = vsub.f32 1.0, %v8395_v45 }
 0x983   : > { %v17121_v2 = vpop.eup %10671  ;;  %v8367_v6 = vmul.f32 %v17115_v55, %v16874_v38  ;;  %v7539_v18 = vsel %vm7536_vm9, %v7538_v24, %v7534_v60  ;;  %v7551_v60 = vand.u32 2147483648, %v19388_v36  ;;  %v6992_v36 = vor.u32 1.1754944e-38, %v6991_v61 }
 0x984   : > { %v17134_v50 = vpop.eup %10673  ;;  %v7555_v43 = vmul.f32 %v17121_v2, %v19399_v14  ;;  %v8397_v56 = vmul.f32 %v17061_v11, %v8396_v59  ;;  %v8538_v8 = vmul.f32 %v7539_v18, %v19415_v42  ;;  %v8403_v59 = vand.u32 2147483647, %v17024_v25  ;;  %v6610_v18 = vpop.f32.mrf.mxu1 }
 0x985   : > { %v8368_v45 = vsub.f32 1.0, %v8367_v6  ;;  %v17176_v62 = vpop.eup %10675  ;;  %v7569_v37 = vmul.f32 %v17134_v50, %v19402_v27  ;;  %v7552_v32 = vor.u32 1.1754944e-38, %v7551_v60  ;;  %v17218_v6 = vpop.xlane.xlu1 %4435  ;;  %vm8372_vm6 = vweird.f32 %v17115_v55 }
 0x986   : > { %v8807_v33 = vpop.permute.xlu0 %8806  ;;  %v7556_v29 = vsub.f32 1.0, %v7555_v43  ;;  %v8398_v9 = vadd.f32 %v17061_v11, %v8397_v56  ;;  %v7947_v25 = vmul.f32 %v17176_v62, %v19409_v19  ;;  %vm8404_vm8 = vcmp.eq.f32.partialorder %v8403_v59, 8.507059e+37  ;;  %v17229_v56 = vpop.eup %10677  ;;  %vm17236_vm10 = vmor %vm8371_vm4, %vm8372_vm6 }
 0x987   : > { %v9042_v54 = vsel %vm3293_vm2, %v9010_v46, %v8807_v33  ;;  %v8369_v7 = vmul.f32 %v17115_v55, %v8368_v45  ;;  %v8599_v33 = vmul.f32 %v8393_v49, %v15744_v30  ;;  %vm7560_vm9 = vweird.f32 %v17121_v2  ;;  %v19424_v45 = vld [vmem:[#allocation50_spill] sm:$0xff] }
 0x988   : > { %4444 = vadd.xlane.f32.xlu2 %v4443_v15  ;;  %v7557_v34 = vmul.f32 %v17121_v2, %v7556_v29  ;;  %v6993_v15 = vsel %vm6990_vm3, %v6992_v36, %v6988_v52  ;;  %v7948_v16 = vsub.f32 1.0, %v7947_v25  ;;  %v8375_v43 = vand.u32 2147483647, %v16874_v38  ;;  %v19425_v49 = vld [vmem:[#allocation42_spill] sm:$0xff]  ;;  %vm17250_vm12 = vmor %vm7559_vm7, %vm7560_vm9 }
 0x989   : > { %8692 = vrot.lane.b32.xlu1 %v8537_v22, %s10761_s28  ;;  %v7548_v22 = vsel %vm17186_vm11, %v17032_v57, %v7544_v40  ;;  %v8402_v57 = vsel %vm17203_vm14, %v17061_v11, %v8398_v9  ;;  %v8370_v26 = vadd.f32 %v17115_v55, %v8369_v7  ;;  %v8377_v11 = vand.u32 2147483648, %v16874_v38  ;;  %v19447_v9 = vld [vmem:[#allocation55_spill] sm:$0xff] }
 0x98a   : > { %8814 = vrot.lane.b32.xlu0 %v8566_v21, %s10762_s29  ;;  %v8406_v21 = vor.u32 1.1754944e-38, %v8405_v5  ;;  %v7553_v61 = vsel %vm7550_vm5, %v7552_v32, %v7548_v22  ;;  %v7558_v51 = vadd.f32 %v17121_v2, %v7557_v34  ;;  %v7570_v52 = vsub.f32 1.0, %v7569_v37  ;;  %v19429_v37 = vld [vmem:[#allocation49_spill] sm:$0xff] }
 0x98b   : > { %v8539_v23 = vmul.f32 %v7553_v61, %v19421_v39  ;;  %10679 = vrcp.f32 %v19424_v45  ;;  %v7563_v38 = vand.u32 2147483647, %v19399_v14  ;;  %v8374_v20 = vsel %vm17236_vm10, %v17115_v55, %v8370_v26 }
 0x98c   : > { %v8407_v24 = vsel %vm8404_vm8, %v8406_v21, %v8402_v57  ;;  %v6995_v46 = vmul.f32 %v17068_v53, %v19394_v1  ;;  %v8499_v29 = vmul.f32 %v6993_v15, %v19425_v49  ;;  %v7961_v14 = vmul.f32 %v17229_v56, %v19418_v44 }
 0x98d   : > { %v8600_v40 = vmul.f32 %v8407_v24, %v6610_v18  ;;  %v7562_v55 = vsel %vm17250_vm12, %v17121_v2, %v7558_v51  ;;  %vm8376_vm11 = vcmp.eq.f32.partialorder %v8375_v43, 8.507059e+37  ;;  %v7566_v42 = vor.u32 1.1754944e-38, %v7565_v47  ;;  %v19430_v47 = vld [vmem:[#allocation179_spill] sm:$0xff]  ;;  %v19431_v18 = vld [vmem:[#allocation62_spill] sm:$0xff] }
 0x98e   : > { %v8935_v0 = vpop.permute.xlu0 %8934  ;;  %vm7564_vm15 = vcmp.eq.f32.partialorder %v7563_v38, 8.507059e+37  ;;  %v6996_v13 = vsub.f32 1.0, %v6995_v46  ;;  %vm7574_vm3 = vweird.f32 %v17134_v50  ;;  %vm7952_vm14 = vweird.f32 %v17176_v62 }
 0x98f   : > { %v9075_v4 = vsel %vm9054_vm13, %v9042_v54, %v8935_v0  ;;  %v8378_v54 = vor.u32 1.1754944e-38, %v8377_v11  ;;  %v7949_v0 = vmul.f32 %v17176_v62, %v7948_v16  ;;  %v7567_v7 = vsel %vm7564_vm15, %v7566_v42, %v7562_v55 }
 0x990   : > { %9837 = vmatmul.msk.f32.gmra.mxu0 %vm322_vm0, %v9075_v4  ;;  %10681 = vrcp.f32 %v19429_v37  ;;  %v7579_v15 = vand.u32 2147483648, %v19402_v27  ;;  %vm7951_vm5 = vweird.f32 %v19409_v19  ;;  %v7955_v32 = vand.u32 2147483647, %v19409_v19 }
 0x991   : > { %8694 = vrot.lane.b32.xlu1 %v8538_v8, %s10761_s28  ;;  %v9253_v30 = vpop.f32.mrf.mxu0  ;;  %v7571_v8 = vmul.f32 %v17134_v50, %v7570_v52  ;;  %v8379_v4 = vsel %vm8376_vm11, %v8378_v54, %v8374_v20  ;;  %v17266_v2 = vpop.eup %10679  ;;  %v7950_v59 = vadd.f32 %v17176_v62, %v7949_v0  ;;  %vm7573_vm6 = vweird.f32 %v19402_v27  ;;  %vm7953_vm8 = vmor %vm7951_vm5, %vm7952_vm14 }
 0x992   : > { %v9254_v48 = vadd.f32 %v16885_v58, %v9253_v30  ;;  %8944 = vrot.lane.b32.xlu0 %v8599_v33, %s10763_s8  ;;  %v7962_v33 = vsub.f32 1.0, %v7961_v14  ;;  %v8598_v35 = vmul.f32 %v8379_v4, %v15732_v17  ;;  %v19428_v30 = vld [vmem:[#allocation65_spill] sm:$0xff]  ;;  %v7009_v17 = vmul.f32 %v17080_v3, %v19397_v41  ;;  %vm7575_vm9 = vmor %vm7573_vm6, %vm7574_vm3 }
 0x993   : > { %v8540_v25 = vmul.f32 %v7567_v7, %v19428_v30  ;;  %v7572_v34 = vadd.f32 %v17134_v50, %v7571_v8  ;;  %v7975_v21 = vmul.f32 %v17266_v2, %v19424_v45  ;;  %v7577_v26 = vand.u32 2147483647, %v19402_v27 }
 0x994   : > { %9319 = vst.msk [vmem:[%s15782_s22 + $0x78] sm:$0xff] %vm322_vm0, %v9254_v48  ;;  %v7957_v48 = vand.u32 2147483648, %v19409_v19  ;;  %v7954_v19 = vsel %vm7953_vm8, %v17176_v62, %v7950_v59  ;;  %v7963_v61 = vmul.f32 %v17229_v56, %v7962_v33  ;;  %v6997_v51 = vmul.f32 %v17068_v53, %v6996_v13 }
 0x995   : > { %v7576_v11 = vsel %vm7575_vm9, %v17134_v50, %v7572_v34  ;;  %v7580_v16 = vor.u32 1.1754944e-38, %v7579_v15  ;;  %vm7956_vm4 = vcmp.eq.f32.partialorder %v7955_v32, 8.507059e+37  ;;  %10683 = vrcp.f32 %v17218_v6 }
 0x996   : > { %v8681_v31 = vpop.permute.xlu0 %8680  ;;  %v7958_v24 = vor.u32 1.1754944e-38, %v7957_v48  ;;  %v7010_v27 = vsub.f32 1.0, %v7009_v17  ;;  %vm7578_vm7 = vcmp.eq.f32.partialorder %v7577_v26, 8.507059e+37  ;;  %v17297_v39 = vpop.eup %10681  ;;  %v7964_v52 = vadd.f32 %v17229_v56, %v7963_v61 }
 0x997   : > { %v9011_v60 = vsel %vm760_vm1, %v8499_v29, %v8681_v31  ;;  %v7976_v31 = vsub.f32 1.0, %v7975_v21  ;;  %vm7966_vm10 = vweird.f32 %v17229_v56  ;;  %10685 = vrcp.f32 %v19431_v18 }
 0x998   : > { %v8809_v5 = vpop.permute.xlu1 %8808  ;;  %v7959_v43 = vsel %vm7956_vm4, %v7958_v24, %v7954_v19  ;;  %v6998_v20 = vadd.f32 %v17068_v53, %v6997_v51  ;;  %vm7000_vm12 = vweird.f32 %v17068_v53  ;;  %vm7965_vm11 = vweird.f32 %v19418_v44 }
 0x999   : > { %8696 = vrot.lane.b32.xlu1 %v8539_v23, %s10761_s28  ;;  %v9043_v36 = vsel %vm3293_vm2, %v9011_v60, %v8809_v5  ;;  %v7581_v23 = vsel %vm7578_vm7, %v7580_v16, %v7576_v11  ;;  %v8568_v62 = vmul.f32 %v7959_v43, %v19430_v47  ;;  %v7969_v46 = vand.u32 2147483647, %v19418_v44  ;;  %vm17314_vm15 = vmor %vm7965_vm11, %vm7966_vm10 }
 0x99a   : > { %8946 = vrot.lane.b32.xlu0 %v8600_v40, %s10763_s8  ;;  %v8541_v38 = vmul.f32 %v7581_v23, %v19432_v63  ;;  %v7971_v40 = vand.u32 2147483648, %v19418_v44  ;;  %v7989_v29 = vmul.f32 %v17297_v39, %v19429_v37  ;;  %v7977_v54 = vmul.f32 %v17266_v2, %v7976_v31 }
 0x99b   : > { %v17321_v55 = vpop.eup %10683  ;;  %vm6999_vm3 = vweird.f32 %v19394_v1  ;;  %v7011_v44 = vmul.f32 %v17080_v3, %v7010_v27  ;;  %v7968_v0 = vsel %vm17314_vm15, %v17229_v56, %v7964_v52  ;;  %v7005_v60 = vand.u32 2147483648, %v19394_v1  ;;  %v19444_v52 = vld [vmem:[#allocation182_spill] sm:$0xff] }
 0x99c   : > { %vm17332_vm14 = vmor %vm6999_vm3, %vm7000_vm12  ;;  %v7972_v5 = vor.u32 1.1754944e-38, %v7971_v40  ;;  %v7003_v56 = vand.u32 2147483647, %v19394_v1  ;;  %vm7970_vm5 = vcmp.eq.f32.partialorder %v7969_v46, 8.507059e+37  ;;  %vm7980_vm6 = vweird.f32 %v17266_v2 }
 0x99d   : > { %v7002_v4 = vsel %vm17332_vm14, %v17068_v53, %v6998_v20  ;;  %v17345_v13 = vpop.eup %10685  ;;  %v7978_v59 = vadd.f32 %v17266_v2, %v7977_v54  ;;  %v7990_v33 = vsub.f32 1.0, %v7989_v29  ;;  %vm7014_vm8 = vweird.f32 %v17080_v3  ;;  %v19437_v53 = vld [vmem:[#allocation136_spill] sm:$0xff] }
 0x99e   : > { %v8937_v22 = vpop.permute.xlu0 %8936  ;;  %v7973_v7 = vsel %vm7970_vm5, %v7972_v5, %v7968_v0  ;;  %v7985_v1 = vand.u32 2147483648, %v19424_v45  ;;  %vm7979_vm9 = vweird.f32 %v19424_v45  ;;  %v7983_v34 = vand.u32 2147483647, %v19424_v45 }
 0x99f   : > { %v9076_v57 = vsel %vm9054_vm13, %v9043_v36, %v8937_v22  ;;  %v8423_v36 = vmul.f32 %v17321_v55, %v17218_v6  ;;  %v17351_v22 = vadd.f32 %v17080_v3, %v7011_v44  ;;  %v8003_v48 = vmul.f32 %v17345_v13, %v19431_v18  ;;  %vm17366_vm10 = vmor %vm7979_vm9, %vm7980_vm6 }
 0x9a0   : > { %8942 = vrot.lane.b32.xlu2 %v8598_v35, %s10763_s8  ;;  %9838 = vmatmul.msk.f32.gmra.mxu0 %vm322_vm0, %v9076_v57  ;;  %v8569_v35 = vmul.f32 %v7973_v7, %v19437_v53  ;;  %vm7004_vm4 = vcmp.eq.f32.partialorder %v7003_v56, 8.507059e+37  ;;  %vm7013_vm7 = vweird.f32 %v19397_v41  ;;  %v7017_v57 = vand.u32 2147483647, %v19397_v41 }
 0x9a1   : > { %8698 = vrot.lane.b32.xlu1 %v8540_v25, %s10761_s28  ;;  %v7006_v25 = vor.u32 1.1754944e-38, %v7005_v60  ;;  %vm17373_vm12 = vmor %vm7013_vm7, %vm7014_vm8  ;;  %v7982_v21 = vsel %vm17366_vm10, %v17266_v2, %v7978_v59  ;;  %v7991_v26 = vmul.f32 %v17297_v39, %v7990_v33  ;;  %v8424_v19 = vsub.f32 1.0, %v8423_v36  ;;  %v6613_v59 = vpop.f32.mrf.mxu1 }
 0x9a2   : > { %v7016_v61 = vsel %vm17373_vm12, %v17080_v3, %v17351_v22  ;;  %v7019_v11 = vand.u32 2147483648, %v19397_v41  ;;  %v7986_v24 = vor.u32 1.1754944e-38, %v7985_v1  ;;  %vm7984_vm11 = vcmp.eq.f32.partialorder %v7983_v34, 8.507059e+37 }
 0x9a3   : > { %v7007_v17 = vsel %vm7004_vm4, %v7006_v25, %v7002_v4  ;;  %v7997_v27 = vand.u32 2147483647, %v19429_v37  ;;  %v7999_v2 = vand.u32 2147483648, %v19429_v37  ;;  %vm17392_vm15 = vcmp.eq.f32.partialorder %v7017_v57, 8.507059e+37 }
 0x9a4   : > { %v7987_v31 = vsel %vm7984_vm11, %v7986_v24, %v7982_v21  ;;  %v8004_v3 = vsub.f32 1.0, %v8003_v48  ;;  %v7992_v41 = vadd.f32 %v17297_v39, %v7991_v26  ;;  %vm7994_vm3 = vweird.f32 %v17297_v39 }
 0x9a5   : > { %v8425_v47 = vmul.f32 %v17321_v55, %v8424_v19  ;;  %v8570_v63 = vmul.f32 %v7987_v31, %v19444_v52  ;;  %v7020_v46 = vor.u32 1.1754944e-38, %v7019_v11  ;;  %vm7993_vm5 = vweird.f32 %v19429_v37 }
 0x9a6   : > { %v17302_v50 = vpop.permute.xlu0 %8682  ;;  %vm17403_vm6 = vcmp.eq.f32.partialorder %v7997_v27, 8.507059e+37  ;;  %v8000_v29 = vor.u32 1.1754944e-38, %v7999_v2  ;;  %v8500_v54 = vmul.f32 %v7007_v17, %v19447_v9  ;;  %vm17408_vm8 = vmor %vm7993_vm5, %vm7994_vm3  ;;  %v8005_v44 = vmul.f32 %v17345_v13, %v8004_v3  ;;  %v19452_v17 = vld [vmem:[#allocation81_spill] sm:$0xff] }
 0x9a7   : > { %v7996_v37 = vsel %vm17408_vm8, %v17297_v39, %v7992_v41  ;;  %v8426_v60 = vadd.f32 %v17321_v55, %v8425_v47  ;;  %vm8428_vm4 = vweird.f32 %v17321_v55  ;;  %vm8427_vm12 = vweird.f32 %v17218_v6 }
 0x9a8   : > { %v9256_v49 = vpop.f32.mrf.mxu0  ;;  %8818 = vrot.lane.b32.xlu2 %v8568_v62, %s10762_s29  ;;  %v9012_v4 = vsel %vm760_vm1, %v8500_v54, %v17302_v50  ;;  %v8433_v39 = vand.u32 2147483648, %v17218_v6  ;;  %v8431_v22 = vand.u32 2147483647, %v17218_v6  ;;  %v7021_v25 = vsel %vm17392_vm15, %v7020_v46, %v7016_v61  ;;  %vm17440_vm3 = vmor %vm8427_vm12, %vm8428_vm4 }
 0x9a9   : > { %v9257_v14 = vadd.f32 %v16885_v58, %v9256_v49  ;;  %8700 = vrot.lane.b32.xlu1 %v8541_v38, %s10761_s28  ;;  %v8001_v34 = vsel %vm17403_vm6, %v8000_v29, %v7996_v37  ;;  %vm8008_vm11 = vweird.f32 %v17345_v13  ;;  %v8006_v57 = vadd.f32 %v17345_v13, %v8005_v44  ;;  %v6680_v44 = vpop.f32.mrf.mxu3  ;;  %v19455_v37 = vld [vmem:[#allocation272_spill] sm:$0xff] }
 0x9aa   : > { %v17328_v42 = vpop.xlane.xlu2 %4432  ;;  %v8501_v45 = vmul.f32 %v7021_v25, %v19452_v17  ;;  %v8011_v21 = vand.u32 2147483647, %v19431_v18  ;;  %v8434_v26 = vor.u32 1.1754944e-38, %v8433_v39  ;;  %vm8007_vm15 = vweird.f32 %v19431_v18 }
 0x9ab   : > { %9320 = vst.msk [vmem:[%s15782_s22 + $0x80] sm:$0xff] %vm322_vm0, %v9257_v14  ;;  %10687 = vrcp.f32 %v17328_v42  ;;  %v8419_v62 = vand.u32 2147483648, %v17328_v42  ;;  %v8417_v40 = vand.u32 2147483647, %v17328_v42  ;;  %vm8413_vm9 = vweird.f32 %v17328_v42  ;;  %vm17462_vm5 = vmor %vm8007_vm15, %vm8008_vm11 }
 0x9ac   : > { %v8010_v24 = vsel %vm17462_vm5, %v17345_v13, %v8006_v57  ;;  %vm8012_vm8 = vcmp.eq.f32.partialorder %v8011_v21, 8.507059e+37 }
 0x9ad   : > { %v8420_v5 = vor.u32 1.1754944e-38, %v8419_v62  ;;  %vm8418_vm10 = vcmp.eq.f32.partialorder %v8417_v40, 8.507059e+37 }
 0x9ae   : > { %v17356_v30 = vpop.permute.xlu0 %8938 }
 0x9b0   : > { %8820 = vrot.lane.b32.xlu2 %v8569_v35, %s10762_s29 }
 0x9b1   : > { %v10688_v32 = vpop.eup %10687 }
 0x9b2   : > { %v8409_v51 = vmul.f32 %v10688_v32, %v17328_v42  ;;  %v17387_v16 = vpop.xlane.xlu2 %4438  ;;  %vm8414_vm14 = vweird.f32 %v10688_v32 }
 0x9b3   : > { %10689 = vrcp.f32 %v17387_v16  ;;  %vm8415_vm7 = vmor %vm8413_vm9, %vm8414_vm14  ;;  %vm8432_vm14 = vcmp.eq.f32.partialorder %v8431_v22, 8.507059e+37  ;;  %v8447_v43 = vand.u32 2147483648, %v17387_v16  ;;  %vm8441_vm9 = vweird.f32 %v17387_v16 }
 0x9b4   : > { %v8410_v23 = vsub.f32 1.0, %v8409_v51 }
 0x9b5   : > { %v8448_v52 = vor.u32 1.1754944e-38, %v8447_v43 }
 0x9b6   : > { %v8411_v38 = vmul.f32 %v10688_v32, %v8410_v23  ;;  %v8685_v20 = vpop.permute.xlu0 %8684  ;;  %v8445_v23 = vand.u32 2147483647, %v17387_v16 }
 0x9b7   : > { %v9013_v61 = vsel %vm760_vm1, %v8501_v45, %v8685_v20 }
 0x9b8   : > { %v8412_v0 = vadd.f32 %v10688_v32, %v8411_v38  ;;  %8822 = vrot.lane.b32.xlu2 %v8570_v63, %s10762_s29 }
 0x9b9   : > { %v17415_v8 = vpop.eup %10689 }
 0x9ba   : > { %v8437_v42 = vmul.f32 %v17415_v8, %v17387_v16  ;;  %v8811_v56 = vpop.permute.xlu2 %8810  ;;  %v8416_v7 = vsel %vm8415_vm7, %v10688_v32, %v8412_v0  ;;  %v8430_v32 = vsel %vm17440_vm3, %v17321_v55, %v8426_v60  ;;  %v6645_v55 = vpop.f32.mrf.mxu2  ;;  %vm8442_vm6 = vweird.f32 %v17415_v8 }
 0x9bb   : > { %v9044_v33 = vsel %vm3293_vm2, %v9012_v4, %v8811_v56  ;;  %v8421_v36 = vsel %vm8418_vm10, %v8420_v5, %v8416_v7  ;;  %v8435_v11 = vsel %vm8432_vm14, %v8434_v26, %v8430_v32  ;;  %vm8443_vm4 = vmor %vm8441_vm9, %vm8442_vm6  ;;  %vm8446_vm7 = vcmp.eq.f32.partialorder %v8445_v23, 8.507059e+37  ;;  %v17488_v5 = vld [vmem:[%s17649_s4] ss:$0 sm:$0xff]  ;;  %v19456_v7 = vld [vmem:[#allocation212_spill] sm:$0xff] }
 0x9bc   : > { %v8438_v53 = vsub.f32 1.0, %v8437_v42  ;;  %v9259_v35 = vpop.f32.mrf.mxu0  ;;  %v9077_v50 = vsel %vm9054_vm13, %v9044_v33, %v17356_v30  ;;  %v8601_v1 = vmul.f32 %v8421_v36, %v6613_v59  ;;  %v8571_v30 = vmul.f32 %v8001_v34, %v15321_v12 }
 0x9bd   : > { %v9260_v6 = vadd.f32 %v16885_v58, %v9259_v35  ;;  %9839 = vmatmul.msk.f32.gmra.mxu0 %vm322_vm0, %v9077_v50  ;;  %v8013_v58 = vand.u32 2147483648, %v19431_v18  ;;  %v8602_v13 = vmul.f32 %v8435_v11, %v6645_v55  ;;  %vm7027_vm9 = vweird.f32 %v19455_v37 }
 0x9be   : > { %v8439_v15 = vmul.f32 %v17415_v8, %v8438_v53  ;;  %8948 = vrot.lane.b32.xlu0 %v8601_v1, %s10763_s8  ;;  %v8813_v12 = vpop.permute.xlu0 %8812  ;;  %v19457_v53 = vld [vmem:[#allocation275_spill] sm:$0xff]  ;;  %v7031_v55 = vand.u32 2147483647, %v19455_v37 }
 0x9bf   : > { %9321 = vst.msk [vmem:[%s15782_s22 + $0x88] sm:$0xff] %vm322_vm0, %v9260_v6  ;;  %v9045_v18 = vsel %vm3293_vm2, %v9013_v61, %v8813_v12  ;;  %v8014_v2 = vor.u32 1.1754944e-38, %v8013_v58  ;;  %v7033_v58 = vand.u32 2147483648, %v19455_v37 }
 0x9c0   : > { %8824 = vrot.lane.b32.xlu2 %v8571_v30, %s10762_s29  ;;  %v8440_v51 = vadd.f32 %v17415_v8, %v8439_v15 }
 0x9c1   : > { %v8015_v41 = vsel %vm8012_vm8, %v8014_v2, %v8010_v24 }
 0x9c2   : > { %v8941_v27 = vpop.permute.xlu2 %8940  ;;  %v8572_v47 = vmul.f32 %v8015_v41, %v15408_v10  ;;  %v8444_v62 = vsel %vm8443_vm4, %v17415_v8, %v8440_v51  ;;  %v6648_v40 = vpop.f32.mrf.mxu2  ;;  %v7047_v41 = vand.u32 2147483648, %v19456_v7 }
 0x9c3   : > { %v4442_v31 = vpop.xlane.xlu1 %4441  ;;  %v9078_v3 = vsel %vm9054_vm13, %v9045_v18, %v8941_v27  ;;  %v8449_v63 = vsel %vm8446_vm7, %v8448_v52, %v8444_v62  ;;  %v7034_v27 = vor.u32 1.1754944e-38, %v7033_v58  ;;  %vm7032_vm7 = vcmp.eq.f32.partialorder %v7031_v55, 8.507059e+37 }
 0x9c4   : > { %10691 = vrcp.f32 %v4442_v31  ;;  %v8603_v20 = vmul.f32 %v8449_v63, %v6648_v40  ;;  %v8461_v49 = vand.u32 2147483648, %v4442_v31  ;;  %v8459_v10 = vand.u32 2147483647, %v4442_v31 }
 0x9c5   : > { %9840 = vmatmul.msk.f32.gmra.mxu0 %vm322_vm0, %v9078_v3  ;;  %vm8455_vm12 = vweird.f32 %v4442_v31  ;;  %10693 = vrcp.f32 %v19455_v37  ;;  %v19458_v3 = vld [vmem:[#allocation78_spill] sm:$0xff]  ;;  %v7045_v62 = vand.u32 2147483647, %v19456_v7 }
 0x9c6   : > { %8950 = vrot.lane.b32.xlu0 %v8602_v13, %s10763_s8  ;;  %v8462_v54 = vor.u32 1.1754944e-38, %v8461_v49  ;;  %vm8460_vm3 = vcmp.eq.f32.partialorder %v8459_v10, 8.507059e+37 }
 0x9c8   : > { %8826 = vrot.lane.b32.xlu2 %v8572_v47, %s10762_s29 }
 0x9ca   : > { %v10692_v38 = vpop.eup %10691 }
 0x9cb   : > { %v8451_v16 = vmul.f32 %v10692_v38, %v4442_v31  ;;  %vm8456_vm10 = vweird.f32 %v10692_v38  ;;  %v10694_v42 = vpop.eup %10693 }
 0x9cc   : > { %vm8457_vm11 = vmor %vm8455_vm12, %vm8456_vm10  ;;  %v7023_v59 = vmul.f32 %v10694_v42, %v19455_v37  ;;  %vm7028_vm5 = vweird.f32 %v10694_v42  ;;  %vm7041_vm12 = vweird.f32 %v19456_v7 }
 0x9cd   : > { %v8452_v46 = vsub.f32 1.0, %v8451_v16  ;;  %vm7029_vm4 = vmor %vm7027_vm9, %vm7028_vm5  ;;  %vm7055_vm5 = vweird.f32 %v19457_v53 }
 0x9ce   : > { %8952 = vrot.lane.b32.xlu0 %v8603_v20, %s10763_s8  ;;  %v7024_v36 = vsub.f32 1.0, %v7023_v59 }
 0x9cf   : > { %v8453_v29 = vmul.f32 %v10692_v38, %v8452_v46 }
 0x9d0   : > { %v7025_v25 = vmul.f32 %v10694_v42, %v7024_v36 }
 0x9d1   : > { %v8454_v9 = vadd.f32 %v10692_v38, %v8453_v29  ;;  %v7048_v29 = vor.u32 1.1754944e-38, %v7047_v41 }
 0x9d2   : > { %v7026_v45 = vadd.f32 %v10694_v42, %v7025_v25 }
 0x9d3   : > { %v8458_v14 = vsel %vm8457_vm11, %v10692_v38, %v8454_v9 }
 0x9d4   : > { %v8463_v0 = vsel %vm8460_vm3, %v8462_v54, %v8458_v14  ;;  %v7030_v51 = vsel %vm7029_vm4, %v10694_v42, %v7026_v45  ;;  %v7061_v54 = vand.u32 2147483648, %v19457_v53 }
 0x9d5   : > { %v8604_v8 = vmul.f32 %v8463_v0, %v6680_v44  ;;  %v7035_v31 = vsel %vm7032_vm7, %v7034_v27, %v7030_v51 }
 0x9d6   : > { %v8502_v23 = vmul.f32 %v7035_v31, %v19458_v3  ;;  %v7062_v36 = vor.u32 1.1754944e-38, %v7061_v54 }
 0x9d7   : > { %8954 = vrot.lane.b32.xlu0 %v8604_v8, %s10763_s8 }
 0x9db   : > { %v8687_v39 = vpop.permute.xlu1 %8686 }
 0x9dc   : > { %v9014_v52 = vsel %vm760_vm1, %v8502_v23, %v8687_v39 }
 0x9e2   : > { %v9262_v60 = vpop.f32.mrf.mxu0 }
 0x9e3   : > { %v9263_v4 = vadd.f32 %v17488_v5, %v9262_v60  ;;  %v8689_v26 = vpop.permute.xlu1 %8688  ;;  %v7059_v60 = vand.u32 2147483647, %v19457_v53 }
 0x9e5   : > { %9322 = vst.msk [vmem:[%s15782_s22 + $0x90] sm:$0xff] %vm322_vm0, %v9263_v4  ;;  %v19461_v4 = vld [vmem:[#allocation41_spill] sm:$0xff]  ;;  %vm7060_vm7 = vcmp.eq.f32.partialorder %v7059_v60, 8.507059e+37 }
 0x9e9   : > { %v4349_v56 = vpop.xlane.xlu0 %4348 }
 0x9ea   : > { %10695 = vrcp.f32 %v4349_v56  ;;  %v8027_v34 = vand.u32 2147483648, %v4349_v56  ;;  %v8025_v6 = vand.u32 2147483647, %v4349_v56  ;;  %vm8021_vm14 = vweird.f32 %v4349_v56 }
 0x9eb   : > { %10697 = vrcp.f32 %v19456_v7  ;;  %v8817_v38 = vpop.permute.xlu1 %8816 }
 0x9ec   : > { %10699 = vrcp.f32 %v19457_v53  ;;  %v8028_v21 = vor.u32 1.1754944e-38, %v8027_v34  ;;  %vm8026_vm8 = vcmp.eq.f32.partialorder %v8025_v6, 8.507059e+37 }
 0x9f0   : > { %v10696_v33 = vpop.eup %10695 }
 0x9f1   : > { %v17495_v22 = vpop.eup %10697  ;;  %v8017_v35 = vmul.f32 %v10696_v33, %v4349_v56  ;;  %vm8022_vm15 = vweird.f32 %v10696_v33 }
 0x9f2   : > { %v7037_v1 = vmul.f32 %v17495_v22, %v19456_v7  ;;  %v17500_v57 = vpop.eup %10699  ;;  %vm8023_vm6 = vmor %vm8021_vm14, %vm8022_vm15  ;;  %vm7042_vm10 = vweird.f32 %v17495_v22  ;;  %vm7046_vm15 = vcmp.eq.f32.partialorder %v7045_v62, 8.507059e+37  ;;  %v19468_v62 = vld [vmem:[#allocation214_spill] sm:$0xff] }
 0x9f3   : > { %v8018_v50 = vsub.f32 1.0, %v8017_v35  ;;  %v7051_v19 = vmul.f32 %v17500_v57, %v19457_v53  ;;  %vm17521_vm11 = vmor %vm7041_vm12, %vm7042_vm10  ;;  %vm7056_vm3 = vweird.f32 %v17500_v57  ;;  %v6683_v35 = vpop.f32.mrf.mxu3  ;;  %v8691_v34 = vpop.permute.xlu1 %8690 }
 0x9f4   : > { %v7038_v17 = vsub.f32 1.0, %v7037_v1 }
 0x9f5   : > { %v8019_v48 = vmul.f32 %v10696_v33, %v8018_v50  ;;  %v7052_v43 = vsub.f32 1.0, %v7051_v19  ;;  %v19466_v19 = vld [vmem:[#allocation213_spill] sm:$0xff] }
 0x9f6   : > { %v9265_v30 = vpop.f32.mrf.mxu0  ;;  %v7039_v18 = vmul.f32 %v17495_v22, %v7038_v17  ;;  %v19465_v17 = vld [vmem:[#allocation277_spill] sm:$0xff] }
 0x9f7   : > { %v8020_v15 = vadd.f32 %v10696_v33, %v8019_v48  ;;  %v9266_v32 = vadd.f32 %v17488_v5, %v9265_v30  ;;  %v7053_v47 = vmul.f32 %v17500_v57, %v7052_v43  ;;  %v19464_v30 = vld [vmem:[#allocation76_spill] sm:$0xff]  ;;  %v7075_v23 = vand.u32 2147483648, %v19465_v17 }
 0x9f8   : > { %v7040_v13 = vadd.f32 %v17495_v22, %v7039_v18  ;;  %v19467_v18 = vld [vmem:[#allocation215_spill] sm:$0xff]  ;;  %vm7069_vm12 = vweird.f32 %v19465_v17 }
 0x9f9   : > { %9323 = vst.msk [vmem:[%s15782_s22 + $0x98] sm:$0xff] %vm322_vm0, %v9266_v32  ;;  %v8024_v12 = vsel %vm8023_vm6, %v10696_v33, %v8020_v15  ;;  %v7054_v9 = vadd.f32 %v17500_v57, %v7053_v47  ;;  %vm17539_vm6 = vmor %vm7055_vm5, %vm7056_vm3 }
 0x9fa   : > { %v8029_v61 = vsel %vm8026_vm8, %v8028_v21, %v8024_v12  ;;  %v7044_v46 = vsel %vm17521_vm11, %v17495_v22, %v7040_v13  ;;  %v7073_v13 = vand.u32 2147483647, %v19465_v17 }
 0x9fb   : > { %v4445_v11 = vpop.xlane.xlu2 %4444  ;;  %v8573_v24 = vmul.f32 %v8029_v61, %v15460_v28  ;;  %v7049_v44 = vsel %vm7046_vm15, %v7048_v29, %v7044_v46  ;;  %v7058_v59 = vsel %vm17539_vm6, %v17500_v57, %v7054_v9  ;;  %v8693_v41 = vpop.permute.xlu1 %8692  ;;  %v7089_v29 = vand.u32 2147483648, %v19466_v19 }
 0x9fc   : > { %10701 = vrcp.f32 %v4445_v11  ;;  %v8815_v2 = vpop.permute.xlu0 %8814  ;;  %v8475_v14 = vand.u32 2147483648, %v4445_v11  ;;  %v8473_v8 = vand.u32 2147483647, %v4445_v11  ;;  %v8503_v42 = vmul.f32 %v7049_v44, %v19461_v4 }
 0x9fd   : > { %8828 = vrot.lane.b32.xlu2 %v8573_v24, %s10762_s29  ;;  %v9046_v16 = vsel %vm3293_vm2, %v9014_v52, %v8815_v2  ;;  %vm8469_vm8 = vweird.f32 %v4445_v11  ;;  %v7063_v25 = vsel %vm7060_vm7, %v7062_v36, %v7058_v59  ;;  %10703 = vrcp.f32 %v19465_v17  ;;  %v19470_v59 = vld [vmem:[#allocation100_spill] sm:$0xff] }
 0x9fe   : > { %v9015_v39 = vsel %vm760_vm1, %v8503_v42, %v8689_v26  ;;  %v8476_v33 = vor.u32 1.1754944e-38, %v8475_v14  ;;  %vm8474_vm4 = vcmp.eq.f32.partialorder %v8473_v8, 8.507059e+37  ;;  %v8504_v57 = vmul.f32 %v7063_v25, %v19464_v30 }
 0x9ff   : > { %v9047_v22 = vsel %vm3293_vm2, %v9015_v39, %v8817_v38  ;;  %10705 = vrcp.f32 %v19466_v19  ;;  %v7076_v38 = vor.u32 1.1754944e-38, %v7075_v23  ;;  %vm7074_vm3 = vcmp.eq.f32.partialorder %v7073_v13, 8.507059e+37 }
 0xa00   : > { %v9016_v45 = vsel %vm760_vm1, %v8504_v57, %v8691_v34  ;;  %10707 = vrcp.f32 %v19467_v18  ;;  %v7087_v9 = vand.u32 2147483647, %v19466_v19  ;;  %v7090_v42 = vor.u32 1.1754944e-38, %v7089_v29 }
 0xa01   : > { %10709 = vrcp.f32 %v19468_v62 }
 0xa02   : > { %v10702_v28 = vpop.eup %10701  ;;  %vm7088_vm6 = vcmp.eq.f32.partialorder %v7087_v9, 8.507059e+37 }
 0xa03   : > { %v8465_v40 = vmul.f32 %v10702_v28, %v4445_v11  ;;  %v8943_v20 = vpop.permute.xlu2 %8942  ;;  %vm8470_vm14 = vweird.f32 %v10702_v28  ;;  %v10704_v12 = vpop.eup %10703 }
 0xa04   : > { %v9079_v49 = vsel %vm9054_vm13, %v9046_v16, %v8943_v20  ;;  %v8945_v37 = vpop.permute.xlu0 %8944  ;;  %vm8471_vm9 = vmor %vm8469_vm8, %vm8470_vm14  ;;  %v7065_v55 = vmul.f32 %v10704_v12, %v19465_v17  ;;  %vm7070_vm10 = vweird.f32 %v10704_v12  ;;  %v19469_v20 = vld [vmem:[#allocation35_spill] sm:$0xff]  ;;  %vm7083_vm14 = vweird.f32 %v19466_v19 }
 0xa05   : > { %v8466_v10 = vsub.f32 1.0, %v8465_v40  ;;  %9841 = vmatmul.msk.f32.gmra.mxu0 %vm322_vm0, %v9079_v49  ;;  %v9080_v50 = vsel %vm9054_vm13, %v9047_v22, %v8945_v37  ;;  %v10706_v24 = vpop.eup %10705  ;;  %vm7071_vm11 = vmor %vm7069_vm12, %vm7070_vm10  ;;  %v8695_v37 = vpop.permute.xlu1 %8694  ;;  %v7103_v22 = vand.u32 2147483648, %v19467_v18  ;;  %vm7111_vm12 = vweird.f32 %v19468_v62 }
 0xa06   : > { %v7066_v61 = vsub.f32 1.0, %v7065_v55  ;;  %v7079_v27 = vmul.f32 %v10706_v24, %v19466_v19  ;;  %v10708_v3 = vpop.eup %10707  ;;  %vm7084_vm15 = vweird.f32 %v10706_v24  ;;  %v7115_v19 = vand.u32 2147483647, %v19468_v62 }
 0xa07   : > { %v8467_v0 = vmul.f32 %v10702_v28, %v8466_v10  ;;  %v7093_v47 = vmul.f32 %v10708_v3, %v19467_v18  ;;  %v10710_v10 = vpop.eup %10709  ;;  %vm7085_vm5 = vmor %vm7083_vm14, %vm7084_vm15  ;;  %vm7098_vm8 = vweird.f32 %v10708_v3 }
 0xa08   : > { %v7067_v2 = vmul.f32 %v10704_v12, %v7066_v61  ;;  %v7080_v43 = vsub.f32 1.0, %v7079_v27  ;;  %v7107_v4 = vmul.f32 %v10710_v10, %v19468_v62  ;;  %vm7112_vm10 = vweird.f32 %v10710_v10 }
 0xa09   : > { %v8468_v7 = vadd.f32 %v10702_v28, %v8467_v0  ;;  %v7094_v16 = vsub.f32 1.0, %v7093_v47 }
 0xa0a   : > { %v7068_v31 = vadd.f32 %v10704_v12, %v7067_v2  ;;  %v7081_v63 = vmul.f32 %v10706_v24, %v7080_v43  ;;  %v7108_v36 = vsub.f32 1.0, %v7107_v4 }
 0xa0b   : > { %v8472_v53 = vsel %vm8471_vm9, %v10702_v28, %v8468_v7  ;;  %v8819_v15 = vpop.permute.xlu2 %8818  ;;  %v7095_v8 = vmul.f32 %v10708_v3, %v7094_v16  ;;  %vm7097_vm9 = vweird.f32 %v19467_v18 }
 0xa0c   : > { %v8477_v1 = vsel %vm8474_vm4, %v8476_v33, %v8472_v53  ;;  %v9048_v21 = vsel %vm3293_vm2, %v9016_v45, %v8819_v15  ;;  %v8947_v58 = vpop.permute.xlu0 %8946  ;;  %v7072_v52 = vsel %vm7071_vm11, %v10704_v12, %v7068_v31  ;;  %v7082_v49 = vadd.f32 %v10706_v24, %v7081_v63  ;;  %vm7099_vm4 = vmor %vm7097_vm9, %vm7098_vm8  ;;  %v19471_v45 = vld [vmem:[#allocation88_spill] sm:$0xff]  ;;  %v19472_v31 = vld [vmem:[#allocation87_spill] sm:$0xff] }
 0xa0d   : > { %v9268_v48 = vpop.f32.mrf.mxu0  ;;  %9842 = vmatmul.msk.f32.gmra.mxu0 %vm322_vm0, %v9080_v50  ;;  %v8605_v6 = vmul.f32 %v8477_v1, %v6683_v35  ;;  %v9081_v26 = vsel %vm9054_vm13, %v9048_v21, %v8947_v58  ;;  %v7077_v40 = vsel %vm7074_vm3, %v7076_v38, %v7072_v52  ;;  %v7096_v33 = vadd.f32 %v10708_v3, %v7095_v8  ;;  %v8697_v57 = vpop.permute.xlu1 %8696  ;;  %vm7113_vm11 = vmor %vm7111_vm12, %vm7112_vm10 }
 0xa0e   : > { %v9269_v32 = vadd.f32 %v17488_v5, %v9268_v48  ;;  %v8505_v46 = vmul.f32 %v7077_v40, %v19469_v20  ;;  %v7086_v0 = vsel %vm7085_vm5, %v10706_v24, %v7082_v49  ;;  %v7101_v53 = vand.u32 2147483647, %v19467_v18 }
 0xa0f   : > { %8956 = vrot.lane.b32.xlu0 %v8605_v6, %s10763_s8  ;;  %v7091_v7 = vsel %vm7088_vm6, %v7090_v42, %v7086_v0  ;;  %v7100_v25 = vsel %vm7099_vm4, %v10708_v3, %v7096_v33  ;;  %v7104_v48 = vor.u32 1.1754944e-38, %v7103_v22  ;;  %v7109_v6 = vmul.f32 %v10710_v10, %v7108_v36 }
 0xa10   : > { %9324 = vst.msk [vmem:[%s15782_s22 + $0xa0] sm:$0xff] %vm322_vm0, %v9269_v32  ;;  %v9017_v54 = vsel %vm760_vm1, %v8505_v46, %v8693_v41  ;;  %v8506_v39 = vmul.f32 %v7091_v7, %v19470_v59  ;;  %vm7102_vm7 = vcmp.eq.f32.partialorder %v7101_v53, 8.507059e+37  ;;  %vm7116_vm3 = vcmp.eq.f32.partialorder %v7115_v19, 8.507059e+37 }
 0xa11   : > { %v7105_v32 = vsel %vm7102_vm7, %v7104_v48, %v7100_v25  ;;  %v7110_v58 = vadd.f32 %v10710_v10, %v7109_v6 }
 0xa12   : > { %v9018_v35 = vsel %vm760_vm1, %v8506_v39, %v8695_v37  ;;  %v8507_v21 = vmul.f32 %v7105_v32, %v19471_v45 }
 0xa13   : > { %v8821_v28 = vpop.permute.xlu2 %8820  ;;  %v7114_v24 = vsel %vm7113_vm11, %v10710_v10, %v7110_v58 }
 0xa14   : > { %v9049_v14 = vsel %vm3293_vm2, %v9017_v54, %v8821_v28  ;;  %v9019_v12 = vsel %vm760_vm1, %v8507_v21, %v8697_v57  ;;  %v19474_v54 = vld [vmem:[#allocation75_spill] sm:$0xff] }
 0xa15   : > { %9843 = vmatmul.msk.f32.gmra.mxu0 %vm322_vm0, %v9081_v26  ;;  %v7117_v26 = vand.u32 2147483648, %v19468_v62  ;;  %v8699_v43 = vpop.permute.xlu1 %8698  ;;  %v19473_v62 = vld [vmem:[#allocation278_spill] sm:$0xff] }
 0xa16   : > { %10711 = vrcp.f32 %v19473_v62  ;;  %v7131_v20 = vand.u32 2147483648, %v19473_v62  ;;  %vm7125_vm14 = vweird.f32 %v19473_v62  ;;  %v7129_v46 = vand.u32 2147483647, %v19473_v62 }
 0xa17   : > { %v7118_v18 = vor.u32 1.1754944e-38, %v7117_v26 }
 0xa18   : > { %v7132_v29 = vor.u32 1.1754944e-38, %v7131_v20  ;;  %vm7130_vm6 = vcmp.eq.f32.partialorder %v7129_v46, 8.507059e+37 }
 0xa19   : > { %v7119_v2 = vsel %vm7116_vm3, %v7118_v18, %v7114_v24 }
 0xa1a   : > { %v8508_v3 = vmul.f32 %v7119_v2, %v19472_v31 }
 0xa1b   : > { %v8823_v56 = vpop.permute.xlu2 %8822 }
 0xa1c   : > { %v9050_v50 = vsel %vm3293_vm2, %v9018_v35, %v8823_v56  ;;  %v9020_v13 = vsel %vm760_vm1, %v8508_v3, %v8699_v43  ;;  %v10712_v52 = vpop.eup %10711 }
 0xa1d   : > { %v9271_v11 = vpop.f32.mrf.mxu0  ;;  %v7121_v63 = vmul.f32 %v10712_v52, %v19473_v62  ;;  %vm7126_vm15 = vweird.f32 %v10712_v52  ;;  %v8701_v9 = vpop.permute.xlu1 %8700 }
 0xa1e   : > { %v9272_v51 = vadd.f32 %v17488_v5, %v9271_v11  ;;  %vm7127_vm5 = vmor %vm7125_vm14, %vm7126_vm15 }
 0xa1f   : > { %v7122_v38 = vsub.f32 1.0, %v7121_v63 }
 0xa20   : > { %9325 = vst.msk [vmem:[%s15782_s22 + $0xa8] sm:$0xff] %vm322_vm0, %v9272_v51 }
 0xa21   : > { %v7123_v40 = vmul.f32 %v10712_v52, %v7122_v38 }
 0xa23   : > { %v8825_v17 = vpop.permute.xlu2 %8824  ;;  %v7124_v16 = vadd.f32 %v10712_v52, %v7123_v40 }
 0xa24   : > { %v9051_v55 = vsel %vm3293_vm2, %v9019_v12, %v8825_v17 }
 0xa25   : > { %v7128_v49 = vsel %vm7127_vm5, %v10712_v52, %v7124_v16 }
 0xa26   : > { %v7133_v10 = vsel %vm7130_vm6, %v7132_v29, %v7128_v49 }
 0xa2b   : > { %v8827_v23 = vpop.permute.xlu2 %8826 }
 0xa2c   : > { %v9052_v41 = vsel %vm3293_vm2, %v9020_v13, %v8827_v23 }
 0xa30   : > { %v8949_v44 = vpop.permute.xlu0 %8948 }
 0xa31   : > { %v9082_v60 = vsel %vm9054_vm13, %v9049_v14, %v8949_v44  ;;  %v8509_v14 = vmul.f32 %v7133_v10, %v19474_v54 }
 0xa32   : > { %9844 = vmatmul.msk.f32.gmra.mxu0 %vm322_vm0, %v9082_v60 }
 0xa33   : > { %v9021_v0 = vsel %vm760_vm1, %v8509_v14, %v8701_v9 }
 0xa38   : > { %v8951_v1 = vpop.permute.xlu0 %8950 }
 0xa39   : > { %v9083_v34 = vsel %vm9054_vm13, %v9050_v50, %v8951_v1 }
 0xa3a   : > { %v9274_v30 = vpop.f32.mrf.mxu0  ;;  %9845 = vmatmul.msk.f32.gmra.mxu0 %vm322_vm0, %v9083_v34 }
 0xa3b   : > { %v9275_v15 = vadd.f32 %v17488_v5, %v9274_v30 }
 0xa3d   : > { %9326 = vst.msk [vmem:[%s15782_s22 + $0xb0] sm:$0xff] %vm322_vm0, %v9275_v15 }
 0xa40   : > { %v8953_v61 = vpop.permute.xlu0 %8952 }
 0xa41   : > { %v9084_v11 = vsel %vm9054_vm13, %v9051_v55, %v8953_v61 }
 0xa42   : > { %v9277_v51 = vpop.f32.mrf.mxu0  ;;  %9846 = vmatmul.msk.f32.gmra.mxu0 %vm322_vm0, %v9084_v11 }
 0xa43   : > { %v9278_v27 = vadd.f32 %v17488_v5, %v9277_v51 }
 0xa45   : > { %9327 = vst.msk [vmem:[%s15782_s22 + $0xb8] sm:$0xff] %vm322_vm0, %v9278_v27 }
 0xa49   : > { %v8955_v28 = vpop.permute.xlu0 %8954 }
 0xa4a   : > { %v9085_v47 = vsel %vm9054_vm13, %v9052_v41, %v8955_v28 }
 0xa4b   : > { %9847 = vmatmul.msk.f32.gmra.mxu0 %vm322_vm0, %v9085_v47 }
 0xa57   : > { %v8829_v44 = vpop.permute.xlu2 %8828 }
 0xa58   : > { %v9053_v8 = vsel %vm3293_vm2, %v9021_v0, %v8829_v44 }
 0xa81   : > { %v8957_v37 = vpop.permute.xlu0 %8956 }
 0xa82   : > { %v9086_v60 = vsel %vm9054_vm13, %v9053_v8, %v8957_v37  ;;  %v9280_v4 = vpop.f32.mrf.mxu0 }
 0xa83   : > { %v9281_v42 = vadd.f32 %v17488_v5, %v9280_v4  ;;  %9848 = vmatmul.msk.f32.gmra.mxu0 %vm322_vm0, %v9086_v60 }
 0xa85   : > { %9328 = vst.msk [vmem:[%s15782_s22 + $0xc0] sm:$0xff] %vm322_vm0, %v9281_v42 }
 0xa8a   : > { %v9283_v56 = vpop.f32.mrf.mxu0 }
 0xa8b   : > { %v9284_v7 = vadd.f32 %v17488_v5, %v9283_v56 }
 0xa8d   : > { %9329 = vst.msk [vmem:[%s15782_s22 + $0xc8] sm:$0xff] %vm322_vm0, %v9284_v7 }
 0xa92   : > { %v9286_v59 = vpop.f32.mrf.mxu0 }
 0xa93   : > { %v9287_v39 = vadd.f32 %v17488_v5, %v9286_v59 }
 0xa95   : > { %9330 = vst.msk [vmem:[%s15782_s22 + $0xd0] sm:$0xff] %vm322_vm0, %v9287_v39 }
 0xaaf   : > { %v9289_v33 = vpop.f32.mrf.mxu0 }
 0xab0   : > { %v9290_v36 = vadd.f32 %v17488_v5, %v9289_v33 }
 0xab2   : > { %9331 = vst.msk [vmem:[%s15782_s22 + $0xd8] sm:$0xff] %vm322_vm0, %v9290_v36 }
 0xab7   : > { %v9292_v22 = vpop.f32.mrf.mxu0 }
 0xab8   : > { %v9293_v53 = vadd.f32 %v17488_v5, %v9292_v22 }
 0xaba   : > { %9332 = vst.msk [vmem:[%s15782_s22 + $0xe0] sm:$0xff] %vm322_vm0, %v9293_v53 }
 0xabf   : > { %v9295_v35 = vpop.f32.mrf.mxu0 }
 0xac0   : > { %v9296_v50 = vadd.f32 %v17488_v5, %v9295_v35 }
 0xac2   : > { %9333 = vst.msk [vmem:[%s15782_s22 + $0xe8] sm:$0xff] %vm322_vm0, %v9296_v50 }
 0xac8   : > { %v9298_v1 = vpop.f32.mrf.mxu0 }
 0xac9   : > { %v9299_v25 = vadd.f32 %v17488_v5, %v9298_v1 }
 0xacb   : > { %9334 = vst.msk [vmem:[%s15782_s22 + $0xf0] sm:$0xff] %vm322_vm0, %v9299_v25 }
 0xb00   : > { %v9301_v34 = vpop.f32.mrf.mxu0 }
 0xb01   : > { %v9302_v48 = vadd.f32 %v17488_v5, %v9301_v34 }
 0xb03   : > { %9335 = vst.msk [vmem:[%s15782_s22 + $0xf8] sm:$0xff] %vm322_vm0, %v9302_v48 }
 0xb04 PF: > { %s17_s24 = sadd.s32 1, %s10754_s24  }
 0xb05   : > { %p14_p4 = scmp.ge.s32.totalorder %s17_s24, 4  }
 0xb07   :  { %16 = sbr.rel (!%p14_p4) target bundleno = 1 (0x1), region = 78 }

</bundles_post_ra>
